<compile_context>
chip_gen: v5e
topology: v5e:2x2
jax: 0.10.0
libtpu: 0.0.40
codegen_flags: <defaults>
</compile_context>

<pallas_src>
import functools

import jax
import jax.numpy as jnp
from jax import lax
from jax.experimental import pallas as pl
from jax.experimental.pallas import tpu as pltpu


def text_encoder_kernel(x_ref, w_ih_ref, w_hh_ref, b_ref, out_ref, xg_ref,
                        *, seq_len, batch_pad):
    """Input projection (one matmul) + LSTM recurrence, all on-chip.

    x_ref:    (S*B_pad, E)       VMEM  gathered embeddings, time-major, batch padded
    w_ih_ref: (E, 4H)            VMEM  PyTorch gate order [i, f, g, o]
    w_hh_ref: (H, 4H)            VMEM
    b_ref:    (1, 4H)  f32       VMEM  (b_ih + b_hh)
    out_ref:  (B_pad, H) f32     VMEM  final hidden state (padded batch rows included)
    xg_ref:   (S*B_pad, 4H) f32  VMEM scratch — pre-gates for every timestep
    """
    H = out_ref.shape[-1]
    compute_dtype = w_hh_ref.dtype

    # One-time, off the serial chain: pre-gates for ALL timesteps in a single MXU
    # matmul, bias folded in.  xg[t*B_pad + b] = emb[tok[t,b]] @ w_ih + (b_ih + b_hh).
    xg_ref[...] = (
        jnp.dot(x_ref[...], w_ih_ref[...], preferred_element_type=jnp.float32)
        + b_ref[...])

    w_hh = w_hh_ref[...]                                  # (H, 4H), loop-invariant

    h = jnp.zeros((batch_pad, H), jnp.float32)
    c = jnp.zeros((batch_pad, H), jnp.float32)

    # seq_len is static -> Python loop fully unrolls; t is a Python int so each step's
    # pre-gate read is a static, sublane-aligned slice (no per-step gather/concatenate).
    for t in range(seq_len):
        xg = xg_ref[t * batch_pad:(t + 1) * batch_pad, :]            # (B_pad, 4H) f32

        # The only MXU op on the serial critical path.
        gates = xg + jnp.dot(h.astype(compute_dtype), w_hh,
                             preferred_element_type=jnp.float32)     # (B_pad, 4H) f32

        i_g = jax.nn.sigmoid(gates[:, 0 * H:1 * H])
        f_g = jax.nn.sigmoid(gates[:, 1 * H:2 * H])
        g_g = jnp.tanh(gates[:, 2 * H:3 * H])
        o_g = jax.nn.sigmoid(gates[:, 3 * H:4 * H])

        c = f_g * c + i_g * g_g
        h = o_g * jnp.tanh(c)

    out_ref[...] = h


def text_encoder_forward(tokens_bs, emb, w_ih, w_hh, b_ih, b_hh,
                         *, param_dtype=jnp.bfloat16):
    """Wrapper: embedding gather + parameter reshuffle (glue) + pallas_call.

    param_dtype=jnp.bfloat16 (default) gives MXU-native matmul operands with f32
    accumulation and f32 gate math; pass jnp.float32 for bit-exact semantics.
    """
    B, S = tokens_bs.shape
    V, E = emb.shape
    H = w_hh.shape[1]
    G4 = 4 * H
    B_pad = max(8, ((B + 7) // 8) * 8)                    # full sublane group(s)

    # Time-major token ids, batch padded with token 0 (padding_idx row is zero, so the
    # padded rows are inert and discarded below).  Gather happens here in XLA: kernel
    # cost / VMEM footprint are independent of the vocabulary size.
    toks = jnp.asarray(tokens_bs, jnp.int32).T            # (S, B)
    toks = jnp.pad(toks, ((0, 0), (0, B_pad - B)))        # (S, B_pad), pad token = 0
    x_emb = emb[toks].reshape(S * B_pad, E).astype(param_dtype)

    w_ih_t = w_ih.T.astype(param_dtype)                   # (E, 4H)
    w_hh_t = w_hh.T.astype(param_dtype)                   # (H, 4H)
    bias = (b_ih + b_hh).reshape(1, G4).astype(jnp.float32)

    vmem = pl.BlockSpec(memory_space=pltpu.MemorySpace.VMEM)

    kernel = functools.partial(text_encoder_kernel, seq_len=S, batch_pad=B_pad)
    out = pl.pallas_call(
        kernel,
        out_shape=jax.ShapeDtypeStruct((B_pad, H), jnp.float32),
        in_specs=[vmem, vmem, vmem, vmem],
        out_specs=vmem,
        scratch_shapes=[pltpu.VMEM((S * B_pad, G4), jnp.float32)],   # pre-gate buffer
    )(x_emb, w_ih_t, w_hh_t, bias)

    return out[:B]                                        # drop padded batch rows


def reference_forward(tokens_bs, emb, w_ih, w_hh, b_ih, b_hh):
    """Pure-JAX reference matching PyTorch nn.Embedding + nn.LSTM semantics."""
    x = emb[tokens_bs]                                     # (B, S, E)
    H = w_hh.shape[1]
    B = x.shape[0]

    def step(carry, x_t):
        h, c = carry
        gates = x_t @ w_ih.T + b_ih + h @ w_hh.T + b_hh
        i_g, f_g, g_g, o_g = jnp.split(gates, 4, axis=-1)
        i_g = jax.nn.sigmoid(i_g)
        f_g = jax.nn.sigmoid(f_g)
        g_g = jnp.tanh(g_g)
        o_g = jax.nn.sigmoid(o_g)
        c_new = f_g * c + i_g * g_g
        h_new = o_g * jnp.tanh(c_new)
        return (h_new, c_new), None

    h0 = jnp.zeros((B, H), jnp.float32)
    c0 = jnp.zeros((B, H), jnp.float32)
    (h_final, _), _ = lax.scan(step, (h0, c0), jnp.swapaxes(x, 0, 1))
    return h_final


def init_params(key, vocab_size, embedding_dim=128, hidden_dim=256):
    k_emb, k_wih, k_whh, k_bih, k_bhh = jax.random.split(key, 5)
    emb = jax.random.normal(k_emb, (vocab_size, embedding_dim), jnp.float32)
    emb = emb.at[0].set(0.0)                               # padding_idx=0 -> zero row
    bound = 1.0 / jnp.sqrt(jnp.float32(hidden_dim))
    w_ih = jax.random.uniform(k_wih, (4 * hidden_dim, embedding_dim),
                              jnp.float32, -bound, bound)
    w_hh = jax.random.uniform(k_whh, (4 * hidden_dim, hidden_dim),
                              jnp.float32, -bound, bound)
    b_ih = jax.random.uniform(k_bih, (4 * hidden_dim,), jnp.float32, -bound, bound)
    b_hh = jax.random.uniform(k_bhh, (4 * hidden_dim,), jnp.float32, -bound, bound)
    return emb, w_ih, w_hh, b_ih, b_hh


if __name__ == "__main__":
    VOCAB = 16
    EMB_DIM = 128     # module default embedding_dim
    HID_DIM = 256     # module default hidden_dim
    BATCH = 2
    SEQ = 8

    key = jax.random.PRNGKey(0)
    k_params, k_tok = jax.random.split(key)
    emb, w_ih, w_hh, b_ih, b_hh = init_params(k_params, VOCAB, EMB_DIM, HID_DIM)

    # token ids in [0, VOCAB); force a couple of padding (0) tokens.
    tokens = jax.random.randint(k_tok, (BATCH, SEQ), 0, VOCAB, dtype=jnp.int32)
    tokens = tokens.at[:, -1].set(0)

    ref = reference_forward(tokens, emb, w_ih, w_hh, b_ih, b_hh)

    # Default fast path: bf16 weights/activations into the MXU, f32 accumulation & gates.
    out = text_encoder_forward(tokens, emb, w_ih, w_hh, b_ih, b_hh)
    out = jax.block_until_ready(out)
    assert out.shape == (BATCH, HID_DIM)
    assert jnp.allclose(out, ref, atol=2e-2, rtol=2e-2), "bf16 kernel mismatch vs reference"

    # Exact-semantics fallback (f32 weights).
    out_f32 = text_encoder_forward(tokens, emb, w_ih, w_hh, b_ih, b_hh,
                                   param_dtype=jnp.float32)
    out_f32 = jax.block_until_ready(out_f32)
    assert jnp.allclose(out_f32, ref, atol=1e-5, rtol=1e-5), "f32 kernel mismatch vs reference"

    print("KERNEL_OK")
</pallas_src>

<mosaic_0001>
module attributes {stable_mosaic.version = 11 : i64} {
  func.func @text_encoder_kernel(%arg0: memref<64x128xbf16, #tpu.memory_space<vmem>>, %arg1: memref<128x1024xbf16, #tpu.memory_space<vmem>>, %arg2: memref<256x1024xbf16, #tpu.memory_space<vmem>>, %arg3: memref<1x1024xf32, #tpu.memory_space<vmem>>, %arg4: memref<8x256xf32, #tpu.memory_space<vmem>>, %arg5: memref<64x1024xf32, #tpu.memory_space<vmem>>) attributes {dimension_semantics = [], scalar_prefetch = 0 : i64, scratch_operands = 1 : i64, tpu.core_type = #tpu.core_type<tc>} {
    %c0 = arith.constant 0 : index
    %c0_0 = arith.constant 0 : index
    %0 = vector.load %arg0[%c0, %c0_0] : memref<64x128xbf16, #tpu.memory_space<vmem>>, vector<64x128xbf16>
    %c0_1 = arith.constant 0 : index
    %c0_2 = arith.constant 0 : index
    %1 = vector.load %arg1[%c0_1, %c0_2] : memref<128x1024xbf16, #tpu.memory_space<vmem>>, vector<128x1024xbf16>
    %cst = arith.constant dense<0.000000e+00> : vector<64x1024xf32>
    %2 = tpu.matmul %0, %1, %cst {dimension_numbers = #tpu.dot_dimension_numbers<[1], [0], [0], [1], [0, 0, 1, 1], [], []>} : vector<64x128xbf16>, vector<128x1024xbf16>, vector<64x1024xf32> -> vector<64x1024xf32>
    %c0_3 = arith.constant 0 : index
    %c0_4 = arith.constant 0 : index
    %3 = vector.load %arg3[%c0_3, %c0_4] : memref<1x1024xf32, #tpu.memory_space<vmem>>, vector<1x1024xf32>
    %4 = vector.broadcast %3 : vector<1x1024xf32> to vector<64x1024xf32>
    %5 = arith.addf %2, %4 : vector<64x1024xf32>
    %c0_5 = arith.constant 0 : index
    %c0_6 = arith.constant 0 : index
    %6 = vector.load %arg5[%c0_5, %c0_6] : memref<64x1024xf32, #tpu.memory_space<vmem>>, vector<64x1024xf32>
    tpu.vector_store %arg5[%c0_5, %c0_6], %5 {strides = array<i32>} : memref<64x1024xf32, #tpu.memory_space<vmem>>, vector<64x1024xf32>,
    %c0_7 = arith.constant 0 : index
    %c0_8 = arith.constant 0 : index
    %7 = vector.load %arg2[%c0_7, %c0_8] : memref<256x1024xbf16, #tpu.memory_space<vmem>>, vector<256x1024xbf16>
    %cst_9 = arith.constant 0.000000e+00 : f32
    %8 = vector.broadcast %cst_9 : f32 to vector<8x256xf32>
    %cst_10 = arith.constant 0.000000e+00 : f32
    %9 = vector.broadcast %cst_10 : f32 to vector<8x256xf32>
    %c0_11 = arith.constant 0 : index
    %c0_12 = arith.constant 0 : index
    %10 = vector.load %arg5[%c0_11, %c0_12] : memref<64x1024xf32, #tpu.memory_space<vmem>>, vector<8x1024xf32>
    %11 = arith.truncf %8 : vector<8x256xf32> to vector<8x256xbf16>
    %cst_13 = arith.constant dense<0.000000e+00> : vector<8x1024xf32>
    %12 = tpu.matmul %11, %7, %cst_13 {dimension_numbers = #tpu.dot_dimension_numbers<[1], [0], [0], [1], [0, 0, 1, 1], [], []>} : vector<8x256xbf16>, vector<256x1024xbf16>, vector<8x1024xf32> -> vector<8x1024xf32>
    %13 = arith.addf %10, %12 : vector<8x1024xf32>
    %14 = vector.extract_strided_slice %13 {offsets = [0, 0], sizes = [8, 256], strides = [1, 1]} : vector<8x1024xf32> to vector<8x256xf32>
    %15 = arith.negf %14 : vector<8x256xf32>
    %16 = math.exp %15 : vector<8x256xf32>
    %cst_14 = arith.constant 1.000000e+00 : f32
    %17 = vector.broadcast %cst_14 : f32 to vector<8x256xf32>
    %18 = arith.addf %17, %16 : vector<8x256xf32>
    %19 = arith.divf %17, %18 : vector<8x256xf32>
    %20 = vector.extract_strided_slice %13 {offsets = [0, 256], sizes = [8, 256], strides = [1, 1]} : vector<8x1024xf32> to vector<8x256xf32>
    %21 = arith.negf %20 : vector<8x256xf32>
    %22 = math.exp %21 : vector<8x256xf32>
    %cst_15 = arith.constant 1.000000e+00 : f32
    %23 = vector.broadcast %cst_15 : f32 to vector<8x256xf32>
    %24 = arith.addf %23, %22 : vector<8x256xf32>
    %25 = arith.divf %23, %24 : vector<8x256xf32>
    %26 = vector.extract_strided_slice %13 {offsets = [0, 512], sizes = [8, 256], strides = [1, 1]} : vector<8x1024xf32> to vector<8x256xf32>
    %27 = math.tanh %26 : vector<8x256xf32>
    %28 = vector.extract_strided_slice %13 {offsets = [0, 768], sizes = [8, 256], strides = [1, 1]} : vector<8x1024xf32> to vector<8x256xf32>
    %29 = arith.negf %28 : vector<8x256xf32>
    %30 = math.exp %29 : vector<8x256xf32>
    %cst_16 = arith.constant 1.000000e+00 : f32
    %31 = vector.broadcast %cst_16 : f32 to vector<8x256xf32>
    %32 = arith.addf %31, %30 : vector<8x256xf32>
    %33 = arith.divf %31, %32 : vector<8x256xf32>
    %34 = arith.mulf %25, %9 : vector<8x256xf32>
    %35 = arith.mulf %19, %27 : vector<8x256xf32>
    %36 = arith.addf %34, %35 : vector<8x256xf32>
    %37 = math.tanh %36 : vector<8x256xf32>
    %38 = arith.mulf %33, %37 : vector<8x256xf32>
    %c8 = arith.constant 8 : index
    %c0_17 = arith.constant 0 : index
    %39 = vector.load %arg5[%c8, %c0_17] : memref<64x1024xf32, #tpu.memory_space<vmem>>, vector<8x1024xf32>
    %40 = arith.truncf %38 : vector<8x256xf32> to vector<8x256xbf16>
    %cst_18 = arith.constant dense<0.000000e+00> : vector<8x1024xf32>
    %41 = tpu.matmul %40, %7, %cst_18 {dimension_numbers = #tpu.dot_dimension_numbers<[1], [0], [0], [1], [0, 0, 1, 1], [], []>} : vector<8x256xbf16>, vector<256x1024xbf16>, vector<8x1024xf32> -> vector<8x1024xf32>
    %42 = arith.addf %39, %41 : vector<8x1024xf32>
    %43 = vector.extract_strided_slice %42 {offsets = [0, 0], sizes = [8, 256], strides = [1, 1]} : vector<8x1024xf32> to vector<8x256xf32>
    %44 = arith.negf %43 : vector<8x256xf32>
    %45 = math.exp %44 : vector<8x256xf32>
    %cst_19 = arith.constant 1.000000e+00 : f32
    %46 = vector.broadcast %cst_19 : f32 to vector<8x256xf32>
    %47 = arith.addf %46, %45 : vector<8x256xf32>
    %48 = arith.divf %46, %47 : vector<8x256xf32>
    %49 = vector.extract_strided_slice %42 {offsets = [0, 256], sizes = [8, 256], strides = [1, 1]} : vector<8x1024xf32> to vector<8x256xf32>
    %50 = arith.negf %49 : vector<8x256xf32>
    %51 = math.exp %50 : vector<8x256xf32>
    %cst_20 = arith.constant 1.000000e+00 : f32
    %52 = vector.broadcast %cst_20 : f32 to vector<8x256xf32>
    %53 = arith.addf %52, %51 : vector<8x256xf32>
    %54 = arith.divf %52, %53 : vector<8x256xf32>
    %55 = vector.extract_strided_slice %42 {offsets = [0, 512], sizes = [8, 256], strides = [1, 1]} : vector<8x1024xf32> to vector<8x256xf32>
    %56 = math.tanh %55 : vector<8x256xf32>
    %57 = vector.extract_strided_slice %42 {offsets = [0, 768], sizes = [8, 256], strides = [1, 1]} : vector<8x1024xf32> to vector<8x256xf32>
    %58 = arith.negf %57 : vector<8x256xf32>
    %59 = math.exp %58 : vector<8x256xf32>
    %cst_21 = arith.constant 1.000000e+00 : f32
    %60 = vector.broadcast %cst_21 : f32 to vector<8x256xf32>
    %61 = arith.addf %60, %59 : vector<8x256xf32>
    %62 = arith.divf %60, %61 : vector<8x256xf32>
    %63 = arith.mulf %54, %36 : vector<8x256xf32>
    %64 = arith.mulf %48, %56 : vector<8x256xf32>
    %65 = arith.addf %63, %64 : vector<8x256xf32>
    %66 = math.tanh %65 : vector<8x256xf32>
    %67 = arith.mulf %62, %66 : vector<8x256xf32>
    %c16 = arith.constant 16 : index
    %c0_22 = arith.constant 0 : index
    %68 = vector.load %arg5[%c16, %c0_22] : memref<64x1024xf32, #tpu.memory_space<vmem>>, vector<8x1024xf32>
    %69 = arith.truncf %67 : vector<8x256xf32> to vector<8x256xbf16>
    %cst_23 = arith.constant dense<0.000000e+00> : vector<8x1024xf32>
    %70 = tpu.matmul %69, %7, %cst_23 {dimension_numbers = #tpu.dot_dimension_numbers<[1], [0], [0], [1], [0, 0, 1, 1], [], []>} : vector<8x256xbf16>, vector<256x1024xbf16>, vector<8x1024xf32> -> vector<8x1024xf32>
    %71 = arith.addf %68, %70 : vector<8x1024xf32>
    %72 = vector.extract_strided_slice %71 {offsets = [0, 0], sizes = [8, 256], strides = [1, 1]} : vector<8x1024xf32> to vector<8x256xf32>
    %73 = arith.negf %72 : vector<8x256xf32>
    %74 = math.exp %73 : vector<8x256xf32>
    %cst_24 = arith.constant 1.000000e+00 : f32
    %75 = vector.broadcast %cst_24 : f32 to vector<8x256xf32>
    %76 = arith.addf %75, %74 : vector<8x256xf32>
    %77 = arith.divf %75, %76 : vector<8x256xf32>
    %78 = vector.extract_strided_slice %71 {offsets = [0, 256], sizes = [8, 256], strides = [1, 1]} : vector<8x1024xf32> to vector<8x256xf32>
    %79 = arith.negf %78 : vector<8x256xf32>
    %80 = math.exp %79 : vector<8x256xf32>
    %cst_25 = arith.constant 1.000000e+00 : f32
    %81 = vector.broadcast %cst_25 : f32 to vector<8x256xf32>
    %82 = arith.addf %81, %80 : vector<8x256xf32>
    %83 = arith.divf %81, %82 : vector<8x256xf32>
    %84 = vector.extract_strided_slice %71 {offsets = [0, 512], sizes = [8, 256], strides = [1, 1]} : vector<8x1024xf32> to vector<8x256xf32>
    %85 = math.tanh %84 : vector<8x256xf32>
    %86 = vector.extract_strided_slice %71 {offsets = [0, 768], sizes = [8, 256], strides = [1, 1]} : vector<8x1024xf32> to vector<8x256xf32>
    %87 = arith.negf %86 : vector<8x256xf32>
    %88 = math.exp %87 : vector<8x256xf32>
    %cst_26 = arith.constant 1.000000e+00 : f32
    %89 = vector.broadcast %cst_26 : f32 to vector<8x256xf32>
    %90 = arith.addf %89, %88 : vector<8x256xf32>
    %91 = arith.divf %89, %90 : vector<8x256xf32>
    %92 = arith.mulf %83, %65 : vector<8x256xf32>
    %93 = arith.mulf %77, %85 : vector<8x256xf32>
    %94 = arith.addf %92, %93 : vector<8x256xf32>
    %95 = math.tanh %94 : vector<8x256xf32>
    %96 = arith.mulf %91, %95 : vector<8x256xf32>
    %c24 = arith.constant 24 : index
    %c0_27 = arith.constant 0 : index
    %97 = vector.load %arg5[%c24, %c0_27] : memref<64x1024xf32, #tpu.memory_space<vmem>>, vector<8x1024xf32>
    %98 = arith.truncf %96 : vector<8x256xf32> to vector<8x256xbf16>
    %cst_28 = arith.constant dense<0.000000e+00> : vector<8x1024xf32>
    %99 = tpu.matmul %98, %7, %cst_28 {dimension_numbers = #tpu.dot_dimension_numbers<[1], [0], [0], [1], [0, 0, 1, 1], [], []>} : vector<8x256xbf16>, vector<256x1024xbf16>, vector<8x1024xf32> -> vector<8x1024xf32>
    %100 = arith.addf %97, %99 : vector<8x1024xf32>
    %101 = vector.extract_strided_slice %100 {offsets = [0, 0], sizes = [8, 256], strides = [1, 1]} : vector<8x1024xf32> to vector<8x256xf32>
    %102 = arith.negf %101 : vector<8x256xf32>
    %103 = math.exp %102 : vector<8x256xf32>
    %cst_29 = arith.constant 1.000000e+00 : f32
    %104 = vector.broadcast %cst_29 : f32 to vector<8x256xf32>
    %105 = arith.addf %104, %103 : vector<8x256xf32>
    %106 = arith.divf %104, %105 : vector<8x256xf32>
    %107 = vector.extract_strided_slice %100 {offsets = [0, 256], sizes = [8, 256], strides = [1, 1]} : vector<8x1024xf32> to vector<8x256xf32>
    %108 = arith.negf %107 : vector<8x256xf32>
    %109 = math.exp %108 : vector<8x256xf32>
    %cst_30 = arith.constant 1.000000e+00 : f32
    %110 = vector.broadcast %cst_30 : f32 to vector<8x256xf32>
    %111 = arith.addf %110, %109 : vector<8x256xf32>
    %112 = arith.divf %110, %111 : vector<8x256xf32>
    %113 = vector.extract_strided_slice %100 {offsets = [0, 512], sizes = [8, 256], strides = [1, 1]} : vector<8x1024xf32> to vector<8x256xf32>
    %114 = math.tanh %113 : vector<8x256xf32>
    %115 = vector.extract_strided_slice %100 {offsets = [0, 768], sizes = [8, 256], strides = [1, 1]} : vector<8x1024xf32> to vector<8x256xf32>
    %116 = arith.negf %115 : vector<8x256xf32>
    %117 = math.exp %116 : vector<8x256xf32>
    %cst_31 = arith.constant 1.000000e+00 : f32
    %118 = vector.broadcast %cst_31 : f32 to vector<8x256xf32>
    %119 = arith.addf %118, %117 : vector<8x256xf32>
    %120 = arith.divf %118, %119 : vector<8x256xf32>
    %121 = arith.mulf %112, %94 : vector<8x256xf32>
    %122 = arith.mulf %106, %114 : vector<8x256xf32>
    %123 = arith.addf %121, %122 : vector<8x256xf32>
    %124 = math.tanh %123 : vector<8x256xf32>
    %125 = arith.mulf %120, %124 : vector<8x256xf32>
    %c32 = arith.constant 32 : index
    %c0_32 = arith.constant 0 : index
    %126 = vector.load %arg5[%c32, %c0_32] : memref<64x1024xf32, #tpu.memory_space<vmem>>, vector<8x1024xf32>
    %127 = arith.truncf %125 : vector<8x256xf32> to vector<8x256xbf16>
    %cst_33 = arith.constant dense<0.000000e+00> : vector<8x1024xf32>
    %128 = tpu.matmul %127, %7, %cst_33 {dimension_numbers = #tpu.dot_dimension_numbers<[1], [0], [0], [1], [0, 0, 1, 1], [], []>} : vector<8x256xbf16>, vector<256x1024xbf16>, vector<8x1024xf32> -> vector<8x1024xf32>
    %129 = arith.addf %126, %128 : vector<8x1024xf32>
    %130 = vector.extract_strided_slice %129 {offsets = [0, 0], sizes = [8, 256], strides = [1, 1]} : vector<8x1024xf32> to vector<8x256xf32>
    %131 = arith.negf %130 : vector<8x256xf32>
    %132 = math.exp %131 : vector<8x256xf32>
    %cst_34 = arith.constant 1.000000e+00 : f32
    %133 = vector.broadcast %cst_34 : f32 to vector<8x256xf32>
    %134 = arith.addf %133, %132 : vector<8x256xf32>
    %135 = arith.divf %133, %134 : vector<8x256xf32>
    %136 = vector.extract_strided_slice %129 {offsets = [0, 256], sizes = [8, 256], strides = [1, 1]} : vector<8x1024xf32> to vector<8x256xf32>
    %137 = arith.negf %136 : vector<8x256xf32>
    %138 = math.exp %137 : vector<8x256xf32>
    %cst_35 = arith.constant 1.000000e+00 : f32
    %139 = vector.broadcast %cst_35 : f32 to vector<8x256xf32>
    %140 = arith.addf %139, %138 : vector<8x256xf32>
    %141 = arith.divf %139, %140 : vector<8x256xf32>
    %142 = vector.extract_strided_slice %129 {offsets = [0, 512], sizes = [8, 256], strides = [1, 1]} : vector<8x1024xf32> to vector<8x256xf32>
    %143 = math.tanh %142 : vector<8x256xf32>
    %144 = vector.extract_strided_slice %129 {offsets = [0, 768], sizes = [8, 256], strides = [1, 1]} : vector<8x1024xf32> to vector<8x256xf32>
    %145 = arith.negf %144 : vector<8x256xf32>
    %146 = math.exp %145 : vector<8x256xf32>
    %cst_36 = arith.constant 1.000000e+00 : f32
    %147 = vector.broadcast %cst_36 : f32 to vector<8x256xf32>
    %148 = arith.addf %147, %146 : vector<8x256xf32>
    %149 = arith.divf %147, %148 : vector<8x256xf32>
    %150 = arith.mulf %141, %123 : vector<8x256xf32>
    %151 = arith.mulf %135, %143 : vector<8x256xf32>
    %152 = arith.addf %150, %151 : vector<8x256xf32>
    %153 = math.tanh %152 : vector<8x256xf32>
    %154 = arith.mulf %149, %153 : vector<8x256xf32>
    %c40 = arith.constant 40 : index
    %c0_37 = arith.constant 0 : index
    %155 = vector.load %arg5[%c40, %c0_37] : memref<64x1024xf32, #tpu.memory_space<vmem>>, vector<8x1024xf32>
    %156 = arith.truncf %154 : vector<8x256xf32> to vector<8x256xbf16>
    %cst_38 = arith.constant dense<0.000000e+00> : vector<8x1024xf32>
    %157 = tpu.matmul %156, %7, %cst_38 {dimension_numbers = #tpu.dot_dimension_numbers<[1], [0], [0], [1], [0, 0, 1, 1], [], []>} : vector<8x256xbf16>, vector<256x1024xbf16>, vector<8x1024xf32> -> vector<8x1024xf32>
    %158 = arith.addf %155, %157 : vector<8x1024xf32>
    %159 = vector.extract_strided_slice %158 {offsets = [0, 0], sizes = [8, 256], strides = [1, 1]} : vector<8x1024xf32> to vector<8x256xf32>
    %160 = arith.negf %159 : vector<8x256xf32>
    %161 = math.exp %160 : vector<8x256xf32>
    %cst_39 = arith.constant 1.000000e+00 : f32
    %162 = vector.broadcast %cst_39 : f32 to vector<8x256xf32>
    %163 = arith.addf %162, %161 : vector<8x256xf32>
    %164 = arith.divf %162, %163 : vector<8x256xf32>
    %165 = vector.extract_strided_slice %158 {offsets = [0, 256], sizes = [8, 256], strides = [1, 1]} : vector<8x1024xf32> to vector<8x256xf32>
    %166 = arith.negf %165 : vector<8x256xf32>
    %167 = math.exp %166 : vector<8x256xf32>
    %cst_40 = arith.constant 1.000000e+00 : f32
    %168 = vector.broadcast %cst_40 : f32 to vector<8x256xf32>
    %169 = arith.addf %168, %167 : vector<8x256xf32>
    %170 = arith.divf %168, %169 : vector<8x256xf32>
    %171 = vector.extract_strided_slice %158 {offsets = [0, 512], sizes = [8, 256], strides = [1, 1]} : vector<8x1024xf32> to vector<8x256xf32>
    %172 = math.tanh %171 : vector<8x256xf32>
    %173 = vector.extract_strided_slice %158 {offsets = [0, 768], sizes = [8, 256], strides = [1, 1]} : vector<8x1024xf32> to vector<8x256xf32>
    %174 = arith.negf %173 : vector<8x256xf32>
    %175 = math.exp %174 : vector<8x256xf32>
    %cst_41 = arith.constant 1.000000e+00 : f32
    %176 = vector.broadcast %cst_41 : f32 to vector<8x256xf32>
    %177 = arith.addf %176, %175 : vector<8x256xf32>
    %178 = arith.divf %176, %177 : vector<8x256xf32>
    %179 = arith.mulf %170, %152 : vector<8x256xf32>
    %180 = arith.mulf %164, %172 : vector<8x256xf32>
    %181 = arith.addf %179, %180 : vector<8x256xf32>
    %182 = math.tanh %181 : vector<8x256xf32>
    %183 = arith.mulf %178, %182 : vector<8x256xf32>
    %c48 = arith.constant 48 : index
    %c0_42 = arith.constant 0 : index
    %184 = vector.load %arg5[%c48, %c0_42] : memref<64x1024xf32, #tpu.memory_space<vmem>>, vector<8x1024xf32>
    %185 = arith.truncf %183 : vector<8x256xf32> to vector<8x256xbf16>
    %cst_43 = arith.constant dense<0.000000e+00> : vector<8x1024xf32>
    %186 = tpu.matmul %185, %7, %cst_43 {dimension_numbers = #tpu.dot_dimension_numbers<[1], [0], [0], [1], [0, 0, 1, 1], [], []>} : vector<8x256xbf16>, vector<256x1024xbf16>, vector<8x1024xf32> -> vector<8x1024xf32>
    %187 = arith.addf %184, %186 : vector<8x1024xf32>
    %188 = vector.extract_strided_slice %187 {offsets = [0, 0], sizes = [8, 256], strides = [1, 1]} : vector<8x1024xf32> to vector<8x256xf32>
    %189 = arith.negf %188 : vector<8x256xf32>
    %190 = math.exp %189 : vector<8x256xf32>
    %cst_44 = arith.constant 1.000000e+00 : f32
    %191 = vector.broadcast %cst_44 : f32 to vector<8x256xf32>
    %192 = arith.addf %191, %190 : vector<8x256xf32>
    %193 = arith.divf %191, %192 : vector<8x256xf32>
    %194 = vector.extract_strided_slice %187 {offsets = [0, 256], sizes = [8, 256], strides = [1, 1]} : vector<8x1024xf32> to vector<8x256xf32>
    %195 = arith.negf %194 : vector<8x256xf32>
    %196 = math.exp %195 : vector<8x256xf32>
    %cst_45 = arith.constant 1.000000e+00 : f32
    %197 = vector.broadcast %cst_45 : f32 to vector<8x256xf32>
    %198 = arith.addf %197, %196 : vector<8x256xf32>
    %199 = arith.divf %197, %198 : vector<8x256xf32>
    %200 = vector.extract_strided_slice %187 {offsets = [0, 512], sizes = [8, 256], strides = [1, 1]} : vector<8x1024xf32> to vector<8x256xf32>
    %201 = math.tanh %200 : vector<8x256xf32>
    %202 = vector.extract_strided_slice %187 {offsets = [0, 768], sizes = [8, 256], strides = [1, 1]} : vector<8x1024xf32> to vector<8x256xf32>
    %203 = arith.negf %202 : vector<8x256xf32>
    %204 = math.exp %203 : vector<8x256xf32>
    %cst_46 = arith.constant 1.000000e+00 : f32
    %205 = vector.broadcast %cst_46 : f32 to vector<8x256xf32>
    %206 = arith.addf %205, %204 : vector<8x256xf32>
    %207 = arith.divf %205, %206 : vector<8x256xf32>
    %208 = arith.mulf %199, %181 : vector<8x256xf32>
    %209 = arith.mulf %193, %201 : vector<8x256xf32>
    %210 = arith.addf %208, %209 : vector<8x256xf32>
    %211 = math.tanh %210 : vector<8x256xf32>
    %212 = arith.mulf %207, %211 : vector<8x256xf32>
    %c56 = arith.constant 56 : index
    %c0_47 = arith.constant 0 : index
    %213 = vector.load %arg5[%c56, %c0_47] : memref<64x1024xf32, #tpu.memory_space<vmem>>, vector<8x1024xf32>
    %214 = arith.truncf %212 : vector<8x256xf32> to vector<8x256xbf16>
    %cst_48 = arith.constant dense<0.000000e+00> : vector<8x1024xf32>
    %215 = tpu.matmul %214, %7, %cst_48 {dimension_numbers = #tpu.dot_dimension_numbers<[1], [0], [0], [1], [0, 0, 1, 1], [], []>} : vector<8x256xbf16>, vector<256x1024xbf16>, vector<8x1024xf32> -> vector<8x1024xf32>
    %216 = arith.addf %213, %215 : vector<8x1024xf32>
    %217 = vector.extract_strided_slice %216 {offsets = [0, 0], sizes = [8, 256], strides = [1, 1]} : vector<8x1024xf32> to vector<8x256xf32>
    %218 = arith.negf %217 : vector<8x256xf32>
    %219 = math.exp %218 : vector<8x256xf32>
    %cst_49 = arith.constant 1.000000e+00 : f32
    %220 = vector.broadcast %cst_49 : f32 to vector<8x256xf32>
    %221 = arith.addf %220, %219 : vector<8x256xf32>
    %222 = arith.divf %220, %221 : vector<8x256xf32>
    %223 = vector.extract_strided_slice %216 {offsets = [0, 256], sizes = [8, 256], strides = [1, 1]} : vector<8x1024xf32> to vector<8x256xf32>
    %224 = arith.negf %223 : vector<8x256xf32>
    %225 = math.exp %224 : vector<8x256xf32>
    %cst_50 = arith.constant 1.000000e+00 : f32
    %226 = vector.broadcast %cst_50 : f32 to vector<8x256xf32>
    %227 = arith.addf %226, %225 : vector<8x256xf32>
    %228 = arith.divf %226, %227 : vector<8x256xf32>
    %229 = vector.extract_strided_slice %216 {offsets = [0, 512], sizes = [8, 256], strides = [1, 1]} : vector<8x1024xf32> to vector<8x256xf32>
    %230 = math.tanh %229 : vector<8x256xf32>
    %231 = vector.extract_strided_slice %216 {offsets = [0, 768], sizes = [8, 256], strides = [1, 1]} : vector<8x1024xf32> to vector<8x256xf32>
    %232 = arith.negf %231 : vector<8x256xf32>
    %233 = math.exp %232 : vector<8x256xf32>
    %cst_51 = arith.constant 1.000000e+00 : f32
    %234 = vector.broadcast %cst_51 : f32 to vector<8x256xf32>
    %235 = arith.addf %234, %233 : vector<8x256xf32>
    %236 = arith.divf %234, %235 : vector<8x256xf32>
    %237 = arith.mulf %228, %210 : vector<8x256xf32>
    %238 = arith.mulf %222, %230 : vector<8x256xf32>
    %239 = arith.addf %237, %238 : vector<8x256xf32>
    %240 = math.tanh %239 : vector<8x256xf32>
    %241 = arith.mulf %236, %240 : vector<8x256xf32>
    %c0_52 = arith.constant 0 : index
    %c0_53 = arith.constant 0 : index
    %242 = vector.load %arg4[%c0_52, %c0_53] : memref<8x256xf32, #tpu.memory_space<vmem>>, vector<8x256xf32>
    tpu.vector_store %arg4[%c0_52, %c0_53], %241 {strides = array<i32>} : memref<8x256xf32, #tpu.memory_space<vmem>>, vector<8x256xf32>,
    return
  }
}

</mosaic_0001>

<bundles_post_ra>
// kernel: tpu_custom_call.1
= control target key start
LH: loop header
LB: loop body
LE: loop exit
PB: predicated region body
PF: predicated region fallthrough
CT: control target
= control target key end

     0   :  { %9 = vsyncpa [#allocation4], 0  ;;  %s8056_s0 = inlined_call_operand.hbm [shape: bf16[64,128], index: 0, kind: input, shape index: {}]   ;;  %s8057_s1 = inlined_call_operand.hbm [shape: bf16[128,1024], index: 1, kind: input, shape index: {}]   ;;  %s8058_s2 = inlined_call_operand.hbm [shape: bf16[256,1024], index: 2, kind: input, shape index: {}]   ;;  %s8059_s3 = inlined_call_operand.hbm [shape: f32[1,1024], index: 3, kind: input, shape index: {}]   ;;  %s8060_s4 = inlined_call_operand.hbm [shape: f32[8,256], index: 4, kind: output, shape index: {}]  }
   0x1   :  { %10 = vsyncpa [#allocation7], 0 }
   0x2   :  { %11 = vsyncpa [#allocation10], 0  ;;  %s30_s17 = sshll.u32 %s8057_s1, 4  ;;  %s31_s17 = int_to_ptr.hbm [resolvable:$true] %s30_s17 }
   0x3   :  { %12 = vsyncpa [#allocation5], 0  ;;  %s5835_s18 = smov [#allocation6]   ;;  %s17_s22 = sshll.u32 %s8056_s0, 4  ;;  %s18_s22 = int_to_ptr.hbm [resolvable:$true] %s17_s22 }
   0x4   :  { %s32_s19 = sshll.u32 %s5835_s18, 4  ;;  %s5836_s23 = smov 512   ;;  %s33_s19 = int_to_ptr.vmem [resolvable:$true] %s32_s19 }
   0x5   :  { %s5837_s24 = smov 32   ;;  %s5838_s25 = smov [#allocation3]  }
   0x6   :  { %38 = dma.hbm_to_vmem [thread:$0]  %s31_s17, 8192, %s33_s19, [#allocation7], %s5836_s23, %s5836_s23, %s5837_s24  }
   0x7   :  { %s19_s26 = sshll.u32 %s5838_s25, 4  ;;  %s5839_s27 = smov 64   ;;  %s20_s26 = int_to_ptr.vmem [resolvable:$true] %s19_s26 }
   0x8   :  { %s5840_s28 = smov 4   ;;  %s43_s30 = sshll.u32 %s8058_s2, 4  ;;  %s44_s30 = int_to_ptr.hbm [resolvable:$true] %s43_s30 }
   0x9   :  { %25 = dma.hbm_to_vmem [thread:$0]  %s18_s22, 512, %s20_s26, [#allocation4], %s5839_s27, %s5839_s27, %s5840_s28  }
   0xa   :  { %s5841_s5 = smov [#allocation8]   ;;  %s57_s8 = sshll.u32 %s8059_s3, 4  ;;  %s58_s8 = int_to_ptr.hbm [resolvable:$true] %s57_s8 }
   0xb   :  { %s45_s6 = sshll.u32 %s5841_s5, 4  ;;  %s5842_s9 = smov [#allocation9]   ;;  %s46_s6 = int_to_ptr.vmem [resolvable:$true] %s45_s6 }
   0xc   :  { %51 = dma.hbm_to_vmem [thread:$0]  %s44_s30, 16384, %s46_s6, [#allocation7], %s5836_s23, %s5836_s23, %s5837_s24  }
   0xd   :  { %s59_s10 = sshll.u32 %s5842_s9, 4  ;;  %s60_s10 = int_to_ptr.vmem [resolvable:$true] %s59_s10 }
   0xe   :  { %62 = dma.hbm_to_vmem [thread:$0]  %s58_s8, 128, %s60_s10, [#allocation10]  }
   0xf   :  { %5827 = dma.done.wait [#allocation4], 512  }
  0x10   :  { %5828 = vsyncadd [#allocation4], 4294966784 }
  0x11   :  { %5829 = dma.done.wait [#allocation7], 24576  }
  0x12   :  { %5830 = vsyncadd [#allocation7], 4294942720 }
  0x13   :  { %5831 = dma.done.wait [#allocation10], 128  }
  0x14   :  { %5832 = vsyncadd [#allocation10], 4294967168  ;;  %v4655_v0 = vld [vmem:[#allocation6 + $0x1c0] sm:$0xf]  ;;  %v5305_v2 = vld [vmem:[#allocation6 + $0x1c4] sm:$0xf] }
  0x15   :  { %v5309_v1 = vld [vmem:[#allocation6 + $0x1dc] sm:$0xf0]  ;;  %v4657_v4 = vld [vmem:[#allocation6 + $0x1e0] sm:$0xf0]  ;;  %v4663_v5 = vld [vmem:[#allocation6 + $0x1c8] sm:$0xf] }
  0x16   :  { %v4656_v3 = vor.u32 %v5309_v1, %v4655_v0  ;;  %v5310_v6 = vld [vmem:[#allocation6 + $0x1e4] sm:$0xf0]  ;;  %v4660_v7 = vor.u32 %v5305_v2, %v4657_v4  ;;  %v5306_v9 = vld [vmem:[#allocation6 + $0x1cc] sm:$0xf]  ;;  %v4623_v11 = vld [vmem:[#allocation6 + $0x180] sm:$0xf] }
  0x17   :  { %v4664_v8 = vor.u32 %v5310_v6, %v4663_v5  ;;  %v4665_v10 = vld [vmem:[#allocation6 + $0x1e8] sm:$0xf0]  ;;  %v5301_v13 = vld [vmem:[#allocation6 + $0x19c] sm:$0xf0]  ;;  %v5297_v14 = vld [vmem:[#allocation6 + $0x184] sm:$0xf] }
  0x18   :  { %514 = vmatpush.bf16.msra.mxu0 %v4656_v3  ;;  %v4668_v12 = vor.u32 %v5306_v9, %v4665_v10  ;;  %v4625_v15 = vld [vmem:[#allocation6 + $0x1a0] sm:$0xf0]  ;;  %543 = vmatpush.bf16.msra.mxu1 %v4660_v7  ;;  %v4624_v16 = vor.u32 %v5301_v13, %v4623_v11  ;;  %v4631_v18 = vld [vmem:[#allocation6 + $0x188] sm:$0xf]  ;;  %v5298_v20 = vld [vmem:[#allocation6 + $0x18c] sm:$0xf] }
  0x19   :  { %572 = vmatpush.bf16.msra.mxu2 %v4664_v8  ;;  %v4628_v17 = vor.u32 %v5297_v14, %v4625_v15  ;;  %v5302_v19 = vld [vmem:[#allocation6 + $0x1a4] sm:$0xf0]  ;;  %v4633_v22 = vld [vmem:[#allocation6 + $0x1a8] sm:$0xf0]  ;;  %v4591_v23 = vld [vmem:[#allocation6 + $0x140] sm:$0xf] }
  0x1a   :  { %601 = vmatpush.bf16.msra.mxu3 %v4668_v12  ;;  %v4632_v21 = vor.u32 %v5302_v19, %v4631_v18  ;;  %v5293_v24 = vld [vmem:[#allocation6 + $0x15c] sm:$0xf0]  ;;  %v4636_v25 = vor.u32 %v5298_v20, %v4633_v22  ;;  %v5289_v26 = vld [vmem:[#allocation6 + $0x144] sm:$0xf]  ;;  %v4599_v28 = vld [vmem:[#allocation6 + $0x148] sm:$0xf] }
  0x1b   :  { %v4593_v27 = vld [vmem:[#allocation6 + $0x160] sm:$0xf0]  ;;  %v4592_v29 = vor.u32 %v5293_v24, %v4591_v23  ;;  %v5294_v30 = vld [vmem:[#allocation6 + $0x164] sm:$0xf0]  ;;  %v5290_v31 = vld [vmem:[#allocation6 + $0x14c] sm:$0xf] }
  0x1c   :  { %515 = vmatpush.bf16.msra.mxu0 %v4624_v16  ;;  %v4601_v32 = vld [vmem:[#allocation6 + $0x168] sm:$0xf0]  ;;  %544 = vmatpush.bf16.msra.mxu1 %v4628_v17  ;;  %v4596_v33 = vor.u32 %v5289_v26, %v4593_v27  ;;  %v4600_v34 = vor.u32 %v5294_v30, %v4599_v28  ;;  %v4559_v35 = vld [vmem:[#allocation6 + $0x100] sm:$0xf]  ;;  %v5281_v37 = vld [vmem:[#allocation6 + $0x104] sm:$0xf] }
  0x1d   :  { %573 = vmatpush.bf16.msra.mxu2 %v4632_v21  ;;  %v5285_v36 = vld [vmem:[#allocation6 + $0x11c] sm:$0xf0]  ;;  %v4604_v38 = vor.u32 %v5290_v31, %v4601_v32  ;;  %v4561_v39 = vld [vmem:[#allocation6 + $0x120] sm:$0xf0]  ;;  %v4567_v40 = vld [vmem:[#allocation6 + $0x108] sm:$0xf] }
  0x1e   :  { %602 = vmatpush.bf16.msra.mxu3 %v4636_v25  ;;  %v5286_v41 = vld [vmem:[#allocation6 + $0x124] sm:$0xf0]  ;;  %v5282_v42 = vld [vmem:[#allocation6 + $0x10c] sm:$0xf]  ;;  %v4560_v44 = vor.u32 %v5285_v36, %v4559_v35  ;;  %v4564_v45 = vor.u32 %v5281_v37, %v4561_v39  ;;  %v4527_v47 = vld [vmem:[#allocation6 + $0xc0] sm:$0xf] }
  0x1f   :  { %v4569_v43 = vld [vmem:[#allocation6 + $0x128] sm:$0xf0]  ;;  %v4568_v46 = vor.u32 %v5286_v41, %v4567_v40  ;;  %v5277_v48 = vld [vmem:[#allocation6 + $0xdc] sm:$0xf0]  ;;  %v5273_v49 = vld [vmem:[#allocation6 + $0xc4] sm:$0xf] }
  0x20   :  { %516 = vmatpush.bf16.msra.mxu0 %v4592_v29  ;;  %545 = vmatpush.bf16.msra.mxu1 %v4596_v33  ;;  %v4572_v50 = vor.u32 %v5282_v42, %v4569_v43  ;;  %v4529_v51 = vld [vmem:[#allocation6 + $0xe0] sm:$0xf0]  ;;  %v4535_v52 = vld [vmem:[#allocation6 + $0xc8] sm:$0xf]  ;;  %v5274_v54 = vld [vmem:[#allocation6 + $0xcc] sm:$0xf]  ;;  %v4528_v56 = vor.u32 %v5277_v48, %v4527_v47 }
  0x21   :  { %574 = vmatpush.bf16.msra.mxu2 %v4600_v34  ;;  %v5278_v53 = vld [vmem:[#allocation6 + $0xe4] sm:$0xf0]  ;;  %v4537_v55 = vld [vmem:[#allocation6 + $0xe8] sm:$0xf0]  ;;  %v4532_v57 = vor.u32 %v5273_v49, %v4529_v51  ;;  %v4495_v59 = vld [vmem:[#allocation6 + $0x80] sm:$0xf] }
  0x22   :  { %603 = vmatpush.bf16.msra.mxu3 %v4604_v38  ;;  %v4536_v58 = vor.u32 %v5278_v53, %v4535_v52  ;;  %v5269_v60 = vld [vmem:[#allocation6 + $0x9c] sm:$0xf0]  ;;  %v5265_v61 = vld [vmem:[#allocation6 + $0x84] sm:$0xf]  ;;  %v4540_v62 = vor.u32 %v5274_v54, %v4537_v55  ;;  %v4503_v0 = vld [vmem:[#allocation6 + $0x88] sm:$0xf] }
  0x23   :  { %v4497_v63 = vld [vmem:[#allocation6 + $0xa0] sm:$0xf0]  ;;  %v5270_v1 = vld [vmem:[#allocation6 + $0xa4] sm:$0xf0]  ;;  %v5266_v2 = vld [vmem:[#allocation6 + $0x8c] sm:$0xf]  ;;  %v4496_v4 = vor.u32 %v5269_v60, %v4495_v59 }
  0x24   :  { %517 = vmatpush.bf16.msra.mxu0 %v4560_v44  ;;  %546 = vmatpush.bf16.msra.mxu1 %v4564_v45  ;;  %v4505_v3 = vld [vmem:[#allocation6 + $0xa8] sm:$0xf0]  ;;  %v4500_v5 = vor.u32 %v5265_v61, %v4497_v63  ;;  %v4504_v6 = vor.u32 %v5270_v1, %v4503_v0  ;;  %v4463_v7 = vld [vmem:[#allocation6 + $0x40] sm:$0xf]  ;;  %v5257_v9 = vld [vmem:[#allocation6 + $0x44] sm:$0xf] }
  0x25   :  { %575 = vmatpush.bf16.msra.mxu2 %v4568_v46  ;;  %v5261_v8 = vld [vmem:[#allocation6 + $0x5c] sm:$0xf0]  ;;  %v4508_v10 = vor.u32 %v5266_v2, %v4505_v3  ;;  %v4465_v11 = vld [vmem:[#allocation6 + $0x60] sm:$0xf0]  ;;  %v4471_v12 = vld [vmem:[#allocation6 + $0x48] sm:$0xf] }
  0x26   :  { %604 = vmatpush.bf16.msra.mxu3 %v4572_v50  ;;  %v5262_v13 = vld [vmem:[#allocation6 + $0x64] sm:$0xf0]  ;;  %v5258_v14 = vld [vmem:[#allocation6 + $0x4c] sm:$0xf]  ;;  %v4464_v16 = vor.u32 %v5261_v8, %v4463_v7  ;;  %v4468_v17 = vor.u32 %v5257_v9, %v4465_v11  ;;  %v4431_v19 = vld [vmem:[#allocation6] sm:$0xf] }
  0x27   :  { %v4473_v15 = vld [vmem:[#allocation6 + $0x68] sm:$0xf0]  ;;  %v4472_v18 = vor.u32 %v5262_v13, %v4471_v12  ;;  %v5253_v20 = vld [vmem:[#allocation6 + $0x1c] sm:$0xf0]  ;;  %v5249_v21 = vld [vmem:[#allocation6 + $0x4] sm:$0xf] }
  0x28   :  { %518 = vmatpush.bf16.msra.mxu0 %v4528_v56  ;;  %547 = vmatpush.bf16.msra.mxu1 %v4532_v57  ;;  %v4476_v22 = vor.u32 %v5258_v14, %v4473_v15  ;;  %v4433_v23 = vld [vmem:[#allocation6 + $0x20] sm:$0xf0]  ;;  %v4439_v24 = vld [vmem:[#allocation6 + $0x8] sm:$0xf]  ;;  %v5250_v26 = vld [vmem:[#allocation6 + $0xc] sm:$0xf]  ;;  %v4432_v28 = vor.u32 %v5253_v20, %v4431_v19 }
  0x29   :  { %576 = vmatpush.bf16.msra.mxu2 %v4536_v58  ;;  %v5254_v25 = vld [vmem:[#allocation6 + $0x24] sm:$0xf0]  ;;  %v4441_v27 = vld [vmem:[#allocation6 + $0x28] sm:$0xf0]  ;;  %v4436_v29 = vor.u32 %v5249_v21, %v4433_v23  ;;  %v5882_v32 = vld [vmem:[#allocation3] sm:$0xff]  ;;  %s5844_s2 = smov [#allocation11]  }
  0x2a   :  { %605 = vmatpush.bf16.msra.mxu3 %v4540_v62  ;;  %v4440_v30 = vor.u32 %v5254_v25, %v4439_v24  ;;  %v4444_v31 = vor.u32 %v5250_v26, %v4441_v27  ;;  %v4671_v33 = vld [vmem:[#allocation6 + $0x1d0] sm:$0xf]  ;;  %v5307_v35 = vld [vmem:[#allocation6 + $0x1d4] sm:$0xf]  ;;  %v4679_v38 = vld [vmem:[#allocation6 + $0x1d8] sm:$0xf] }
  0x2b   :  { %v5311_v34 = vld [vmem:[#allocation6 + $0x1ec] sm:$0xf0]  ;;  %v4673_v37 = vld [vmem:[#allocation6 + $0x1f0] sm:$0xf0]  ;;  %v5312_v39 = vld [vmem:[#allocation6 + $0x1f4] sm:$0xf0] }
  0x2c   :  { %519 = vmatpush.bf16.msra.mxu0 %v4496_v4  ;;  %548 = vmatpush.bf16.msra.mxu1 %v4500_v5  ;;  %v4672_v36 = vor.u32 %v5311_v34, %v4671_v33  ;;  %v4676_v40 = vor.u32 %v5307_v35, %v4673_v37  ;;  %v4680_v41 = vor.u32 %v5312_v39, %v4679_v38  ;;  %v5308_v42 = vld [vmem:[#allocation6 + $0x1dc] sm:$0xf]  ;;  %v4639_v44 = vld [vmem:[#allocation6 + $0x190] sm:$0xf]  ;;  %v5299_v47 = vld [vmem:[#allocation6 + $0x194] sm:$0xf] }
  0x2d   :  { %577 = vmatpush.bf16.msra.mxu2 %v4504_v6  ;;  %v4681_v43 = vld [vmem:[#allocation6 + $0x1f8] sm:$0xf0]  ;;  %v5303_v46 = vld [vmem:[#allocation6 + $0x1ac] sm:$0xf0]  ;;  %v4641_v48 = vld [vmem:[#allocation6 + $0x1b0] sm:$0xf0] }
  0x2e   :  { %606 = vmatpush.bf16.msra.mxu3 %v4508_v10  ;;  %v4684_v45 = vor.u32 %v5308_v42, %v4681_v43  ;;  %v4640_v49 = vor.u32 %v5303_v46, %v4639_v44  ;;  %v4644_v50 = vor.u32 %v5299_v47, %v4641_v48  ;;  %v4647_v51 = vld [vmem:[#allocation6 + $0x198] sm:$0xf]  ;;  %v5300_v53 = vld [vmem:[#allocation6 + $0x19c] sm:$0xf]  ;;  %v4607_v56 = vld [vmem:[#allocation6 + $0x150] sm:$0xf] }
  0x2f   :  { %v5304_v52 = vld [vmem:[#allocation6 + $0x1b4] sm:$0xf0]  ;;  %v4649_v55 = vld [vmem:[#allocation6 + $0x1b8] sm:$0xf0]  ;;  %v5295_v57 = vld [vmem:[#allocation6 + $0x16c] sm:$0xf0] }
  0x30   :  { %520 = vmatpush.bf16.msra.mxu0 %v4464_v16  ;;  %549 = vmatpush.bf16.msra.mxu1 %v4468_v17  ;;  %v4648_v54 = vor.u32 %v5304_v52, %v4647_v51  ;;  %v4652_v58 = vor.u32 %v5300_v53, %v4649_v55  ;;  %v5291_v59 = vld [vmem:[#allocation6 + $0x154] sm:$0xf]  ;;  %v4615_v61 = vld [vmem:[#allocation6 + $0x158] sm:$0xf]  ;;  %v4608_v62 = vor.u32 %v5295_v57, %v4607_v56  ;;  %v5292_v0 = vld [vmem:[#allocation6 + $0x15c] sm:$0xf] }
  0x31   :  { %578 = vmatpush.bf16.msra.mxu2 %v4472_v18  ;;  %v4609_v60 = vld [vmem:[#allocation6 + $0x170] sm:$0xf0]  ;;  %v5296_v63 = vld [vmem:[#allocation6 + $0x174] sm:$0xf0]  ;;  %v4617_v1 = vld [vmem:[#allocation6 + $0x178] sm:$0xf0] }
  0x32   :  { %607 = vmatpush.bf16.msra.mxu3 %v4476_v22  ;;  %v4612_v2 = vor.u32 %v5291_v59, %v4609_v60  ;;  %v4616_v3 = vor.u32 %v5296_v63, %v4615_v61  ;;  %v4575_v4 = vld [vmem:[#allocation6 + $0x110] sm:$0xf]  ;;  %v4620_v6 = vor.u32 %v5292_v0, %v4617_v1  ;;  %v5283_v7 = vld [vmem:[#allocation6 + $0x114] sm:$0xf]  ;;  %v4583_v10 = vld [vmem:[#allocation6 + $0x118] sm:$0xf] }
  0x33   :  { %v5287_v5 = vld [vmem:[#allocation6 + $0x12c] sm:$0xf0]  ;;  %v4577_v8 = vld [vmem:[#allocation6 + $0x130] sm:$0xf0]  ;;  %v5288_v11 = vld [vmem:[#allocation6 + $0x134] sm:$0xf0] }
  0x34   :  { %521 = vmatpush.bf16.msra.mxu0 %v4432_v28  ;;  %550 = vmatpush.bf16.msra.mxu1 %v4436_v29  ;;  %v4576_v9 = vor.u32 %v5287_v5, %v4575_v4  ;;  %v5888_v12 = vld [vmem:[#allocation3 + $0x8] sm:$0xff]  ;;  %v4580_v13 = vor.u32 %v5283_v7, %v4577_v8  ;;  %v5284_v14 = vld [vmem:[#allocation6 + $0x11c] sm:$0xf]  ;;  %v4584_v16 = vor.u32 %v5288_v11, %v4583_v10  ;;  %v4543_v18 = vld [vmem:[#allocation6 + $0xd0] sm:$0xf]  ;;  %s4399_s3 = sshll.u32 %s5844_s2, 4  ;;  %s4400_s3 = int_to_ptr.vmem [resolvable:$true] %s4399_s3 }
  0x35   :  { %579 = vmatpush.bf16.msra.mxu2 %v4440_v30  ;;  %v4585_v15 = vld [vmem:[#allocation6 + $0x138] sm:$0xf0]  ;;  %v5279_v19 = vld [vmem:[#allocation6 + $0xec] sm:$0xf0]  ;;  %v5275_v20 = vld [vmem:[#allocation6 + $0xd4] sm:$0xf] }
  0x36   :  { %608 = vmatpush.bf16.msra.mxu3 %v4444_v31  ;;  %v4588_v17 = vor.u32 %v5284_v14, %v4585_v15  ;;  %v4544_v21 = vor.u32 %v5279_v19, %v4543_v18  ;;  %v4545_v22 = vld [vmem:[#allocation6 + $0xf0] sm:$0xf0]  ;;  %v4551_v23 = vld [vmem:[#allocation6 + $0xd8] sm:$0xf]  ;;  %v5276_v27 = vld [vmem:[#allocation6 + $0xdc] sm:$0xf] }
  0x37   :  { %522 = vmatmul.bf16.vlgmr.msra.gmra.mxu0 %v5882_v32  ;;  %551 = vmatmul.bf16.vlgmr.msra.gmra.mxu1 %v5882_v32  ;;  %v5280_v24 = vld [vmem:[#allocation6 + $0xf4] sm:$0xf0]  ;;  %v4548_v25 = vor.u32 %v5275_v20, %v4545_v22  ;;  %v4553_v28 = vld [vmem:[#allocation6 + $0xf8] sm:$0xf0]  ;;  %v4511_v29 = vld [vmem:[#allocation6 + $0x90] sm:$0xf] }
  0x38   :  { %580 = vmatmul.bf16.vlgmr.msra.gmra.mxu2 %v5882_v32  ;;  %630 = vmatpush.bf16.msrb.mxu0 %v4672_v36  ;;  %v4552_v26 = vor.u32 %v5280_v24, %v4551_v23  ;;  %v4556_v30 = vor.u32 %v5276_v27, %v4553_v28  ;;  %v5271_v31 = vld [vmem:[#allocation6 + $0xac] sm:$0xf0]  ;;  %v5267_v33 = vld [vmem:[#allocation6 + $0x94] sm:$0xf]  ;;  %v4519_v37 = vld [vmem:[#allocation6 + $0x98] sm:$0xf] }
  0x39   :  { %609 = vmatmul.bf16.vlgmr.msra.gmra.mxu3 %v5882_v32  ;;  %659 = vmatpush.bf16.msrb.mxu1 %v4676_v40  ;;  %v4513_v34 = vld [vmem:[#allocation6 + $0xb0] sm:$0xf0]  ;;  %v4512_v35 = vor.u32 %v5271_v31, %v4511_v29  ;;  %v5272_v38 = vld [vmem:[#allocation6 + $0xb4] sm:$0xf0]  ;;  %v5268_v39 = vld [vmem:[#allocation6 + $0x9c] sm:$0xf] }
  0x3a   :  { %688 = vmatpush.bf16.msrb.mxu2 %v4680_v41  ;;  %717 = vmatpush.bf16.msrb.mxu3 %v4684_v45  ;;  %v4516_v36 = vor.u32 %v5267_v33, %v4513_v34  ;;  %v4521_v40 = vld [vmem:[#allocation6 + $0xb8] sm:$0xf0]  ;;  %v4479_v41 = vld [vmem:[#allocation6 + $0x50] sm:$0xf]  ;;  %v4520_v43 = vor.u32 %v5272_v38, %v4519_v37  ;;  %v5259_v44 = vld [vmem:[#allocation6 + $0x54] sm:$0xf] }
  0x3b   :  { %v5263_v42 = vld [vmem:[#allocation6 + $0x6c] sm:$0xf0]  ;;  %v4481_v45 = vld [vmem:[#allocation6 + $0x70] sm:$0xf0]  ;;  %v4524_v46 = vor.u32 %v5268_v39, %v4521_v40  ;;  %v4487_v48 = vld [vmem:[#allocation6 + $0x58] sm:$0xf] }
  0x3c   :  { %631 = vmatpush.bf16.msrb.mxu0 %v4640_v49  ;;  %v4480_v47 = vor.u32 %v5263_v42, %v4479_v41  ;;  %v5264_v49 = vld [vmem:[#allocation6 + $0x74] sm:$0xf0]  ;;  %v4484_v51 = vor.u32 %v5259_v44, %v4481_v45  ;;  %v4489_v52 = vld [vmem:[#allocation6 + $0x78] sm:$0xf0]  ;;  %v4447_v53 = vld [vmem:[#allocation6 + $0x10] sm:$0xf] }
  0x3d   :  { %660 = vmatpush.bf16.msrb.mxu1 %v4644_v50  ;;  %v5260_v50 = vld [vmem:[#allocation6 + $0x5c] sm:$0xf]  ;;  %v5251_v55 = vld [vmem:[#allocation6 + $0x14] sm:$0xf]  ;;  %v4488_v57 = vor.u32 %v5264_v49, %v4487_v48  ;;  %v4455_v60 = vld [vmem:[#allocation6 + $0x18] sm:$0xf] }
  0x3e   :  { %689 = vmatpush.bf16.msrb.mxu2 %v4648_v54  ;;  %718 = vmatpush.bf16.msrb.mxu3 %v4652_v58  ;;  %v5255_v54 = vld [vmem:[#allocation6 + $0x2c] sm:$0xf0]  ;;  %v4449_v56 = vld [vmem:[#allocation6 + $0x30] sm:$0xf0]  ;;  %v4492_v58 = vor.u32 %v5260_v50, %v4489_v52  ;;  %v5256_v61 = vld [vmem:[#allocation6 + $0x34] sm:$0xf0] }
  0x3f   :  { %v4448_v59 = vor.u32 %v5255_v54, %v4447_v53  ;;  %v4452_v63 = vor.u32 %v5251_v55, %v4449_v56  ;;  %v5252_v0 = vld [vmem:[#allocation6 + $0x1c] sm:$0xf]  ;;  %v4911_v4 = vld [vmem:[#allocation8 + $0x1c0] sm:$0xf]  ;;  %v4913_v10 = vld [vmem:[#allocation8 + $0x1e0] sm:$0xf0] }
  0x40   :  { %632 = vmatpush.bf16.msrb.mxu0 %v4608_v62  ;;  %v5894_v62 = vld [vmem:[#allocation3 + $0x10] sm:$0xff]  ;;  %v4457_v1 = vld [vmem:[#allocation6 + $0x38] sm:$0xf0]  ;;  %v5373_v5 = vld [vmem:[#allocation8 + $0x1dc] sm:$0xf0]  ;;  %s4401_s13 = sshll.u32 %s8060_s4, 4  ;;  %s4402_s13 = int_to_ptr.hbm [resolvable:$true] %s4401_s13 }
  0x41   :  { %661 = vmatpush.bf16.msrb.mxu1 %v4612_v2  ;;  %v4456_v2 = vor.u32 %v5256_v61, %v4455_v60  ;;  %v5900_v7 = vor.u32 %v5373_v5, %v4911_v4  ;;  %v5437_v8 = vld [vmem:[#allocation8 + $0x3dc] sm:$0xf0]  ;;  %v5433_v14 = vld [vmem:[#allocation8 + $0x3c4] sm:$0xf]  ;;  %v5932_v42 = vld [vmem:[#allocation3 + $0x18] sm:$0xff] }
  0x42   :  { %690 = vmatpush.bf16.msrb.mxu2 %v4616_v3  ;;  %719 = vmatpush.bf16.msrb.mxu3 %v4620_v6  ;;  %v4460_v3 = vor.u32 %v5252_v0, %v4457_v1  ;;  %v5167_v6 = vld [vmem:[#allocation8 + $0x3c0] sm:$0xf]  ;;  %v5169_v15 = vld [vmem:[#allocation8 + $0x3e0] sm:$0xf0] }
  0x43   :  { %8348 = vst [vmem:[#allocation16_spill] sm:$0xff] %v5900_v7  ;;  %v5902_v11 = vor.u32 %v5437_v8, %v5167_v6  ;;  %v5365_v18 = vld [vmem:[#allocation8 + $0x19c] sm:$0xf0]  ;;  %v5361_v23 = vld [vmem:[#allocation8 + $0x184] sm:$0xf] }
  0x44   :  { %633 = vmatpush.bf16.msrb.mxu0 %v4576_v9  ;;  %v5369_v9 = vld [vmem:[#allocation8 + $0x1c4] sm:$0xf]  ;;  %v5135_v19 = vld [vmem:[#allocation8 + $0x380] sm:$0xf] }
  0x45   :  { %662 = vmatpush.bf16.msrb.mxu1 %v4580_v13  ;;  %8349 = vst [vmem:[#allocation17_spill] sm:$0xff] %v5902_v11  ;;  %v5904_v13 = vor.u32 %v5369_v9, %v4913_v10  ;;  %v5429_v20 = vld [vmem:[#allocation8 + $0x39c] sm:$0xf0]  ;;  %v4881_v24 = vld [vmem:[#allocation8 + $0x1a0] sm:$0xf0] }
  0x46   :  { %691 = vmatpush.bf16.msrb.mxu2 %v4584_v16  ;;  %720 = vmatpush.bf16.msrb.mxu3 %v4588_v17  ;;  %v4879_v16 = vld [vmem:[#allocation8 + $0x180] sm:$0xf]  ;;  %v5907_v17 = vor.u32 %v5433_v14, %v5169_v15  ;;  %v5913_v22 = vor.u32 %v5429_v20, %v5135_v19  ;;  %v5137_v27 = vld [vmem:[#allocation8 + $0x3a0] sm:$0xf0] }
  0x47   :  { %527 = vmatmul.bf16.gmra.mxu0 %v5888_v12  ;;  %556 = vmatmul.bf16.gmra.mxu1 %v5888_v12  ;;  %8350 = vst [vmem:[#allocation18_spill] sm:$0xff] %v5904_v13  ;;  %v4847_v28 = vld [vmem:[#allocation8 + $0x140] sm:$0xf]  ;;  %v5353_v34 = vld [vmem:[#allocation8 + $0x144] sm:$0xf] }
  0x48   :  { %585 = vmatmul.bf16.gmra.mxu2 %v5888_v12  ;;  %634 = vmatpush.bf16.msrb.mxu0 %v4544_v21  ;;  %8351 = vst [vmem:[#allocation19_spill] sm:$0xff] %v5907_v17  ;;  %v5911_v21 = vor.u32 %v5365_v18, %v4879_v16  ;;  %v5357_v29 = vld [vmem:[#allocation8 + $0x15c] sm:$0xf0]  ;;  %v5417_v37 = vld [vmem:[#allocation8 + $0x344] sm:$0xf] }
  0x49   :  { %614 = vmatmul.bf16.gmra.mxu3 %v5888_v12  ;;  %663 = vmatpush.bf16.msrb.mxu1 %v4548_v25  ;;  %8353 = vst [vmem:[#allocation21_spill] sm:$0xff] %v5913_v22  ;;  %v5425_v25 = vld [vmem:[#allocation8 + $0x384] sm:$0xf]  ;;  %v5103_v31 = vld [vmem:[#allocation8 + $0x340] sm:$0xf] }
  0x4a   :  { %692 = vmatpush.bf16.msrb.mxu2 %v4552_v26  ;;  %721 = vmatpush.bf16.msrb.mxu3 %v4556_v30  ;;  %8352 = vst [vmem:[#allocation20_spill] sm:$0xff] %v5911_v21  ;;  %v5916_v26 = vor.u32 %v5361_v23, %v4881_v24  ;;  %v5918_v30 = vor.u32 %v5425_v25, %v5137_v27  ;;  %v5421_v33 = vld [vmem:[#allocation8 + $0x35c] sm:$0xf0]  ;;  %v5105_v38 = vld [vmem:[#allocation8 + $0x360] sm:$0xf0] }
  0x4b   :  { %v5925_v39 = vor.u32 %v5421_v33, %v5103_v31  ;;  %v5930_v41 = vor.u32 %v5417_v37, %v5105_v38  ;;  %v5349_v44 = vld [vmem:[#allocation8 + $0x11c] sm:$0xf0]  ;;  %v5345_v48 = vld [vmem:[#allocation8 + $0x104] sm:$0xf] }
  0x4c   :  { %635 = vmatpush.bf16.msrb.mxu0 %v4512_v35  ;;  %8354 = vst [vmem:[#allocation22_spill] sm:$0xff] %v5916_v26  ;;  %v5921_v35 = vor.u32 %v5357_v29, %v4847_v28  ;;  %v5071_v45 = vld [vmem:[#allocation8 + $0x300] sm:$0xf]  ;;  %v4817_v49 = vld [vmem:[#allocation8 + $0x120] sm:$0xf0] }
  0x4d   :  { %664 = vmatpush.bf16.msrb.mxu1 %v4516_v36  ;;  %8355 = vst [vmem:[#allocation23_spill] sm:$0xff] %v5918_v30  ;;  %v4849_v36 = vld [vmem:[#allocation8 + $0x160] sm:$0xf0]  ;;  %v4783_v54 = vld [vmem:[#allocation8 + $0xc0] sm:$0xf] }
  0x4e   :  { %693 = vmatpush.bf16.msrb.mxu2 %v4520_v43  ;;  %722 = vmatpush.bf16.msrb.mxu3 %v4524_v46  ;;  %8356 = vst [vmem:[#allocation24_spill] sm:$0xff] %v5921_v35  ;;  %v5927_v40 = vor.u32 %v5353_v34, %v4849_v36  ;;  %v4815_v43 = vld [vmem:[#allocation8 + $0x100] sm:$0xf]  ;;  %v5409_v52 = vld [vmem:[#allocation8 + $0x304] sm:$0xf] }
  0x4f   :  { %8357 = vst [vmem:[#allocation25_spill] sm:$0xff] %v5925_v39  ;;  %v5942_v46 = vor.u32 %v5349_v44, %v4815_v43  ;;  %v5073_v53 = vld [vmem:[#allocation8 + $0x320] sm:$0xf0]  ;;  %v5341_v56 = vld [vmem:[#allocation8 + $0xdc] sm:$0xf0] }
  0x50   :  { %636 = vmatpush.bf16.msrb.mxu0 %v4480_v47  ;;  %8358 = vst [vmem:[#allocation26_spill] sm:$0xff] %v5927_v40  ;;  %v5413_v47 = vld [vmem:[#allocation8 + $0x31c] sm:$0xf0]  ;;  %v5949_v55 = vor.u32 %v5409_v52, %v5073_v53  ;;  %v5337_v61 = vld [vmem:[#allocation8 + $0xc4] sm:$0xf] }
  0x51   :  { %665 = vmatpush.bf16.msrb.mxu1 %v4484_v51  ;;  %8359 = vst [vmem:[#allocation27_spill] sm:$0xff] %v5930_v41  ;;  %v5944_v50 = vor.u32 %v5413_v47, %v5071_v45  ;;  %v5946_v51 = vor.u32 %v5345_v48, %v4817_v49  ;;  %v5401_v0 = vld [vmem:[#allocation8 + $0x2c4] sm:$0xf]  ;;  %v5333_v4 = vld [vmem:[#allocation8 + $0x9c] sm:$0xf0] }
  0x52   :  { %694 = vmatpush.bf16.msrb.mxu2 %v4488_v57  ;;  %723 = vmatpush.bf16.msrb.mxu3 %v4492_v58  ;;  %8360 = vst [vmem:[#allocation28_spill] sm:$0xff] %v5942_v46  ;;  %v5039_v57 = vld [vmem:[#allocation8 + $0x2c0] sm:$0xf]  ;;  %v5329_v9 = vld [vmem:[#allocation8 + $0x84] sm:$0xf] }
  0x53   :  { %8361 = vst [vmem:[#allocation29_spill] sm:$0xff] %v5944_v50  ;;  %v5405_v58 = vld [vmem:[#allocation8 + $0x2dc] sm:$0xf0]  ;;  %v4753_v14 = vld [vmem:[#allocation8 + $0xa0] sm:$0xf0] }
  0x54   :  { %637 = vmatpush.bf16.msrb.mxu0 %v4448_v59  ;;  %8362 = vst [vmem:[#allocation30_spill] sm:$0xff] %v5946_v51  ;;  %v5953_v59 = vor.u32 %v5341_v56, %v4783_v54  ;;  %v5955_v60 = vor.u32 %v5405_v58, %v5039_v57  ;;  %v5007_v6 = vld [vmem:[#allocation8 + $0x280] sm:$0xf]  ;;  %v5393_v15 = vld [vmem:[#allocation8 + $0x284] sm:$0xf]  ;;  %v5969_v19 = vor.u32 %v5329_v9, %v4753_v14 }
  0x55   :  { %666 = vmatpush.bf16.msrb.mxu1 %v4452_v63  ;;  %8363 = vst [vmem:[#allocation31_spill] sm:$0xff] %v5949_v55  ;;  %v4785_v63 = vld [vmem:[#allocation8 + $0xe0] sm:$0xf0]  ;;  %v5397_v8 = vld [vmem:[#allocation8 + $0x29c] sm:$0xf0] }
  0x56   :  { %695 = vmatpush.bf16.msrb.mxu2 %v4456_v2  ;;  %724 = vmatpush.bf16.msrb.mxu3 %v4460_v3  ;;  %8364 = vst [vmem:[#allocation32_spill] sm:$0xff] %v5953_v59  ;;  %v5958_v1 = vor.u32 %v5337_v61, %v4785_v63  ;;  %v5041_v2 = vld [vmem:[#allocation8 + $0x2e0] sm:$0xf0]  ;;  %v4751_v3 = vld [vmem:[#allocation8 + $0x80] sm:$0xf]  ;;  %v5967_v18 = vor.u32 %v5397_v8, %v5007_v6 }
  0x57   :  { %532 = vmatmul.bf16.gmra.mxu0 %v5894_v62  ;;  %561 = vmatmul.bf16.gmra.mxu1 %v5894_v62  ;;  %8365 = vst [vmem:[#allocation33_spill] sm:$0xff] %v5955_v60  ;;  %v5960_v5 = vor.u32 %v5401_v0, %v5041_v2  ;;  %v5963_v10 = vor.u32 %v5333_v4, %v4751_v3  ;;  %v5009_v16 = vld [vmem:[#allocation8 + $0x2a0] sm:$0xf0]  ;;  %v4719_v23 = vld [vmem:[#allocation8 + $0x40] sm:$0xf] }
  0x58   :  { %590 = vmatmul.bf16.gmra.mxu2 %v5894_v62  ;;  %1586 = vmatpush.bf16.msra.mxu0 %v5900_v7  ;;  %8366 = vst [vmem:[#allocation34_spill] sm:$0xff] %v5958_v1  ;;  %v5972_v20 = vor.u32 %v5393_v15, %v5009_v16  ;;  %v5325_v24 = vld [vmem:[#allocation8 + $0x5c] sm:$0xf0]  ;;  %v5321_v28 = vld [vmem:[#allocation8 + $0x44] sm:$0xf] }
  0x59   :  { %619 = vmatmul.bf16.gmra.mxu3 %v5894_v62  ;;  %1599 = vmatpush.bf16.msra.mxu1 %v5902_v11  ;;  %8367 = vst [vmem:[#allocation35_spill] sm:$0xff] %v5960_v5  ;;  %v4975_v25 = vld [vmem:[#allocation8 + $0x240] sm:$0xf]  ;;  %v4721_v29 = vld [vmem:[#allocation8 + $0x60] sm:$0xf0]  ;;  %v5978_v34 = vor.u32 %v5325_v24, %v4719_v23 }
  0x5a   :  { %1612 = vmatpush.bf16.msra.mxu2 %v5904_v13  ;;  %1625 = vmatpush.bf16.msra.mxu3 %v5907_v17  ;;  %8368 = vst [vmem:[#allocation36_spill] sm:$0xff] %v5963_v10  ;;  %v5389_v27 = vld [vmem:[#allocation8 + $0x25c] sm:$0xf0]  ;;  %v5385_v31 = vld [vmem:[#allocation8 + $0x244] sm:$0xf]  ;;  %v5982_v37 = vor.u32 %v5321_v28, %v4721_v29 }
  0x5b   :  { %8369 = vst [vmem:[#allocation37_spill] sm:$0xff] %v5967_v18  ;;  %v4977_v33 = vld [vmem:[#allocation8 + $0x260] sm:$0xf0]  ;;  %v5980_v36 = vor.u32 %v5389_v27, %v4975_v25  ;;  %v4687_v43 = vld [vmem:[#allocation8] sm:$0xf] }
  0x5c   :  { %1587 = vmatpush.bf16.msra.mxu0 %v5911_v21  ;;  %8370 = vst [vmem:[#allocation38_spill] sm:$0xff] %v5969_v19  ;;  %v5985_v38 = vor.u32 %v5385_v31, %v4977_v33  ;;  %v5317_v44 = vld [vmem:[#allocation8 + $0x1c] sm:$0xf0]  ;;  %v5313_v49 = vld [vmem:[#allocation8 + $0x4] sm:$0xf] }
  0x5d   :  { %1600 = vmatpush.bf16.msra.mxu1 %v5913_v22  ;;  %8371 = vst [vmem:[#allocation39_spill] sm:$0xff] %v5972_v20  ;;  %v4943_v45 = vld [vmem:[#allocation8 + $0x200] sm:$0xf]  ;;  %v5991_v47 = vor.u32 %v5317_v44, %v4687_v43  ;;  %v4689_v52 = vld [vmem:[#allocation8 + $0x20] sm:$0xf0] }
  0x5e   :  { %1613 = vmatpush.bf16.msra.mxu2 %v5916_v26  ;;  %1626 = vmatpush.bf16.msra.mxu3 %v5918_v30  ;;  %8372 = vst [vmem:[#allocation40_spill] sm:$0xff] %v5978_v34  ;;  %v5381_v48 = vld [vmem:[#allocation8 + $0x21c] sm:$0xf0]  ;;  %v5997_v54 = vor.u32 %v5313_v49, %v4689_v52  ;;  %v5377_v56 = vld [vmem:[#allocation8 + $0x204] sm:$0xf] }
  0x5f   :  { %8373 = vst [vmem:[#allocation41_spill] sm:$0xff] %v5980_v36  ;;  %v5995_v53 = vor.u32 %v5381_v48, %v4943_v45  ;;  %v4945_v57 = vld [vmem:[#allocation8 + $0x220] sm:$0xf0]  ;;  %v4919_v58 = vld [vmem:[#allocation8 + $0x1c8] sm:$0xf] }
  0x60   :  { %1588 = vmatpush.bf16.msra.mxu0 %v5921_v35  ;;  %8374 = vst [vmem:[#allocation42_spill] sm:$0xff] %v5982_v37  ;;  %v5374_v61 = vld [vmem:[#allocation8 + $0x1e4] sm:$0xf0]  ;;  %v5370_v4 = vld [vmem:[#allocation8 + $0x1cc] sm:$0xf] }
  0x61   :  { %1601 = vmatpush.bf16.msra.mxu1 %v5925_v39  ;;  %8375 = vst [vmem:[#allocation43_spill] sm:$0xff] %v5985_v38  ;;  %v5175_v63 = vld [vmem:[#allocation8 + $0x3c8] sm:$0xf]  ;;  %v6002_v2 = vor.u32 %v5374_v61, %v4919_v58  ;;  %v4921_v6 = vld [vmem:[#allocation8 + $0x1e8] sm:$0xf0] }
  0x62   :  { %1614 = vmatpush.bf16.msra.mxu2 %v5927_v40  ;;  %1627 = vmatpush.bf16.msra.mxu3 %v5930_v41  ;;  %8376 = vst [vmem:[#allocation44_spill] sm:$0xff] %v5991_v47  ;;  %v5438_v0 = vld [vmem:[#allocation8 + $0x3e4] sm:$0xf0]  ;;  %v5434_v8 = vld [vmem:[#allocation8 + $0x3cc] sm:$0xf]  ;;  %v6007_v9 = vor.u32 %v5370_v4, %v4921_v6 }
  0x63   :  { %8377 = vst [vmem:[#allocation45_spill] sm:$0xff] %v5995_v53  ;;  %v6004_v3 = vor.u32 %v5438_v0, %v5175_v63  ;;  %v5177_v14 = vld [vmem:[#allocation8 + $0x3e8] sm:$0xf0]  ;;  %v4887_v15 = vld [vmem:[#allocation8 + $0x188] sm:$0xf] }
  0x64   :  { %1589 = vmatpush.bf16.msra.mxu0 %v5942_v46  ;;  %8378 = vst [vmem:[#allocation46_spill] sm:$0xff] %v5997_v54  ;;  %v5366_v16 = vld [vmem:[#allocation8 + $0x1a4] sm:$0xf0]  ;;  %v6011_v23 = vor.u32 %v5434_v8, %v5177_v14  ;;  %v5362_v27 = vld [vmem:[#allocation8 + $0x18c] sm:$0xf] }
  0x65   :  { %1602 = vmatpush.bf16.msra.mxu1 %v5944_v50  ;;  %8380 = vst [vmem:[#allocation48_spill] sm:$0xff] %v6002_v2  ;;  %v5143_v24 = vld [vmem:[#allocation8 + $0x388] sm:$0xf]  ;;  %v6015_v28 = vor.u32 %v5366_v16, %v4887_v15  ;;  %v4889_v29 = vld [vmem:[#allocation8 + $0x1a8] sm:$0xf0] }
  0x66   :  { %1615 = vmatpush.bf16.msra.mxu2 %v5946_v51  ;;  %1628 = vmatpush.bf16.msra.mxu3 %v5949_v55  ;;  %8381 = vst [vmem:[#allocation49_spill] sm:$0xff] %v6004_v3  ;;  %v5430_v25 = vld [vmem:[#allocation8 + $0x3a4] sm:$0xf0]  ;;  %v5426_v31 = vld [vmem:[#allocation8 + $0x38c] sm:$0xf]  ;;  %v6021_v44 = vor.u32 %v5362_v27, %v4889_v29 }
  0x67   :  { %537 = vmatmul.bf16.gmra.mxu0 %v5932_v42  ;;  %566 = vmatmul.bf16.gmra.mxu1 %v5932_v42  ;;  %8382 = vst [vmem:[#allocation50_spill] sm:$0xff] %v6007_v9  ;;  %v5145_v33 = vld [vmem:[#allocation8 + $0x3a8] sm:$0xf0]  ;;  %v6019_v43 = vor.u32 %v5430_v25, %v5143_v24  ;;  %v4855_v48 = vld [vmem:[#allocation8 + $0x148] sm:$0xf] }
  0x68   :  { %595 = vmatmul.bf16.gmra.mxu2 %v5932_v42  ;;  %1590 = vmatpush.bf16.msra.mxu0 %v5953_v59  ;;  %8383 = vst [vmem:[#allocation51_spill] sm:$0xff] %v6011_v23  ;;  %v6024_v45 = vor.u32 %v5426_v31, %v5145_v33  ;;  %v5358_v49 = vld [vmem:[#allocation8 + $0x164] sm:$0xf0]  ;;  %v4857_v58 = vld [vmem:[#allocation8 + $0x168] sm:$0xf0] }
  0x69   :  { %624 = vmatmul.bf16.gmra.mxu3 %v5932_v42  ;;  %1603 = vmatpush.bf16.msra.mxu1 %v5955_v60  ;;  %8384 = vst [vmem:[#allocation52_spill] sm:$0xff] %v6015_v28  ;;  %v5111_v52 = vld [vmem:[#allocation8 + $0x348] sm:$0xf]  ;;  %v5418_v61 = vld [vmem:[#allocation8 + $0x34c] sm:$0xf]  ;;  %v6030_v0 = vor.u32 %v5358_v49, %v4855_v48 }
  0x6a   :  { %1616 = vmatpush.bf16.msra.mxu2 %v5958_v1  ;;  %1629 = vmatpush.bf16.msra.mxu3 %v5960_v5  ;;  %8385 = vst [vmem:[#allocation53_spill] sm:$0xff] %v6019_v43  ;;  %v5113_v63 = vld [vmem:[#allocation8 + $0x368] sm:$0xf0]  ;;  %v4823_v8 = vld [vmem:[#allocation8 + $0x108] sm:$0xf] }
  0x6b   :  { %8386 = vst [vmem:[#allocation54_spill] sm:$0xff] %v6021_v44  ;;  %v5350_v14 = vld [vmem:[#allocation8 + $0x124] sm:$0xf0]  ;;  %v6037_v16 = vor.u32 %v5418_v61, %v5113_v63  ;;  %v5346_v25 = vld [vmem:[#allocation8 + $0x10c] sm:$0xf] }
  0x6c   :  { %1591 = vmatpush.bf16.msra.mxu0 %v5963_v10  ;;  %8387 = vst [vmem:[#allocation55_spill] sm:$0xff] %v6024_v45  ;;  %v5079_v15 = vld [vmem:[#allocation8 + $0x308] sm:$0xf]  ;;  %v4825_v27 = vld [vmem:[#allocation8 + $0x128] sm:$0xf0]  ;;  %v6043_v33 = vor.u32 %v5350_v14, %v4823_v8 }
  0x6d   :  { %1604 = vmatpush.bf16.msra.mxu1 %v5967_v18  ;;  %8388 = vst [vmem:[#allocation56_spill] sm:$0xff] %v6030_v0  ;;  %v5414_v24 = vld [vmem:[#allocation8 + $0x324] sm:$0xf0]  ;;  %v5410_v29 = vld [vmem:[#allocation8 + $0x30c] sm:$0xf]  ;;  %v6049_v49 = vor.u32 %v5346_v25, %v4825_v27 }
  0x6e   :  { %1617 = vmatpush.bf16.msra.mxu2 %v5969_v19  ;;  %1630 = vmatpush.bf16.msra.mxu3 %v5972_v20  ;;  %8391 = vst [vmem:[#allocation59_spill] sm:$0xff] %v6037_v16  ;;  %v5081_v31 = vld [vmem:[#allocation8 + $0x328] sm:$0xf0]  ;;  %v6047_v48 = vor.u32 %v5414_v24, %v5079_v15  ;;  %v4759_v25 = vld [vmem:[#allocation8 + $0x88] sm:$0xf] }
  0x6f   :  { %8392 = vst [vmem:[#allocation60_spill] sm:$0xff] %v6043_v33  ;;  %v5338_v61 = vld [vmem:[#allocation8 + $0xcc] sm:$0xf]  ;;  %v5334_v27 = vld [vmem:[#allocation8 + $0xa4] sm:$0xf0] }
  0x70   :  { %1592 = vmatpush.bf16.msra.mxu0 %v5978_v34  ;;  %8393 = vst [vmem:[#allocation61_spill] sm:$0xff] %v6047_v48  ;;  %v4793_v63 = vld [vmem:[#allocation8 + $0xe8] sm:$0xf0] }
  0x71   :  { %1605 = vmatpush.bf16.msra.mxu1 %v5980_v36  ;;  %8394 = vst [vmem:[#allocation62_spill] sm:$0xff] %v6049_v49  ;;  %v5402_v8 = vld [vmem:[#allocation8 + $0x2cc] sm:$0xf]  ;;  %v6061_v24 = vor.u32 %v5338_v61, %v4793_v63  ;;  %v4727_v61 = vld [vmem:[#allocation8 + $0x48] sm:$0xf] }
  0x72   :  { %1618 = vmatpush.bf16.msra.mxu2 %v5982_v37  ;;  %1631 = vmatpush.bf16.msra.mxu3 %v5985_v38  ;;  %v5049_v14 = vld [vmem:[#allocation8 + $0x2e8] sm:$0xf0]  ;;  %v5326_v63 = vld [vmem:[#allocation8 + $0x64] sm:$0xf0] }
  0x73   :  { %8398 = vst [vmem:[#allocation66_spill] sm:$0xff] %v6061_v24 }
  0x74   :  { %1593 = vmatpush.bf16.msra.mxu0 %v5991_v47 }
  0x75   :  { %1606 = vmatpush.bf16.msra.mxu1 %v5995_v53 }
  0x76   :  { %1619 = vmatpush.bf16.msra.mxu2 %v5997_v54 }
  0x77   :  { %638 = vmatmul.bf16.vlgmr.msrb.gmra.mxu0 %v5882_v32  ;;  %667 = vmatmul.bf16.vlgmr.msrb.gmra.mxu1 %v5882_v32 }
  0x78   :  { %696 = vmatmul.bf16.vlgmr.msrb.gmra.mxu2 %v5882_v32  ;;  %1638 = vmatpush.bf16.msrb.mxu0 %v6002_v2 }
  0x79   :  { %725 = vmatmul.bf16.vlgmr.msrb.gmra.mxu3 %v5882_v32  ;;  %v6000_v32 = vor.u32 %v5377_v56, %v4945_v57  ;;  %1651 = vmatpush.bf16.msrb.mxu1 %v6004_v3  ;;  %v5422_v56 = vld [vmem:[#allocation8 + $0x364] sm:$0xf0]  ;;  %v5354_v57 = vld [vmem:[#allocation8 + $0x14c] sm:$0xf]  ;;  %v5191_v3 = vld [vmem:[#allocation8 + $0x3d8] sm:$0xf] }
  0x7a   :  { %1664 = vmatpush.bf16.msrb.mxu2 %v6007_v9  ;;  %v6032_v4 = vor.u32 %v5422_v56, %v5111_v52  ;;  %v6034_v6 = vor.u32 %v5354_v57, %v4857_v58  ;;  %v4791_v52 = vld [vmem:[#allocation8 + $0xc8] sm:$0xf]  ;;  %v6052_v58 = vor.u32 %v5410_v29, %v5081_v31  ;;  %v6064_v31 = vor.u32 %v5402_v8, %v5049_v14 }
  0x7b   :  { %8379 = vst [vmem:[#allocation47_spill] sm:$0xff] %v6000_v32  ;;  %1632 = vmatpush.bf16.msra.mxu3 %v6000_v32  ;;  %v5342_v56 = vld [vmem:[#allocation8 + $0xe4] sm:$0xf0] }
  0x7c   :  { %1639 = vmatpush.bf16.msrb.mxu0 %v6015_v28  ;;  %8389 = vst [vmem:[#allocation57_spill] sm:$0xff] %v6032_v4  ;;  %v5047_v57 = vld [vmem:[#allocation8 + $0x2c8] sm:$0xf]  ;;  %v5376_v28 = vld [vmem:[#allocation8 + $0x1f4] sm:$0xf0] }
  0x7d   :  { %1652 = vmatpush.bf16.msrb.mxu1 %v6019_v43  ;;  %8390 = vst [vmem:[#allocation58_spill] sm:$0xff] %v6034_v6  ;;  %v5015_v29 = vld [vmem:[#allocation8 + $0x288] sm:$0xf] }
  0x7e   :  { %1665 = vmatpush.bf16.msrb.mxu2 %v6021_v44  ;;  %8395 = vst [vmem:[#allocation63_spill] sm:$0xff] %v6052_v58  ;;  %v4983_v8 = vld [vmem:[#allocation8 + $0x248] sm:$0xf]  ;;  %v5391_v44 = vld [vmem:[#allocation8 + $0x26c] sm:$0xf0] }
  0x7f   :  { %1677 = vmatpush.bf16.msrb.mxu3 %v6011_v23  ;;  %8399 = vst [vmem:[#allocation67_spill] sm:$0xff] %v6064_v31  ;;  %v5383_v23 = vld [vmem:[#allocation8 + $0x22c] sm:$0xf0] }
  0x80   :  { %1640 = vmatpush.bf16.msrb.mxu0 %v6030_v0 }
  0x81   :  { %1653 = vmatpush.bf16.msrb.mxu1 %v6032_v4  ;;  %v6055_v4 = vor.u32 %v5342_v56, %v4791_v52  ;;  %v5394_v52 = vld [vmem:[#allocation8 + $0x28c] sm:$0xf] }
  0x82   :  { %1666 = vmatpush.bf16.msrb.mxu2 %v6034_v6  ;;  %v5330_v6 = vld [vmem:[#allocation8 + $0x8c] sm:$0xf] }
  0x83   :  { %1678 = vmatpush.bf16.msrb.mxu3 %v6024_v45  ;;  %8396 = vst [vmem:[#allocation64_spill] sm:$0xff] %v6055_v4  ;;  %v5017_v56 = vld [vmem:[#allocation8 + $0x2a8] sm:$0xf0]  ;;  %v5335_v45 = vld [vmem:[#allocation8 + $0xac] sm:$0xf0] }
  0x84   :  { %1641 = vmatpush.bf16.msrb.mxu0 %v6043_v33  ;;  %v4761_v33 = vld [vmem:[#allocation8 + $0xa8] sm:$0xf0]  ;;  %v6076_v14 = vor.u32 %v5394_v52, %v5017_v56  ;;  %v4951_v52 = vld [vmem:[#allocation8 + $0x208] sm:$0xf] }
  0x85   :  { %1654 = vmatpush.bf16.msrb.mxu1 %v6047_v48  ;;  %v6067_v48 = vor.u32 %v5334_v27, %v4759_v25  ;;  %v5386_v25 = vld [vmem:[#allocation8 + $0x24c] sm:$0xf] }
  0x86   :  { %1667 = vmatpush.bf16.msrb.mxu2 %v6049_v49  ;;  %8403 = vst [vmem:[#allocation71_spill] sm:$0xff] %v6076_v14  ;;  %v5322_v49 = vld [vmem:[#allocation8 + $0x4c] sm:$0xf] }
  0x87   :  { %643 = vmatmul.bf16.gmra.mxu0 %v5888_v12  ;;  %672 = vmatmul.bf16.gmra.mxu1 %v5888_v12  ;;  %8400 = vst [vmem:[#allocation68_spill] sm:$0xff] %v6067_v48  ;;  %v4985_v27 = vld [vmem:[#allocation8 + $0x268] sm:$0xf0] }
  0x88   :  { %701 = vmatmul.bf16.gmra.mxu2 %v5888_v12  ;;  %1679 = vmatpush.bf16.msrb.mxu3 %v6037_v16  ;;  %v5398_v16 = vld [vmem:[#allocation8 + $0x2a4] sm:$0xf0]  ;;  %v6089_v56 = vor.u32 %v5386_v25, %v4985_v27 }
  0x89   :  { %730 = vmatmul.bf16.gmra.mxu3 %v5888_v12  ;;  %v5406_v12 = vld [vmem:[#allocation8 + $0x2e4] sm:$0xf0]  ;;  %1642 = vmatpush.bf16.msrb.mxu0 %v6055_v4  ;;  %v4729_v4 = vld [vmem:[#allocation8 + $0x68] sm:$0xf0] }
  0x8a   :  { %v6059_v15 = vor.u32 %v5406_v12, %v5047_v57  ;;  %1668 = vmatpush.bf16.msrb.mxu2 %v6061_v24  ;;  %v6071_v57 = vor.u32 %v5398_v16, %v5015_v29  ;;  %v6073_v12 = vor.u32 %v5330_v6, %v4761_v33  ;;  %v6085_v16 = vor.u32 %v5322_v49, %v4729_v4  ;;  %v4695_v33 = vld [vmem:[#allocation8 + $0x8] sm:$0xf]  ;;  %v4767_v24 = vld [vmem:[#allocation8 + $0x90] sm:$0xf] }
  0x8b   :  { %v5318_v29 = vld [vmem:[#allocation8 + $0x24] sm:$0xf0]  ;;  %8407 = vst [vmem:[#allocation75_spill] sm:$0xff] %v6089_v56 }
  0x8c   :  { %8397 = vst [vmem:[#allocation65_spill] sm:$0xff] %v6059_v15  ;;  %1680 = vmatpush.bf16.msrb.mxu3 %v6052_v58  ;;  %1655 = vmatpush.bf16.msrb.mxu1 %v6059_v15  ;;  %v5390_v58 = vld [vmem:[#allocation8 + $0x264] sm:$0xf0]  ;;  %v6079_v15 = vor.u32 %v5326_v63, %v4727_v61  ;;  %v5314_v61 = vld [vmem:[#allocation8 + $0xc] sm:$0xf]  ;;  %v6095_v4 = vor.u32 %v5318_v29, %v4695_v33 }
  0x8d   :  { %8401 = vst [vmem:[#allocation69_spill] sm:$0xff] %v6071_v57  ;;  %1643 = vmatpush.bf16.msrb.mxu0 %v6067_v48  ;;  %v6083_v6 = vor.u32 %v5390_v58, %v4983_v8  ;;  %v4697_v63 = vld [vmem:[#allocation8 + $0x28] sm:$0xf0]  ;;  %v5183_v33 = vld [vmem:[#allocation8 + $0x3d0] sm:$0xf] }
  0x8e   :  { %8402 = vst [vmem:[#allocation70_spill] sm:$0xff] %v6073_v12  ;;  %1669 = vmatpush.bf16.msrb.mxu2 %v6073_v12  ;;  %v5378_v58 = vld [vmem:[#allocation8 + $0x20c] sm:$0xf]  ;;  %v6101_v25 = vor.u32 %v5314_v61, %v4697_v63  ;;  %v5439_v29 = vld [vmem:[#allocation8 + $0x3ec] sm:$0xf0] }
  0x8f   :  { %8404 = vst [vmem:[#allocation72_spill] sm:$0xff] %v6079_v15  ;;  %v4953_v8 = vld [vmem:[#allocation8 + $0x228] sm:$0xf0]  ;;  %v4929_v61 = vld [vmem:[#allocation8 + $0x1f0] sm:$0xf0] }
  0x90   :  { %1681 = vmatpush.bf16.msrb.mxu3 %v6064_v31  ;;  %1656 = vmatpush.bf16.msrb.mxu1 %v6071_v57  ;;  %8405 = vst [vmem:[#allocation73_spill] sm:$0xff] %v6083_v6  ;;  %v5382_v31 = vld [vmem:[#allocation8 + $0x224] sm:$0xf0]  ;;  %v6104_v27 = vor.u32 %v5378_v58, %v4953_v8  ;;  %v5435_v58 = vld [vmem:[#allocation8 + $0x3d4] sm:$0xf] }
  0x91   :  { %8406 = vst [vmem:[#allocation74_spill] sm:$0xff] %v6085_v16  ;;  %1644 = vmatpush.bf16.msrb.mxu0 %v6079_v15  ;;  %v6099_v49 = vor.u32 %v5382_v31, %v4951_v52  ;;  %v5375_v31 = vld [vmem:[#allocation8 + $0x1ec] sm:$0xf0]  ;;  %v5371_v52 = vld [vmem:[#allocation8 + $0x1d4] sm:$0xf] }
  0x92   :  { %8408 = vst [vmem:[#allocation76_spill] sm:$0xff] %v6095_v4  ;;  %1670 = vmatpush.bf16.msrb.mxu2 %v6085_v16  ;;  %v5185_v8 = vld [vmem:[#allocation8 + $0x3f0] sm:$0xf0]  ;;  %v8101_v16 = vmov 0   ;;  %v5431_v15 = vld [vmem:[#allocation8 + $0x3ac] sm:$0xf0] }
  0x93   :  { %8409 = vst [vmem:[#allocation77_spill] sm:$0xff] %v6099_v49  ;;  %v4897_v57 = vld [vmem:[#allocation8 + $0x1b0] sm:$0xf0] }
  0x94   :  { %1682 = vmatpush.bf16.msrb.mxu3 %v6076_v14  ;;  %1657 = vmatpush.bf16.msrb.mxu1 %v6083_v6  ;;  %8410 = vst [vmem:[#allocation78_spill] sm:$0xff] %v6101_v25  ;;  %v5151_v6 = vld [vmem:[#allocation8 + $0x390] sm:$0xf]  ;;  %v6125_v14 = vor.u32 %v5435_v58, %v5185_v8  ;;  %v5347_v48 = vld [vmem:[#allocation8 + $0x114] sm:$0xf] }
  0x95   :  { %8411 = vst [vmem:[#allocation79_spill] sm:$0xff] %v6104_v27  ;;  %1645 = vmatpush.bf16.msrb.mxu0 %v6095_v4  ;;  %v4895_v4 = vld [vmem:[#allocation8 + $0x190] sm:$0xf] }
  0x96   :  { %1671 = vmatpush.bf16.msrb.mxu2 %v6101_v25  ;;  %v6120_v25 = vor.u32 %v5439_v29, %v5183_v33  ;;  %8417 = vst [vmem:[#allocation85_spill] sm:$0xff] %v6125_v14  ;;  %v6135_v29 = vor.u32 %v5431_v15, %v5151_v6  ;;  %v5359_v58 = vld [vmem:[#allocation8 + $0x16c] sm:$0xf0]  ;;  %v5419_v15 = vld [vmem:[#allocation8 + $0x354] sm:$0xf] }
  0x97   :  { %648 = vmatmul.bf16.gmra.mxu0 %v5894_v62  ;;  %677 = vmatmul.bf16.gmra.mxu1 %v5894_v62  ;;  %v5119_v8 = vld [vmem:[#allocation8 + $0x350] sm:$0xf]  ;;  %v5121_v6 = vld [vmem:[#allocation8 + $0x370] sm:$0xf0] }
  0x98   :  { %706 = vmatmul.bf16.gmra.mxu2 %v5894_v62  ;;  %1683 = vmatpush.bf16.msrb.mxu3 %v6089_v56  ;;  %8415 = vst [vmem:[#allocation83_spill] sm:$0xff] %v6120_v25  ;;  %v6122_v56 = vor.u32 %v5371_v52, %v4929_v61  ;;  %v4863_v61 = vld [vmem:[#allocation8 + $0x150] sm:$0xf] }
  0x99   :  { %735 = vmatmul.bf16.gmra.mxu3 %v5894_v62  ;;  %1658 = vmatpush.bf16.msrb.mxu1 %v6099_v49  ;;  %v4927_v62 = vld [vmem:[#allocation8 + $0x1d0] sm:$0xf]  ;;  %8419 = vst [vmem:[#allocation87_spill] sm:$0xff] %v6135_v29 }
  0x9a   :  { %8416 = vst [vmem:[#allocation84_spill] sm:$0xff] %v6122_v56 }
  0x9c   :  { %1684 = vmatpush.bf16.msrb.mxu3 %v6104_v27  ;;  %v6118_v27 = vor.u32 %v5375_v31, %v4927_v62  ;;  %v5427_v62 = vld [vmem:[#allocation8 + $0x394] sm:$0xf] }
  0x9d   :  { %v5153_v31 = vld [vmem:[#allocation8 + $0x3b0] sm:$0xf0] }
  0x9e   :  { %8414 = vst [vmem:[#allocation82_spill] sm:$0xff] %v6118_v27 }
  0xa7   :  { %653 = vmatmul.bf16.gmra.mxu0 %v5932_v42  ;;  %682 = vmatmul.bf16.gmra.mxu1 %v5932_v42 }
  0xa8   :  { %711 = vmatmul.bf16.gmra.mxu2 %v5932_v42 }
  0xa9   :  { %740 = vmatmul.bf16.gmra.mxu3 %v5932_v42  ;;  %v5367_v42 = vld [vmem:[#allocation8 + $0x1ac] sm:$0xf0] }
  0xaa   :  { %v6131_v33 = vor.u32 %v5367_v42, %v4895_v4  ;;  %v5355_v4 = vld [vmem:[#allocation8 + $0x154] sm:$0xf] }
  0xab   :  { %v4865_v42 = vld [vmem:[#allocation8 + $0x170] sm:$0xf0] }
  0xac   :  { %8418 = vst [vmem:[#allocation86_spill] sm:$0xff] %v6131_v33 }
  0xb4   :  { %v6114_v63 = vpop.f32.mrf.mxu0  ;;  %v6116_v49 = vpop.f32.mrf.mxu1 }
  0xb5   :  { %8412 = vst [vmem:[#allocation80_spill] sm:$0xff] %v6114_v63  ;;  %v5363_v63 = vld [vmem:[#allocation8 + $0x194] sm:$0xf] }
  0xb6   :  { %8413 = vst [vmem:[#allocation81_spill] sm:$0xff] %v6116_v49  ;;  %v6137_v52 = vor.u32 %v5363_v63, %v4897_v57  ;;  %v6148_v57 = vld [vmem:[#allocation9] sm:$0xff] }
  0xb7   :  { %1594 = vmatmul.bf16.vlgmr.msra.gmra.mxu0 %v8101_v16  ;;  %1607 = vmatmul.bf16.vlgmr.msra.gmra.mxu1 %v8101_v16 }
  0xb8   :  { %1620 = vmatmul.bf16.vlgmr.msra.gmra.mxu2 %v8101_v16  ;;  %1690 = vmatpush.bf16.msra.mxu0 %v6118_v27  ;;  %8420 = vst [vmem:[#allocation88_spill] sm:$0xff] %v6137_v52  ;;  %v5423_v27 = vld [vmem:[#allocation8 + $0x36c] sm:$0xf0] }
  0xb9   :  { %1633 = vmatmul.bf16.vlgmr.msra.gmra.mxu3 %v8101_v16  ;;  %1703 = vmatpush.bf16.msra.mxu1 %v6120_v25  ;;  %v6142_v16 = vor.u32 %v5427_v62, %v5153_v31  ;;  %v6157_v62 = vor.u32 %v5423_v27, %v5119_v8  ;;  %v6159_v31 = vor.u32 %v5355_v4, %v4865_v42  ;;  %v4799_v42 = vld [vmem:[#allocation8 + $0xd0] sm:$0xf] }
  0xba   :  { %1716 = vmatpush.bf16.msra.mxu2 %v6122_v56  ;;  %1729 = vmatpush.bf16.msra.mxu3 %v6125_v14  ;;  %v6153_v14 = vor.u32 %v5359_v58, %v4863_v61  ;;  %v4831_v56 = vld [vmem:[#allocation8 + $0x110] sm:$0xf]  ;;  %v5411_v61 = vld [vmem:[#allocation8 + $0x314] sm:$0xf] }
  0xbb   :  { %v6140_v49 = vpop.f32.mrf.mxu2  ;;  %8422 = vst [vmem:[#allocation90_spill] sm:$0xff] %v6142_v16  ;;  %v5089_v58 = vld [vmem:[#allocation8 + $0x330] sm:$0xf0] }
  0xbc   :  { %8421 = vst [vmem:[#allocation89_spill] sm:$0xff] %v6140_v49  ;;  %v6144_v12 = vpop.f32.mrf.mxu3  ;;  %v6146_v25 = vpop.f32.mrf.mxu0  ;;  %1691 = vmatpush.bf16.msra.mxu0 %v6131_v33  ;;  %v6162_v49 = vor.u32 %v5419_v15, %v5121_v6  ;;  %v5415_v33 = vld [vmem:[#allocation8 + $0x32c] sm:$0xf0] }
  0xbd   :  { %8423 = vst [vmem:[#allocation91_spill] sm:$0xff] %v6144_v12  ;;  %v6151_v63 = vpop.f32.mrf.mxu1  ;;  %1704 = vmatpush.bf16.msra.mxu1 %v6135_v29  ;;  %v5087_v12 = vld [vmem:[#allocation8 + $0x310] sm:$0xf]  ;;  %v6165_v29 = vperm.slane %v6148_v57, 0 }
  0xbe   :  { %8424 = vst [vmem:[#allocation92_spill] sm:$0xff] %v6146_v25  ;;  %1717 = vmatpush.bf16.msra.mxu2 %v6137_v52  ;;  %v5351_v25 = vld [vmem:[#allocation8 + $0x12c] sm:$0xf0]  ;;  %1730 = vmatpush.bf16.msra.mxu3 %v6142_v16  ;;  %v6172_v8 = vor.u32 %v5415_v33, %v5087_v12  ;;  %v6179_v52 = vor.u32 %v5411_v61, %v5089_v58  ;;  %v5057_v33 = vld [vmem:[#allocation8 + $0x2f0] sm:$0xf0] }
  0xbf   :  { %8425 = vst [vmem:[#allocation93_spill] sm:$0xff] %v6151_v63  ;;  %v4833_v63 = vld [vmem:[#allocation8 + $0x130] sm:$0xf0]  ;;  %v6168_v27 = vor.u32 %v5351_v25, %v4831_v56  ;;  %v5343_v15 = vld [vmem:[#allocation8 + $0xec] sm:$0xf0] }
  0xc0   :  { %8426 = vst [vmem:[#allocation94_spill] sm:$0xff] %v6153_v14  ;;  %1692 = vmatpush.bf16.msra.mxu0 %v6153_v14  ;;  %v6174_v4 = vor.u32 %v5347_v48, %v4833_v63  ;;  %v5055_v6 = vld [vmem:[#allocation8 + $0x2d0] sm:$0xf]  ;;  %v5339_v56 = vld [vmem:[#allocation8 + $0xd4] sm:$0xf] }
  0xc1   :  { %8427 = vst [vmem:[#allocation95_spill] sm:$0xff] %v6157_v62  ;;  %1705 = vmatpush.bf16.msra.mxu1 %v6157_v62  ;;  %v5407_v14 = vld [vmem:[#allocation8 + $0x2ec] sm:$0xf0]  ;;  %v4801_v25 = vld [vmem:[#allocation8 + $0xf0] sm:$0xf0]  ;;  %v6182_v62 = vperm.slane %v6148_v57, 1 }
  0xc2   :  { %8428 = vst [vmem:[#allocation96_spill] sm:$0xff] %v6159_v31  ;;  %1718 = vmatpush.bf16.msra.mxu2 %v6159_v31  ;;  %1731 = vmatpush.bf16.msra.mxu3 %v6162_v49  ;;  %v5403_v48 = vld [vmem:[#allocation8 + $0x2d4] sm:$0xf]  ;;  %v6197_v58 = vor.u32 %v5407_v14, %v5055_v6  ;;  %v6208_v6 = vperm.slane %v6148_v57, 2 }
  0xc3   :  { %8429 = vst [vmem:[#allocation97_spill] sm:$0xff] %v6162_v49  ;;  %v6177_v16 = vpop.f32.mrf.mxu2  ;;  %v5395_v14 = vld [vmem:[#allocation8 + $0x294] sm:$0xf] }
  0xc4   :  { %8430 = vst [vmem:[#allocation98_spill] sm:$0xff] %v6165_v29  ;;  %v6184_v31 = vpop.f32.mrf.mxu3  ;;  %v528_v12 = vpop.f32.mrf.mxu0  ;;  %1693 = vmatpush.bf16.msra.mxu0 %v6168_v27 }
  0xc5   :  { %8431 = vst [vmem:[#allocation99_spill] sm:$0xff] %v6168_v27  ;;  %v6188_v63 = vadd.f32 %v528_v12, %v6165_v29  ;;  %v557_v49 = vpop.f32.mrf.mxu1  ;;  %1706 = vmatpush.bf16.msra.mxu1 %v6172_v8  ;;  %v5023_v27 = vld [vmem:[#allocation8 + $0x290] sm:$0xf]  ;;  %v8443_v12 = vmov 0  }
  0xc6   :  { %8432 = vst [vmem:[#allocation100_spill] sm:$0xff] %v6172_v8  ;;  %1719 = vmatpush.bf16.msra.mxu2 %v6174_v4  ;;  %v6195_v61 = vadd.f32 %v557_v49, %v6182_v62  ;;  %1732 = vmatpush.bf16.msra.mxu3 %v6179_v52  ;;  %v4769_v8 = vld [vmem:[#allocation8 + $0xb0] sm:$0xf0] }
  0xc7   :  { %8433 = vst [vmem:[#allocation101_spill] sm:$0xff] %v6174_v4  ;;  %1646 = vmatmul.bf16.vlgmr.msrb.gmra.mxu0 %v8443_v12  ;;  %1659 = vmatmul.bf16.vlgmr.msrb.gmra.mxu1 %v8443_v12  ;;  %v5025_v49 = vld [vmem:[#allocation8 + $0x2b0] sm:$0xf0]  ;;  %v4991_v4 = vld [vmem:[#allocation8 + $0x250] sm:$0xf] }
  0xc8   :  { %8434 = vst [vmem:[#allocation102_spill] sm:$0xff] %v6177_v16  ;;  %v6190_v16 = vor.u32 %v5343_v15, %v4799_v42  ;;  %v6203_v42 = vor.u32 %v5403_v48, %v5057_v33  ;;  %v5399_v15 = vld [vmem:[#allocation8 + $0x2ac] sm:$0xf0]  ;;  %1672 = vmatmul.bf16.vlgmr.msrb.gmra.mxu2 %v8443_v12  ;;  %v6224_v43 = vor.u32 %v5395_v14, %v5025_v49 }
  0xc9   :  { %8435 = vst [vmem:[#allocation103_spill] sm:$0xff] %v6179_v52  ;;  %1685 = vmatmul.bf16.vlgmr.msrb.gmra.mxu3 %v8443_v12  ;;  %1707 = vmatpush.bf16.msra.mxu1 %v6197_v58  ;;  %v6219_v48 = vor.u32 %v5399_v15, %v5023_v27  ;;  %v5327_v52 = vld [vmem:[#allocation8 + $0x6c] sm:$0xf0]  ;;  %v5387_v27 = vld [vmem:[#allocation8 + $0x254] sm:$0xf] }
  0xca   :  { %8436 = vst [vmem:[#allocation104_spill] sm:$0xff] %v6182_v62  ;;  %1694 = vmatpush.bf16.msra.mxu0 %v6190_v16  ;;  %1733 = vmatpush.bf16.msra.mxu3 %v6203_v42  ;;  %v4703_v49 = vld [vmem:[#allocation8 + $0x10] sm:$0xf] }
  0xcb   :  { %8437 = vst [vmem:[#allocation105_spill] sm:$0xff] %v6184_v31  ;;  %v6199_v31 = vor.u32 %v5339_v56, %v4801_v25  ;;  %v6211_v56 = vperm.slane %v6148_v57, 3  ;;  %v6215_v25 = vor.u32 %v5335_v45, %v4767_v24  ;;  %v586_v0 = vpop.f32.mrf.mxu2  ;;  %v4737_v45 = vld [vmem:[#allocation8 + $0x70] sm:$0xf0] }
  0xcc   :  { %8438 = vst [vmem:[#allocation106_spill] sm:$0xff] %v6188_v63  ;;  %v5331_v63 = vld [vmem:[#allocation8 + $0x94] sm:$0xf]  ;;  %v6227_v24 = vadd.f32 %v586_v0, %v6208_v6  ;;  %v6241_v0 = vor.u32 %v5391_v44, %v4991_v4  ;;  %v5440_v44 = vld [vmem:[#allocation8 + $0x3f4] sm:$0xf0] }
  0xcd   :  { %8439 = vst [vmem:[#allocation107_spill] sm:$0xff] %v6190_v16  ;;  %1720 = vmatpush.bf16.msra.mxu2 %v6199_v31  ;;  %v6221_v33 = vor.u32 %v5331_v63, %v4769_v8  ;;  %v5323_v16 = vld [vmem:[#allocation8 + $0x54] sm:$0xf]  ;;  %v6235_v15 = vpop.f32.mrf.mxu1  ;;  %1708 = vmatpush.bf16.msra.mxu1 %v6219_v48  ;;  %v4937_v4 = vld [vmem:[#allocation8 + $0x1f8] sm:$0xf0] }
  0xce   :  { %8440 = vst [vmem:[#allocation108_spill] sm:$0xff] %v6195_v61  ;;  %v4735_v61 = vld [vmem:[#allocation8 + $0x50] sm:$0xf]  ;;  %v4993_v8 = vld [vmem:[#allocation8 + $0x270] sm:$0xf0]  ;;  %1695 = vmatpush.bf16.msra.mxu0 %v6215_v25  ;;  %1734 = vmatpush.bf16.msra.mxu3 %v6224_v43 }
  0xcf   :  { %8441 = vst [vmem:[#allocation109_spill] sm:$0xff] %v6197_v58  ;;  %v615_v58 = vpop.f32.mrf.mxu3  ;;  %v6237_v14 = vor.u32 %v5327_v52, %v4735_v61  ;;  %v5379_v52 = vld [vmem:[#allocation8 + $0x214] sm:$0xf] }
  0xd0   :  { %8442 = vst [vmem:[#allocation110_spill] sm:$0xff] %v6199_v31  ;;  %v6229_v31 = vpop.f32.mrf.mxu0  ;;  %v6232_v63 = vadd.f32 %v615_v58, %v6211_v56  ;;  %v5315_v58 = vld [vmem:[#allocation8 + $0x14] sm:$0xf] }
  0xd1   :  { %8444 = vst [vmem:[#allocation111_spill] sm:$0xff] %v6203_v42  ;;  %v5319_v42 = vld [vmem:[#allocation8 + $0x2c] sm:$0xf0]  ;;  %1721 = vmatpush.bf16.msra.mxu2 %v6221_v33  ;;  %v4961_v61 = vld [vmem:[#allocation8 + $0x230] sm:$0xf0]  ;;  %1709 = vmatpush.bf16.msra.mxu1 %v6241_v0 }
  0xd2   :  { %8445 = vst [vmem:[#allocation112_spill] sm:$0xff] %v6208_v6  ;;  %1696 = vmatpush.bf16.msra.mxu0 %v6237_v14 }
  0xd3   :  { %8446 = vst [vmem:[#allocation113_spill] sm:$0xff] %v6211_v56 }
  0xd4   :  { %8447 = vst [vmem:[#allocation114_spill] sm:$0xff] %v6215_v25  ;;  %v4935_v25 = vld [vmem:[#allocation8 + $0x1d8] sm:$0xf] }
  0xd5   :  { %8448 = vst [vmem:[#allocation115_spill] sm:$0xff] %v6219_v48  ;;  %v6249_v48 = vor.u32 %v5319_v42, %v4703_v49  ;;  %v6262_v42 = vor.u32 %v5376_v28, %v4935_v25  ;;  %v5432_v28 = vld [vmem:[#allocation8 + $0x3b4] sm:$0xf0]  ;;  %v5364_v25 = vld [vmem:[#allocation8 + $0x19c] sm:$0xf] }
  0xd6   :  { %8449 = vst [vmem:[#allocation116_spill] sm:$0xff] %v6221_v33  ;;  %v6258_v33 = vpop.f32.mrf.mxu2 }
  0xd7   :  { %8450 = vst [vmem:[#allocation117_spill] sm:$0xff] %v6224_v43  ;;  %v5193_v43 = vld [vmem:[#allocation8 + $0x3f8] sm:$0xf0]  ;;  %v6264_v49 = vpop.f32.mrf.mxu3  ;;  %1697 = vmatpush.bf16.msra.mxu0 %v6249_v48 }
  0xd8   :  { %8451 = vst [vmem:[#allocation118_spill] sm:$0xff] %v6227_v24  ;;  %v4959_v24 = vld [vmem:[#allocation8 + $0x210] sm:$0xf]  ;;  %v533_v32 = vpop.f32.mrf.mxu0 }
  0xd9   :  { %8452 = vst [vmem:[#allocation119_spill] sm:$0xff] %v6229_v31  ;;  %v6243_v31 = vor.u32 %v5323_v16, %v4737_v45  ;;  %v5372_v16 = vld [vmem:[#allocation8 + $0x1dc] sm:$0xf]  ;;  %v6253_v45 = vor.u32 %v5383_v23, %v4959_v24  ;;  %v4903_v23 = vld [vmem:[#allocation8 + $0x198] sm:$0xf] }
  0xda   :  { %8453 = vst [vmem:[#allocation120_spill] sm:$0xff] %v6232_v63  ;;  %v6246_v63 = vor.u32 %v5387_v27, %v4993_v8  ;;  %v5436_v8 = vld [vmem:[#allocation8 + $0x3dc] sm:$0xf]  ;;  %v5368_v24 = vld [vmem:[#allocation8 + $0x1b4] sm:$0xf0]  ;;  %1698 = vmatmul.bf16.vlgmr.msra.gmra.mxu0 %v8443_v12 }
  0xdb   :  { %8454 = vst [vmem:[#allocation121_spill] sm:$0xff] %v6235_v15  ;;  %v4705_v15 = vld [vmem:[#allocation8 + $0x30] sm:$0xf0]  ;;  %1722 = vmatpush.bf16.msra.mxu2 %v6243_v31  ;;  %1710 = vmatpush.bf16.msra.mxu1 %v6253_v45 }
  0xdc   :  { %8455 = vst [vmem:[#allocation122_spill] sm:$0xff] %v6237_v14  ;;  %v6255_v27 = vor.u32 %v5315_v58, %v4705_v15  ;;  %1735 = vmatpush.bf16.msra.mxu3 %v6246_v63  ;;  %v6260_v14 = vor.u32 %v5379_v52, %v4961_v61  ;;  %v5159_v15 = vld [vmem:[#allocation8 + $0x398] sm:$0xf]  ;;  %v6272_v58 = vadd.f32 %v533_v32, %v6165_v29  ;;  %v4905_v61 = vld [vmem:[#allocation8 + $0x1b8] sm:$0xf0] }
  0xdd   :  { %8456 = vst [vmem:[#allocation123_spill] sm:$0xff] %v6241_v0  ;;  %v6266_v0 = vor.u32 %v5440_v44, %v5191_v3  ;;  %v6274_v52 = vor.u32 %v5436_v8, %v5193_v43  ;;  %v5428_v44 = vld [vmem:[#allocation8 + $0x39c] sm:$0xf]  ;;  %1742 = vmatpush.bf16.msrb.mxu0 %v6262_v42  ;;  %v6283_v32 = vor.u32 %v5368_v24, %v4903_v23  ;;  %v4871_v8 = vld [vmem:[#allocation8 + $0x158] sm:$0xf] }
  0xde   :  { %8457 = vst [vmem:[#allocation124_spill] sm:$0xff] %v6243_v31  ;;  %v6268_v31 = vor.u32 %v5372_v16, %v4937_v4  ;;  %v5161_v16 = vld [vmem:[#allocation8 + $0x3b8] sm:$0xf0]  ;;  %v6287_v43 = vor.u32 %v5432_v28, %v5159_v15  ;;  %v6289_v4 = vor.u32 %v5364_v25, %v4905_v61  ;;  %1711 = vmatmul.bf16.vlgmr.msra.gmra.mxu1 %v8443_v12  ;;  %v591_v25 = vpop.f32.mrf.mxu2 }
  0xdf   :  { %8458 = vst [vmem:[#allocation125_spill] sm:$0xff] %v6246_v63  ;;  %1723 = vmatpush.bf16.msra.mxu2 %v6255_v27  ;;  %1755 = vmatpush.bf16.msrb.mxu1 %v6266_v0  ;;  %v5356_v23 = vld [vmem:[#allocation8 + $0x15c] sm:$0xf]  ;;  %v5352_v63 = vld [vmem:[#allocation8 + $0x134] sm:$0xf0] }
  0xe0   :  { %8459 = vst [vmem:[#allocation126_spill] sm:$0xff] %v6249_v48  ;;  %1736 = vmatpush.bf16.msra.mxu3 %v6260_v14  ;;  %v4873_v24 = vld [vmem:[#allocation8 + $0x178] sm:$0xf0] }
  0xe1   :  { %8460 = vst [vmem:[#allocation127_spill] sm:$0xff] %v6253_v45  ;;  %v5420_v15 = vld [vmem:[#allocation8 + $0x35c] sm:$0xf]  ;;  %1743 = vmatpush.bf16.msrb.mxu0 %v6283_v32  ;;  %v4839_v45 = vld [vmem:[#allocation8 + $0x118] sm:$0xf] }
  0xe2   :  { %8461 = vst [vmem:[#allocation128_spill] sm:$0xff] %v6255_v27  ;;  %1724 = vmatmul.bf16.vlgmr.msra.gmra.mxu2 %v8443_v12  ;;  %v5129_v28 = vld [vmem:[#allocation8 + $0x378] sm:$0xf0] }
  0xe3   :  { %8462 = vst [vmem:[#allocation129_spill] sm:$0xff] %v6258_v33  ;;  %v562_v33 = vpop.f32.mrf.mxu1  ;;  %1768 = vmatpush.bf16.msrb.mxu2 %v6268_v31  ;;  %1737 = vmatmul.bf16.vlgmr.msra.gmra.mxu3 %v8443_v12 }
  0xe4   :  { %8463 = vst [vmem:[#allocation130_spill] sm:$0xff] %v6260_v14  ;;  %v6279_v3 = vadd.f32 %v562_v33, %v6182_v62  ;;  %v5127_v33 = vld [vmem:[#allocation8 + $0x358] sm:$0xf]  ;;  %1781 = vmatpush.bf16.msrb.mxu3 %v6274_v52  ;;  %1756 = vmatpush.bf16.msrb.mxu1 %v6287_v43  ;;  %v6310_v14 = vor.u32 %v5356_v23, %v4873_v24 }
  0xe5   :  { %8464 = vst [vmem:[#allocation131_spill] sm:$0xff] %v6262_v42 }
  0xe6   :  { %8465 = vst [vmem:[#allocation132_spill] sm:$0xff] %v6264_v49  ;;  %v5424_v49 = vld [vmem:[#allocation8 + $0x374] sm:$0xf0] }
  0xe7   :  { %8466 = vst [vmem:[#allocation133_spill] sm:$0xff] %v6266_v0  ;;  %1769 = vmatpush.bf16.msrb.mxu2 %v6289_v4  ;;  %v6308_v0 = vor.u32 %v5424_v49, %v5127_v33  ;;  %v5097_v49 = vld [vmem:[#allocation8 + $0x338] sm:$0xf0]  ;;  %v6321_v33 = vor.u32 %v5352_v63, %v4839_v45 }
  0xe8   :  { %8467 = vst [vmem:[#allocation134_spill] sm:$0xff] %v6268_v31  ;;  %v5404_v63 = vld [vmem:[#allocation8 + $0x2dc] sm:$0xf] }
  0xe9   :  { %8468 = vst [vmem:[#allocation135_spill] sm:$0xff] %v6272_v58  ;;  %v5360_v58 = vld [vmem:[#allocation8 + $0x174] sm:$0xf0]  ;;  %1757 = vmatpush.bf16.msrb.mxu1 %v6308_v0  ;;  %v5065_v45 = vld [vmem:[#allocation8 + $0x2f8] sm:$0xf0] }
  0xea   :  { %8469 = vst [vmem:[#allocation136_spill] sm:$0xff] %v6274_v52  ;;  %v6299_v61 = vor.u32 %v5360_v58, %v4871_v8  ;;  %v6306_v52 = vpop.f32.mrf.mxu0 }
  0xeb   :  { %8470 = vst [vmem:[#allocation137_spill] sm:$0xff] %v6279_v3  ;;  %v6293_v3 = vor.u32 %v5428_v44, %v5161_v16  ;;  %v6304_v44 = vadd.f32 %v591_v25, %v6208_v6  ;;  %v620_v16 = vpop.f32.mrf.mxu3  ;;  %v6316_v8 = vpop.f32.mrf.mxu1  ;;  %v5416_v25 = vld [vmem:[#allocation8 + $0x334] sm:$0xf0]  ;;  %1770 = vmatpush.bf16.msrb.mxu2 %v6310_v14 }
  0xec   :  { %8471 = vst [vmem:[#allocation138_spill] sm:$0xff] %v6283_v32  ;;  %v5095_v32 = vld [vmem:[#allocation8 + $0x318] sm:$0xf]  ;;  %v6314_v58 = vadd.f32 %v620_v16, %v6211_v56  ;;  %1744 = vmatpush.bf16.msrb.mxu0 %v6299_v61 }
  0xed   :  { %8472 = vst [vmem:[#allocation139_spill] sm:$0xff] %v6287_v43  ;;  %1782 = vmatpush.bf16.msrb.mxu3 %v6293_v3  ;;  %v6318_v43 = vor.u32 %v5420_v15, %v5129_v28  ;;  %v6325_v23 = vor.u32 %v5416_v25, %v5095_v32  ;;  %v4807_v16 = vld [vmem:[#allocation8 + $0xd8] sm:$0xf] }
  0xee   :  { %8473 = vst [vmem:[#allocation140_spill] sm:$0xff] %v6289_v4  ;;  %v4841_v4 = vld [vmem:[#allocation8 + $0x138] sm:$0xf0]  ;;  %v5344_v15 = vld [vmem:[#allocation8 + $0xf4] sm:$0xf0] }
  0xef   :  { %8474 = vst [vmem:[#allocation141_spill] sm:$0xff] %v6293_v3  ;;  %v5063_v28 = vld [vmem:[#allocation8 + $0x2d8] sm:$0xf]  ;;  %v5340_v3 = vld [vmem:[#allocation8 + $0xdc] sm:$0xf]  ;;  %v6335_v32 = vor.u32 %v5344_v15, %v4807_v16  ;;  %1758 = vmatpush.bf16.msrb.mxu1 %v6325_v23  ;;  %v6349_v15 = vor.u32 %v5404_v63, %v5065_v45 }
  0xf0   :  { %8475 = vst [vmem:[#allocation142_spill] sm:$0xff] %v6299_v61  ;;  %v4809_v61 = vld [vmem:[#allocation8 + $0xf8] sm:$0xf0]  ;;  %1745 = vmatpush.bf16.msrb.mxu0 %v6321_v33  ;;  %v4743_v45 = vld [vmem:[#allocation8 + $0x58] sm:$0xf] }
  0xf1   :  { %8476 = vst [vmem:[#allocation143_spill] sm:$0xff] %v6304_v44  ;;  %v5348_v44 = vld [vmem:[#allocation8 + $0x11c] sm:$0xf]  ;;  %1783 = vmatpush.bf16.msrb.mxu3 %v6318_v43  ;;  %v6343_v25 = vor.u32 %v5340_v3, %v4809_v61 }
  0xf2   :  { %8477 = vst [vmem:[#allocation144_spill] sm:$0xff] %v6306_v52  ;;  %v5412_v52 = vld [vmem:[#allocation8 + $0x31c] sm:$0xf]  ;;  %v6327_v24 = vor.u32 %v5348_v44, %v4841_v4  ;;  %v538_v44 = vpop.f32.mrf.mxu0 }
  0xf3   :  { %8478 = vst [vmem:[#allocation145_spill] sm:$0xff] %v6308_v0  ;;  %v6333_v0 = vpop.f32.mrf.mxu2  ;;  %v6339_v4 = vpop.f32.mrf.mxu3  ;;  %v5033_v3 = vld [vmem:[#allocation8 + $0x2b8] sm:$0xf0] }
  0xf4   :  { %8479 = vst [vmem:[#allocation146_spill] sm:$0xff] %v6310_v14  ;;  %1771 = vmatpush.bf16.msrb.mxu2 %v6327_v24  ;;  %v5031_v14 = vld [vmem:[#allocation8 + $0x298] sm:$0xf]  ;;  %v567_v16 = vpop.f32.mrf.mxu1  ;;  %1746 = vmatpush.bf16.msrb.mxu0 %v6335_v32 }
  0xf5   :  { %8480 = vst [vmem:[#allocation147_spill] sm:$0xff] %v6314_v58  ;;  %v5408_v58 = vld [vmem:[#allocation8 + $0x2f4] sm:$0xf0] }
  0xf6   :  { %8481 = vst [vmem:[#allocation148_spill] sm:$0xff] %v6316_v8  ;;  %v6330_v8 = vor.u32 %v5412_v52, %v5097_v49  ;;  %v6341_v52 = vor.u32 %v5408_v58, %v5063_v28  ;;  %v4775_v49 = vld [vmem:[#allocation8 + $0x98] sm:$0xf]  ;;  %v5396_v58 = vld [vmem:[#allocation8 + $0x29c] sm:$0xf] }
  0xf7   :  { %8482 = vst [vmem:[#allocation149_spill] sm:$0xff] %v6318_v43  ;;  %v5336_v43 = vld [vmem:[#allocation8 + $0xb4] sm:$0xf0] }
  0xf8   :  { %8483 = vst [vmem:[#allocation150_spill] sm:$0xff] %v6321_v33  ;;  %1784 = vmatpush.bf16.msrb.mxu3 %v6330_v8  ;;  %v4777_v33 = vld [vmem:[#allocation8 + $0xb8] sm:$0xf0]  ;;  %v6355_v61 = vor.u32 %v5336_v43, %v4775_v49  ;;  %1759 = vmatpush.bf16.msrb.mxu1 %v6341_v52 }
  0xf9   :  { %8484 = vst [vmem:[#allocation151_spill] sm:$0xff] %v6325_v23  ;;  %v5400_v23 = vld [vmem:[#allocation8 + $0x2b4] sm:$0xf0]  ;;  %1772 = vmatpush.bf16.msrb.mxu2 %v6343_v25  ;;  %v5388_v43 = vld [vmem:[#allocation8 + $0x25c] sm:$0xf] }
  0xfa   :  { %8485 = vst [vmem:[#allocation152_spill] sm:$0xff] %v6327_v24  ;;  %v5332_v24 = vld [vmem:[#allocation8 + $0x9c] sm:$0xf]  ;;  %v6359_v28 = vor.u32 %v5400_v23, %v5031_v14  ;;  %1747 = vmatpush.bf16.msrb.mxu0 %v6355_v61  ;;  %v6374_v23 = vpop.f32.mrf.mxu0 }
  0xfb   :  { %8486 = vst [vmem:[#allocation153_spill] sm:$0xff] %v6330_v8  ;;  %v6361_v63 = vor.u32 %v5332_v24, %v4777_v33  ;;  %v5324_v8 = vld [vmem:[#allocation8 + $0x5c] sm:$0xf]  ;;  %v625_v33 = vpop.f32.mrf.mxu3 }
  0xfc   :  { %8487 = vst [vmem:[#allocation154_spill] sm:$0xff] %v6333_v0  ;;  %v6347_v0 = vadd.f32 %v538_v44, %v6165_v29  ;;  %v5328_v44 = vld [vmem:[#allocation8 + $0x74] sm:$0xf0]  ;;  %1785 = vmatpush.bf16.msrb.mxu3 %v6349_v15  ;;  %v5001_v49 = vld [vmem:[#allocation8 + $0x278] sm:$0xf0]  ;;  %1760 = vmatpush.bf16.msrb.mxu1 %v6359_v28 }
  0xfd   :  { %8488 = vst [vmem:[#allocation155_spill] sm:$0xff] %v6335_v32  ;;  %v4745_v32 = vld [vmem:[#allocation8 + $0x78] sm:$0xf0]  ;;  %1773 = vmatpush.bf16.msrb.mxu2 %v6361_v63 }
  0xfe   :  { %8489 = vst [vmem:[#allocation156_spill] sm:$0xff] %v6339_v4  ;;  %v6352_v4 = vadd.f32 %v567_v16, %v6182_v62  ;;  %v6364_v16 = vor.u32 %v5396_v58, %v5033_v3  ;;  %v6378_v58 = vor.u32 %v5324_v8, %v4745_v32  ;;  %v4711_v3 = vld [vmem:[#allocation8 + $0x18] sm:$0xf] }
  0xff   :  { %8490 = vst [vmem:[#allocation157_spill] sm:$0xff] %v6341_v52  ;;  %v596_v52 = vpop.f32.mrf.mxu2 }
 0x100   :  { %8491 = vst [vmem:[#allocation158_spill] sm:$0xff] %v6343_v25  ;;  %v6367_v25 = vor.u32 %v5328_v44, %v4743_v45  ;;  %v6372_v14 = vadd.f32 %v596_v52, %v6208_v6  ;;  %1786 = vmatpush.bf16.msrb.mxu3 %v6364_v16  ;;  %v6382_v45 = vadd.f32 %v625_v33, %v6211_v56  ;;  %v6384_v44 = vpop.f32.mrf.mxu1  ;;  %v5384_v52 = vld [vmem:[#allocation8 + $0x234] sm:$0xf0] }
 0x101   :  { %8492 = vst [vmem:[#allocation159_spill] sm:$0xff] %v6347_v0  ;;  %v4999_v0 = vld [vmem:[#allocation8 + $0x258] sm:$0xf]  ;;  %1774 = vmatpush.bf16.msrb.mxu2 %v6378_v58 }
 0x102   :  { %8493 = vst [vmem:[#allocation160_spill] sm:$0xff] %v6349_v15  ;;  %v5320_v15 = vld [vmem:[#allocation8 + $0x34] sm:$0xf0]  ;;  %1748 = vmatpush.bf16.msrb.mxu0 %v6367_v25  ;;  %v6407_v33 = vpop.f32.mrf.mxu0 }
 0x103   :  { %8494 = vst [vmem:[#allocation161_spill] sm:$0xff] %v6352_v4  ;;  %v5392_v4 = vld [vmem:[#allocation8 + $0x274] sm:$0xf0]  ;;  %v6389_v8 = vor.u32 %v5320_v15, %v4711_v3  ;;  %v6405_v15 = vpop.f32.mrf.mxu3 }
 0x104   :  { %8495 = vst [vmem:[#allocation162_spill] sm:$0xff] %v6355_v61  ;;  %v6376_v24 = vor.u32 %v5392_v4, %v4999_v0  ;;  %v4967_v61 = vld [vmem:[#allocation8 + $0x218] sm:$0xf]  ;;  %v4969_v0 = vld [vmem:[#allocation8 + $0x238] sm:$0xf0] }
 0x105   :  { %8496 = vst [vmem:[#allocation163_spill] sm:$0xff] %v6359_v28  ;;  %v6386_v28 = vor.u32 %v5388_v43, %v5001_v49  ;;  %v6393_v32 = vor.u32 %v5384_v52, %v4967_v61 }
 0x106   :  { %8497 = vst [vmem:[#allocation164_spill] sm:$0xff] %v6361_v63  ;;  %v4713_v63 = vld [vmem:[#allocation8 + $0x38] sm:$0xf0]  ;;  %1761 = vmatpush.bf16.msrb.mxu1 %v6376_v24  ;;  %1749 = vmatpush.bf16.msrb.mxu0 %v6389_v8 }
 0x107   :  { %8498 = vst [vmem:[#allocation165_spill] sm:$0xff] %v6364_v16  ;;  %1787 = vmatpush.bf16.msrb.mxu3 %v6386_v28  ;;  %v6401_v49 = vpop.f32.mrf.mxu2 }
 0x108   :  { %8499 = vst [vmem:[#allocation166_spill] sm:$0xff] %v6367_v25  ;;  %v6410_v61 = vpop.f32.mrf.mxu1 }
 0x109   :  { %8500 = vst [vmem:[#allocation167_spill] sm:$0xff] %v6372_v14  ;;  %v5316_v14 = vld [vmem:[#allocation8 + $0x1c] sm:$0xf]  ;;  %1750 = vmatmul.bf16.vlgmr.msrb.gmra.mxu0 %v8443_v12 }
 0x10a   :  { %8501 = vst [vmem:[#allocation168_spill] sm:$0xff] %v6374_v23  ;;  %v5380_v23 = vld [vmem:[#allocation8 + $0x21c] sm:$0xf]  ;;  %v6395_v4 = vor.u32 %v5316_v14, %v4713_v63  ;;  %1762 = vmatpush.bf16.msrb.mxu1 %v6393_v32  ;;  %1938 = vmatpush.bf16.msra.mxu0 %v5900_v7 }
 0x10b   :  { %8502 = vst [vmem:[#allocation169_spill] sm:$0xff] %v6376_v24  ;;  %v6398_v43 = vor.u32 %v5380_v23, %v4969_v0  ;;  %v6424_v14 = vpop.f32.mrf.mxu3  ;;  %v6426_v23 = vpop.f32.mrf.mxu0  ;;  %v6444_v0 = vperm.slane %v6148_v57, 5 }
 0x10c   :  { %8503 = vst [vmem:[#allocation170_spill] sm:$0xff] %v6378_v58  ;;  %1775 = vmatpush.bf16.msrb.mxu2 %v6395_v4 }
 0x10d   :  { %8504 = vst [vmem:[#allocation171_spill] sm:$0xff] %v6382_v45  ;;  %1788 = vmatpush.bf16.msrb.mxu3 %v6398_v43  ;;  %1763 = vmatmul.bf16.vlgmr.msrb.gmra.mxu1 %v8443_v12 }
 0x10e   :  { %8505 = vst [vmem:[#allocation172_spill] sm:$0xff] %v6384_v44  ;;  %1951 = vmatpush.bf16.msra.mxu1 %v5902_v11  ;;  %1939 = vmatpush.bf16.msra.mxu0 %v5911_v21 }
 0x10f   :  { %8506 = vst [vmem:[#allocation173_spill] sm:$0xff] %v6386_v28  ;;  %1776 = vmatmul.bf16.vlgmr.msrb.gmra.mxu2 %v8443_v12  ;;  %v6422_v63 = vpop.f32.mrf.mxu2 }
 0x110   :  { %8507 = vst [vmem:[#allocation174_spill] sm:$0xff] %v6389_v8  ;;  %1964 = vmatpush.bf16.msra.mxu2 %v5904_v13  ;;  %1789 = vmatmul.bf16.vlgmr.msrb.gmra.mxu3 %v8443_v12  ;;  %v6429_v3 = vpop.f32.mrf.mxu1  ;;  %v6439_v12 = vperm.slane %v6148_v57, 4 }
 0x111   :  { %8508 = vst [vmem:[#allocation175_spill] sm:$0xff] %v6393_v32  ;;  %1977 = vmatpush.bf16.msra.mxu3 %v5907_v17 }
 0x112   :  { %8509 = vst [vmem:[#allocation176_spill] sm:$0xff] %v6395_v4  ;;  %1952 = vmatpush.bf16.msra.mxu1 %v5913_v22  ;;  %1940 = vmatpush.bf16.msra.mxu0 %v5921_v35 }
 0x113   :  { %8510 = vst [vmem:[#allocation177_spill] sm:$0xff] %v6398_v43 }
 0x114   :  { %8511 = vst [vmem:[#allocation178_spill] sm:$0xff] %v6401_v49  ;;  %1965 = vmatpush.bf16.msra.mxu2 %v5916_v26  ;;  %v644_v49 = vpop.f32.mrf.mxu0 }
 0x115   :  { %8512 = vst [vmem:[#allocation179_spill] sm:$0xff] %v6405_v15  ;;  %1978 = vmatpush.bf16.msra.mxu3 %v5918_v30  ;;  %v6446_v15 = vpop.f32.mrf.mxu3  ;;  %v6450_v44 = vadd.f32 %v644_v49, %v6439_v12  ;;  %v6466_v49 = vperm.slane %v6148_v57, 7 }
 0x116   :  { %8513 = vst [vmem:[#allocation180_spill] sm:$0xff] %v6426_v23  ;;  %1953 = vmatpush.bf16.msra.mxu1 %v5925_v39  ;;  %1941 = vmatpush.bf16.msra.mxu0 %v5942_v46 }
 0x117   :  { %8514 = vst [vmem:[#allocation181_spill] sm:$0xff] %v6429_v3  ;;  %v6441_v52 = vpop.f32.mrf.mxu2 }
 0x118   :  { %1966 = vmatpush.bf16.msra.mxu2 %v5927_v40  ;;  %8515 = vst [vmem:[#allocation182_spill] sm:$0xff] %v6439_v12  ;;  %v673_v45 = vpop.f32.mrf.mxu1 }
 0x119   :  { %1979 = vmatpush.bf16.msra.mxu3 %v5930_v41  ;;  %8516 = vst [vmem:[#allocation183_spill] sm:$0xff] %v6441_v52  ;;  %v6455_v3 = vadd.f32 %v673_v45, %v6444_v0 }
 0x11a   :  { %8517 = vst [vmem:[#allocation184_spill] sm:$0xff] %v6444_v0  ;;  %1954 = vmatpush.bf16.msra.mxu1 %v5944_v50  ;;  %1942 = vmatpush.bf16.msra.mxu0 %v5953_v59 }
 0x11b   :  { %8518 = vst [vmem:[#allocation185_spill] sm:$0xff] %v6446_v15  ;;  %v6462_v15 = vperm.slane %v6148_v57, 6 }
 0x11c   :  { %1967 = vmatpush.bf16.msra.mxu2 %v5946_v51  ;;  %8519 = vst [vmem:[#allocation186_spill] sm:$0xff] %v6450_v44  ;;  %v6471_v52 = vpop.f32.mrf.mxu0 }
 0x11d   :  { %1980 = vmatpush.bf16.msra.mxu3 %v5949_v55  ;;  %8520 = vst [vmem:[#allocation187_spill] sm:$0xff] %v6455_v3  ;;  %v731_v3 = vpop.f32.mrf.mxu3 }
 0x11e   :  { %1955 = vmatpush.bf16.msra.mxu1 %v5955_v60  ;;  %1943 = vmatpush.bf16.msra.mxu0 %v5963_v10  ;;  %8521 = vst [vmem:[#allocation188_spill] sm:$0xff] %v6462_v15  ;;  %v6475_v23 = vadd.f32 %v731_v3, %v6466_v49 }
 0x11f   :  { %8522 = vst [vmem:[#allocation189_spill] sm:$0xff] %v6466_v49  ;;  %v702_v44 = vpop.f32.mrf.mxu2 }
 0x120   :  { %1968 = vmatpush.bf16.msra.mxu2 %v5958_v1  ;;  %v6469_v45 = vadd.f32 %v702_v44, %v6462_v15  ;;  %8524 = vst [vmem:[#allocation191_spill] sm:$0xff] %v6471_v52 }
 0x121   :  { %1981 = vmatpush.bf16.msra.mxu3 %v5960_v5  ;;  %8525 = vst [vmem:[#allocation192_spill] sm:$0xff] %v6475_v23  ;;  %v6477_v5 = vpop.f32.mrf.mxu1  ;;  %v8530_v23 = vld [vmem:[#allocation47_spill] sm:$0xff] }
 0x122   :  { %8523 = vst [vmem:[#allocation190_spill] sm:$0xff] %v6469_v45  ;;  %1956 = vmatpush.bf16.msra.mxu1 %v5967_v18  ;;  %1944 = vmatpush.bf16.msra.mxu0 %v5978_v34  ;;  %v8531_v45 = vld [vmem:[#allocation49_spill] sm:$0xff] }
 0x123   :  { %8526 = vst [vmem:[#allocation193_spill] sm:$0xff] %v6477_v5 }
 0x124   :  { %1969 = vmatpush.bf16.msra.mxu2 %v5969_v19  ;;  %v649_v3 = vpop.f32.mrf.mxu0 }
 0x125   :  { %1982 = vmatpush.bf16.msra.mxu3 %v5972_v20  ;;  %v6490_v44 = vpop.f32.mrf.mxu3  ;;  %v6494_v5 = vadd.f32 %v649_v3, %v6439_v12  ;;  %v8538_v3 = vld [vmem:[#allocation55_spill] sm:$0xff] }
 0x126   :  { %1957 = vmatpush.bf16.msra.mxu1 %v5980_v36  ;;  %1945 = vmatpush.bf16.msra.mxu0 %v5991_v47  ;;  %8528 = vst [vmem:[#allocation195_spill] sm:$0xff] %v6490_v44  ;;  %v8533_v36 = vld [vmem:[#allocation52_spill] sm:$0xff]  ;;  %v8536_v44 = vld [vmem:[#allocation53_spill] sm:$0xff] }
 0x127   :  { %v6487_v57 = vpop.f32.mrf.mxu2  ;;  %8529 = vst [vmem:[#allocation196_spill] sm:$0xff] %v6494_v5 }
 0x128   :  { %1970 = vmatpush.bf16.msra.mxu2 %v5982_v37  ;;  %8527 = vst [vmem:[#allocation194_spill] sm:$0xff] %v6487_v57  ;;  %v8534_v57 = vld [vmem:[#allocation51_spill] sm:$0xff] }
 0x129   :  { %1983 = vmatpush.bf16.msra.mxu3 %v5985_v38  ;;  %v678_v52 = vpop.f32.mrf.mxu1 }
 0x12a   :  { %1990 = vmatpush.bf16.msrb.mxu0 %v6002_v2  ;;  %1958 = vmatpush.bf16.msra.mxu1 %v5995_v53  ;;  %v6499_v38 = vadd.f32 %v678_v52, %v6444_v0  ;;  %v8537_v53 = vld [vmem:[#allocation56_spill] sm:$0xff]  ;;  %v8539_v2 = vld [vmem:[#allocation58_spill] sm:$0xff] }
 0x12c   :  { %1971 = vmatpush.bf16.msra.mxu2 %v5997_v54  ;;  %8532 = vst [vmem:[#allocation197_spill] sm:$0xff] %v6499_v38  ;;  %v6511_v38 = vpop.f32.mrf.mxu0 }
 0x12d   :  { %1984 = vmatpush.bf16.msra.mxu3 %v8530_v23  ;;  %v736_v52 = vpop.f32.mrf.mxu3  ;;  %8541 = vst [vmem:[#allocation199_spill] sm:$0xff] %v6511_v38 }
 0x12e   :  { %2003 = vmatpush.bf16.msrb.mxu1 %v8531_v45  ;;  %1991 = vmatpush.bf16.msrb.mxu0 %v8533_v36  ;;  %v6514_v23 = vadd.f32 %v736_v52, %v6466_v49  ;;  %v8552_v52 = vld [vmem:[#allocation66_spill] sm:$0xff] }
 0x12f   :  { %v707_v5 = vpop.f32.mrf.mxu2 }
 0x130   :  { %2016 = vmatpush.bf16.msrb.mxu2 %v6007_v9  ;;  %v8535_v9 = vld [vmem:[#allocation54_spill] sm:$0xff]  ;;  %v6509_v45 = vadd.f32 %v707_v5, %v6462_v15  ;;  %8542 = vst [vmem:[#allocation200_spill] sm:$0xff] %v6514_v23  ;;  %v8549_v5 = vld [vmem:[#allocation64_spill] sm:$0xff] }
 0x131   :  { %2029 = vmatpush.bf16.msrb.mxu3 %v8534_v57  ;;  %v6516_v57 = vpop.f32.mrf.mxu1 }
 0x132   :  { %2004 = vmatpush.bf16.msrb.mxu1 %v8536_v44  ;;  %1992 = vmatpush.bf16.msrb.mxu0 %v8537_v53  ;;  %8540 = vst [vmem:[#allocation198_spill] sm:$0xff] %v6509_v45  ;;  %v8545_v44 = vld [vmem:[#allocation60_spill] sm:$0xff]  ;;  %v8546_v53 = vld [vmem:[#allocation59_spill] sm:$0xff] }
 0x133   :  { %8543 = vst [vmem:[#allocation201_spill] sm:$0xff] %v6516_v57  ;;  %v8550_v45 = vld [vmem:[#allocation63_spill] sm:$0xff] }
 0x134   :  { %2017 = vmatpush.bf16.msrb.mxu2 %v8535_v9  ;;  %v8544_v9 = vld [vmem:[#allocation57_spill] sm:$0xff]  ;;  %v654_v57 = vpop.f32.mrf.mxu0 }
 0x135   :  { %2030 = vmatpush.bf16.msrb.mxu3 %v8538_v3  ;;  %v8547_v3 = vld [vmem:[#allocation62_spill] sm:$0xff]  ;;  %v6528_v23 = vpop.f32.mrf.mxu3 }
 0x136   :  { %2005 = vmatpush.bf16.msrb.mxu1 %v8544_v9  ;;  %1993 = vmatpush.bf16.msrb.mxu0 %v8545_v44  ;;  %8553 = vst [vmem:[#allocation203_spill] sm:$0xff] %v6528_v23  ;;  %v6531_v9 = vadd.f32 %v654_v57, %v6439_v12  ;;  %v8562_v23 = vld [vmem:[#allocation71_spill] sm:$0xff] }
 0x137   :  { %v6525_v38 = vpop.f32.mrf.mxu2 }
 0x138   :  { %2018 = vmatpush.bf16.msrb.mxu2 %v8539_v2  ;;  %v8548_v2 = vld [vmem:[#allocation61_spill] sm:$0xff]  ;;  %8551 = vst [vmem:[#allocation202_spill] sm:$0xff] %v6525_v38 }
 0x139   :  { %2031 = vmatpush.bf16.msrb.mxu3 %v8546_v53  ;;  %8554 = vst [vmem:[#allocation204_spill] sm:$0xff] %v6531_v9  ;;  %v683_v44 = vpop.f32.mrf.mxu1  ;;  %v8555_v53 = vld [vmem:[#allocation65_spill] sm:$0xff]  ;;  %v8563_v9 = vld [vmem:[#allocation74_spill] sm:$0xff] }
 0x13a   :  { %2006 = vmatpush.bf16.msrb.mxu1 %v8548_v2  ;;  %1994 = vmatpush.bf16.msrb.mxu0 %v8549_v5  ;;  %v8557_v2 = vld [vmem:[#allocation68_spill] sm:$0xff]  ;;  %v8558_v5 = vld [vmem:[#allocation67_spill] sm:$0xff]  ;;  %v8560_v38 = vld [vmem:[#allocation69_spill] sm:$0xff] }
 0x13c   :  { %2019 = vmatpush.bf16.msrb.mxu2 %v8547_v3  ;;  %v6535_v3 = vadd.f32 %v683_v44, %v6444_v0 }
 0x13d   :  { %2032 = vmatpush.bf16.msrb.mxu3 %v8550_v45  ;;  %v8559_v45 = vld [vmem:[#allocation70_spill] sm:$0xff]  ;;  %v741_v44 = vpop.f32.mrf.mxu3 }
 0x13e   :  { %2007 = vmatpush.bf16.msrb.mxu1 %v8555_v53  ;;  %8556 = vst [vmem:[#allocation205_spill] sm:$0xff] %v6535_v3  ;;  %1995 = vmatpush.bf16.msrb.mxu0 %v8557_v2  ;;  %v6547_v3 = vpop.f32.mrf.mxu0  ;;  %v6550_v2 = vadd.f32 %v741_v44, %v6466_v49 }
 0x13f   :  { %v712_v57 = vpop.f32.mrf.mxu2  ;;  %8565 = vst [vmem:[#allocation207_spill] sm:$0xff] %v6547_v3 }
 0x140   :  { %2020 = vmatpush.bf16.msrb.mxu2 %v8552_v52  ;;  %v8561_v52 = vld [vmem:[#allocation72_spill] sm:$0xff]  ;;  %v6545_v53 = vadd.f32 %v712_v57, %v6462_v15  ;;  %8566 = vst [vmem:[#allocation208_spill] sm:$0xff] %v6550_v2  ;;  %v8573_v57 = vld [vmem:[#allocation79_spill] sm:$0xff] }
 0x141   :  { %2033 = vmatpush.bf16.msrb.mxu3 %v8558_v5  ;;  %v6552_v5 = vpop.f32.mrf.mxu1 }
 0x142   :  { %2008 = vmatpush.bf16.msrb.mxu1 %v8560_v38  ;;  %1996 = vmatpush.bf16.msrb.mxu0 %v8561_v52  ;;  %8564 = vst [vmem:[#allocation206_spill] sm:$0xff] %v6545_v53  ;;  %v8569_v38 = vld [vmem:[#allocation76_spill] sm:$0xff]  ;;  %v8570_v52 = vld [vmem:[#allocation75_spill] sm:$0xff] }
 0x143   :  { %8567 = vst [vmem:[#allocation209_spill] sm:$0xff] %v6552_v5  ;;  %v8576_v5 = vld [vmem:[#allocation80_spill] sm:$0xff] }
 0x144   :  { %2021 = vmatpush.bf16.msrb.mxu2 %v8559_v45  ;;  %v8568_v45 = vld [vmem:[#allocation73_spill] sm:$0xff]  ;;  %v524_v36 = vadd.f32 %v8576_v5, %v6165_v29 }
 0x145   :  { %2034 = vmatpush.bf16.msrb.mxu3 %v8562_v23  ;;  %v8571_v23 = vld [vmem:[#allocation78_spill] sm:$0xff]  ;;  %v6562_v3 = vpop.f32.mrf.mxu3 }
 0x146   :  { %2009 = vmatpush.bf16.msrb.mxu1 %v8568_v45  ;;  %1997 = vmatpush.bf16.msrb.mxu0 %v8569_v38  ;;  %8575 = vst [vmem:[#allocation211_spill] sm:$0xff] %v6562_v3  ;;  %v1595_v44 = vpop.f32.mrf.mxu0 }
 0x147   :  { %v6560_v53 = vpop.f32.mrf.mxu2 }
 0x148   :  { %2022 = vmatpush.bf16.msrb.mxu2 %v8563_v9  ;;  %v8572_v9 = vld [vmem:[#allocation77_spill] sm:$0xff]  ;;  %8574 = vst [vmem:[#allocation210_spill] sm:$0xff] %v6560_v53 }
 0x149   :  { %2035 = vmatpush.bf16.msrb.mxu3 %v8570_v52  ;;  %v1608_v2 = vpop.f32.mrf.mxu1 }
 0x14a   :  { %2010 = vmatpush.bf16.msrb.mxu1 %v8572_v9  ;;  %v1609_v45 = vadd.f32 %v1608_v2, %v1595_v44  ;;  %v8577_v9 = vld [vmem:[#allocation81_spill] sm:$0xff] }
 0x14b   :  { %v553_v20 = vadd.f32 %v8577_v9, %v6182_v62 }
 0x14c   :  { %2023 = vmatpush.bf16.msrb.mxu2 %v8571_v23  ;;  %v1794_v54 = vadd.f32 %v1609_v45, %v524_v36 }
 0x14d   :  { %2036 = vmatpush.bf16.msrb.mxu3 %v8573_v57  ;;  %v1634_v52 = vpop.f32.mrf.mxu3 }
 0x14e   :  { %v5197_v38 = vmul.f32 -1.442695, %v1794_v54  ;;  %v1597_v23 = vpop.f32.mrf.mxu0  ;;  %v8578_v54 = vld [vmem:[#allocation89_spill] sm:$0xff] }
 0x14f   :  { %v1621_v47 = vpop.f32.mrf.mxu2 }
 0x150   :  { %5451 = vpow2.f32 %v5197_v38  ;;  %v1635_v57 = vadd.f32 %v1634_v52, %v1621_v47  ;;  %v582_v38 = vadd.f32 %v8578_v54, %v6208_v6 }
 0x151   :  { %v1610_v18 = vpop.f32.mrf.mxu1 }
 0x152   :  { %v1795_v53 = vadd.f32 %v1635_v57, %v553_v20 }
 0x154   :  { %v5198_v37 = vmul.f32 -1.442695, %v1795_v53 }
 0x155   :  { %v1636_v5 = vpop.f32.mrf.mxu3 }
 0x156   :  { %v5452_v3 = vpop.eup %5451  ;;  %5453 = vpow2.f32 %v5198_v37  ;;  %v1647_v2 = vpop.f32.mrf.mxu0 }
 0x157   :  { %v6568_v34 = vadd.f32 1.0, %v5452_v3  ;;  %v1623_v60 = vpop.f32.mrf.mxu2  ;;  %v8579_v3 = vld [vmem:[#allocation91_spill] sm:$0xff] }
 0x158   :  { %v611_v52 = vadd.f32 %v8579_v3, %v6211_v56 }
 0x159   :  { %v1660_v36 = vpop.f32.mrf.mxu1  ;;  %5455 = vrcp.f32 %v6568_v34  ;;  %vm1815_vm1 = vweird.f32 %v6568_v34 }
 0x15a   :  { %v1661_v23 = vadd.f32 %v1660_v36, %v1647_v2 }
 0x15c   :  { %v1796_v45 = vadd.f32 %v1661_v23, %v582_v38  ;;  %v5454_v9 = vpop.eup %5453 }
 0x15d   :  { %v6573_v47 = vadd.f32 1.0, %v5454_v9  ;;  %v1686_v37 = vpop.f32.mrf.mxu3 }
 0x15e   :  { %v5199_v18 = vmul.f32 -1.442695, %v1796_v45  ;;  %v1649_v60 = vpop.f32.mrf.mxu0 }
 0x15f   :  { %v1673_v20 = vpop.f32.mrf.mxu2  ;;  %v5456_v53 = vpop.eup %5455  ;;  %5457 = vrcp.f32 %v6573_v47  ;;  %vm1830_vm8 = vweird.f32 %v6573_v47 }
 0x160   :  { %5459 = vpow2.f32 %v5199_v18  ;;  %v1687_v57 = vadd.f32 %v1686_v37, %v1673_v20  ;;  %v1811_v5 = vmul.f32 %v5456_v53, %v6568_v34  ;;  %v640_v37 = vadd.f32 %v6407_v33, %v6439_v12 }
 0x161   :  { %v1662_v44 = vpop.f32.mrf.mxu1  ;;  %vm1816_vm0 = vweird.f32 %v5456_v53 }
 0x162   :  { %v1797_v2 = vadd.f32 %v1687_v57, %v611_v52  ;;  %v1812_v23 = vsub.f32 1.0, %v1811_v5  ;;  %vm6591_vm2 = vmor %vm1815_vm1, %vm1816_vm0 }
 0x164   :  { %v5200_v36 = vmul.f32 -1.442695, %v1797_v2  ;;  %v1813_v20 = vmul.f32 %v5456_v53, %v1812_v23 }
 0x165   :  { %v6579_v54 = vpop.eup %5457  ;;  %v1688_v6 = vpop.f32.mrf.mxu3 }
 0x166   :  { %v5460_v38 = vpop.eup %5459  ;;  %5461 = vpow2.f32 %v5200_v36  ;;  %v1826_v60 = vmul.f32 %v6579_v54, %v6573_v47  ;;  %v1699_v3 = vpop.f32.mrf.mxu0  ;;  %v1814_v36 = vadd.f32 %v5456_v53, %v1813_v20  ;;  %v1819_v6 = vand.u32 2147483647, %v6568_v34 }
 0x167   :  { %v1675_v45 = vpop.f32.mrf.mxu2  ;;  %v1846_v9 = vadd.f32 1.0, %v5460_v38  ;;  %v669_v20 = vadd.f32 %v6410_v61, %v6444_v0  ;;  %vm1831_vm5 = vweird.f32 %v6579_v54 }
 0x168   :  { %v1827_v44 = vsub.f32 1.0, %v1826_v60  ;;  %v1821_v45 = vand.u32 2147483648, %v6568_v34  ;;  %vm1820_vm3 = vcmp.eq.f32.partialorder %v1819_v6, 8.507059e+37  ;;  %vm6608_vm10 = vmor %vm1830_vm8, %vm1831_vm5 }
 0x169   :  { %5463 = vrcp.f32 %v1846_v9  ;;  %v1712_v18 = vpop.f32.mrf.mxu1  ;;  %v1859_v34 = vand.u32 2147483648, %v1846_v9  ;;  %v1857_v29 = vand.u32 2147483647, %v1846_v9  ;;  %vm1853_vm6 = vweird.f32 %v1846_v9 }
 0x16a   :  { %v1713_v52 = vadd.f32 %v1712_v18, %v1699_v3  ;;  %v1828_v3 = vmul.f32 %v6579_v54, %v1827_v44 }
 0x16b   :  { %vm1858_vm9 = vcmp.eq.f32.partialorder %v1857_v29, 8.507059e+37 }
 0x16c   :  { %v5462_v57 = vpop.eup %5461  ;;  %v1798_v5 = vadd.f32 %v1713_v52, %v640_v37  ;;  %v1818_v52 = vsel %vm6591_vm2, %v5456_v53, %v1814_v36  ;;  %v1829_v44 = vadd.f32 %v6579_v54, %v1828_v3  ;;  %v1860_v36 = vor.u32 1.1754944e-38, %v1859_v34 }
 0x16d   :  { %v6585_v2 = vadd.f32 1.0, %v5462_v57  ;;  %v1738_v60 = vpop.f32.mrf.mxu3 }
 0x16e   :  { %v1701_v18 = vpop.f32.mrf.mxu0 }
 0x16f   :  { %v5464_v38 = vpop.eup %5463  ;;  %5465 = vrcp.f32 %v6585_v2  ;;  %v1725_v33 = vpop.f32.mrf.mxu2  ;;  %v1872_v29 = vand.u32 2147483647, %v6585_v2  ;;  %vm1868_vm13 = vweird.f32 %v6585_v2 }
 0x170   :  { %v1849_v56 = vmul.f32 %v5464_v38, %v1846_v9  ;;  %5467 = vtanh.f32 %v1798_v5  ;;  %v1739_v57 = vadd.f32 %v1738_v60, %v1725_v33  ;;  %v1822_v5 = vor.u32 1.1754944e-38, %v1821_v45 }
 0x171   :  { %v1714_v12 = vpop.f32.mrf.mxu1  ;;  %vm1854_vm4 = vweird.f32 %v5464_v38  ;;  %v1834_v45 = vand.u32 2147483647, %v6573_v47  ;;  %vm1873_vm15 = vcmp.eq.f32.partialorder %v1872_v29, 8.507059e+37 }
 0x172   :  { %v1850_v37 = vsub.f32 1.0, %v1849_v56  ;;  %v1799_v19 = vadd.f32 %v1739_v57, %v669_v20  ;;  %v1823_v55 = vsel %vm1820_vm3, %v1822_v5, %v1818_v52  ;;  %v1836_v56 = vand.u32 2147483648, %v6573_v47  ;;  %vm1855_vm7 = vmor %vm1853_vm6, %vm1854_vm4 }
 0x173   :  { %vm1835_vm12 = vcmp.eq.f32.partialorder %v1834_v45, 8.507059e+37 }
 0x174   :  { %v1851_v62 = vmul.f32 %v5464_v38, %v1850_v37  ;;  %5469 = vtanh.f32 %v1799_v19  ;;  %v1837_v3 = vor.u32 1.1754944e-38, %v1836_v56 }
 0x175   :  { %v5466_v10 = vpop.eup %5465  ;;  %v1740_v18 = vpop.f32.mrf.mxu3 }
 0x176   :  { %v5468_v61 = vpop.eup %5467  ;;  %v1864_v53 = vmul.f32 %v5466_v10, %v6585_v2  ;;  %v1852_v12 = vadd.f32 %v5464_v38, %v1851_v62  ;;  %v1874_v62 = vand.u32 2147483648, %v6585_v2  ;;  %vm1869_vm11 = vweird.f32 %v5466_v10 }
 0x177   :  { %v1920_v6 = vmul.f32 %v5468_v61, %v1823_v55  ;;  %v1727_v9 = vpop.f32.mrf.mxu2  ;;  %v1833_v55 = vsel %vm6608_vm10, %v6579_v54, %v1829_v44  ;;  %vm1870_vm14 = vmor %vm1868_vm13, %vm1869_vm11 }
 0x178   :  { %v1865_v33 = vsub.f32 1.0, %v1864_v53  ;;  %v1856_v23 = vsel %vm1855_vm7, %v5464_v38, %v1852_v12  ;;  %v1838_v52 = vsel %vm1835_vm12, %v1837_v3, %v1833_v55  ;;  %v1875_v34 = vor.u32 1.1754944e-38, %v1874_v62 }
 0x179   :  { %v1861_v19 = vsel %vm1858_vm9, %v1860_v36, %v1856_v23  ;;  %v698_v36 = vadd.f32 %v6422_v63, %v6462_v15 }
 0x17a   :  { %v1866_v47 = vmul.f32 %v5466_v10, %v1865_v33  ;;  %v1918_v20 = vmul.f32 0.0, %v1861_v19  ;;  %v5470_v38 = vpop.eup %5469 }
 0x17b   :  { %v1921_v5 = vmul.f32 %v5470_v38, %v1838_v52 }
 0x17c   :  { %v6618_v37 = vadd.f32 %v1920_v6, %v1918_v20  ;;  %v1867_v57 = vadd.f32 %v5466_v10, %v1866_v47 }
 0x17e   :  { %v1871_v61 = vsel %vm1870_vm14, %v5466_v10, %v1867_v57  ;;  %v727_v10 = vadd.f32 %v6424_v14, %v6466_v49 }
 0x17f   :  { %v1876_v54 = vsel %vm1873_vm15, %v1875_v34, %v1871_v61 }
 0x180   :  { %v1919_v44 = vmul.f32 0.0, %v1876_v54 }
 0x182   :  { %v6620_v56 = vadd.f32 %v1921_v5, %v1919_v44 }
 0x186   :  { %v1751_v53 = vpop.f32.mrf.mxu0 }
 0x18a   :  { %v1764_v12 = vpop.f32.mrf.mxu1 }
 0x18b   :  { %v1765_v45 = vadd.f32 %v1764_v12, %v1751_v53 }
 0x18d   :  { %v1800_v2 = vadd.f32 %v1765_v45, %v698_v36 }
 0x18e   :  { %v1753_v60 = vpop.f32.mrf.mxu0 }
 0x18f   :  { %v5201_v6 = vmul.f32 -1.442695, %v1800_v2 }
 0x191   :  { %5471 = vpow2.f32 %v5201_v6 }
 0x192   :  { %v1777_v33 = vpop.f32.mrf.mxu2  ;;  %v1766_v62 = vpop.f32.mrf.mxu1 }
 0x193   :  { %v1790_v23 = vpop.f32.mrf.mxu3 }
 0x194   :  { %v1791_v9 = vadd.f32 %v1790_v23, %v1777_v33 }
 0x196   :  { %v1801_v19 = vadd.f32 %v1791_v9, %v727_v10 }
 0x197   :  { %v5472_v3 = vpop.eup %5471 }
 0x198   :  { %v5202_v55 = vmul.f32 -1.442695, %v1801_v19  ;;  %v1886_v18 = vadd.f32 1.0, %v5472_v3  ;;  %v8585_v3 = vld [vmem:[#allocation84_spill] sm:$0xff] }
 0x19a   :  { %5473 = vpow2.f32 %v5202_v55  ;;  %v1779_v47 = vpop.f32.mrf.mxu2  ;;  %v1899_v34 = vand.u32 2147483648, %v1886_v18  ;;  %v1897_v5 = vand.u32 2147483647, %v1886_v18  ;;  %vm1893_vm1 = vweird.f32 %v1886_v18  ;;  %v8584_v55 = vld [vmem:[#allocation82_spill] sm:$0xff] }
 0x19b   :  { %v1792_v20 = vpop.f32.mrf.mxu3  ;;  %5475 = vrcp.f32 %v1886_v18 }
 0x19c   :  { %v1900_v44 = vor.u32 1.1754944e-38, %v1899_v34  ;;  %vm1898_vm3 = vcmp.eq.f32.partialorder %v1897_v5, 8.507059e+37  ;;  %v8590_v34 = vld [vmem:[#allocation94_spill] sm:$0xff]  ;;  %v8592_v5 = vld [vmem:[#allocation87_spill] sm:$0xff] }
 0x1a0   :  { %v5474_v63 = vpop.eup %5473 }
 0x1a1   :  { %v1887_v29 = vadd.f32 1.0, %v5474_v63  ;;  %v5476_v38 = vpop.eup %5475 }
 0x1a2   :  { %v1889_v52 = vmul.f32 %v5476_v38, %v1886_v18  ;;  %vm1894_vm0 = vweird.f32 %v5476_v38 }
 0x1a3   :  { %5477 = vrcp.f32 %v1887_v29  ;;  %vm1895_vm2 = vmor %vm1893_vm1, %vm1894_vm0  ;;  %v1914_v33 = vand.u32 2147483648, %v1887_v29  ;;  %v1912_v60 = vand.u32 2147483647, %v1887_v29  ;;  %vm1908_vm5 = vweird.f32 %v1887_v29 }
 0x1a4   :  { %v1890_v57 = vsub.f32 1.0, %v1889_v52  ;;  %5479 = vtanh.f32 %v6618_v37  ;;  %v8588_v52 = vld [vmem:[#allocation83_spill] sm:$0xff] }
 0x1a5   :  { %5481 = vtanh.f32 %v6620_v56  ;;  %v1915_v62 = vor.u32 1.1754944e-38, %v1914_v33  ;;  %vm1913_vm7 = vcmp.eq.f32.partialorder %v1912_v60, 8.507059e+37  ;;  %v8602_v33 = vld [vmem:[#allocation114_spill] sm:$0xff]  ;;  %v8604_v60 = vld [vmem:[#allocation109_spill] sm:$0xff] }
 0x1a6   :  { %v1891_v14 = vmul.f32 %v5476_v38, %v1890_v57  ;;  %v8589_v57 = vld [vmem:[#allocation85_spill] sm:$0xff] }
 0x1a8   :  { %v1892_v54 = vadd.f32 %v5476_v38, %v1891_v14  ;;  %v8591_v14 = vld [vmem:[#allocation96_spill] sm:$0xff] }
 0x1a9   :  { %v5478_v61 = vpop.eup %5477 }
 0x1aa   :  { %v1904_v53 = vmul.f32 %v5478_v61, %v1887_v29  ;;  %v1896_v12 = vsel %vm1895_vm2, %v5476_v38, %v1892_v54  ;;  %v5480_v36 = vpop.eup %5479  ;;  %vm1909_vm4 = vweird.f32 %v5478_v61  ;;  %v8586_v38 = vld [vmem:[#allocation86_spill] sm:$0xff]  ;;  %v8587_v29 = vld [vmem:[#allocation88_spill] sm:$0xff]  ;;  %v8594_v54 = vld [vmem:[#allocation99_spill] sm:$0xff] }
 0x1ab   :  { %v1901_v45 = vsel %vm1898_vm3, %v1900_v44, %v1896_v12  ;;  %vm1910_vm6 = vmor %vm1908_vm5, %vm1909_vm4  ;;  %v5482_v18 = vpop.eup %5481  ;;  %v8595_v44 = vld [vmem:[#allocation101_spill] sm:$0xff] }
 0x1ac   :  { %v1905_v2 = vsub.f32 1.0, %v1904_v53  ;;  %v1926_v6 = vmul.f32 %v5480_v36, %v1901_v45  ;;  %v8596_v53 = vld [vmem:[#allocation95_spill] sm:$0xff]  ;;  %v8597_v12 = vld [vmem:[#allocation97_spill] sm:$0xff]  ;;  %v8599_v45 = vld [vmem:[#allocation110_spill] sm:$0xff] }
 0x1ad   :  { %v8598_v36 = vld [vmem:[#allocation107_spill] sm:$0xff] }
 0x1ae   :  { %v1906_v23 = vmul.f32 %v5478_v61, %v1905_v2  ;;  %v6628_v10 = vpack.c.bf16 %v1926_v6, %v1926_v6  ;;  %v8600_v2 = vld [vmem:[#allocation100_spill] sm:$0xff]  ;;  %v8601_v6 = vld [vmem:[#allocation103_spill] sm:$0xff] }
 0x1b0   :  { %v1907_v9 = vadd.f32 %v5478_v61, %v1906_v23  ;;  %1946 = vmatmul.bf16.vlgmr.msra.gmra.mxu0 %v6628_v10  ;;  %1972 = vmatmul.bf16.vlgmr.msra.gmra.mxu2 %v6628_v10  ;;  %v8603_v23 = vld [vmem:[#allocation116_spill] sm:$0xff] }
 0x1b1   :  { %2042 = vmatpush.bf16.msra.mxu0 %v8584_v55  ;;  %2068 = vmatpush.bf16.msra.mxu2 %v8585_v3 }
 0x1b2   :  { %v1911_v19 = vsel %vm1910_vm6, %v5478_v61, %v1907_v9  ;;  %v8593_v61 = vld [vmem:[#allocation90_spill] sm:$0xff]  ;;  %v8605_v9 = vld [vmem:[#allocation111_spill] sm:$0xff] }
 0x1b3   :  { %v1916_v47 = vsel %vm1913_vm7, %v1915_v62, %v1911_v19  ;;  %v8606_v62 = vld [vmem:[#allocation122_spill] sm:$0xff]  ;;  %v8607_v19 = vld [vmem:[#allocation124_spill] sm:$0xff] }
 0x1b4   :  { %v1927_v20 = vmul.f32 %v5482_v18, %v1916_v47  ;;  %v8608_v18 = vld [vmem:[#allocation115_spill] sm:$0xff]  ;;  %v8609_v47 = vld [vmem:[#allocation117_spill] sm:$0xff] }
 0x1b5   :  { %2043 = vmatpush.bf16.msra.mxu0 %v8586_v38  ;;  %2069 = vmatpush.bf16.msra.mxu2 %v8587_v29 }
 0x1b6   :  { %v6634_v63 = vpack.c.bf16 %v1927_v20, %v1927_v20  ;;  %v8610_v20 = vld [vmem:[#allocation123_spill] sm:$0xff] }
 0x1b8   :  { %1959 = vmatmul.bf16.vlgmr.msra.gmra.mxu1 %v6634_v63  ;;  %1985 = vmatmul.bf16.vlgmr.msra.gmra.mxu3 %v6634_v63 }
 0x1b9   :  { %2055 = vmatpush.bf16.msra.mxu1 %v8588_v52  ;;  %2081 = vmatpush.bf16.msra.mxu3 %v8589_v57 }
 0x1ba   :  { %2044 = vmatpush.bf16.msra.mxu0 %v8590_v34  ;;  %2070 = vmatpush.bf16.msra.mxu2 %v8591_v14 }
 0x1bd   :  { %2056 = vmatpush.bf16.msra.mxu1 %v8592_v5  ;;  %2082 = vmatpush.bf16.msra.mxu3 %v8593_v61 }
 0x1be   :  { %2045 = vmatpush.bf16.msra.mxu0 %v8594_v54  ;;  %2071 = vmatpush.bf16.msra.mxu2 %v8595_v44 }
 0x1c0   :  { %1998 = vmatmul.bf16.vlgmr.msrb.gmra.mxu0 %v6628_v10  ;;  %2024 = vmatmul.bf16.vlgmr.msrb.gmra.mxu2 %v6628_v10 }
 0x1c1   :  { %2057 = vmatpush.bf16.msra.mxu1 %v8596_v53  ;;  %2083 = vmatpush.bf16.msra.mxu3 %v8597_v12 }
 0x1c2   :  { %2046 = vmatpush.bf16.msra.mxu0 %v8598_v36  ;;  %2072 = vmatpush.bf16.msra.mxu2 %v8599_v45 }
 0x1c5   :  { %2058 = vmatpush.bf16.msra.mxu1 %v8600_v2  ;;  %2084 = vmatpush.bf16.msra.mxu3 %v8601_v6 }
 0x1c6   :  { %2047 = vmatpush.bf16.msra.mxu0 %v8602_v33  ;;  %2073 = vmatpush.bf16.msra.mxu2 %v8603_v23 }
 0x1c8   :  { %2011 = vmatmul.bf16.vlgmr.msrb.gmra.mxu1 %v6634_v63  ;;  %2037 = vmatmul.bf16.vlgmr.msrb.gmra.mxu3 %v6634_v63 }
 0x1c9   :  { %2059 = vmatpush.bf16.msra.mxu1 %v8604_v60  ;;  %2085 = vmatpush.bf16.msra.mxu3 %v8605_v9  ;;  %v8611_v60 = vld [vmem:[#allocation125_spill] sm:$0xff]  ;;  %v8630_v9 = vld [vmem:[#allocation162_spill] sm:$0xff] }
 0x1ca   :  { %2048 = vmatpush.bf16.msra.mxu0 %v8606_v62  ;;  %2074 = vmatpush.bf16.msra.mxu2 %v8607_v19  ;;  %v8612_v19 = vld [vmem:[#allocation138_spill] sm:$0xff]  ;;  %v8629_v62 = vld [vmem:[#allocation153_spill] sm:$0xff] }
 0x1cd   :  { %2060 = vmatpush.bf16.msra.mxu1 %v8608_v18  ;;  %2086 = vmatpush.bf16.msra.mxu3 %v8609_v47  ;;  %v8613_v18 = vld [vmem:[#allocation140_spill] sm:$0xff]  ;;  %v8614_v47 = vld [vmem:[#allocation127_spill] sm:$0xff] }
 0x1ce   :  { %2049 = vmatpush.bf16.msra.mxu0 %v6249_v48  ;;  %2075 = vmatpush.bf16.msra.mxu2 %v6255_v27  ;;  %v8615_v48 = vld [vmem:[#allocation130_spill] sm:$0xff]  ;;  %v8616_v27 = vld [vmem:[#allocation133_spill] sm:$0xff] }
 0x1d1   :  { %2061 = vmatpush.bf16.msra.mxu1 %v8610_v20  ;;  %2087 = vmatpush.bf16.msra.mxu3 %v8611_v60  ;;  %v8619_v20 = vld [vmem:[#allocation146_spill] sm:$0xff]  ;;  %v8620_v60 = vld [vmem:[#allocation139_spill] sm:$0xff] }
 0x1d2   :  { %2094 = vmatpush.bf16.msrb.mxu0 %v6262_v42  ;;  %2120 = vmatpush.bf16.msrb.mxu2 %v6268_v31  ;;  %v8617_v42 = vld [vmem:[#allocation136_spill] sm:$0xff]  ;;  %v8618_v31 = vld [vmem:[#allocation142_spill] sm:$0xff] }
 0x1d3   :  { %2050 = vmatmul.bf16.vlgmr.msra.gmra.mxu0 %v6628_v10  ;;  %2076 = vmatmul.bf16.vlgmr.msra.gmra.mxu2 %v6628_v10 }
 0x1d5   :  { %2062 = vmatpush.bf16.msra.mxu1 %v8614_v47  ;;  %2088 = vmatpush.bf16.msra.mxu3 %v8615_v48  ;;  %v8623_v47 = vld [vmem:[#allocation152_spill] sm:$0xff]  ;;  %v8624_v48 = vld [vmem:[#allocation145_spill] sm:$0xff] }
 0x1d6   :  { %2095 = vmatpush.bf16.msrb.mxu0 %v8612_v19  ;;  %2121 = vmatpush.bf16.msrb.mxu2 %v8613_v18  ;;  %v8621_v19 = vld [vmem:[#allocation141_spill] sm:$0xff]  ;;  %v8622_v18 = vld [vmem:[#allocation150_spill] sm:$0xff] }
 0x1d8   :  { %2063 = vmatmul.bf16.vlgmr.msra.gmra.mxu1 %v6634_v63  ;;  %2089 = vmatmul.bf16.vlgmr.msra.gmra.mxu3 %v6634_v63 }
 0x1d9   :  { %2107 = vmatpush.bf16.msrb.mxu1 %v8616_v27  ;;  %2133 = vmatpush.bf16.msrb.mxu3 %v8617_v42  ;;  %v8625_v27 = vld [vmem:[#allocation149_spill] sm:$0xff]  ;;  %v8626_v42 = vld [vmem:[#allocation155_spill] sm:$0xff] }
 0x1da   :  { %2096 = vmatpush.bf16.msrb.mxu0 %v8618_v31  ;;  %2122 = vmatpush.bf16.msrb.mxu2 %v8619_v20  ;;  %v8627_v31 = vld [vmem:[#allocation158_spill] sm:$0xff]  ;;  %v8628_v20 = vld [vmem:[#allocation151_spill] sm:$0xff] }
 0x1dd   :  { %2108 = vmatpush.bf16.msrb.mxu1 %v8620_v60  ;;  %2134 = vmatpush.bf16.msrb.mxu3 %v8621_v19  ;;  %v8631_v60 = vld [vmem:[#allocation164_spill] sm:$0xff]  ;;  %v8632_v19 = vld [vmem:[#allocation157_spill] sm:$0xff] }
 0x1de   :  { %2097 = vmatpush.bf16.msrb.mxu0 %v8622_v18  ;;  %2123 = vmatpush.bf16.msrb.mxu2 %v8623_v47  ;;  %v8633_v18 = vld [vmem:[#allocation160_spill] sm:$0xff] }
 0x1e1   :  { %2109 = vmatpush.bf16.msrb.mxu1 %v8624_v48  ;;  %2135 = vmatpush.bf16.msrb.mxu3 %v8625_v27  ;;  %v8634_v27 = vld [vmem:[#allocation163_spill] sm:$0xff] }
 0x1e2   :  { %2098 = vmatpush.bf16.msrb.mxu0 %v8626_v42  ;;  %2124 = vmatpush.bf16.msrb.mxu2 %v8627_v31 }
 0x1e5   :  { %2110 = vmatpush.bf16.msrb.mxu1 %v8628_v20  ;;  %2136 = vmatpush.bf16.msrb.mxu3 %v8629_v62 }
 0x1e6   :  { %2099 = vmatpush.bf16.msrb.mxu0 %v8630_v9  ;;  %2125 = vmatpush.bf16.msrb.mxu2 %v8631_v60 }
 0x1e9   :  { %2111 = vmatpush.bf16.msrb.mxu1 %v8632_v19  ;;  %2137 = vmatpush.bf16.msrb.mxu3 %v8633_v18 }
 0x1ea   :  { %2100 = vmatpush.bf16.msrb.mxu0 %v6367_v25  ;;  %2126 = vmatpush.bf16.msrb.mxu2 %v6378_v58 }
 0x1ed   :  { %2112 = vmatpush.bf16.msrb.mxu1 %v8634_v27  ;;  %2138 = vmatpush.bf16.msrb.mxu3 %v6364_v16 }
 0x1ee   :  { %2101 = vmatpush.bf16.msrb.mxu0 %v6389_v8  ;;  %2127 = vmatpush.bf16.msrb.mxu2 %v6395_v4 }
 0x1f1   :  { %2113 = vmatpush.bf16.msrb.mxu1 %v6376_v24  ;;  %2139 = vmatpush.bf16.msrb.mxu3 %v6386_v28 }
 0x1f2   :  { %2290 = vmatpush.bf16.msra.mxu0 %v5900_v7  ;;  %2316 = vmatpush.bf16.msra.mxu2 %v5904_v13 }
 0x1f3   :  { %2102 = vmatmul.bf16.vlgmr.msrb.gmra.mxu0 %v6628_v10  ;;  %2128 = vmatmul.bf16.vlgmr.msrb.gmra.mxu2 %v6628_v10  ;;  %v8635_v10 = vld [vmem:[#allocation31_spill] sm:$0xff] }
 0x1f5   :  { %2114 = vmatpush.bf16.msrb.mxu1 %v6393_v32  ;;  %2140 = vmatpush.bf16.msrb.mxu3 %v6398_v43  ;;  %v8685_v32 = vld [vmem:[#allocation93_spill] sm:$0xff] }
 0x1f6   :  { %2291 = vmatpush.bf16.msra.mxu0 %v5911_v21  ;;  %2317 = vmatpush.bf16.msra.mxu2 %v5916_v26 }
 0x1f8   :  { %2115 = vmatmul.bf16.vlgmr.msrb.gmra.mxu1 %v6634_v63  ;;  %2141 = vmatmul.bf16.vlgmr.msrb.gmra.mxu3 %v6634_v63  ;;  %v8636_v63 = vld [vmem:[#allocation36_spill] sm:$0xff] }
 0x1f9   :  { %2303 = vmatpush.bf16.msra.mxu1 %v5902_v11  ;;  %2329 = vmatpush.bf16.msra.mxu3 %v5907_v17 }
 0x1fa   :  { %2292 = vmatpush.bf16.msra.mxu0 %v5921_v35  ;;  %2318 = vmatpush.bf16.msra.mxu2 %v5927_v40  ;;  %v8683_v35 = vld [vmem:[#allocation92_spill] sm:$0xff] }
 0x1fd   :  { %2304 = vmatpush.bf16.msra.mxu1 %v5913_v22  ;;  %2330 = vmatpush.bf16.msra.mxu3 %v5918_v30  ;;  %v8637_v22 = vld [vmem:[#allocation38_spill] sm:$0xff]  ;;  %v8638_v30 = vld [vmem:[#allocation33_spill] sm:$0xff] }
 0x1fe   :  { %2293 = vmatpush.bf16.msra.mxu0 %v5942_v46  ;;  %2319 = vmatpush.bf16.msra.mxu2 %v5946_v51  ;;  %v8639_v46 = vld [vmem:[#allocation35_spill] sm:$0xff]  ;;  %v8640_v51 = vld [vmem:[#allocation40_spill] sm:$0xff] }
 0x201   :  { %2305 = vmatpush.bf16.msra.mxu1 %v5925_v39  ;;  %2331 = vmatpush.bf16.msra.mxu3 %v5930_v41  ;;  %v8641_v39 = vld [vmem:[#allocation42_spill] sm:$0xff]  ;;  %v8642_v41 = vld [vmem:[#allocation37_spill] sm:$0xff] }
 0x202   :  { %2294 = vmatpush.bf16.msra.mxu0 %v5953_v59  ;;  %2320 = vmatpush.bf16.msra.mxu2 %v5958_v1  ;;  %v8643_v59 = vld [vmem:[#allocation39_spill] sm:$0xff]  ;;  %v8644_v1 = vld [vmem:[#allocation44_spill] sm:$0xff] }
 0x205   :  { %2306 = vmatpush.bf16.msra.mxu1 %v5944_v50  ;;  %2332 = vmatpush.bf16.msra.mxu3 %v8635_v10  ;;  %v8645_v50 = vld [vmem:[#allocation46_spill] sm:$0xff]  ;;  %v8646_v10 = vld [vmem:[#allocation48_spill] sm:$0xff] }
 0x206   :  { %2295 = vmatpush.bf16.msra.mxu0 %v8636_v63  ;;  %2321 = vmatpush.bf16.msra.mxu2 %v8637_v22  ;;  %v8647_v63 = vld [vmem:[#allocation50_spill] sm:$0xff]  ;;  %v8648_v22 = vld [vmem:[#allocation41_spill] sm:$0xff] }
 0x209   :  { %2307 = vmatpush.bf16.msra.mxu1 %v8638_v30  ;;  %2333 = vmatpush.bf16.msra.mxu3 %v8639_v46  ;;  %v8649_v30 = vld [vmem:[#allocation43_spill] sm:$0xff]  ;;  %v8650_v46 = vld [vmem:[#allocation52_spill] sm:$0xff] }
 0x20a   :  { %2296 = vmatpush.bf16.msra.mxu0 %v8640_v51  ;;  %2322 = vmatpush.bf16.msra.mxu2 %v8641_v39  ;;  %v8651_v51 = vld [vmem:[#allocation54_spill] sm:$0xff]  ;;  %v8652_v39 = vld [vmem:[#allocation45_spill] sm:$0xff] }
 0x20d   :  { %2308 = vmatpush.bf16.msra.mxu1 %v8642_v41  ;;  %2334 = vmatpush.bf16.msra.mxu3 %v8643_v59  ;;  %v8653_v41 = vld [vmem:[#allocation47_spill] sm:$0xff]  ;;  %v8654_v59 = vld [vmem:[#allocation49_spill] sm:$0xff] }
 0x20e   :  { %2297 = vmatpush.bf16.msra.mxu0 %v8644_v1  ;;  %2323 = vmatpush.bf16.msra.mxu2 %v8645_v50  ;;  %v8655_v1 = vld [vmem:[#allocation51_spill] sm:$0xff]  ;;  %v8656_v50 = vld [vmem:[#allocation56_spill] sm:$0xff] }
 0x211   :  { %2309 = vmatpush.bf16.msra.mxu1 %v8648_v22  ;;  %2335 = vmatpush.bf16.msra.mxu3 %v8649_v30  ;;  %v8659_v22 = vld [vmem:[#allocation55_spill] sm:$0xff]  ;;  %v8660_v30 = vld [vmem:[#allocation60_spill] sm:$0xff] }
 0x212   :  { %2342 = vmatpush.bf16.msrb.mxu0 %v8646_v10  ;;  %2368 = vmatpush.bf16.msrb.mxu2 %v8647_v63  ;;  %v8657_v10 = vld [vmem:[#allocation58_spill] sm:$0xff]  ;;  %v8658_v63 = vld [vmem:[#allocation53_spill] sm:$0xff] }
 0x215   :  { %2310 = vmatpush.bf16.msra.mxu1 %v8652_v39  ;;  %2336 = vmatpush.bf16.msra.mxu3 %v8653_v41  ;;  %v8663_v39 = vld [vmem:[#allocation59_spill] sm:$0xff]  ;;  %v8664_v41 = vld [vmem:[#allocation64_spill] sm:$0xff] }
 0x216   :  { %2343 = vmatpush.bf16.msrb.mxu0 %v8650_v46  ;;  %2369 = vmatpush.bf16.msrb.mxu2 %v8651_v51  ;;  %v8661_v46 = vld [vmem:[#allocation62_spill] sm:$0xff]  ;;  %v8662_v51 = vld [vmem:[#allocation57_spill] sm:$0xff] }
 0x219   :  { %2355 = vmatpush.bf16.msrb.mxu1 %v8654_v59  ;;  %2381 = vmatpush.bf16.msrb.mxu3 %v8655_v1  ;;  %v8665_v59 = vld [vmem:[#allocation66_spill] sm:$0xff]  ;;  %v8666_v1 = vld [vmem:[#allocation61_spill] sm:$0xff] }
 0x21a   :  { %2344 = vmatpush.bf16.msrb.mxu0 %v8656_v50  ;;  %2370 = vmatpush.bf16.msrb.mxu2 %v8657_v10  ;;  %v8667_v50 = vld [vmem:[#allocation63_spill] sm:$0xff]  ;;  %v8668_v10 = vld [vmem:[#allocation68_spill] sm:$0xff] }
 0x21d   :  { %2356 = vmatpush.bf16.msrb.mxu1 %v8658_v63  ;;  %2382 = vmatpush.bf16.msrb.mxu3 %v8659_v22  ;;  %v8669_v63 = vld [vmem:[#allocation70_spill] sm:$0xff]  ;;  %v8670_v22 = vld [vmem:[#allocation65_spill] sm:$0xff] }
 0x21e   :  { %2345 = vmatpush.bf16.msrb.mxu0 %v8660_v30  ;;  %2371 = vmatpush.bf16.msrb.mxu2 %v8661_v46  ;;  %v8671_v30 = vld [vmem:[#allocation67_spill] sm:$0xff]  ;;  %v8672_v46 = vld [vmem:[#allocation72_spill] sm:$0xff] }
 0x221   :  { %2357 = vmatpush.bf16.msrb.mxu1 %v8662_v51  ;;  %2383 = vmatpush.bf16.msrb.mxu3 %v8663_v39  ;;  %v8673_v51 = vld [vmem:[#allocation74_spill] sm:$0xff]  ;;  %v8674_v39 = vld [vmem:[#allocation69_spill] sm:$0xff] }
 0x222   :  { %2346 = vmatpush.bf16.msrb.mxu0 %v8664_v41  ;;  %2372 = vmatpush.bf16.msrb.mxu2 %v8665_v59  ;;  %v8675_v41 = vld [vmem:[#allocation71_spill] sm:$0xff]  ;;  %v8676_v59 = vld [vmem:[#allocation76_spill] sm:$0xff] }
 0x225   :  { %2358 = vmatpush.bf16.msrb.mxu1 %v8666_v1  ;;  %2384 = vmatpush.bf16.msrb.mxu3 %v8667_v50  ;;  %v8677_v1 = vld [vmem:[#allocation78_spill] sm:$0xff]  ;;  %v8678_v50 = vld [vmem:[#allocation73_spill] sm:$0xff] }
 0x226   :  { %2347 = vmatpush.bf16.msrb.mxu0 %v8668_v10  ;;  %2373 = vmatpush.bf16.msrb.mxu2 %v8669_v63  ;;  %v8679_v10 = vld [vmem:[#allocation75_spill] sm:$0xff]  ;;  %v8680_v63 = vld [vmem:[#allocation77_spill] sm:$0xff] }
 0x229   :  { %2359 = vmatpush.bf16.msrb.mxu1 %v8670_v22  ;;  %2385 = vmatpush.bf16.msrb.mxu3 %v8671_v30  ;;  %v8681_v22 = vld [vmem:[#allocation79_spill] sm:$0xff] }
 0x22a   :  { %2348 = vmatpush.bf16.msrb.mxu0 %v8672_v46  ;;  %2374 = vmatpush.bf16.msrb.mxu2 %v8673_v51  ;;  %v8682_v51 = vld [vmem:[#allocation98_spill] sm:$0xff] }
 0x22d   :  { %2360 = vmatpush.bf16.msrb.mxu1 %v8674_v39  ;;  %2386 = vmatpush.bf16.msrb.mxu3 %v8675_v41  ;;  %v1947_v30 = vpop.f32.mrf.mxu0  ;;  %v526_v39 = vadd.f32 %v8683_v35, %v8682_v51 }
 0x22e   :  { %2349 = vmatpush.bf16.msrb.mxu0 %v8676_v59  ;;  %2375 = vmatpush.bf16.msrb.mxu2 %v8677_v1  ;;  %v8684_v1 = vld [vmem:[#allocation104_spill] sm:$0xff] }
 0x231   :  { %2361 = vmatpush.bf16.msrb.mxu1 %v8678_v50  ;;  %2387 = vmatpush.bf16.msrb.mxu3 %v8679_v10  ;;  %v555_v50 = vadd.f32 %v8685_v32, %v8684_v1 }
 0x233   :  { %v1973_v46 = vpop.f32.mrf.mxu2 }
 0x235   :  { %2362 = vmatpush.bf16.msrb.mxu1 %v8680_v63  ;;  %2388 = vmatpush.bf16.msrb.mxu3 %v8681_v22  ;;  %v1960_v40 = vpop.f32.mrf.mxu1  ;;  %v1949_v41 = vpop.f32.mrf.mxu0 }
 0x236   :  { %v1961_v17 = vadd.f32 %v1960_v40, %v1947_v30  ;;  %v8686_v40 = vld [vmem:[#allocation112_spill] sm:$0xff] }
 0x238   :  { %v2146_v11 = vadd.f32 %v1961_v17, %v526_v39  ;;  %v8687_v17 = vld [vmem:[#allocation102_spill] sm:$0xff] }
 0x23a   :  { %v5203_v59 = vmul.f32 -1.442695, %v2146_v11  ;;  %v584_v11 = vadd.f32 %v8687_v17, %v8686_v40 }
 0x23b   :  { %v1986_v43 = vpop.f32.mrf.mxu3  ;;  %v1975_v26 = vpop.f32.mrf.mxu2 }
 0x23c   :  { %5483 = vpow2.f32 %v5203_v59  ;;  %v1987_v10 = vadd.f32 %v1986_v43, %v1973_v46 }
 0x23d   :  { %v1962_v63 = vpop.f32.mrf.mxu1  ;;  %v1999_v22 = vpop.f32.mrf.mxu0 }
 0x23e   :  { %v2147_v21 = vadd.f32 %v1987_v10, %v555_v50 }
 0x240   :  { %v5204_v28 = vmul.f32 -1.442695, %v2147_v21 }
 0x242   :  { %v5484_v24 = vpop.eup %5483  ;;  %5485 = vpow2.f32 %v5204_v28  ;;  %v8688_v28 = vld [vmem:[#allocation113_spill] sm:$0xff] }
 0x243   :  { %v2160_v13 = vadd.f32 1.0, %v5484_v24  ;;  %v1988_v7 = vpop.f32.mrf.mxu3  ;;  %v2025_v30 = vpop.f32.mrf.mxu2 }
 0x244   :  { %v8689_v7 = vld [vmem:[#allocation105_spill] sm:$0xff] }
 0x245   :  { %v2012_v35 = vpop.f32.mrf.mxu1  ;;  %5487 = vrcp.f32 %v2160_v13  ;;  %v2001_v41 = vpop.f32.mrf.mxu0  ;;  %v613_v24 = vadd.f32 %v8689_v7, %v8688_v28  ;;  %v8691_v7 = vld [vmem:[#allocation180_spill] sm:$0xff]  ;;  %vm2167_vm9 = vweird.f32 %v2160_v13 }
 0x246   :  { %v2013_v39 = vadd.f32 %v2012_v35, %v1999_v22 }
 0x248   :  { %v5486_v32 = vpop.eup %5485  ;;  %v2148_v59 = vadd.f32 %v2013_v39, %v584_v11 }
 0x249   :  { %v6782_v46 = vadd.f32 1.0, %v5486_v32 }
 0x24a   :  { %v5205_v26 = vmul.f32 -1.442695, %v2148_v59 }
 0x24b   :  { %5489 = vrcp.f32 %v6782_v46  ;;  %v2038_v21 = vpop.f32.mrf.mxu3  ;;  %v6785_v50 = vpop.eup %5487  ;;  %vm2182_vm14 = vweird.f32 %v6782_v46 }
 0x24c   :  { %5491 = vpow2.f32 %v5205_v26  ;;  %v2039_v43 = vadd.f32 %v2038_v21, %v2025_v30  ;;  %v2027_v63 = vpop.f32.mrf.mxu2  ;;  %v2163_v22 = vmul.f32 %v6785_v50, %v2160_v13  ;;  %v8690_v21 = vld [vmem:[#allocation182_spill] sm:$0xff]  ;;  %vm2168_vm8 = vweird.f32 %v6785_v50 }
 0x24d   :  { %v2014_v10 = vpop.f32.mrf.mxu1  ;;  %vm6805_vm10 = vmor %vm2167_vm9, %vm2168_vm8 }
 0x24e   :  { %v2149_v17 = vadd.f32 %v2039_v43, %v613_v24  ;;  %v2164_v32 = vsub.f32 1.0, %v2163_v22  ;;  %v642_v24 = vadd.f32 %v8691_v7, %v8690_v21 }
 0x250   :  { %v2051_v35 = vpop.f32.mrf.mxu0  ;;  %v5206_v11 = vmul.f32 -1.442695, %v2149_v17  ;;  %v2165_v10 = vmul.f32 %v6785_v50, %v2164_v32 }
 0x251   :  { %v6790_v39 = vpop.eup %5489 }
 0x252   :  { %v5492_v41 = vpop.eup %5491  ;;  %5493 = vpow2.f32 %v5206_v11  ;;  %v2178_v1 = vmul.f32 %v6790_v39, %v6782_v46  ;;  %v2171_v11 = vand.u32 2147483647, %v2160_v13  ;;  %v2166_v4 = vadd.f32 %v6785_v50, %v2165_v10 }
 0x253   :  { %v2198_v59 = vadd.f32 1.0, %v5492_v41  ;;  %v2040_v40 = vpop.f32.mrf.mxu3  ;;  %vm2183_vm12 = vweird.f32 %v6790_v39 }
 0x254   :  { %v2179_v28 = vsub.f32 1.0, %v2178_v1  ;;  %v2173_v40 = vand.u32 2147483648, %v2160_v13  ;;  %vm6809_vm11 = vcmp.eq.f32.partialorder %v2171_v11, 8.507059e+37  ;;  %v2186_v11 = vand.u32 2147483647, %v6782_v46  ;;  %vm6826_vm0 = vmor %vm2182_vm14, %vm2183_vm12 }
 0x255   :  { %5495 = vrcp.f32 %v2198_v59  ;;  %v2064_v30 = vpop.f32.mrf.mxu1  ;;  %v2211_v21 = vand.u32 2147483648, %v2198_v59  ;;  %vm2205_vm15 = vweird.f32 %v2198_v59 }
 0x256   :  { %v2077_v26 = vpop.f32.mrf.mxu2  ;;  %v2065_v43 = vadd.f32 %v2064_v30, %v2051_v35  ;;  %v2180_v32 = vmul.f32 %v6790_v39, %v2179_v28  ;;  %v8692_v30 = vld [vmem:[#allocation181_spill] sm:$0xff]  ;;  %v2170_v28 = vsel %vm6805_vm10, %v6785_v50, %v2166_v4  ;;  %vm2187_vm3 = vcmp.eq.f32.partialorder %v2186_v11, 8.507059e+37 }
 0x257   :  { %v671_v1 = vadd.f32 %v8692_v30, %v6444_v0  ;;  %v8726_v0 = vld [vmem:[#allocation176_spill] sm:$0xff] }
 0x258   :  { %v2053_v63 = vpop.f32.mrf.mxu0  ;;  %v5494_v17 = vpop.eup %5493  ;;  %v2150_v22 = vadd.f32 %v2065_v43, %v642_v24 }
 0x259   :  { %v6797_v51 = vadd.f32 1.0, %v5494_v17  ;;  %v2174_v17 = vor.u32 1.1754944e-38, %v2173_v40  ;;  %v2188_v40 = vand.u32 2147483648, %v6782_v46 }
 0x25b   :  { %v5496_v41 = vpop.eup %5495  ;;  %5497 = vrcp.f32 %v6797_v51  ;;  %v2090_v35 = vpop.f32.mrf.mxu3  ;;  %v2175_v50 = vsel %vm6809_vm11, %v2174_v17, %v2170_v28  ;;  %v2226_v10 = vand.u32 2147483648, %v6797_v51  ;;  %v2189_v28 = vor.u32 1.1754944e-38, %v2188_v40 }
 0x25c   :  { %v2201_v8 = vmul.f32 %v5496_v41, %v2198_v59  ;;  %5499 = vtanh.f32 %v2150_v22  ;;  %v2091_v7 = vadd.f32 %v2090_v35, %v2077_v26  ;;  %vm2206_vm13 = vweird.f32 %v5496_v41 }
 0x25d   :  { %v2066_v22 = vpop.f32.mrf.mxu1  ;;  %v2181_v26 = vadd.f32 %v6790_v39, %v2180_v32  ;;  %vm2207_vm1 = vmor %vm2205_vm15, %vm2206_vm13  ;;  %vm2220_vm5 = vweird.f32 %v6797_v51 }
 0x25e   :  { %v2079_v24 = vpop.f32.mrf.mxu2  ;;  %v2202_v43 = vsub.f32 1.0, %v2201_v8  ;;  %v2151_v30 = vadd.f32 %v2091_v7, %v671_v1  ;;  %v2209_v8 = vand.u32 2147483647, %v2198_v59  ;;  %v2212_v7 = vor.u32 1.1754944e-38, %v2211_v21 }
 0x25f   :  { %v2185_v59 = vsel %vm6826_vm0, %v6790_v39, %v2181_v26  ;;  %v2224_v21 = vand.u32 2147483647, %v6797_v51  ;;  %v2227_v26 = vor.u32 1.1754944e-38, %v2226_v10  ;;  %v8700_v10 = vld [vmem:[#allocation185_spill] sm:$0xff] }
 0x260   :  { %v2203_v13 = vmul.f32 %v5496_v41, %v2202_v43  ;;  %5501 = vtanh.f32 %v2151_v30  ;;  %vm2210_vm2 = vcmp.eq.f32.partialorder %v2209_v8, 8.507059e+37 }
 0x261   :  { %v5498_v35 = vpop.eup %5497  ;;  %vm2225_vm7 = vcmp.eq.f32.partialorder %v2224_v21, 8.507059e+37 }
 0x262   :  { %v5500_v24 = vpop.eup %5499  ;;  %v2216_v4 = vmul.f32 %v5498_v35, %v6797_v51  ;;  %v2204_v1 = vadd.f32 %v5496_v41, %v2203_v13  ;;  %vm2221_vm4 = vweird.f32 %v5498_v35 }
 0x263   :  { %v2272_v43 = vmul.f32 %v5500_v24, %v2175_v50  ;;  %v2092_v22 = vpop.f32.mrf.mxu3  ;;  %vm2222_vm6 = vmor %vm2220_vm5, %vm2221_vm4 }
 0x264   :  { %v2217_v63 = vsub.f32 1.0, %v2216_v4  ;;  %v2208_v46 = vsel %vm2207_vm1, %v5496_v41, %v2204_v1  ;;  %v2190_v4 = vsel %vm2187_vm3, %v2189_v28, %v2185_v59 }
 0x265   :  { %v2213_v17 = vsel %vm2210_vm2, %v2212_v7, %v2208_v46 }
 0x266   :  { %v2218_v30 = vmul.f32 %v5498_v35, %v2217_v63  ;;  %v2270_v13 = vmul.f32 %v2213_v17, %v6618_v37  ;;  %v5502_v24 = vpop.eup %5501  ;;  %v8699_v63 = vld [vmem:[#allocation183_spill] sm:$0xff] }
 0x267   :  { %v2273_v39 = vmul.f32 %v5502_v24, %v2190_v4  ;;  %v700_v46 = vadd.f32 %v8699_v63, %v6462_v15  ;;  %v8725_v15 = vld [vmem:[#allocation174_spill] sm:$0xff] }
 0x268   :  { %v6837_v41 = vadd.f32 %v2272_v43, %v2270_v13  ;;  %v2219_v8 = vadd.f32 %v5498_v35, %v2218_v30 }
 0x26a   :  { %v2223_v50 = vsel %vm2222_vm6, %v5498_v35, %v2219_v8  ;;  %v729_v35 = vadd.f32 %v8700_v10, %v6466_v49  ;;  %v8724_v49 = vld [vmem:[#allocation149_spill] sm:$0xff] }
 0x26b   :  { %v2228_v11 = vsel %vm2225_vm7, %v2227_v26, %v2223_v50 }
 0x26c   :  { %v2271_v40 = vmul.f32 %v2228_v11, %v6620_v56 }
 0x26e   :  { %v6840_v32 = vadd.f32 %v2273_v39, %v2271_v40 }
 0x270   :  { %v2103_v1 = vpop.f32.mrf.mxu0 }
 0x275   :  { %v2116_v37 = vpop.f32.mrf.mxu1 }
 0x276   :  { %v2129_v7 = vpop.f32.mrf.mxu2  ;;  %v2117_v51 = vadd.f32 %v2116_v37, %v2103_v1 }
 0x278   :  { %v2105_v43 = vpop.f32.mrf.mxu0  ;;  %v2152_v59 = vadd.f32 %v2117_v51, %v700_v46 }
 0x27a   :  { %v5207_v22 = vmul.f32 -1.442695, %v2152_v59 }
 0x27b   :  { %v2142_v17 = vpop.f32.mrf.mxu3 }
 0x27c   :  { %5503 = vpow2.f32 %v5207_v22  ;;  %v2143_v28 = vadd.f32 %v2142_v17, %v2129_v7 }
 0x27d   :  { %v2118_v30 = vpop.f32.mrf.mxu1 }
 0x27e   :  { %v2131_v56 = vpop.f32.mrf.mxu2  ;;  %v2153_v13 = vadd.f32 %v2143_v28, %v729_v35 }
 0x280   :  { %v5208_v21 = vmul.f32 -1.442695, %v2153_v13 }
 0x282   :  { %v5504_v24 = vpop.eup %5503  ;;  %5505 = vpow2.f32 %v5208_v21 }
 0x283   :  { %v2238_v4 = vadd.f32 1.0, %v5504_v24  ;;  %v2144_v8 = vpop.f32.mrf.mxu3 }
 0x285   :  { %5507 = vrcp.f32 %v2238_v4  ;;  %v2251_v1 = vand.u32 2147483648, %v2238_v4  ;;  %v2249_v7 = vand.u32 2147483647, %v2238_v4  ;;  %vm2245_vm9 = vweird.f32 %v2238_v4 }
 0x287   :  { %v2252_v43 = vor.u32 1.1754944e-38, %v2251_v1  ;;  %vm2250_vm11 = vcmp.eq.f32.partialorder %v2249_v7, 8.507059e+37  ;;  %v8703_v1 = vld [vmem:[#allocation122_spill] sm:$0xff]  ;;  %v8705_v7 = vld [vmem:[#allocation115_spill] sm:$0xff] }
 0x288   :  { %v5506_v39 = vpop.eup %5505 }
 0x289   :  { %v2239_v26 = vadd.f32 1.0, %v5506_v39 }
 0x28b   :  { %v5508_v50 = vpop.eup %5507  ;;  %5509 = vrcp.f32 %v2239_v26  ;;  %v2266_v35 = vand.u32 2147483648, %v2239_v26  ;;  %v2264_v56 = vand.u32 2147483647, %v2239_v26  ;;  %vm2260_vm13 = vweird.f32 %v2239_v26 }
 0x28c   :  { %v2241_v11 = vmul.f32 %v5508_v50, %v2238_v4  ;;  %5511 = vtanh.f32 %v6837_v41  ;;  %vm2246_vm8 = vweird.f32 %v5508_v50 }
 0x28d   :  { %vm2247_vm10 = vmor %vm2245_vm9, %vm2246_vm8  ;;  %5513 = vtanh.f32 %v6840_v32  ;;  %v2267_v24 = vor.u32 1.1754944e-38, %v2266_v35  ;;  %vm2265_vm15 = vcmp.eq.f32.partialorder %v2264_v56, 8.507059e+37  ;;  %v8714_v35 = vld [vmem:[#allocation140_spill] sm:$0xff]  ;;  %v8717_v56 = vld [vmem:[#allocation133_spill] sm:$0xff] }
 0x28e   :  { %v2242_v40 = vsub.f32 1.0, %v2241_v11 }
 0x290   :  { %v2243_v37 = vmul.f32 %v5508_v50, %v2242_v40  ;;  %v8702_v40 = vld [vmem:[#allocation111_spill] sm:$0xff] }
 0x291   :  { %v5510_v63 = vpop.eup %5509 }
 0x292   :  { %v2244_v46 = vadd.f32 %v5508_v50, %v2243_v37  ;;  %v2256_v51 = vmul.f32 %v5510_v63, %v2239_v26  ;;  %v5512_v17 = vpop.eup %5511  ;;  %vm2261_vm12 = vweird.f32 %v5510_v63  ;;  %v8701_v26 = vld [vmem:[#allocation109_spill] sm:$0xff]  ;;  %v8704_v37 = vld [vmem:[#allocation124_spill] sm:$0xff] }
 0x293   :  { %vm2262_vm14 = vmor %vm2260_vm13, %vm2261_vm12  ;;  %v5514_v8 = vpop.eup %5513 }
 0x294   :  { %v2248_v59 = vsel %vm2247_vm10, %v5508_v50, %v2244_v46  ;;  %v2257_v22 = vsub.f32 1.0, %v2256_v51  ;;  %v8707_v46 = vld [vmem:[#allocation126_spill] sm:$0xff]  ;;  %v8708_v51 = vld [vmem:[#allocation128_spill] sm:$0xff] }
 0x295   :  { %v2253_v10 = vsel %vm2250_vm11, %v2252_v43, %v2248_v59  ;;  %v8709_v43 = vld [vmem:[#allocation131_spill] sm:$0xff]  ;;  %v8710_v59 = vld [vmem:[#allocation134_spill] sm:$0xff] }
 0x296   :  { %v2278_v28 = vmul.f32 %v5512_v17, %v2253_v10  ;;  %v2258_v30 = vmul.f32 %v5510_v63, %v2257_v22  ;;  %v8711_v22 = vld [vmem:[#allocation123_spill] sm:$0xff]  ;;  %v8712_v17 = vld [vmem:[#allocation125_spill] sm:$0xff]  ;;  %v8713_v10 = vld [vmem:[#allocation138_spill] sm:$0xff] }
 0x298   :  { %v6848_v13 = vpack.c.bf16 %v2278_v28, %v2278_v28  ;;  %v2259_v21 = vadd.f32 %v5510_v63, %v2258_v30  ;;  %v8715_v28 = vld [vmem:[#allocation127_spill] sm:$0xff]  ;;  %v8716_v30 = vld [vmem:[#allocation130_spill] sm:$0xff] }
 0x29a   :  { %v2263_v4 = vsel %vm2262_vm14, %v5510_v63, %v2259_v21  ;;  %2298 = vmatmul.bf16.vlgmr.msra.gmra.mxu0 %v6848_v13  ;;  %2324 = vmatmul.bf16.vlgmr.msra.gmra.mxu2 %v6848_v13  ;;  %v8706_v63 = vld [vmem:[#allocation117_spill] sm:$0xff]  ;;  %v8718_v21 = vld [vmem:[#allocation136_spill] sm:$0xff] }
 0x29b   :  { %v2268_v39 = vsel %vm2265_vm15, %v2267_v24, %v2263_v4  ;;  %2394 = vmatpush.bf16.msra.mxu0 %v8584_v55  ;;  %2420 = vmatpush.bf16.msra.mxu2 %v8585_v3  ;;  %v8719_v24 = vld [vmem:[#allocation142_spill] sm:$0xff] }
 0x29c   :  { %v2279_v50 = vmul.f32 %v5514_v8, %v2268_v39  ;;  %v8720_v4 = vld [vmem:[#allocation146_spill] sm:$0xff]  ;;  %v8721_v8 = vld [vmem:[#allocation139_spill] sm:$0xff]  ;;  %v8722_v39 = vld [vmem:[#allocation141_spill] sm:$0xff] }
 0x29e   :  { %v6854_v11 = vpack.c.bf16 %v2279_v50, %v2279_v50  ;;  %v8723_v50 = vld [vmem:[#allocation150_spill] sm:$0xff] }
 0x29f   :  { %2395 = vmatpush.bf16.msra.mxu0 %v8586_v38  ;;  %2421 = vmatpush.bf16.msra.mxu2 %v8587_v29 }
 0x2a0   :  { %2311 = vmatmul.bf16.vlgmr.msra.gmra.mxu1 %v6854_v11  ;;  %2337 = vmatmul.bf16.vlgmr.msra.gmra.mxu3 %v6854_v11 }
 0x2a1   :  { %2407 = vmatpush.bf16.msra.mxu1 %v8588_v52  ;;  %2433 = vmatpush.bf16.msra.mxu3 %v8589_v57 }
 0x2a3   :  { %2396 = vmatpush.bf16.msra.mxu0 %v8590_v34  ;;  %2422 = vmatpush.bf16.msra.mxu2 %v8591_v14 }
 0x2a5   :  { %2408 = vmatpush.bf16.msra.mxu1 %v8592_v5  ;;  %2434 = vmatpush.bf16.msra.mxu3 %v8593_v61 }
 0x2a7   :  { %2397 = vmatpush.bf16.msra.mxu0 %v8594_v54  ;;  %2423 = vmatpush.bf16.msra.mxu2 %v8595_v44 }
 0x2a9   :  { %2409 = vmatpush.bf16.msra.mxu1 %v8596_v53  ;;  %2435 = vmatpush.bf16.msra.mxu3 %v8597_v12 }
 0x2aa   :  { %2350 = vmatmul.bf16.vlgmr.msrb.gmra.mxu0 %v6848_v13  ;;  %2376 = vmatmul.bf16.vlgmr.msrb.gmra.mxu2 %v6848_v13 }
 0x2ab   :  { %2398 = vmatpush.bf16.msra.mxu0 %v8598_v36  ;;  %2424 = vmatpush.bf16.msra.mxu2 %v8599_v45 }
 0x2ad   :  { %2410 = vmatpush.bf16.msra.mxu1 %v8600_v2  ;;  %2436 = vmatpush.bf16.msra.mxu3 %v8601_v6 }
 0x2af   :  { %2399 = vmatpush.bf16.msra.mxu0 %v8602_v33  ;;  %2425 = vmatpush.bf16.msra.mxu2 %v8603_v23 }
 0x2b0   :  { %2363 = vmatmul.bf16.vlgmr.msrb.gmra.mxu1 %v6854_v11  ;;  %2389 = vmatmul.bf16.vlgmr.msrb.gmra.mxu3 %v6854_v11 }
 0x2b1   :  { %2411 = vmatpush.bf16.msra.mxu1 %v8701_v26  ;;  %2437 = vmatpush.bf16.msra.mxu3 %v8702_v40 }
 0x2b3   :  { %2400 = vmatpush.bf16.msra.mxu0 %v8703_v1  ;;  %2426 = vmatpush.bf16.msra.mxu2 %v8704_v37 }
 0x2b5   :  { %2412 = vmatpush.bf16.msra.mxu1 %v8705_v7  ;;  %2438 = vmatpush.bf16.msra.mxu3 %v8706_v63 }
 0x2b7   :  { %2401 = vmatpush.bf16.msra.mxu0 %v8707_v46  ;;  %2427 = vmatpush.bf16.msra.mxu2 %v8708_v51 }
 0x2b9   :  { %2413 = vmatpush.bf16.msra.mxu1 %v8711_v22  ;;  %2439 = vmatpush.bf16.msra.mxu3 %v8712_v17 }
 0x2ba   :  { %2402 = vmatmul.bf16.vlgmr.msra.gmra.mxu0 %v6848_v13  ;;  %2428 = vmatmul.bf16.vlgmr.msra.gmra.mxu2 %v6848_v13 }
 0x2bb   :  { %2446 = vmatpush.bf16.msrb.mxu0 %v8709_v43  ;;  %2472 = vmatpush.bf16.msrb.mxu2 %v8710_v59 }
 0x2bd   :  { %2414 = vmatpush.bf16.msra.mxu1 %v8715_v28  ;;  %2440 = vmatpush.bf16.msra.mxu3 %v8716_v30 }
 0x2bf   :  { %2447 = vmatpush.bf16.msrb.mxu0 %v8713_v10  ;;  %2473 = vmatpush.bf16.msrb.mxu2 %v8714_v35 }
 0x2c0   :  { %2415 = vmatmul.bf16.vlgmr.msra.gmra.mxu1 %v6854_v11  ;;  %2441 = vmatmul.bf16.vlgmr.msra.gmra.mxu3 %v6854_v11 }
 0x2c1   :  { %2459 = vmatpush.bf16.msrb.mxu1 %v8717_v56  ;;  %2485 = vmatpush.bf16.msrb.mxu3 %v8718_v21  ;;  %v8804_v21 = vld [vmem:[#allocation187_spill] sm:$0xff] }
 0x2c3   :  { %2448 = vmatpush.bf16.msrb.mxu0 %v8719_v24  ;;  %2474 = vmatpush.bf16.msrb.mxu2 %v8720_v4 }
 0x2c5   :  { %2460 = vmatpush.bf16.msrb.mxu1 %v8721_v8  ;;  %2486 = vmatpush.bf16.msrb.mxu3 %v8722_v39 }
 0x2c7   :  { %2449 = vmatpush.bf16.msrb.mxu0 %v8723_v50  ;;  %2475 = vmatpush.bf16.msrb.mxu2 %v8623_v47 }
 0x2c9   :  { %2461 = vmatpush.bf16.msrb.mxu1 %v8624_v48  ;;  %2487 = vmatpush.bf16.msrb.mxu3 %v8724_v49 }
 0x2cb   :  { %2450 = vmatpush.bf16.msrb.mxu0 %v8626_v42  ;;  %2476 = vmatpush.bf16.msrb.mxu2 %v8627_v31 }
 0x2cd   :  { %2462 = vmatpush.bf16.msrb.mxu1 %v8628_v20  ;;  %2488 = vmatpush.bf16.msrb.mxu3 %v8629_v62  ;;  %v8727_v62 = vld [vmem:[#allocation16_spill] sm:$0xff] }
 0x2cf   :  { %2451 = vmatpush.bf16.msrb.mxu0 %v8630_v9  ;;  %2477 = vmatpush.bf16.msrb.mxu2 %v8631_v60  ;;  %v8728_v9 = vld [vmem:[#allocation18_spill] sm:$0xff]  ;;  %v8729_v60 = vld [vmem:[#allocation169_spill] sm:$0xff] }
 0x2d1   :  { %2463 = vmatpush.bf16.msrb.mxu1 %v8632_v19  ;;  %2489 = vmatpush.bf16.msrb.mxu3 %v8633_v18  ;;  %v8730_v19 = vld [vmem:[#allocation173_spill] sm:$0xff] }
 0x2d3   :  { %2452 = vmatpush.bf16.msrb.mxu0 %v6367_v25  ;;  %2478 = vmatpush.bf16.msrb.mxu2 %v6378_v58  ;;  %v8731_v58 = vld [vmem:[#allocation20_spill] sm:$0xff] }
 0x2d5   :  { %2464 = vmatpush.bf16.msrb.mxu1 %v8634_v27  ;;  %2490 = vmatpush.bf16.msrb.mxu3 %v6364_v16  ;;  %v8732_v27 = vld [vmem:[#allocation22_spill] sm:$0xff]  ;;  %v8733_v16 = vld [vmem:[#allocation175_spill] sm:$0xff] }
 0x2d7   :  { %2453 = vmatpush.bf16.msrb.mxu0 %v8725_v15  ;;  %2479 = vmatpush.bf16.msrb.mxu2 %v8726_v0  ;;  %v8734_v15 = vld [vmem:[#allocation177_spill] sm:$0xff] }
 0x2d8   :  { %v8735_v0 = vld [vmem:[#allocation17_spill] sm:$0xff] }
 0x2d9   :  { %2465 = vmatpush.bf16.msrb.mxu1 %v8729_v60  ;;  %2491 = vmatpush.bf16.msrb.mxu3 %v8730_v19  ;;  %v8737_v19 = vld [vmem:[#allocation24_spill] sm:$0xff]  ;;  %v8738_v60 = vld [vmem:[#allocation26_spill] sm:$0xff] }
 0x2da   :  { %2454 = vmatmul.bf16.vlgmr.msrb.gmra.mxu0 %v6848_v13  ;;  %2480 = vmatmul.bf16.vlgmr.msrb.gmra.mxu2 %v6848_v13  ;;  %v8739_v13 = vld [vmem:[#allocation21_spill] sm:$0xff] }
 0x2db   :  { %2642 = vmatpush.bf16.msra.mxu0 %v8727_v62  ;;  %2668 = vmatpush.bf16.msra.mxu2 %v8728_v9  ;;  %v8736_v62 = vld [vmem:[#allocation19_spill] sm:$0xff]  ;;  %v8746_v9 = vld [vmem:[#allocation34_spill] sm:$0xff] }
 0x2dd   :  { %2466 = vmatpush.bf16.msrb.mxu1 %v8733_v16  ;;  %2492 = vmatpush.bf16.msrb.mxu3 %v8734_v15  ;;  %v8742_v16 = vld [vmem:[#allocation30_spill] sm:$0xff]  ;;  %v8743_v15 = vld [vmem:[#allocation25_spill] sm:$0xff] }
 0x2df   :  { %2643 = vmatpush.bf16.msra.mxu0 %v8731_v58  ;;  %2669 = vmatpush.bf16.msra.mxu2 %v8732_v27  ;;  %v8740_v58 = vld [vmem:[#allocation23_spill] sm:$0xff]  ;;  %v8741_v27 = vld [vmem:[#allocation28_spill] sm:$0xff] }
 0x2e0   :  { %2467 = vmatmul.bf16.vlgmr.msrb.gmra.mxu1 %v6854_v11  ;;  %2493 = vmatmul.bf16.vlgmr.msrb.gmra.mxu3 %v6854_v11  ;;  %v8747_v11 = vld [vmem:[#allocation29_spill] sm:$0xff] }
 0x2e1   :  { %2655 = vmatpush.bf16.msra.mxu1 %v8735_v0  ;;  %2681 = vmatpush.bf16.msra.mxu3 %v8736_v62  ;;  %v8744_v0 = vld [vmem:[#allocation27_spill] sm:$0xff]  ;;  %v8745_v62 = vld [vmem:[#allocation32_spill] sm:$0xff] }
 0x2e3   :  { %2644 = vmatpush.bf16.msra.mxu0 %v8737_v19  ;;  %2670 = vmatpush.bf16.msra.mxu2 %v8738_v60  ;;  %v8748_v19 = vld [vmem:[#allocation31_spill] sm:$0xff]  ;;  %v8749_v60 = vld [vmem:[#allocation36_spill] sm:$0xff] }
 0x2e5   :  { %2656 = vmatpush.bf16.msra.mxu1 %v8739_v13  ;;  %2682 = vmatpush.bf16.msra.mxu3 %v8740_v58  ;;  %v8750_v13 = vld [vmem:[#allocation38_spill] sm:$0xff]  ;;  %v8751_v58 = vld [vmem:[#allocation33_spill] sm:$0xff] }
 0x2e7   :  { %2645 = vmatpush.bf16.msra.mxu0 %v8741_v27  ;;  %2671 = vmatpush.bf16.msra.mxu2 %v8742_v16  ;;  %v8752_v27 = vld [vmem:[#allocation35_spill] sm:$0xff]  ;;  %v8753_v16 = vld [vmem:[#allocation40_spill] sm:$0xff] }
 0x2e9   :  { %2657 = vmatpush.bf16.msra.mxu1 %v8743_v15  ;;  %2683 = vmatpush.bf16.msra.mxu3 %v8744_v0  ;;  %v8754_v15 = vld [vmem:[#allocation42_spill] sm:$0xff]  ;;  %v8755_v0 = vld [vmem:[#allocation37_spill] sm:$0xff] }
 0x2eb   :  { %2646 = vmatpush.bf16.msra.mxu0 %v8745_v62  ;;  %2672 = vmatpush.bf16.msra.mxu2 %v8746_v9  ;;  %v8756_v62 = vld [vmem:[#allocation39_spill] sm:$0xff]  ;;  %v8757_v9 = vld [vmem:[#allocation44_spill] sm:$0xff] }
 0x2ed   :  { %2658 = vmatpush.bf16.msra.mxu1 %v8747_v11  ;;  %2684 = vmatpush.bf16.msra.mxu3 %v8748_v19  ;;  %v8758_v11 = vld [vmem:[#allocation46_spill] sm:$0xff]  ;;  %v8759_v19 = vld [vmem:[#allocation48_spill] sm:$0xff] }
 0x2ef   :  { %2647 = vmatpush.bf16.msra.mxu0 %v8749_v60  ;;  %2673 = vmatpush.bf16.msra.mxu2 %v8750_v13  ;;  %v8760_v60 = vld [vmem:[#allocation50_spill] sm:$0xff]  ;;  %v8761_v13 = vld [vmem:[#allocation41_spill] sm:$0xff] }
 0x2f1   :  { %2659 = vmatpush.bf16.msra.mxu1 %v8751_v58  ;;  %2685 = vmatpush.bf16.msra.mxu3 %v8752_v27  ;;  %v8762_v58 = vld [vmem:[#allocation43_spill] sm:$0xff]  ;;  %v8763_v27 = vld [vmem:[#allocation52_spill] sm:$0xff] }
 0x2f3   :  { %2648 = vmatpush.bf16.msra.mxu0 %v8753_v16  ;;  %2674 = vmatpush.bf16.msra.mxu2 %v8754_v15  ;;  %v8764_v16 = vld [vmem:[#allocation54_spill] sm:$0xff]  ;;  %v8765_v15 = vld [vmem:[#allocation45_spill] sm:$0xff] }
 0x2f5   :  { %2660 = vmatpush.bf16.msra.mxu1 %v8755_v0  ;;  %2686 = vmatpush.bf16.msra.mxu3 %v8756_v62  ;;  %v8766_v0 = vld [vmem:[#allocation47_spill] sm:$0xff]  ;;  %v8767_v62 = vld [vmem:[#allocation49_spill] sm:$0xff] }
 0x2f7   :  { %2649 = vmatpush.bf16.msra.mxu0 %v8757_v9  ;;  %2675 = vmatpush.bf16.msra.mxu2 %v8758_v11  ;;  %v8768_v9 = vld [vmem:[#allocation51_spill] sm:$0xff]  ;;  %v8769_v11 = vld [vmem:[#allocation56_spill] sm:$0xff] }
 0x2f9   :  { %2661 = vmatpush.bf16.msra.mxu1 %v8761_v13  ;;  %2687 = vmatpush.bf16.msra.mxu3 %v8762_v58  ;;  %v8772_v13 = vld [vmem:[#allocation55_spill] sm:$0xff]  ;;  %v8773_v58 = vld [vmem:[#allocation60_spill] sm:$0xff] }
 0x2fb   :  { %2694 = vmatpush.bf16.msrb.mxu0 %v8759_v19  ;;  %2720 = vmatpush.bf16.msrb.mxu2 %v8760_v60  ;;  %v8770_v19 = vld [vmem:[#allocation58_spill] sm:$0xff]  ;;  %v8771_v60 = vld [vmem:[#allocation53_spill] sm:$0xff] }
 0x2fd   :  { %2662 = vmatpush.bf16.msra.mxu1 %v8765_v15  ;;  %2688 = vmatpush.bf16.msra.mxu3 %v8766_v0  ;;  %v8776_v15 = vld [vmem:[#allocation59_spill] sm:$0xff]  ;;  %v8777_v0 = vld [vmem:[#allocation64_spill] sm:$0xff] }
 0x2ff   :  { %2695 = vmatpush.bf16.msrb.mxu0 %v8763_v27  ;;  %2721 = vmatpush.bf16.msrb.mxu2 %v8764_v16  ;;  %v8774_v27 = vld [vmem:[#allocation62_spill] sm:$0xff]  ;;  %v8775_v16 = vld [vmem:[#allocation57_spill] sm:$0xff] }
 0x301   :  { %2707 = vmatpush.bf16.msrb.mxu1 %v8767_v62  ;;  %2733 = vmatpush.bf16.msrb.mxu3 %v8768_v9  ;;  %v8778_v62 = vld [vmem:[#allocation66_spill] sm:$0xff]  ;;  %v8779_v9 = vld [vmem:[#allocation61_spill] sm:$0xff] }
 0x303   :  { %2696 = vmatpush.bf16.msrb.mxu0 %v8769_v11  ;;  %2722 = vmatpush.bf16.msrb.mxu2 %v8770_v19  ;;  %v8780_v11 = vld [vmem:[#allocation63_spill] sm:$0xff]  ;;  %v8781_v19 = vld [vmem:[#allocation68_spill] sm:$0xff] }
 0x305   :  { %2708 = vmatpush.bf16.msrb.mxu1 %v8771_v60  ;;  %2734 = vmatpush.bf16.msrb.mxu3 %v8772_v13  ;;  %v8782_v60 = vld [vmem:[#allocation70_spill] sm:$0xff]  ;;  %v8783_v13 = vld [vmem:[#allocation65_spill] sm:$0xff] }
 0x307   :  { %2697 = vmatpush.bf16.msrb.mxu0 %v8773_v58  ;;  %2723 = vmatpush.bf16.msrb.mxu2 %v8774_v27  ;;  %v8784_v58 = vld [vmem:[#allocation67_spill] sm:$0xff]  ;;  %v8785_v27 = vld [vmem:[#allocation72_spill] sm:$0xff] }
 0x309   :  { %2709 = vmatpush.bf16.msrb.mxu1 %v8775_v16  ;;  %2735 = vmatpush.bf16.msrb.mxu3 %v8776_v15  ;;  %v8786_v16 = vld [vmem:[#allocation74_spill] sm:$0xff]  ;;  %v8787_v15 = vld [vmem:[#allocation69_spill] sm:$0xff] }
 0x30b   :  { %2698 = vmatpush.bf16.msrb.mxu0 %v8777_v0  ;;  %2724 = vmatpush.bf16.msrb.mxu2 %v8778_v62  ;;  %v8788_v0 = vld [vmem:[#allocation71_spill] sm:$0xff]  ;;  %v8789_v62 = vld [vmem:[#allocation76_spill] sm:$0xff] }
 0x30d   :  { %2710 = vmatpush.bf16.msrb.mxu1 %v8779_v9  ;;  %2736 = vmatpush.bf16.msrb.mxu3 %v8780_v11  ;;  %v8790_v9 = vld [vmem:[#allocation78_spill] sm:$0xff]  ;;  %v8791_v11 = vld [vmem:[#allocation73_spill] sm:$0xff] }
 0x30f   :  { %2699 = vmatpush.bf16.msrb.mxu0 %v8781_v19  ;;  %2725 = vmatpush.bf16.msrb.mxu2 %v8782_v60  ;;  %v8792_v19 = vld [vmem:[#allocation75_spill] sm:$0xff]  ;;  %v8793_v60 = vld [vmem:[#allocation77_spill] sm:$0xff] }
 0x311   :  { %2711 = vmatpush.bf16.msrb.mxu1 %v8783_v13  ;;  %2737 = vmatpush.bf16.msrb.mxu3 %v8784_v58  ;;  %v8794_v13 = vld [vmem:[#allocation79_spill] sm:$0xff] }
 0x313   :  { %2700 = vmatpush.bf16.msrb.mxu0 %v8785_v27  ;;  %2726 = vmatpush.bf16.msrb.mxu2 %v8786_v16 }
 0x315   :  { %2712 = vmatpush.bf16.msrb.mxu1 %v8787_v15  ;;  %2738 = vmatpush.bf16.msrb.mxu3 %v8788_v0  ;;  %v8795_v15 = vld [vmem:[#allocation106_spill] sm:$0xff] }
 0x317   :  { %2701 = vmatpush.bf16.msrb.mxu0 %v8789_v62  ;;  %2727 = vmatpush.bf16.msrb.mxu2 %v8790_v9  ;;  %v2299_v58 = vpop.f32.mrf.mxu0 }
 0x319   :  { %2713 = vmatpush.bf16.msrb.mxu1 %v8791_v11  ;;  %2739 = vmatpush.bf16.msrb.mxu3 %v8792_v19  ;;  %v8796_v11 = vld [vmem:[#allocation108_spill] sm:$0xff] }
 0x31d   :  { %2714 = vmatpush.bf16.msrb.mxu1 %v8793_v60  ;;  %2740 = vmatpush.bf16.msrb.mxu3 %v8794_v13  ;;  %v2312_v27 = vpop.f32.mrf.mxu1  ;;  %v2325_v25 = vpop.f32.mrf.mxu2 }
 0x31e   :  { %v2313_v16 = vadd.f32 %v2312_v27, %v2299_v58 }
 0x31f   :  { %v2301_v18 = vpop.f32.mrf.mxu0 }
 0x320   :  { %v2498_v20 = vadd.f32 %v2313_v16, %v8795_v15  ;;  %v8797_v15 = vld [vmem:[#allocation118_spill] sm:$0xff] }
 0x322   :  { %v5209_v0 = vmul.f32 -1.442695, %v2498_v20 }
 0x323   :  { %v2338_v31 = vpop.f32.mrf.mxu3 }
 0x324   :  { %5515 = vpow2.f32 %v5209_v0  ;;  %v2339_v62 = vadd.f32 %v2338_v31, %v2325_v25 }
 0x325   :  { %v2314_v9 = vpop.f32.mrf.mxu1  ;;  %v2327_v42 = vpop.f32.mrf.mxu2 }
 0x326   :  { %v2499_v49 = vadd.f32 %v2339_v62, %v8796_v11  ;;  %v8798_v9 = vld [vmem:[#allocation120_spill] sm:$0xff] }
 0x327   :  { %v2351_v19 = vpop.f32.mrf.mxu0 }
 0x328   :  { %v5210_v48 = vmul.f32 -1.442695, %v2499_v49 }
 0x32a   :  { %v5516_v60 = vpop.eup %5515  ;;  %5517 = vpow2.f32 %v5210_v48 }
 0x32b   :  { %v2512_v13 = vadd.f32 1.0, %v5516_v60  ;;  %v2340_v47 = vpop.f32.mrf.mxu3 }
 0x32d   :  { %v2364_v50 = vpop.f32.mrf.mxu1  ;;  %v2377_v39 = vpop.f32.mrf.mxu2  ;;  %5519 = vrcp.f32 %v2512_v13  ;;  %v2523_v4 = vand.u32 2147483647, %v2512_v13  ;;  %vm2519_vm1 = vweird.f32 %v2512_v13 }
 0x32e   :  { %v2365_v27 = vadd.f32 %v2364_v50, %v2351_v19 }
 0x32f   :  { %v2353_v58 = vpop.f32.mrf.mxu0  ;;  %vm7016_vm3 = vcmp.eq.f32.partialorder %v2523_v4, 8.507059e+37 }
 0x330   :  { %v5518_v16 = vpop.eup %5517  ;;  %v2500_v18 = vadd.f32 %v2365_v27, %v8797_v15 }
 0x331   :  { %v6999_v0 = vadd.f32 1.0, %v5518_v16 }
 0x332   :  { %v5211_v31 = vmul.f32 -1.442695, %v2500_v18 }
 0x333   :  { %5521 = vrcp.f32 %v6999_v0  ;;  %v2390_v42 = vpop.f32.mrf.mxu3  ;;  %v5520_v25 = vpop.eup %5519  ;;  %vm2534_vm6 = vweird.f32 %v6999_v0  ;;  %v2538_v4 = vand.u32 2147483647, %v6999_v0 }
 0x334   :  { %5523 = vpow2.f32 %v5211_v31  ;;  %v2391_v49 = vadd.f32 %v2390_v42, %v2377_v39  ;;  %v2515_v47 = vmul.f32 %v5520_v25, %v2512_v13  ;;  %vm2520_vm0 = vweird.f32 %v5520_v25 }
 0x335   :  { %v2366_v48 = vpop.f32.mrf.mxu1  ;;  %v2379_v60 = vpop.f32.mrf.mxu2  ;;  %vm7012_vm2 = vmor %vm2519_vm1, %vm2520_vm0  ;;  %vm2539_vm11 = vcmp.eq.f32.partialorder %v2538_v4, 8.507059e+37 }
 0x336   :  { %v2501_v62 = vadd.f32 %v2391_v49, %v8798_v9  ;;  %v2516_v27 = vsub.f32 1.0, %v2515_v47 }
 0x337   :  { %v2403_v20 = vpop.f32.mrf.mxu0 }
 0x338   :  { %v5212_v19 = vmul.f32 -1.442695, %v2501_v62  ;;  %v2517_v42 = vmul.f32 %v5520_v25, %v2516_v27  ;;  %v8799_v62 = vld [vmem:[#allocation186_spill] sm:$0xff] }
 0x339   :  { %v7003_v50 = vpop.eup %5521 }
 0x33a   :  { %v5524_v11 = vpop.eup %5523  ;;  %5525 = vpow2.f32 %v5212_v19  ;;  %v2530_v15 = vmul.f32 %v7003_v50, %v6999_v0  ;;  %v2525_v19 = vand.u32 2147483648, %v2512_v13  ;;  %vm2535_vm4 = vweird.f32 %v7003_v50 }
 0x33b   :  { %v2550_v58 = vadd.f32 1.0, %v5524_v11  ;;  %v2392_v16 = vpop.f32.mrf.mxu3  ;;  %v2518_v11 = vadd.f32 %v5520_v25, %v2517_v42  ;;  %vm7033_vm8 = vmor %vm2534_vm6, %vm2535_vm4 }
 0x33c   :  { %v2531_v60 = vsub.f32 1.0, %v2530_v15 }
 0x33d   :  { %5527 = vrcp.f32 %v2550_v58  ;;  %v2429_v18 = vpop.f32.mrf.mxu2  ;;  %v2416_v39 = vpop.f32.mrf.mxu1  ;;  %v2561_v13 = vand.u32 2147483647, %v2550_v58  ;;  %vm2557_vm7 = vweird.f32 %v2550_v58 }
 0x33e   :  { %v2417_v31 = vadd.f32 %v2416_v39, %v2403_v20  ;;  %v2532_v20 = vmul.f32 %v7003_v50, %v2531_v60 }
 0x33f   :  { %v2405_v48 = vpop.f32.mrf.mxu0  ;;  %vm2562_vm10 = vcmp.eq.f32.partialorder %v2561_v13, 8.507059e+37 }
 0x340   :  { %v5526_v49 = vpop.eup %5525  ;;  %v2502_v8 = vadd.f32 %v2417_v31, %v8799_v62  ;;  %v2563_v62 = vand.u32 2147483648, %v2550_v58 }
 0x341   :  { %v7007_v9 = vadd.f32 1.0, %v5526_v49  ;;  %v2526_v49 = vor.u32 1.1754944e-38, %v2525_v19  ;;  %v2540_v19 = vand.u32 2147483648, %v6999_v0 }
 0x343   :  { %v5528_v47 = vpop.eup %5527  ;;  %5529 = vrcp.f32 %v7007_v9  ;;  %v2442_v24 = vpop.f32.mrf.mxu3  ;;  %v2578_v31 = vand.u32 2147483648, %v7007_v9  ;;  %vm2572_vm13 = vweird.f32 %v7007_v9 }
 0x344   :  { %v2553_v16 = vmul.f32 %v5528_v47, %v2550_v58  ;;  %5531 = vtanh.f32 %v2502_v8  ;;  %v2443_v27 = vadd.f32 %v2442_v24, %v2429_v18  ;;  %v2522_v8 = vsel %vm7012_vm2, %v5520_v25, %v2518_v11 }
 0x345   :  { %v2431_v39 = vpop.f32.mrf.mxu2  ;;  %v2418_v42 = vpop.f32.mrf.mxu1  ;;  %vm2558_vm5 = vweird.f32 %v5528_v47  ;;  %v2533_v18 = vadd.f32 %v7003_v50, %v2532_v20 }
 0x346   :  { %v2554_v15 = vsub.f32 1.0, %v2553_v16  ;;  %v2503_v60 = vadd.f32 %v2443_v27, %v8804_v21  ;;  %v2527_v21 = vsel %vm7016_vm3, %v2526_v49, %v2522_v8  ;;  %vm2559_vm9 = vmor %vm2557_vm7, %vm2558_vm5  ;;  %v2564_v27 = vor.u32 1.1754944e-38, %v2563_v62 }
 0x347   :  { %v2537_v58 = vsel %vm7033_vm8, %v7003_v50, %v2533_v18  ;;  %v2541_v8 = vor.u32 1.1754944e-38, %v2540_v19  ;;  %v2576_v62 = vand.u32 2147483647, %v7007_v9  ;;  %v2579_v18 = vor.u32 1.1754944e-38, %v2578_v31 }
 0x348   :  { %v2555_v24 = vmul.f32 %v5528_v47, %v2554_v15  ;;  %5533 = vtanh.f32 %v2503_v60 }
 0x349   :  { %v5530_v16 = vpop.eup %5529  ;;  %vm2577_vm15 = vcmp.eq.f32.partialorder %v2576_v62, 8.507059e+37 }
 0x34a   :  { %v5532_v39 = vpop.eup %5531  ;;  %v2568_v25 = vmul.f32 %v5530_v16, %v7007_v9  ;;  %v2556_v11 = vadd.f32 %v5528_v47, %v2555_v24  ;;  %vm2573_vm12 = vweird.f32 %v5530_v16 }
 0x34b   :  { %v2624_v15 = vmul.f32 %v5532_v39, %v2527_v21  ;;  %v2444_v42 = vpop.f32.mrf.mxu3  ;;  %vm2574_vm14 = vmor %vm2572_vm13, %vm2573_vm12 }
 0x34c   :  { %v2569_v48 = vsub.f32 1.0, %v2568_v25  ;;  %v2560_v0 = vsel %vm2559_vm9, %v5528_v47, %v2556_v11  ;;  %v2542_v25 = vsel %vm2539_vm11, %v2541_v8, %v2537_v58  ;;  %v8807_v58 = vld [vmem:[#allocation190_spill] sm:$0xff] }
 0x34d   :  { %v2565_v49 = vsel %vm2562_vm10, %v2564_v27, %v2560_v0 }
 0x34e   :  { %v2570_v60 = vmul.f32 %v5530_v16, %v2569_v48  ;;  %v2622_v24 = vmul.f32 %v2565_v49, %v6837_v41  ;;  %v5534_v39 = vpop.eup %5533 }
 0x34f   :  { %v2625_v50 = vmul.f32 %v5534_v39, %v2542_v25 }
 0x350   :  { %v7044_v47 = vadd.f32 %v2624_v15, %v2622_v24  ;;  %v2571_v13 = vadd.f32 %v5530_v16, %v2570_v60 }
 0x352   :  { %v2575_v21 = vsel %vm2574_vm14, %v5530_v16, %v2571_v13  ;;  %v8808_v16 = vld [vmem:[#allocation192_spill] sm:$0xff] }
 0x353   :  { %v2580_v4 = vsel %vm2577_vm15, %v2579_v18, %v2575_v21 }
 0x354   :  { %v2623_v19 = vmul.f32 %v2580_v4, %v6840_v32 }
 0x356   :  { %v7047_v20 = vadd.f32 %v2625_v50, %v2623_v19 }
 0x357   :  { %v2455_v11 = vpop.f32.mrf.mxu0 }
 0x35d   :  { %v2468_v41 = vpop.f32.mrf.mxu1  ;;  %v2481_v27 = vpop.f32.mrf.mxu2 }
 0x35e   :  { %v2469_v48 = vadd.f32 %v2468_v41, %v2455_v11 }
 0x35f   :  { %v2457_v0 = vpop.f32.mrf.mxu0 }
 0x360   :  { %v2504_v9 = vadd.f32 %v2469_v48, %v8807_v58 }
 0x362   :  { %v5213_v15 = vmul.f32 -1.442695, %v2504_v9 }
 0x363   :  { %v2494_v42 = vpop.f32.mrf.mxu3 }
 0x364   :  { %5535 = vpow2.f32 %v5213_v15  ;;  %v2495_v49 = vadd.f32 %v2494_v42, %v2481_v27 }
 0x365   :  { %v2470_v8 = vpop.f32.mrf.mxu1  ;;  %v2483_v31 = vpop.f32.mrf.mxu2 }
 0x366   :  { %v2505_v60 = vadd.f32 %v2495_v49, %v8808_v16 }
 0x368   :  { %v5214_v24 = vmul.f32 -1.442695, %v2505_v60 }
 0x36a   :  { %v5536_v62 = vpop.eup %5535  ;;  %5537 = vpow2.f32 %v5214_v24 }
 0x36b   :  { %v2590_v32 = vadd.f32 1.0, %v5536_v62  ;;  %v2496_v39 = vpop.f32.mrf.mxu3 }
 0x36d   :  { %5539 = vrcp.f32 %v2590_v32  ;;  %v2603_v4 = vand.u32 2147483648, %v2590_v32  ;;  %v2601_v11 = vand.u32 2147483647, %v2590_v32  ;;  %vm2597_vm1 = vweird.f32 %v2590_v32 }
 0x36f   :  { %v2604_v0 = vor.u32 1.1754944e-38, %v2603_v4  ;;  %vm2602_vm3 = vcmp.eq.f32.partialorder %v2601_v11, 8.507059e+37  ;;  %v8811_v4 = vld [vmem:[#allocation146_spill] sm:$0xff]  ;;  %v8813_v11 = vld [vmem:[#allocation141_spill] sm:$0xff] }
 0x370   :  { %v5538_v25 = vpop.eup %5537 }
 0x371   :  { %v2591_v13 = vadd.f32 1.0, %v5538_v25 }
 0x373   :  { %v5540_v50 = vpop.eup %5539  ;;  %5541 = vrcp.f32 %v2591_v13  ;;  %v2618_v49 = vand.u32 2147483648, %v2591_v13  ;;  %v2616_v16 = vand.u32 2147483647, %v2591_v13  ;;  %vm2612_vm5 = vweird.f32 %v2591_v13 }
 0x374   :  { %v2593_v18 = vmul.f32 %v5540_v50, %v2590_v32  ;;  %5543 = vtanh.f32 %v7044_v47  ;;  %vm2598_vm0 = vweird.f32 %v5540_v50 }
 0x375   :  { %vm2599_vm2 = vmor %vm2597_vm1, %vm2598_vm0  ;;  %5545 = vtanh.f32 %v7047_v20  ;;  %v2619_v62 = vor.u32 1.1754944e-38, %v2618_v49  ;;  %vm2617_vm7 = vcmp.eq.f32.partialorder %v2616_v16, 8.507059e+37  ;;  %v8822_v49 = vld [vmem:[#allocation162_spill] sm:$0xff]  ;;  %v8825_v16 = vld [vmem:[#allocation160_spill] sm:$0xff] }
 0x376   :  { %v2594_v21 = vsub.f32 1.0, %v2593_v18 }
 0x378   :  { %v2595_v19 = vmul.f32 %v5540_v50, %v2594_v21  ;;  %v8810_v21 = vld [vmem:[#allocation142_spill] sm:$0xff] }
 0x379   :  { %v5542_v41 = vpop.eup %5541 }
 0x37a   :  { %v2596_v27 = vadd.f32 %v5540_v50, %v2595_v19  ;;  %v2608_v48 = vmul.f32 %v5542_v41, %v2591_v13  ;;  %v5544_v15 = vpop.eup %5543  ;;  %vm2613_vm4 = vweird.f32 %v5542_v41  ;;  %v8809_v13 = vld [vmem:[#allocation136_spill] sm:$0xff]  ;;  %v8812_v19 = vld [vmem:[#allocation139_spill] sm:$0xff] }
 0x37b   :  { %vm2614_vm6 = vmor %vm2612_vm5, %vm2613_vm4  ;;  %v5546_v39 = vpop.eup %5545 }
 0x37c   :  { %v2600_v58 = vsel %vm2599_vm2, %v5540_v50, %v2596_v27  ;;  %v2609_v9 = vsub.f32 1.0, %v2608_v48  ;;  %v8815_v27 = vld [vmem:[#allocation152_spill] sm:$0xff]  ;;  %v8816_v48 = vld [vmem:[#allocation145_spill] sm:$0xff] }
 0x37d   :  { %v2605_v42 = vsel %vm2602_vm3, %v2604_v0, %v2600_v58  ;;  %v8817_v0 = vld [vmem:[#allocation149_spill] sm:$0xff]  ;;  %v8818_v58 = vld [vmem:[#allocation155_spill] sm:$0xff] }
 0x37e   :  { %v2630_v8 = vmul.f32 %v5544_v15, %v2605_v42  ;;  %v2610_v31 = vmul.f32 %v5542_v41, %v2609_v9  ;;  %v8819_v9 = vld [vmem:[#allocation158_spill] sm:$0xff]  ;;  %v8820_v15 = vld [vmem:[#allocation151_spill] sm:$0xff]  ;;  %v8821_v42 = vld [vmem:[#allocation153_spill] sm:$0xff] }
 0x380   :  { %v7053_v60 = vpack.c.bf16 %v2630_v8, %v2630_v8  ;;  %v2611_v24 = vadd.f32 %v5542_v41, %v2610_v31  ;;  %v8823_v8 = vld [vmem:[#allocation164_spill] sm:$0xff]  ;;  %v8824_v31 = vld [vmem:[#allocation157_spill] sm:$0xff] }
 0x382   :  { %v2615_v32 = vsel %vm2614_vm6, %v5542_v41, %v2611_v24  ;;  %2650 = vmatmul.bf16.vlgmr.msra.gmra.mxu0 %v7053_v60  ;;  %2676 = vmatmul.bf16.vlgmr.msra.gmra.mxu2 %v7053_v60  ;;  %v8814_v41 = vld [vmem:[#allocation150_spill] sm:$0xff] }
 0x383   :  { %v2620_v25 = vsel %vm2617_vm7, %v2619_v62, %v2615_v32  ;;  %2746 = vmatpush.bf16.msra.mxu0 %v8584_v55  ;;  %2772 = vmatpush.bf16.msra.mxu2 %v8585_v3  ;;  %v8826_v24 = vld [vmem:[#allocation166_spill] sm:$0xff]  ;;  %v8828_v32 = vld [vmem:[#allocation163_spill] sm:$0xff] }
 0x384   :  { %v2631_v50 = vmul.f32 %v5546_v39, %v2620_v25  ;;  %v8827_v62 = vld [vmem:[#allocation170_spill] sm:$0xff]  ;;  %v8829_v39 = vld [vmem:[#allocation165_spill] sm:$0xff] }
 0x385   :  { %v8830_v25 = vld [vmem:[#allocation174_spill] sm:$0xff] }
 0x386   :  { %v7059_v18 = vpack.c.bf16 %v2631_v50, %v2631_v50  ;;  %v8831_v50 = vld [vmem:[#allocation176_spill] sm:$0xff] }
 0x387   :  { %2747 = vmatpush.bf16.msra.mxu0 %v8586_v38  ;;  %2773 = vmatpush.bf16.msra.mxu2 %v8587_v29 }
 0x388   :  { %2663 = vmatmul.bf16.vlgmr.msra.gmra.mxu1 %v7059_v18  ;;  %2689 = vmatmul.bf16.vlgmr.msra.gmra.mxu3 %v7059_v18 }
 0x389   :  { %2759 = vmatpush.bf16.msra.mxu1 %v8588_v52  ;;  %2785 = vmatpush.bf16.msra.mxu3 %v8589_v57 }
 0x38b   :  { %2748 = vmatpush.bf16.msra.mxu0 %v8590_v34  ;;  %2774 = vmatpush.bf16.msra.mxu2 %v8591_v14 }
 0x38d   :  { %2760 = vmatpush.bf16.msra.mxu1 %v8592_v5  ;;  %2786 = vmatpush.bf16.msra.mxu3 %v8593_v61 }
 0x38f   :  { %2749 = vmatpush.bf16.msra.mxu0 %v8594_v54  ;;  %2775 = vmatpush.bf16.msra.mxu2 %v8595_v44 }
 0x391   :  { %2761 = vmatpush.bf16.msra.mxu1 %v8596_v53  ;;  %2787 = vmatpush.bf16.msra.mxu3 %v8597_v12 }
 0x392   :  { %2702 = vmatmul.bf16.vlgmr.msrb.gmra.mxu0 %v7053_v60  ;;  %2728 = vmatmul.bf16.vlgmr.msrb.gmra.mxu2 %v7053_v60 }
 0x393   :  { %2750 = vmatpush.bf16.msra.mxu0 %v8598_v36  ;;  %2776 = vmatpush.bf16.msra.mxu2 %v8599_v45 }
 0x395   :  { %2762 = vmatpush.bf16.msra.mxu1 %v8600_v2  ;;  %2788 = vmatpush.bf16.msra.mxu3 %v8601_v6 }
 0x397   :  { %2751 = vmatpush.bf16.msra.mxu0 %v8602_v33  ;;  %2777 = vmatpush.bf16.msra.mxu2 %v8603_v23 }
 0x398   :  { %2715 = vmatmul.bf16.vlgmr.msrb.gmra.mxu1 %v7059_v18  ;;  %2741 = vmatmul.bf16.vlgmr.msrb.gmra.mxu3 %v7059_v18 }
 0x399   :  { %2763 = vmatpush.bf16.msra.mxu1 %v8701_v26  ;;  %2789 = vmatpush.bf16.msra.mxu3 %v8702_v40 }
 0x39b   :  { %2752 = vmatpush.bf16.msra.mxu0 %v8703_v1  ;;  %2778 = vmatpush.bf16.msra.mxu2 %v8704_v37 }
 0x39d   :  { %2764 = vmatpush.bf16.msra.mxu1 %v8705_v7  ;;  %2790 = vmatpush.bf16.msra.mxu3 %v8706_v63 }
 0x39f   :  { %2753 = vmatpush.bf16.msra.mxu0 %v8707_v46  ;;  %2779 = vmatpush.bf16.msra.mxu2 %v8708_v51 }
 0x3a1   :  { %2765 = vmatpush.bf16.msra.mxu1 %v8711_v22  ;;  %2791 = vmatpush.bf16.msra.mxu3 %v8712_v17 }
 0x3a2   :  { %2754 = vmatmul.bf16.vlgmr.msra.gmra.mxu0 %v7053_v60  ;;  %2780 = vmatmul.bf16.vlgmr.msra.gmra.mxu2 %v7053_v60 }
 0x3a3   :  { %2798 = vmatpush.bf16.msrb.mxu0 %v8709_v43  ;;  %2824 = vmatpush.bf16.msrb.mxu2 %v8710_v59 }
 0x3a5   :  { %2766 = vmatpush.bf16.msra.mxu1 %v8715_v28  ;;  %2792 = vmatpush.bf16.msra.mxu3 %v8716_v30 }
 0x3a7   :  { %2799 = vmatpush.bf16.msrb.mxu0 %v8713_v10  ;;  %2825 = vmatpush.bf16.msrb.mxu2 %v8714_v35 }
 0x3a8   :  { %2767 = vmatmul.bf16.vlgmr.msra.gmra.mxu1 %v7059_v18  ;;  %2793 = vmatmul.bf16.vlgmr.msra.gmra.mxu3 %v7059_v18 }
 0x3a9   :  { %2811 = vmatpush.bf16.msrb.mxu1 %v8717_v56  ;;  %2837 = vmatpush.bf16.msrb.mxu3 %v8809_v13 }
 0x3ab   :  { %2800 = vmatpush.bf16.msrb.mxu0 %v8810_v21  ;;  %2826 = vmatpush.bf16.msrb.mxu2 %v8811_v4 }
 0x3ad   :  { %2812 = vmatpush.bf16.msrb.mxu1 %v8812_v19  ;;  %2838 = vmatpush.bf16.msrb.mxu3 %v8813_v11 }
 0x3af   :  { %2801 = vmatpush.bf16.msrb.mxu0 %v8814_v41  ;;  %2827 = vmatpush.bf16.msrb.mxu2 %v8815_v27 }
 0x3b1   :  { %2813 = vmatpush.bf16.msrb.mxu1 %v8816_v48  ;;  %2839 = vmatpush.bf16.msrb.mxu3 %v8817_v0  ;;  %v8903_v0 = vld [vmem:[#allocation121_spill] sm:$0xff] }
 0x3b3   :  { %2802 = vmatpush.bf16.msrb.mxu0 %v8818_v58  ;;  %2828 = vmatpush.bf16.msrb.mxu2 %v8819_v9 }
 0x3b5   :  { %2814 = vmatpush.bf16.msrb.mxu1 %v8820_v15  ;;  %2840 = vmatpush.bf16.msrb.mxu3 %v8821_v42  ;;  %v8832_v42 = vld [vmem:[#allocation16_spill] sm:$0xff] }
 0x3b7   :  { %2803 = vmatpush.bf16.msrb.mxu0 %v8822_v49  ;;  %2829 = vmatpush.bf16.msrb.mxu2 %v8823_v8  ;;  %v8833_v49 = vld [vmem:[#allocation18_spill] sm:$0xff]  ;;  %v8834_v8 = vld [vmem:[#allocation169_spill] sm:$0xff] }
 0x3b9   :  { %2815 = vmatpush.bf16.msrb.mxu1 %v8824_v31  ;;  %2841 = vmatpush.bf16.msrb.mxu3 %v8825_v16  ;;  %v8835_v31 = vld [vmem:[#allocation173_spill] sm:$0xff]  ;;  %v8901_v16 = vld [vmem:[#allocation119_spill] sm:$0xff] }
 0x3bb   :  { %2804 = vmatpush.bf16.msrb.mxu0 %v8826_v24  ;;  %2830 = vmatpush.bf16.msrb.mxu2 %v8827_v62  ;;  %v8836_v62 = vld [vmem:[#allocation20_spill] sm:$0xff] }
 0x3bd   :  { %2816 = vmatpush.bf16.msrb.mxu1 %v8828_v32  ;;  %2842 = vmatpush.bf16.msrb.mxu3 %v8829_v39  ;;  %v8837_v32 = vld [vmem:[#allocation22_spill] sm:$0xff]  ;;  %v8838_v39 = vld [vmem:[#allocation175_spill] sm:$0xff] }
 0x3bf   :  { %2805 = vmatpush.bf16.msrb.mxu0 %v8830_v25  ;;  %2831 = vmatpush.bf16.msrb.mxu2 %v8831_v50  ;;  %v8839_v25 = vld [vmem:[#allocation177_spill] sm:$0xff] }
 0x3c0   :  { %v8840_v50 = vld [vmem:[#allocation17_spill] sm:$0xff] }
 0x3c1   :  { %2817 = vmatpush.bf16.msrb.mxu1 %v8834_v8  ;;  %2843 = vmatpush.bf16.msrb.mxu3 %v8835_v31  ;;  %v8842_v31 = vld [vmem:[#allocation24_spill] sm:$0xff]  ;;  %v8843_v8 = vld [vmem:[#allocation26_spill] sm:$0xff] }
 0x3c2   :  { %2806 = vmatmul.bf16.vlgmr.msrb.gmra.mxu0 %v7053_v60  ;;  %2832 = vmatmul.bf16.vlgmr.msrb.gmra.mxu2 %v7053_v60  ;;  %v8844_v60 = vld [vmem:[#allocation21_spill] sm:$0xff] }
 0x3c3   :  { %2994 = vmatpush.bf16.msra.mxu0 %v8832_v42  ;;  %3020 = vmatpush.bf16.msra.mxu2 %v8833_v49  ;;  %v8841_v42 = vld [vmem:[#allocation19_spill] sm:$0xff]  ;;  %v8851_v49 = vld [vmem:[#allocation34_spill] sm:$0xff] }
 0x3c5   :  { %2818 = vmatpush.bf16.msrb.mxu1 %v8838_v39  ;;  %2844 = vmatpush.bf16.msrb.mxu3 %v8839_v25  ;;  %v8847_v39 = vld [vmem:[#allocation30_spill] sm:$0xff]  ;;  %v8848_v25 = vld [vmem:[#allocation25_spill] sm:$0xff] }
 0x3c7   :  { %2995 = vmatpush.bf16.msra.mxu0 %v8836_v62  ;;  %3021 = vmatpush.bf16.msra.mxu2 %v8837_v32  ;;  %v8845_v62 = vld [vmem:[#allocation23_spill] sm:$0xff]  ;;  %v8846_v32 = vld [vmem:[#allocation28_spill] sm:$0xff] }
 0x3c8   :  { %2819 = vmatmul.bf16.vlgmr.msrb.gmra.mxu1 %v7059_v18  ;;  %2845 = vmatmul.bf16.vlgmr.msrb.gmra.mxu3 %v7059_v18  ;;  %v8852_v18 = vld [vmem:[#allocation29_spill] sm:$0xff] }
 0x3c9   :  { %3007 = vmatpush.bf16.msra.mxu1 %v8840_v50  ;;  %3033 = vmatpush.bf16.msra.mxu3 %v8841_v42  ;;  %v8849_v50 = vld [vmem:[#allocation27_spill] sm:$0xff]  ;;  %v8850_v42 = vld [vmem:[#allocation32_spill] sm:$0xff] }
 0x3cb   :  { %2996 = vmatpush.bf16.msra.mxu0 %v8842_v31  ;;  %3022 = vmatpush.bf16.msra.mxu2 %v8843_v8  ;;  %v8853_v31 = vld [vmem:[#allocation31_spill] sm:$0xff]  ;;  %v8854_v8 = vld [vmem:[#allocation36_spill] sm:$0xff] }
 0x3cd   :  { %3008 = vmatpush.bf16.msra.mxu1 %v8844_v60  ;;  %3034 = vmatpush.bf16.msra.mxu3 %v8845_v62  ;;  %v8855_v60 = vld [vmem:[#allocation38_spill] sm:$0xff]  ;;  %v8856_v62 = vld [vmem:[#allocation33_spill] sm:$0xff] }
 0x3cf   :  { %2997 = vmatpush.bf16.msra.mxu0 %v8846_v32  ;;  %3023 = vmatpush.bf16.msra.mxu2 %v8847_v39  ;;  %v8857_v32 = vld [vmem:[#allocation35_spill] sm:$0xff]  ;;  %v8858_v39 = vld [vmem:[#allocation40_spill] sm:$0xff] }
 0x3d1   :  { %3009 = vmatpush.bf16.msra.mxu1 %v8848_v25  ;;  %3035 = vmatpush.bf16.msra.mxu3 %v8849_v50  ;;  %v8859_v25 = vld [vmem:[#allocation42_spill] sm:$0xff]  ;;  %v8860_v50 = vld [vmem:[#allocation37_spill] sm:$0xff] }
 0x3d3   :  { %2998 = vmatpush.bf16.msra.mxu0 %v8850_v42  ;;  %3024 = vmatpush.bf16.msra.mxu2 %v8851_v49  ;;  %v8861_v42 = vld [vmem:[#allocation39_spill] sm:$0xff]  ;;  %v8862_v49 = vld [vmem:[#allocation44_spill] sm:$0xff] }
 0x3d5   :  { %3010 = vmatpush.bf16.msra.mxu1 %v8852_v18  ;;  %3036 = vmatpush.bf16.msra.mxu3 %v8853_v31  ;;  %v8863_v18 = vld [vmem:[#allocation46_spill] sm:$0xff]  ;;  %v8864_v31 = vld [vmem:[#allocation48_spill] sm:$0xff] }
 0x3d7   :  { %2999 = vmatpush.bf16.msra.mxu0 %v8854_v8  ;;  %3025 = vmatpush.bf16.msra.mxu2 %v8855_v60  ;;  %v8865_v8 = vld [vmem:[#allocation50_spill] sm:$0xff]  ;;  %v8866_v60 = vld [vmem:[#allocation41_spill] sm:$0xff] }
 0x3d9   :  { %3011 = vmatpush.bf16.msra.mxu1 %v8856_v62  ;;  %3037 = vmatpush.bf16.msra.mxu3 %v8857_v32  ;;  %v8867_v62 = vld [vmem:[#allocation43_spill] sm:$0xff]  ;;  %v8868_v32 = vld [vmem:[#allocation52_spill] sm:$0xff] }
 0x3db   :  { %3000 = vmatpush.bf16.msra.mxu0 %v8858_v39  ;;  %3026 = vmatpush.bf16.msra.mxu2 %v8859_v25  ;;  %v8869_v39 = vld [vmem:[#allocation54_spill] sm:$0xff]  ;;  %v8870_v25 = vld [vmem:[#allocation45_spill] sm:$0xff] }
 0x3dd   :  { %3012 = vmatpush.bf16.msra.mxu1 %v8860_v50  ;;  %3038 = vmatpush.bf16.msra.mxu3 %v8861_v42  ;;  %v8871_v50 = vld [vmem:[#allocation47_spill] sm:$0xff]  ;;  %v8872_v42 = vld [vmem:[#allocation49_spill] sm:$0xff] }
 0x3df   :  { %3001 = vmatpush.bf16.msra.mxu0 %v8862_v49  ;;  %3027 = vmatpush.bf16.msra.mxu2 %v8863_v18  ;;  %v8873_v49 = vld [vmem:[#allocation51_spill] sm:$0xff]  ;;  %v8874_v18 = vld [vmem:[#allocation56_spill] sm:$0xff] }
 0x3e1   :  { %3013 = vmatpush.bf16.msra.mxu1 %v8866_v60  ;;  %3039 = vmatpush.bf16.msra.mxu3 %v8867_v62  ;;  %v8877_v60 = vld [vmem:[#allocation55_spill] sm:$0xff]  ;;  %v8878_v62 = vld [vmem:[#allocation60_spill] sm:$0xff] }
 0x3e3   :  { %3046 = vmatpush.bf16.msrb.mxu0 %v8864_v31  ;;  %3072 = vmatpush.bf16.msrb.mxu2 %v8865_v8  ;;  %v8875_v31 = vld [vmem:[#allocation58_spill] sm:$0xff]  ;;  %v8876_v8 = vld [vmem:[#allocation53_spill] sm:$0xff] }
 0x3e5   :  { %3014 = vmatpush.bf16.msra.mxu1 %v8870_v25  ;;  %3040 = vmatpush.bf16.msra.mxu3 %v8871_v50  ;;  %v8881_v25 = vld [vmem:[#allocation59_spill] sm:$0xff]  ;;  %v8882_v50 = vld [vmem:[#allocation64_spill] sm:$0xff] }
 0x3e7   :  { %3047 = vmatpush.bf16.msrb.mxu0 %v8868_v32  ;;  %3073 = vmatpush.bf16.msrb.mxu2 %v8869_v39  ;;  %v8879_v32 = vld [vmem:[#allocation62_spill] sm:$0xff]  ;;  %v8880_v39 = vld [vmem:[#allocation57_spill] sm:$0xff] }
 0x3e9   :  { %3059 = vmatpush.bf16.msrb.mxu1 %v8872_v42  ;;  %3085 = vmatpush.bf16.msrb.mxu3 %v8873_v49  ;;  %v8883_v42 = vld [vmem:[#allocation66_spill] sm:$0xff]  ;;  %v8884_v49 = vld [vmem:[#allocation61_spill] sm:$0xff] }
 0x3eb   :  { %3048 = vmatpush.bf16.msrb.mxu0 %v8874_v18  ;;  %3074 = vmatpush.bf16.msrb.mxu2 %v8875_v31  ;;  %v8885_v18 = vld [vmem:[#allocation63_spill] sm:$0xff]  ;;  %v8886_v31 = vld [vmem:[#allocation68_spill] sm:$0xff] }
 0x3ed   :  { %3060 = vmatpush.bf16.msrb.mxu1 %v8876_v8  ;;  %3086 = vmatpush.bf16.msrb.mxu3 %v8877_v60  ;;  %v8887_v8 = vld [vmem:[#allocation70_spill] sm:$0xff]  ;;  %v8888_v60 = vld [vmem:[#allocation65_spill] sm:$0xff] }
 0x3ef   :  { %3049 = vmatpush.bf16.msrb.mxu0 %v8878_v62  ;;  %3075 = vmatpush.bf16.msrb.mxu2 %v8879_v32  ;;  %v8889_v62 = vld [vmem:[#allocation67_spill] sm:$0xff]  ;;  %v8890_v32 = vld [vmem:[#allocation72_spill] sm:$0xff] }
 0x3f1   :  { %3061 = vmatpush.bf16.msrb.mxu1 %v8880_v39  ;;  %3087 = vmatpush.bf16.msrb.mxu3 %v8881_v25  ;;  %v8891_v39 = vld [vmem:[#allocation74_spill] sm:$0xff]  ;;  %v8892_v25 = vld [vmem:[#allocation69_spill] sm:$0xff] }
 0x3f3   :  { %3050 = vmatpush.bf16.msrb.mxu0 %v8882_v50  ;;  %3076 = vmatpush.bf16.msrb.mxu2 %v8883_v42  ;;  %v8893_v50 = vld [vmem:[#allocation71_spill] sm:$0xff]  ;;  %v8894_v42 = vld [vmem:[#allocation76_spill] sm:$0xff] }
 0x3f5   :  { %3062 = vmatpush.bf16.msrb.mxu1 %v8884_v49  ;;  %3088 = vmatpush.bf16.msrb.mxu3 %v8885_v18  ;;  %v8895_v49 = vld [vmem:[#allocation78_spill] sm:$0xff]  ;;  %v8896_v18 = vld [vmem:[#allocation73_spill] sm:$0xff] }
 0x3f7   :  { %3051 = vmatpush.bf16.msrb.mxu0 %v8886_v31  ;;  %3077 = vmatpush.bf16.msrb.mxu2 %v8887_v8  ;;  %v8897_v31 = vld [vmem:[#allocation75_spill] sm:$0xff]  ;;  %v8898_v8 = vld [vmem:[#allocation77_spill] sm:$0xff] }
 0x3f9   :  { %3063 = vmatpush.bf16.msrb.mxu1 %v8888_v60  ;;  %3089 = vmatpush.bf16.msrb.mxu3 %v8889_v62  ;;  %v8899_v60 = vld [vmem:[#allocation79_spill] sm:$0xff] }
 0x3fb   :  { %3052 = vmatpush.bf16.msrb.mxu0 %v8890_v32  ;;  %3078 = vmatpush.bf16.msrb.mxu2 %v8891_v39  ;;  %v8900_v39 = vld [vmem:[#allocation98_spill] sm:$0xff] }
 0x3fd   :  { %3064 = vmatpush.bf16.msrb.mxu1 %v8892_v25  ;;  %3090 = vmatpush.bf16.msrb.mxu3 %v8893_v50  ;;  %v531_v25 = vadd.f32 %v8901_v16, %v8900_v39 }
 0x3ff   :  { %3053 = vmatpush.bf16.msrb.mxu0 %v8894_v42  ;;  %3079 = vmatpush.bf16.msrb.mxu2 %v8895_v49  ;;  %v2651_v62 = vpop.f32.mrf.mxu0  ;;  %v8902_v49 = vld [vmem:[#allocation104_spill] sm:$0xff] }
 0x401   :  { %3065 = vmatpush.bf16.msrb.mxu1 %v8896_v18  ;;  %3091 = vmatpush.bf16.msrb.mxu3 %v8897_v31  ;;  %v560_v18 = vadd.f32 %v8903_v0, %v8902_v49 }
 0x405   :  { %3066 = vmatpush.bf16.msrb.mxu1 %v8898_v8  ;;  %3092 = vmatpush.bf16.msrb.mxu3 %v8899_v60  ;;  %v2664_v32 = vpop.f32.mrf.mxu1  ;;  %v2677_v24 = vpop.f32.mrf.mxu2 }
 0x406   :  { %v2665_v15 = vadd.f32 %v2664_v32, %v2651_v62  ;;  %v8904_v32 = vld [vmem:[#allocation112_spill] sm:$0xff] }
 0x407   :  { %v2653_v50 = vpop.f32.mrf.mxu0 }
 0x408   :  { %v2850_v9 = vadd.f32 %v2665_v15, %v531_v25  ;;  %v8905_v15 = vld [vmem:[#allocation129_spill] sm:$0xff] }
 0x40a   :  { %v5215_v42 = vmul.f32 -1.442695, %v2850_v9  ;;  %v589_v9 = vadd.f32 %v8905_v15, %v8904_v32 }
 0x40b   :  { %v2690_v58 = vpop.f32.mrf.mxu3 }
 0x40c   :  { %5547 = vpow2.f32 %v5215_v42  ;;  %v2691_v31 = vadd.f32 %v2690_v58, %v2677_v24 }
 0x40d   :  { %v2666_v48 = vpop.f32.mrf.mxu1  ;;  %v2679_v8 = vpop.f32.mrf.mxu2 }
 0x40e   :  { %v2851_v27 = vadd.f32 %v2691_v31, %v560_v18 }
 0x40f   :  { %v2703_v60 = vpop.f32.mrf.mxu0 }
 0x410   :  { %v5216_v41 = vmul.f32 -1.442695, %v2851_v27 }
 0x412   :  { %v5548_v11 = vpop.eup %5547  ;;  %5549 = vpow2.f32 %v5216_v41 }
 0x413   :  { %v2864_v19 = vadd.f32 1.0, %v5548_v11  ;;  %v2692_v4 = vpop.f32.mrf.mxu3  ;;  %v8906_v11 = vld [vmem:[#allocation113_spill] sm:$0xff] }
 0x414   :  { %v8907_v4 = vld [vmem:[#allocation132_spill] sm:$0xff] }
 0x415   :  { %v2716_v16 = vpop.f32.mrf.mxu1  ;;  %v2729_v62 = vpop.f32.mrf.mxu2  ;;  %5551 = vrcp.f32 %v2864_v19  ;;  %v618_v41 = vadd.f32 %v8907_v4, %v8906_v11  ;;  %v8909_v4 = vld [vmem:[#allocation191_spill] sm:$0xff]  ;;  %vm2871_vm9 = vweird.f32 %v2864_v19 }
 0x416   :  { %v2717_v25 = vadd.f32 %v2716_v16, %v2703_v60 }
 0x417   :  { %v2705_v50 = vpop.f32.mrf.mxu0 }
 0x418   :  { %v5550_v0 = vpop.eup %5549  ;;  %v2852_v42 = vadd.f32 %v2717_v25, %v589_v9 }
 0x419   :  { %v7207_v58 = vadd.f32 1.0, %v5550_v0 }
 0x41a   :  { %v5217_v48 = vmul.f32 -1.442695, %v2852_v42 }
 0x41b   :  { %5553 = vrcp.f32 %v7207_v58  ;;  %v2742_v27 = vpop.f32.mrf.mxu3  ;;  %v7210_v8 = vpop.eup %5551  ;;  %vm2886_vm14 = vweird.f32 %v7207_v58 }
 0x41c   :  { %5555 = vpow2.f32 %v5217_v48  ;;  %v2743_v31 = vadd.f32 %v2742_v27, %v2729_v62  ;;  %v2867_v60 = vmul.f32 %v7210_v8, %v2864_v19  ;;  %v8908_v27 = vld [vmem:[#allocation182_spill] sm:$0xff]  ;;  %vm2872_vm8 = vweird.f32 %v7210_v8 }
 0x41d   :  { %v2718_v24 = vpop.f32.mrf.mxu1  ;;  %v2731_v18 = vpop.f32.mrf.mxu2  ;;  %vm7230_vm10 = vmor %vm2871_vm9, %vm2872_vm8 }
 0x41e   :  { %v2853_v15 = vadd.f32 %v2743_v31, %v618_v41  ;;  %v2868_v0 = vsub.f32 1.0, %v2867_v60  ;;  %v647_v41 = vadd.f32 %v8909_v4, %v8908_v27  ;;  %v8911_v4 = vld [vmem:[#allocation193_spill] sm:$0xff] }
 0x41f   :  { %v2755_v16 = vpop.f32.mrf.mxu0 }
 0x420   :  { %v5218_v9 = vmul.f32 -1.442695, %v2853_v15  ;;  %v2869_v24 = vmul.f32 %v7210_v8, %v2868_v0 }
 0x421   :  { %v7215_v25 = vpop.eup %5553 }
 0x422   :  { %v5556_v50 = vpop.eup %5555  ;;  %5557 = vpow2.f32 %v5218_v9  ;;  %v2882_v49 = vmul.f32 %v7215_v25, %v7207_v58  ;;  %v2875_v9 = vand.u32 2147483647, %v2864_v19  ;;  %v2870_v21 = vadd.f32 %v7210_v8, %v2869_v24 }
 0x423   :  { %v2902_v42 = vadd.f32 1.0, %v5556_v50  ;;  %v2744_v32 = vpop.f32.mrf.mxu3  ;;  %vm2887_vm12 = vweird.f32 %v7215_v25 }
 0x424   :  { %v2883_v11 = vsub.f32 1.0, %v2882_v49  ;;  %v2877_v32 = vand.u32 2147483648, %v2864_v19  ;;  %vm7234_vm11 = vcmp.eq.f32.partialorder %v2875_v9, 8.507059e+37  ;;  %v2890_v9 = vand.u32 2147483647, %v7207_v58  ;;  %vm7251_vm0 = vmor %vm2886_vm14, %vm2887_vm12 }
 0x425   :  { %5559 = vrcp.f32 %v2902_v42  ;;  %v2781_v48 = vpop.f32.mrf.mxu2  ;;  %v2768_v62 = vpop.f32.mrf.mxu1  ;;  %v2915_v56 = vand.u32 2147483648, %v2902_v42  ;;  %vm2909_vm15 = vweird.f32 %v2902_v42 }
 0x426   :  { %v2769_v31 = vadd.f32 %v2768_v62, %v2755_v16  ;;  %v2884_v0 = vmul.f32 %v7215_v25, %v2883_v11  ;;  %v8910_v62 = vld [vmem:[#allocation184_spill] sm:$0xff]  ;;  %v2878_v27 = vor.u32 1.1754944e-38, %v2877_v32  ;;  %v2874_v11 = vsel %vm7230_vm10, %v7210_v8, %v2870_v21 }
 0x427   :  { %v2757_v18 = vpop.f32.mrf.mxu0  ;;  %v676_v49 = vadd.f32 %v8911_v4, %v8910_v62  ;;  %v2892_v32 = vand.u32 2147483648, %v7207_v58  ;;  %vm2891_vm3 = vcmp.eq.f32.partialorder %v2890_v9, 8.507059e+37  ;;  %v8945_v62 = vld [vmem:[#allocation176_spill] sm:$0xff] }
 0x428   :  { %v5558_v15 = vpop.eup %5557  ;;  %v2854_v60 = vadd.f32 %v2769_v31, %v647_v41  ;;  %v2879_v8 = vsel %vm7234_vm11, %v2878_v27, %v2874_v11 }
 0x429   :  { %v7222_v39 = vadd.f32 1.0, %v5558_v15  ;;  %v2893_v11 = vor.u32 1.1754944e-38, %v2892_v32 }
 0x42b   :  { %v5560_v50 = vpop.eup %5559  ;;  %5561 = vrcp.f32 %v7222_v39  ;;  %v2794_v16 = vpop.f32.mrf.mxu3  ;;  %v2930_v27 = vand.u32 2147483648, %v7222_v39  ;;  %vm2924_vm5 = vweird.f32 %v7222_v39 }
 0x42c   :  { %v2905_v13 = vmul.f32 %v5560_v50, %v2902_v42  ;;  %5563 = vtanh.f32 %v2854_v60  ;;  %v2795_v18 = vadd.f32 %v2794_v16, %v2781_v48  ;;  %vm2910_vm13 = vweird.f32 %v5560_v50 }
 0x42d   :  { %v2783_v41 = vpop.f32.mrf.mxu2  ;;  %v2770_v60 = vpop.f32.mrf.mxu1  ;;  %v2885_v48 = vadd.f32 %v7215_v25, %v2884_v0  ;;  %vm2911_vm1 = vmor %vm2909_vm15, %vm2910_vm13 }
 0x42e   :  { %v2906_v31 = vsub.f32 1.0, %v2905_v13  ;;  %v2855_v4 = vadd.f32 %v2795_v18, %v676_v49  ;;  %v2913_v13 = vand.u32 2147483647, %v2902_v42  ;;  %v2916_v18 = vor.u32 1.1754944e-38, %v2915_v56 }
 0x42f   :  { %v2889_v42 = vsel %vm7251_vm0, %v7215_v25, %v2885_v48  ;;  %v2928_v56 = vand.u32 2147483647, %v7222_v39  ;;  %v2931_v48 = vor.u32 1.1754944e-38, %v2930_v27  ;;  %v8921_v27 = vld [vmem:[#allocation195_spill] sm:$0xff] }
 0x430   :  { %v2907_v19 = vmul.f32 %v5560_v50, %v2906_v31  ;;  %5565 = vtanh.f32 %v2855_v4  ;;  %vm2914_vm2 = vcmp.eq.f32.partialorder %v2913_v13, 8.507059e+37 }
 0x431   :  { %v5562_v16 = vpop.eup %5561  ;;  %vm2929_vm7 = vcmp.eq.f32.partialorder %v2928_v56, 8.507059e+37 }
 0x432   :  { %v5564_v41 = vpop.eup %5563  ;;  %v2920_v21 = vmul.f32 %v5562_v16, %v7222_v39  ;;  %v2908_v49 = vadd.f32 %v5560_v50, %v2907_v19  ;;  %vm2925_vm4 = vweird.f32 %v5562_v16 }
 0x433   :  { %v2976_v31 = vmul.f32 %v5564_v41, %v2879_v8  ;;  %v2796_v60 = vpop.f32.mrf.mxu3  ;;  %vm2926_vm6 = vmor %vm2924_vm5, %vm2925_vm4 }
 0x434   :  { %v2921_v15 = vsub.f32 1.0, %v2920_v21  ;;  %v2912_v58 = vsel %vm2911_vm1, %v5560_v50, %v2908_v49  ;;  %v2894_v21 = vsel %vm2891_vm3, %v2893_v11, %v2889_v42 }
 0x435   :  { %v2917_v24 = vsel %vm2914_vm2, %v2916_v18, %v2912_v58  ;;  %v8919_v58 = vld [vmem:[#allocation194_spill] sm:$0xff] }
 0x436   :  { %v2922_v4 = vmul.f32 %v5562_v16, %v2921_v15  ;;  %v2974_v19 = vmul.f32 %v2917_v24, %v7044_v47  ;;  %v5566_v41 = vpop.eup %5565  ;;  %v8918_v15 = vld [vmem:[#allocation188_spill] sm:$0xff] }
 0x437   :  { %v2977_v25 = vmul.f32 %v5566_v41, %v2894_v21  ;;  %v705_v42 = vadd.f32 %v8919_v58, %v8918_v15  ;;  %v8944_v15 = vld [vmem:[#allocation174_spill] sm:$0xff] }
 0x438   :  { %v7262_v50 = vadd.f32 %v2976_v31, %v2974_v19  ;;  %v2923_v13 = vadd.f32 %v5562_v16, %v2922_v4  ;;  %v8920_v4 = vld [vmem:[#allocation189_spill] sm:$0xff] }
 0x43a   :  { %v2927_v8 = vsel %vm2926_vm6, %v5562_v16, %v2923_v13  ;;  %v734_v16 = vadd.f32 %v8921_v27, %v8920_v4  ;;  %v8943_v4 = vld [vmem:[#allocation165_spill] sm:$0xff] }
 0x43b   :  { %v2932_v9 = vsel %vm2929_vm7, %v2931_v48, %v2927_v8 }
 0x43c   :  { %v2975_v32 = vmul.f32 %v2932_v9, %v7047_v20 }
 0x43e   :  { %v7265_v0 = vadd.f32 %v2977_v25, %v2975_v32 }
 0x43f   :  { %v2807_v49 = vpop.f32.mrf.mxu0 }
 0x445   :  { %v2820_v47 = vpop.f32.mrf.mxu1  ;;  %v2833_v18 = vpop.f32.mrf.mxu2 }
 0x446   :  { %v2821_v39 = vadd.f32 %v2820_v47, %v2807_v49 }
 0x447   :  { %v2809_v31 = vpop.f32.mrf.mxu0 }
 0x448   :  { %v2856_v60 = vadd.f32 %v2821_v39, %v705_v42 }
 0x44a   :  { %v5219_v24 = vmul.f32 -1.442695, %v2856_v60 }
 0x44b   :  { %v2846_v11 = vpop.f32.mrf.mxu3 }
 0x44c   :  { %5567 = vpow2.f32 %v5219_v24  ;;  %v2847_v19 = vadd.f32 %v2846_v11, %v2833_v18 }
 0x44d   :  { %v2822_v56 = vpop.f32.mrf.mxu1  ;;  %v2835_v20 = vpop.f32.mrf.mxu2 }
 0x44e   :  { %v2857_v41 = vadd.f32 %v2847_v19, %v734_v16 }
 0x450   :  { %v5220_v21 = vmul.f32 -1.442695, %v2857_v41 }
 0x452   :  { %v5568_v13 = vpop.eup %5567  ;;  %5569 = vpow2.f32 %v5220_v21 }
 0x453   :  { %v2942_v25 = vadd.f32 1.0, %v5568_v13  ;;  %v2848_v48 = vpop.f32.mrf.mxu3 }
 0x455   :  { %5571 = vrcp.f32 %v2942_v25  ;;  %v2955_v58 = vand.u32 2147483648, %v2942_v25  ;;  %v2953_v18 = vand.u32 2147483647, %v2942_v25  ;;  %vm2949_vm9 = vweird.f32 %v2942_v25 }
 0x457   :  { %v2956_v24 = vor.u32 1.1754944e-38, %v2955_v58  ;;  %vm2954_vm11 = vcmp.eq.f32.partialorder %v2953_v18, 8.507059e+37  ;;  %v8924_v18 = vld [vmem:[#allocation142_spill] sm:$0xff] }
 0x458   :  { %v5570_v8 = vpop.eup %5569 }
 0x459   :  { %v2943_v9 = vadd.f32 1.0, %v5570_v8 }
 0x45b   :  { %v5572_v32 = vpop.eup %5571  ;;  %5573 = vrcp.f32 %v2943_v9  ;;  %v2970_v56 = vand.u32 2147483648, %v2943_v9  ;;  %v2968_v21 = vand.u32 2147483647, %v2943_v9  ;;  %vm2964_vm13 = vweird.f32 %v2943_v9 }
 0x45c   :  { %v2945_v49 = vmul.f32 %v5572_v32, %v2942_v25  ;;  %5575 = vtanh.f32 %v7262_v50  ;;  %vm2950_vm8 = vweird.f32 %v5572_v32 }
 0x45d   :  { %vm2951_vm10 = vmor %vm2949_vm9, %vm2950_vm8  ;;  %5577 = vtanh.f32 %v7265_v0  ;;  %v2971_v25 = vor.u32 1.1754944e-38, %v2970_v56  ;;  %vm2969_vm15 = vcmp.eq.f32.partialorder %v2968_v21, 8.507059e+37  ;;  %v8933_v56 = vld [vmem:[#allocation158_spill] sm:$0xff] }
 0x45e   :  { %v2946_v47 = vsub.f32 1.0, %v2945_v49  ;;  %v8936_v21 = vld [vmem:[#allocation162_spill] sm:$0xff] }
 0x460   :  { %v2947_v42 = vmul.f32 %v5572_v32, %v2946_v47 }
 0x461   :  { %v5574_v39 = vpop.eup %5573 }
 0x462   :  { %v2948_v31 = vadd.f32 %v5572_v32, %v2947_v42  ;;  %v2960_v60 = vmul.f32 %v5574_v39, %v2943_v9  ;;  %v5576_v16 = vpop.eup %5575  ;;  %vm2965_vm12 = vweird.f32 %v5574_v39  ;;  %v8922_v9 = vld [vmem:[#allocation133_spill] sm:$0xff]  ;;  %v8923_v42 = vld [vmem:[#allocation136_spill] sm:$0xff] }
 0x463   :  { %vm2966_vm14 = vmor %vm2964_vm13, %vm2965_vm12 }
 0x464   :  { %v2952_v11 = vsel %vm2951_vm10, %v5572_v32, %v2948_v31  ;;  %v2961_v27 = vsub.f32 1.0, %v2960_v60  ;;  %v5578_v32 = vpop.eup %5577  ;;  %v8926_v31 = vld [vmem:[#allocation139_spill] sm:$0xff]  ;;  %v8927_v60 = vld [vmem:[#allocation141_spill] sm:$0xff] }
 0x465   :  { %v2957_v19 = vsel %vm2954_vm11, %v2956_v24, %v2952_v11  ;;  %v8928_v24 = vld [vmem:[#allocation150_spill] sm:$0xff]  ;;  %v8929_v11 = vld [vmem:[#allocation152_spill] sm:$0xff] }
 0x466   :  { %v2982_v20 = vmul.f32 %v5576_v16, %v2957_v19  ;;  %v2962_v41 = vmul.f32 %v5574_v39, %v2961_v27  ;;  %v8930_v27 = vld [vmem:[#allocation145_spill] sm:$0xff]  ;;  %v8932_v19 = vld [vmem:[#allocation155_spill] sm:$0xff] }
 0x467   :  { %v8931_v16 = vld [vmem:[#allocation149_spill] sm:$0xff] }
 0x468   :  { %v7273_v13 = vpack.c.bf16 %v2982_v20, %v2982_v20  ;;  %v2963_v48 = vadd.f32 %v5574_v39, %v2962_v41  ;;  %v8934_v20 = vld [vmem:[#allocation151_spill] sm:$0xff]  ;;  %v8935_v41 = vld [vmem:[#allocation153_spill] sm:$0xff] }
 0x46a   :  { %v2967_v8 = vsel %vm2966_vm14, %v5574_v39, %v2963_v48  ;;  %3002 = vmatmul.bf16.vlgmr.msra.gmra.mxu0 %v7273_v13  ;;  %3028 = vmatmul.bf16.vlgmr.msra.gmra.mxu2 %v7273_v13  ;;  %v8925_v39 = vld [vmem:[#allocation146_spill] sm:$0xff]  ;;  %v8937_v48 = vld [vmem:[#allocation164_spill] sm:$0xff] }
 0x46b   :  { %v2972_v49 = vsel %vm2969_vm15, %v2971_v25, %v2967_v8  ;;  %3098 = vmatpush.bf16.msra.mxu0 %v8584_v55  ;;  %3124 = vmatpush.bf16.msra.mxu2 %v8585_v3  ;;  %v8938_v25 = vld [vmem:[#allocation157_spill] sm:$0xff]  ;;  %v8939_v8 = vld [vmem:[#allocation160_spill] sm:$0xff] }
 0x46c   :  { %v2983_v47 = vmul.f32 %v5578_v32, %v2972_v49  ;;  %v8940_v32 = vld [vmem:[#allocation166_spill] sm:$0xff] }
 0x46d   :  { %v8941_v49 = vld [vmem:[#allocation170_spill] sm:$0xff] }
 0x46e   :  { %v7279_v58 = vpack.c.bf16 %v2983_v47, %v2983_v47  ;;  %v8942_v47 = vld [vmem:[#allocation163_spill] sm:$0xff] }
 0x46f   :  { %3099 = vmatpush.bf16.msra.mxu0 %v8586_v38  ;;  %3125 = vmatpush.bf16.msra.mxu2 %v8587_v29 }
 0x470   :  { %3015 = vmatmul.bf16.vlgmr.msra.gmra.mxu1 %v7279_v58  ;;  %3041 = vmatmul.bf16.vlgmr.msra.gmra.mxu3 %v7279_v58 }
 0x471   :  { %3111 = vmatpush.bf16.msra.mxu1 %v8588_v52  ;;  %3137 = vmatpush.bf16.msra.mxu3 %v8589_v57 }
 0x473   :  { %3100 = vmatpush.bf16.msra.mxu0 %v8590_v34  ;;  %3126 = vmatpush.bf16.msra.mxu2 %v8591_v14 }
 0x475   :  { %3112 = vmatpush.bf16.msra.mxu1 %v8592_v5  ;;  %3138 = vmatpush.bf16.msra.mxu3 %v8593_v61 }
 0x477   :  { %3101 = vmatpush.bf16.msra.mxu0 %v8594_v54  ;;  %3127 = vmatpush.bf16.msra.mxu2 %v8595_v44 }
 0x479   :  { %3113 = vmatpush.bf16.msra.mxu1 %v8596_v53  ;;  %3139 = vmatpush.bf16.msra.mxu3 %v8597_v12 }
 0x47a   :  { %3054 = vmatmul.bf16.vlgmr.msrb.gmra.mxu0 %v7273_v13  ;;  %3080 = vmatmul.bf16.vlgmr.msrb.gmra.mxu2 %v7273_v13 }
 0x47b   :  { %3102 = vmatpush.bf16.msra.mxu0 %v8598_v36  ;;  %3128 = vmatpush.bf16.msra.mxu2 %v8599_v45 }
 0x47d   :  { %3114 = vmatpush.bf16.msra.mxu1 %v8600_v2  ;;  %3140 = vmatpush.bf16.msra.mxu3 %v8601_v6 }
 0x47f   :  { %3103 = vmatpush.bf16.msra.mxu0 %v8602_v33  ;;  %3129 = vmatpush.bf16.msra.mxu2 %v8603_v23 }
 0x480   :  { %3067 = vmatmul.bf16.vlgmr.msrb.gmra.mxu1 %v7279_v58  ;;  %3093 = vmatmul.bf16.vlgmr.msrb.gmra.mxu3 %v7279_v58 }
 0x481   :  { %3115 = vmatpush.bf16.msra.mxu1 %v8701_v26  ;;  %3141 = vmatpush.bf16.msra.mxu3 %v8702_v40 }
 0x483   :  { %3104 = vmatpush.bf16.msra.mxu0 %v8703_v1  ;;  %3130 = vmatpush.bf16.msra.mxu2 %v8704_v37 }
 0x485   :  { %3116 = vmatpush.bf16.msra.mxu1 %v8705_v7  ;;  %3142 = vmatpush.bf16.msra.mxu3 %v8706_v63 }
 0x487   :  { %3105 = vmatpush.bf16.msra.mxu0 %v8707_v46  ;;  %3131 = vmatpush.bf16.msra.mxu2 %v8708_v51 }
 0x489   :  { %3117 = vmatpush.bf16.msra.mxu1 %v8711_v22  ;;  %3143 = vmatpush.bf16.msra.mxu3 %v8712_v17 }
 0x48a   :  { %3106 = vmatmul.bf16.vlgmr.msra.gmra.mxu0 %v7273_v13  ;;  %3132 = vmatmul.bf16.vlgmr.msra.gmra.mxu2 %v7273_v13 }
 0x48b   :  { %3150 = vmatpush.bf16.msrb.mxu0 %v8709_v43  ;;  %3176 = vmatpush.bf16.msrb.mxu2 %v8710_v59 }
 0x48d   :  { %3118 = vmatpush.bf16.msra.mxu1 %v8715_v28  ;;  %3144 = vmatpush.bf16.msra.mxu3 %v8716_v30 }
 0x48f   :  { %3151 = vmatpush.bf16.msrb.mxu0 %v8713_v10  ;;  %3177 = vmatpush.bf16.msrb.mxu2 %v8714_v35 }
 0x490   :  { %3119 = vmatmul.bf16.vlgmr.msra.gmra.mxu1 %v7279_v58  ;;  %3145 = vmatmul.bf16.vlgmr.msra.gmra.mxu3 %v7279_v58 }
 0x491   :  { %3163 = vmatpush.bf16.msrb.mxu1 %v8922_v9  ;;  %3189 = vmatpush.bf16.msrb.mxu3 %v8923_v42  ;;  %v9023_v42 = vld [vmem:[#allocation197_spill] sm:$0xff] }
 0x493   :  { %3152 = vmatpush.bf16.msrb.mxu0 %v8924_v18  ;;  %3178 = vmatpush.bf16.msrb.mxu2 %v8925_v39 }
 0x495   :  { %3164 = vmatpush.bf16.msrb.mxu1 %v8926_v31  ;;  %3190 = vmatpush.bf16.msrb.mxu3 %v8927_v60 }
 0x497   :  { %3153 = vmatpush.bf16.msrb.mxu0 %v8928_v24  ;;  %3179 = vmatpush.bf16.msrb.mxu2 %v8929_v11 }
 0x499   :  { %3165 = vmatpush.bf16.msrb.mxu1 %v8930_v27  ;;  %3191 = vmatpush.bf16.msrb.mxu3 %v8931_v16 }
 0x49b   :  { %3154 = vmatpush.bf16.msrb.mxu0 %v8932_v19  ;;  %3180 = vmatpush.bf16.msrb.mxu2 %v8933_v56 }
 0x49d   :  { %3166 = vmatpush.bf16.msrb.mxu1 %v8934_v20  ;;  %3192 = vmatpush.bf16.msrb.mxu3 %v8935_v41  ;;  %v8946_v41 = vld [vmem:[#allocation16_spill] sm:$0xff] }
 0x49f   :  { %3155 = vmatpush.bf16.msrb.mxu0 %v8936_v21  ;;  %3181 = vmatpush.bf16.msrb.mxu2 %v8937_v48  ;;  %v8947_v21 = vld [vmem:[#allocation18_spill] sm:$0xff]  ;;  %v8948_v48 = vld [vmem:[#allocation169_spill] sm:$0xff] }
 0x4a1   :  { %3167 = vmatpush.bf16.msrb.mxu1 %v8938_v25  ;;  %3193 = vmatpush.bf16.msrb.mxu3 %v8939_v8  ;;  %v8949_v25 = vld [vmem:[#allocation173_spill] sm:$0xff] }
 0x4a3   :  { %3156 = vmatpush.bf16.msrb.mxu0 %v8940_v32  ;;  %3182 = vmatpush.bf16.msrb.mxu2 %v8941_v49  ;;  %v8950_v49 = vld [vmem:[#allocation20_spill] sm:$0xff] }
 0x4a5   :  { %3168 = vmatpush.bf16.msrb.mxu1 %v8942_v47  ;;  %3194 = vmatpush.bf16.msrb.mxu3 %v8943_v4  ;;  %v8951_v47 = vld [vmem:[#allocation22_spill] sm:$0xff]  ;;  %v8952_v4 = vld [vmem:[#allocation175_spill] sm:$0xff] }
 0x4a7   :  { %3157 = vmatpush.bf16.msrb.mxu0 %v8944_v15  ;;  %3183 = vmatpush.bf16.msrb.mxu2 %v8945_v62  ;;  %v8953_v15 = vld [vmem:[#allocation177_spill] sm:$0xff] }
 0x4a8   :  { %v8954_v62 = vld [vmem:[#allocation17_spill] sm:$0xff] }
 0x4a9   :  { %3169 = vmatpush.bf16.msrb.mxu1 %v8948_v48  ;;  %3195 = vmatpush.bf16.msrb.mxu3 %v8949_v25  ;;  %v8956_v25 = vld [vmem:[#allocation24_spill] sm:$0xff]  ;;  %v8957_v48 = vld [vmem:[#allocation26_spill] sm:$0xff] }
 0x4aa   :  { %3158 = vmatmul.bf16.vlgmr.msrb.gmra.mxu0 %v7273_v13  ;;  %3184 = vmatmul.bf16.vlgmr.msrb.gmra.mxu2 %v7273_v13  ;;  %v8958_v13 = vld [vmem:[#allocation21_spill] sm:$0xff] }
 0x4ab   :  { %3346 = vmatpush.bf16.msra.mxu0 %v8946_v41  ;;  %3372 = vmatpush.bf16.msra.mxu2 %v8947_v21  ;;  %v8955_v41 = vld [vmem:[#allocation19_spill] sm:$0xff]  ;;  %v8965_v21 = vld [vmem:[#allocation34_spill] sm:$0xff] }
 0x4ad   :  { %3170 = vmatpush.bf16.msrb.mxu1 %v8952_v4  ;;  %3196 = vmatpush.bf16.msrb.mxu3 %v8953_v15  ;;  %v8961_v4 = vld [vmem:[#allocation30_spill] sm:$0xff]  ;;  %v8962_v15 = vld [vmem:[#allocation25_spill] sm:$0xff] }
 0x4af   :  { %3347 = vmatpush.bf16.msra.mxu0 %v8950_v49  ;;  %3373 = vmatpush.bf16.msra.mxu2 %v8951_v47  ;;  %v8959_v49 = vld [vmem:[#allocation23_spill] sm:$0xff]  ;;  %v8960_v47 = vld [vmem:[#allocation28_spill] sm:$0xff] }
 0x4b0   :  { %3171 = vmatmul.bf16.vlgmr.msrb.gmra.mxu1 %v7279_v58  ;;  %3197 = vmatmul.bf16.vlgmr.msrb.gmra.mxu3 %v7279_v58  ;;  %v8966_v58 = vld [vmem:[#allocation29_spill] sm:$0xff] }
 0x4b1   :  { %3359 = vmatpush.bf16.msra.mxu1 %v8954_v62  ;;  %3385 = vmatpush.bf16.msra.mxu3 %v8955_v41  ;;  %v8963_v62 = vld [vmem:[#allocation27_spill] sm:$0xff]  ;;  %v8964_v41 = vld [vmem:[#allocation32_spill] sm:$0xff] }
 0x4b3   :  { %3348 = vmatpush.bf16.msra.mxu0 %v8956_v25  ;;  %3374 = vmatpush.bf16.msra.mxu2 %v8957_v48  ;;  %v8967_v25 = vld [vmem:[#allocation31_spill] sm:$0xff]  ;;  %v8968_v48 = vld [vmem:[#allocation36_spill] sm:$0xff] }
 0x4b5   :  { %3360 = vmatpush.bf16.msra.mxu1 %v8958_v13  ;;  %3386 = vmatpush.bf16.msra.mxu3 %v8959_v49  ;;  %v8969_v13 = vld [vmem:[#allocation38_spill] sm:$0xff]  ;;  %v8970_v49 = vld [vmem:[#allocation33_spill] sm:$0xff] }
 0x4b7   :  { %3349 = vmatpush.bf16.msra.mxu0 %v8960_v47  ;;  %3375 = vmatpush.bf16.msra.mxu2 %v8961_v4  ;;  %v8971_v47 = vld [vmem:[#allocation35_spill] sm:$0xff]  ;;  %v8972_v4 = vld [vmem:[#allocation40_spill] sm:$0xff] }
 0x4b9   :  { %3361 = vmatpush.bf16.msra.mxu1 %v8962_v15  ;;  %3387 = vmatpush.bf16.msra.mxu3 %v8963_v62  ;;  %v8973_v15 = vld [vmem:[#allocation42_spill] sm:$0xff]  ;;  %v8974_v62 = vld [vmem:[#allocation37_spill] sm:$0xff] }
 0x4bb   :  { %3350 = vmatpush.bf16.msra.mxu0 %v8964_v41  ;;  %3376 = vmatpush.bf16.msra.mxu2 %v8965_v21  ;;  %v8975_v41 = vld [vmem:[#allocation39_spill] sm:$0xff]  ;;  %v8976_v21 = vld [vmem:[#allocation44_spill] sm:$0xff] }
 0x4bd   :  { %3362 = vmatpush.bf16.msra.mxu1 %v8966_v58  ;;  %3388 = vmatpush.bf16.msra.mxu3 %v8967_v25  ;;  %v8977_v58 = vld [vmem:[#allocation46_spill] sm:$0xff]  ;;  %v8978_v25 = vld [vmem:[#allocation48_spill] sm:$0xff] }
 0x4bf   :  { %3351 = vmatpush.bf16.msra.mxu0 %v8968_v48  ;;  %3377 = vmatpush.bf16.msra.mxu2 %v8969_v13  ;;  %v8979_v48 = vld [vmem:[#allocation50_spill] sm:$0xff]  ;;  %v8980_v13 = vld [vmem:[#allocation41_spill] sm:$0xff] }
 0x4c1   :  { %3363 = vmatpush.bf16.msra.mxu1 %v8970_v49  ;;  %3389 = vmatpush.bf16.msra.mxu3 %v8971_v47  ;;  %v8981_v49 = vld [vmem:[#allocation43_spill] sm:$0xff]  ;;  %v8982_v47 = vld [vmem:[#allocation52_spill] sm:$0xff] }
 0x4c3   :  { %3352 = vmatpush.bf16.msra.mxu0 %v8972_v4  ;;  %3378 = vmatpush.bf16.msra.mxu2 %v8973_v15  ;;  %v8983_v4 = vld [vmem:[#allocation54_spill] sm:$0xff]  ;;  %v8984_v15 = vld [vmem:[#allocation45_spill] sm:$0xff] }
 0x4c5   :  { %3364 = vmatpush.bf16.msra.mxu1 %v8974_v62  ;;  %3390 = vmatpush.bf16.msra.mxu3 %v8975_v41  ;;  %v8985_v62 = vld [vmem:[#allocation47_spill] sm:$0xff]  ;;  %v8986_v41 = vld [vmem:[#allocation49_spill] sm:$0xff] }
 0x4c7   :  { %3353 = vmatpush.bf16.msra.mxu0 %v8976_v21  ;;  %3379 = vmatpush.bf16.msra.mxu2 %v8977_v58  ;;  %v8987_v21 = vld [vmem:[#allocation51_spill] sm:$0xff]  ;;  %v8988_v58 = vld [vmem:[#allocation56_spill] sm:$0xff] }
 0x4c9   :  { %3365 = vmatpush.bf16.msra.mxu1 %v8980_v13  ;;  %3391 = vmatpush.bf16.msra.mxu3 %v8981_v49  ;;  %v8991_v13 = vld [vmem:[#allocation55_spill] sm:$0xff]  ;;  %v8992_v49 = vld [vmem:[#allocation60_spill] sm:$0xff] }
 0x4cb   :  { %3398 = vmatpush.bf16.msrb.mxu0 %v8978_v25  ;;  %3424 = vmatpush.bf16.msrb.mxu2 %v8979_v48  ;;  %v8989_v25 = vld [vmem:[#allocation58_spill] sm:$0xff]  ;;  %v8990_v48 = vld [vmem:[#allocation53_spill] sm:$0xff] }
 0x4cd   :  { %3366 = vmatpush.bf16.msra.mxu1 %v8984_v15  ;;  %3392 = vmatpush.bf16.msra.mxu3 %v8985_v62  ;;  %v8995_v15 = vld [vmem:[#allocation59_spill] sm:$0xff]  ;;  %v8996_v62 = vld [vmem:[#allocation64_spill] sm:$0xff] }
 0x4cf   :  { %3399 = vmatpush.bf16.msrb.mxu0 %v8982_v47  ;;  %3425 = vmatpush.bf16.msrb.mxu2 %v8983_v4  ;;  %v8993_v47 = vld [vmem:[#allocation62_spill] sm:$0xff]  ;;  %v8994_v4 = vld [vmem:[#allocation57_spill] sm:$0xff] }
 0x4d1   :  { %3411 = vmatpush.bf16.msrb.mxu1 %v8986_v41  ;;  %3437 = vmatpush.bf16.msrb.mxu3 %v8987_v21  ;;  %v8997_v41 = vld [vmem:[#allocation66_spill] sm:$0xff]  ;;  %v8998_v21 = vld [vmem:[#allocation61_spill] sm:$0xff] }
 0x4d3   :  { %3400 = vmatpush.bf16.msrb.mxu0 %v8988_v58  ;;  %3426 = vmatpush.bf16.msrb.mxu2 %v8989_v25  ;;  %v8999_v58 = vld [vmem:[#allocation63_spill] sm:$0xff]  ;;  %v9000_v25 = vld [vmem:[#allocation68_spill] sm:$0xff] }
 0x4d5   :  { %3412 = vmatpush.bf16.msrb.mxu1 %v8990_v48  ;;  %3438 = vmatpush.bf16.msrb.mxu3 %v8991_v13  ;;  %v9001_v48 = vld [vmem:[#allocation70_spill] sm:$0xff]  ;;  %v9002_v13 = vld [vmem:[#allocation65_spill] sm:$0xff] }
 0x4d7   :  { %3401 = vmatpush.bf16.msrb.mxu0 %v8992_v49  ;;  %3427 = vmatpush.bf16.msrb.mxu2 %v8993_v47  ;;  %v9003_v49 = vld [vmem:[#allocation67_spill] sm:$0xff]  ;;  %v9004_v47 = vld [vmem:[#allocation72_spill] sm:$0xff] }
 0x4d9   :  { %3413 = vmatpush.bf16.msrb.mxu1 %v8994_v4  ;;  %3439 = vmatpush.bf16.msrb.mxu3 %v8995_v15  ;;  %v9005_v4 = vld [vmem:[#allocation74_spill] sm:$0xff]  ;;  %v9006_v15 = vld [vmem:[#allocation69_spill] sm:$0xff] }
 0x4db   :  { %3402 = vmatpush.bf16.msrb.mxu0 %v8996_v62  ;;  %3428 = vmatpush.bf16.msrb.mxu2 %v8997_v41  ;;  %v9007_v62 = vld [vmem:[#allocation71_spill] sm:$0xff]  ;;  %v9008_v41 = vld [vmem:[#allocation76_spill] sm:$0xff] }
 0x4dd   :  { %3414 = vmatpush.bf16.msrb.mxu1 %v8998_v21  ;;  %3440 = vmatpush.bf16.msrb.mxu3 %v8999_v58  ;;  %v9009_v21 = vld [vmem:[#allocation78_spill] sm:$0xff]  ;;  %v9010_v58 = vld [vmem:[#allocation73_spill] sm:$0xff] }
 0x4df   :  { %3403 = vmatpush.bf16.msrb.mxu0 %v9000_v25  ;;  %3429 = vmatpush.bf16.msrb.mxu2 %v9001_v48  ;;  %v9011_v25 = vld [vmem:[#allocation75_spill] sm:$0xff]  ;;  %v9012_v48 = vld [vmem:[#allocation77_spill] sm:$0xff] }
 0x4e1   :  { %3415 = vmatpush.bf16.msrb.mxu1 %v9002_v13  ;;  %3441 = vmatpush.bf16.msrb.mxu3 %v9003_v49  ;;  %v9013_v13 = vld [vmem:[#allocation79_spill] sm:$0xff] }
 0x4e3   :  { %3404 = vmatpush.bf16.msrb.mxu0 %v9004_v47  ;;  %3430 = vmatpush.bf16.msrb.mxu2 %v9005_v4 }
 0x4e5   :  { %3416 = vmatpush.bf16.msrb.mxu1 %v9006_v15  ;;  %3442 = vmatpush.bf16.msrb.mxu3 %v9007_v62  ;;  %v9014_v15 = vld [vmem:[#allocation135_spill] sm:$0xff] }
 0x4e7   :  { %3405 = vmatpush.bf16.msrb.mxu0 %v9008_v41  ;;  %3431 = vmatpush.bf16.msrb.mxu2 %v9009_v21  ;;  %v3003_v49 = vpop.f32.mrf.mxu0 }
 0x4e9   :  { %3417 = vmatpush.bf16.msrb.mxu1 %v9010_v58  ;;  %3443 = vmatpush.bf16.msrb.mxu3 %v9011_v25  ;;  %v9015_v58 = vld [vmem:[#allocation137_spill] sm:$0xff] }
 0x4ed   :  { %3418 = vmatpush.bf16.msrb.mxu1 %v9012_v48  ;;  %3444 = vmatpush.bf16.msrb.mxu3 %v9013_v13  ;;  %v3016_v47 = vpop.f32.mrf.mxu1  ;;  %v3029_v32 = vpop.f32.mrf.mxu2 }
 0x4ee   :  { %v3017_v4 = vadd.f32 %v3016_v47, %v3003_v49 }
 0x4ef   :  { %v3005_v8 = vpop.f32.mrf.mxu0 }
 0x4f0   :  { %v3202_v20 = vadd.f32 %v3017_v4, %v9014_v15  ;;  %v9016_v4 = vld [vmem:[#allocation143_spill] sm:$0xff] }
 0x4f2   :  { %v5221_v62 = vmul.f32 -1.442695, %v3202_v20 }
 0x4f3   :  { %v3042_v56 = vpop.f32.mrf.mxu3 }
 0x4f4   :  { %5579 = vpow2.f32 %v5221_v62  ;;  %v3043_v41 = vadd.f32 %v3042_v56, %v3029_v32 }
 0x4f5   :  { %v3018_v21 = vpop.f32.mrf.mxu1  ;;  %v3031_v19 = vpop.f32.mrf.mxu2 }
 0x4f6   :  { %v3203_v16 = vadd.f32 %v3043_v41, %v9015_v58 }
 0x4f7   :  { %v3055_v25 = vpop.f32.mrf.mxu0 }
 0x4f8   :  { %v5222_v27 = vmul.f32 -1.442695, %v3203_v16 }
 0x4fa   :  { %v5580_v48 = vpop.eup %5579  ;;  %5581 = vpow2.f32 %v5222_v27 }
 0x4fb   :  { %v3216_v13 = vadd.f32 1.0, %v5580_v48  ;;  %v3044_v11 = vpop.f32.mrf.mxu3 }
 0x4fc   :  { %v9017_v11 = vld [vmem:[#allocation147_spill] sm:$0xff] }
 0x4fd   :  { %v3068_v24 = vpop.f32.mrf.mxu1  ;;  %v3081_v60 = vpop.f32.mrf.mxu2  ;;  %5583 = vrcp.f32 %v3216_v13  ;;  %v3227_v39 = vand.u32 2147483647, %v3216_v13  ;;  %vm3223_vm1 = vweird.f32 %v3216_v13 }
 0x4fe   :  { %v3069_v8 = vadd.f32 %v3068_v24, %v3055_v25 }
 0x4ff   :  { %v3057_v49 = vpop.f32.mrf.mxu0  ;;  %vm7441_vm3 = vcmp.eq.f32.partialorder %v3227_v39, 8.507059e+37 }
 0x500   :  { %v5582_v15 = vpop.eup %5581  ;;  %v3204_v20 = vadd.f32 %v3069_v8, %v9016_v4 }
 0x501   :  { %v7424_v62 = vadd.f32 1.0, %v5582_v15 }
 0x502   :  { %v5223_v56 = vmul.f32 -1.442695, %v3204_v20 }
 0x503   :  { %5585 = vrcp.f32 %v7424_v62  ;;  %v3094_v19 = vpop.f32.mrf.mxu3  ;;  %v5584_v41 = vpop.eup %5583  ;;  %vm3238_vm6 = vweird.f32 %v7424_v62  ;;  %v3242_v39 = vand.u32 2147483647, %v7424_v62 }
 0x504   :  { %5587 = vpow2.f32 %v5223_v56  ;;  %v3095_v16 = vadd.f32 %v3094_v19, %v3081_v60  ;;  %v3219_v32 = vmul.f32 %v5584_v41, %v3216_v13  ;;  %vm3224_vm0 = vweird.f32 %v5584_v41 }
 0x505   :  { %v3070_v27 = vpop.f32.mrf.mxu1  ;;  %v3083_v21 = vpop.f32.mrf.mxu2  ;;  %vm7437_vm2 = vmor %vm3223_vm1, %vm3224_vm0  ;;  %vm3243_vm11 = vcmp.eq.f32.partialorder %v3242_v39, 8.507059e+37 }
 0x506   :  { %v3205_v48 = vadd.f32 %v3095_v16, %v9017_v11  ;;  %v3220_v8 = vsub.f32 1.0, %v3219_v32 }
 0x507   :  { %v3107_v47 = vpop.f32.mrf.mxu0 }
 0x508   :  { %v5224_v24 = vmul.f32 -1.442695, %v3205_v48  ;;  %v3221_v19 = vmul.f32 %v5584_v41, %v3220_v8  ;;  %v9018_v48 = vld [vmem:[#allocation196_spill] sm:$0xff] }
 0x509   :  { %v7428_v25 = vpop.eup %5585 }
 0x50a   :  { %v5588_v58 = vpop.eup %5587  ;;  %5589 = vpow2.f32 %v5224_v24  ;;  %v3234_v4 = vmul.f32 %v7428_v25, %v7424_v62  ;;  %v3229_v24 = vand.u32 2147483648, %v3216_v13  ;;  %vm3239_vm4 = vweird.f32 %v7428_v25 }
 0x50b   :  { %v3254_v49 = vadd.f32 1.0, %v5588_v58  ;;  %v3096_v15 = vpop.f32.mrf.mxu3  ;;  %v3222_v58 = vadd.f32 %v5584_v41, %v3221_v19  ;;  %vm7458_vm8 = vmor %vm3238_vm6, %vm3239_vm4 }
 0x50c   :  { %v3235_v21 = vsub.f32 1.0, %v3234_v4 }
 0x50d   :  { %5591 = vrcp.f32 %v3254_v49  ;;  %v3133_v20 = vpop.f32.mrf.mxu2  ;;  %v3120_v60 = vpop.f32.mrf.mxu1  ;;  %v3265_v13 = vand.u32 2147483647, %v3254_v49  ;;  %vm3261_vm7 = vweird.f32 %v3254_v49 }
 0x50e   :  { %v3121_v56 = vadd.f32 %v3120_v60, %v3107_v47  ;;  %v3236_v47 = vmul.f32 %v7428_v25, %v3235_v21 }
 0x50f   :  { %v3109_v27 = vpop.f32.mrf.mxu0  ;;  %vm3266_vm10 = vcmp.eq.f32.partialorder %v3265_v13, 8.507059e+37 }
 0x510   :  { %v5590_v16 = vpop.eup %5589  ;;  %v3206_v31 = vadd.f32 %v3121_v56, %v9018_v48  ;;  %v3267_v48 = vand.u32 2147483648, %v3254_v49 }
 0x511   :  { %v7432_v11 = vadd.f32 1.0, %v5590_v16  ;;  %v3230_v16 = vor.u32 1.1754944e-38, %v3229_v24  ;;  %v3244_v24 = vand.u32 2147483648, %v7424_v62 }
 0x513   :  { %v5592_v32 = vpop.eup %5591  ;;  %5593 = vrcp.f32 %v7432_v11  ;;  %v3146_v18 = vpop.f32.mrf.mxu3  ;;  %v3282_v56 = vand.u32 2147483648, %v7432_v11  ;;  %vm3276_vm13 = vweird.f32 %v7432_v11 }
 0x514   :  { %v3257_v15 = vmul.f32 %v5592_v32, %v3254_v49  ;;  %5595 = vtanh.f32 %v3206_v31  ;;  %v3147_v8 = vadd.f32 %v3146_v18, %v3133_v20  ;;  %v3226_v31 = vsel %vm7437_vm2, %v5584_v41, %v3222_v58 }
 0x515   :  { %v3135_v60 = vpop.f32.mrf.mxu2  ;;  %v3122_v19 = vpop.f32.mrf.mxu1  ;;  %vm3262_vm5 = vweird.f32 %v5592_v32  ;;  %v3237_v20 = vadd.f32 %v7428_v25, %v3236_v47 }
 0x516   :  { %v3258_v4 = vsub.f32 1.0, %v3257_v15  ;;  %v3207_v21 = vadd.f32 %v3147_v8, %v9023_v42  ;;  %v3231_v42 = vsel %vm7441_vm3, %v3230_v16, %v3226_v31  ;;  %vm3263_vm9 = vmor %vm3261_vm7, %vm3262_vm5  ;;  %v3268_v8 = vor.u32 1.1754944e-38, %v3267_v48 }
 0x517   :  { %v3241_v49 = vsel %vm7458_vm8, %v7428_v25, %v3237_v20  ;;  %v3245_v31 = vor.u32 1.1754944e-38, %v3244_v24  ;;  %v3280_v48 = vand.u32 2147483647, %v7432_v11  ;;  %v3283_v20 = vor.u32 1.1754944e-38, %v3282_v56 }
 0x518   :  { %v3259_v18 = vmul.f32 %v5592_v32, %v3258_v4  ;;  %5597 = vtanh.f32 %v3207_v21 }
 0x519   :  { %v5594_v15 = vpop.eup %5593  ;;  %vm3281_vm15 = vcmp.eq.f32.partialorder %v3280_v48, 8.507059e+37 }
 0x51a   :  { %v5596_v60 = vpop.eup %5595  ;;  %v3272_v41 = vmul.f32 %v5594_v15, %v7432_v11  ;;  %v3260_v58 = vadd.f32 %v5592_v32, %v3259_v18  ;;  %vm3277_vm12 = vweird.f32 %v5594_v15 }
 0x51b   :  { %v3328_v4 = vmul.f32 %v5596_v60, %v3231_v42  ;;  %v3148_v19 = vpop.f32.mrf.mxu3  ;;  %vm3278_vm14 = vmor %vm3276_vm13, %vm3277_vm12 }
 0x51c   :  { %v3273_v27 = vsub.f32 1.0, %v3272_v41  ;;  %v3264_v62 = vsel %vm3263_vm9, %v5592_v32, %v3260_v58  ;;  %v3246_v41 = vsel %vm3243_vm11, %v3245_v31, %v3241_v49  ;;  %v9026_v49 = vld [vmem:[#allocation198_spill] sm:$0xff] }
 0x51d   :  { %v3269_v16 = vsel %vm3266_vm10, %v3268_v8, %v3264_v62 }
 0x51e   :  { %v3274_v21 = vmul.f32 %v5594_v15, %v3273_v27  ;;  %v3326_v18 = vmul.f32 %v3269_v16, %v7262_v50  ;;  %v5598_v60 = vpop.eup %5597 }
 0x51f   :  { %v3329_v25 = vmul.f32 %v5598_v60, %v3246_v41 }
 0x520   :  { %v7469_v32 = vadd.f32 %v3328_v4, %v3326_v18  ;;  %v3275_v13 = vadd.f32 %v5594_v15, %v3274_v21 }
 0x522   :  { %v3279_v42 = vsel %vm3278_vm14, %v5594_v15, %v3275_v13  ;;  %v9027_v15 = vld [vmem:[#allocation200_spill] sm:$0xff] }
 0x523   :  { %v3284_v39 = vsel %vm3281_vm15, %v3283_v20, %v3279_v42 }
 0x524   :  { %v3327_v24 = vmul.f32 %v3284_v39, %v7265_v0 }
 0x526   :  { %v7472_v47 = vadd.f32 %v3329_v25, %v3327_v24 }
 0x527   :  { %v3159_v58 = vpop.f32.mrf.mxu0 }
 0x52d   :  { %v3172_v50 = vpop.f32.mrf.mxu1  ;;  %v3185_v8 = vpop.f32.mrf.mxu2 }
 0x52e   :  { %v3173_v27 = vadd.f32 %v3172_v50, %v3159_v58 }
 0x52f   :  { %v3161_v62 = vpop.f32.mrf.mxu0 }
 0x530   :  { %v3208_v11 = vadd.f32 %v3173_v27, %v9026_v49 }
 0x532   :  { %v5225_v4 = vmul.f32 -1.442695, %v3208_v11 }
 0x533   :  { %v3198_v19 = vpop.f32.mrf.mxu3 }
 0x534   :  { %5599 = vpow2.f32 %v5225_v4  ;;  %v3199_v16 = vadd.f32 %v3198_v19, %v3185_v8 }
 0x535   :  { %v3174_v31 = vpop.f32.mrf.mxu1  ;;  %v3187_v56 = vpop.f32.mrf.mxu2 }
 0x536   :  { %v3209_v21 = vadd.f32 %v3199_v16, %v9027_v15 }
 0x538   :  { %v5226_v18 = vmul.f32 -1.442695, %v3209_v21 }
 0x53a   :  { %v5600_v48 = vpop.eup %5599  ;;  %5601 = vpow2.f32 %v5226_v18 }
 0x53b   :  { %v3294_v0 = vadd.f32 1.0, %v5600_v48  ;;  %v3200_v60 = vpop.f32.mrf.mxu3 }
 0x53d   :  { %5603 = vrcp.f32 %v3294_v0  ;;  %v3307_v39 = vand.u32 2147483648, %v3294_v0  ;;  %v3305_v58 = vand.u32 2147483647, %v3294_v0  ;;  %vm3301_vm1 = vweird.f32 %v3294_v0 }
 0x53f   :  { %v3308_v62 = vor.u32 1.1754944e-38, %v3307_v39  ;;  %vm3306_vm3 = vcmp.eq.f32.partialorder %v3305_v58, 8.507059e+37  ;;  %v9030_v39 = vld [vmem:[#allocation146_spill] sm:$0xff]  ;;  %v9032_v58 = vld [vmem:[#allocation141_spill] sm:$0xff] }
 0x540   :  { %v5602_v41 = vpop.eup %5601 }
 0x541   :  { %v3295_v13 = vadd.f32 1.0, %v5602_v41 }
 0x543   :  { %v5604_v25 = vpop.eup %5603  ;;  %5605 = vrcp.f32 %v3295_v13  ;;  %v3322_v16 = vand.u32 2147483648, %v3295_v13  ;;  %v3320_v15 = vand.u32 2147483647, %v3295_v13  ;;  %vm3316_vm5 = vweird.f32 %v3295_v13 }
 0x544   :  { %v3297_v20 = vmul.f32 %v5604_v25, %v3294_v0  ;;  %5607 = vtanh.f32 %v7469_v32  ;;  %vm3302_vm0 = vweird.f32 %v5604_v25 }
 0x545   :  { %vm3303_vm2 = vmor %vm3301_vm1, %vm3302_vm0  ;;  %5609 = vtanh.f32 %v7472_v47  ;;  %v3323_v48 = vor.u32 1.1754944e-38, %v3322_v16  ;;  %vm3321_vm7 = vcmp.eq.f32.partialorder %v3320_v15, 8.507059e+37  ;;  %v9041_v16 = vld [vmem:[#allocation162_spill] sm:$0xff]  ;;  %v9044_v15 = vld [vmem:[#allocation160_spill] sm:$0xff] }
 0x546   :  { %v3298_v42 = vsub.f32 1.0, %v3297_v20 }
 0x548   :  { %v3299_v24 = vmul.f32 %v5604_v25, %v3298_v42  ;;  %v9029_v42 = vld [vmem:[#allocation142_spill] sm:$0xff] }
 0x549   :  { %v5606_v50 = vpop.eup %5605 }
 0x54a   :  { %v3300_v8 = vadd.f32 %v5604_v25, %v3299_v24  ;;  %v3312_v27 = vmul.f32 %v5606_v50, %v3295_v13  ;;  %v5608_v4 = vpop.eup %5607  ;;  %vm3317_vm4 = vweird.f32 %v5606_v50  ;;  %v9028_v13 = vld [vmem:[#allocation136_spill] sm:$0xff]  ;;  %v9031_v24 = vld [vmem:[#allocation139_spill] sm:$0xff] }
 0x54b   :  { %vm3318_vm6 = vmor %vm3316_vm5, %vm3317_vm4  ;;  %v5610_v60 = vpop.eup %5609 }
 0x54c   :  { %v3304_v49 = vsel %vm3303_vm2, %v5604_v25, %v3300_v8  ;;  %v3313_v11 = vsub.f32 1.0, %v3312_v27  ;;  %v9034_v8 = vld [vmem:[#allocation152_spill] sm:$0xff]  ;;  %v9035_v27 = vld [vmem:[#allocation145_spill] sm:$0xff] }
 0x54d   :  { %v3309_v19 = vsel %vm3306_vm3, %v3308_v62, %v3304_v49  ;;  %v9036_v62 = vld [vmem:[#allocation149_spill] sm:$0xff]  ;;  %v9037_v49 = vld [vmem:[#allocation155_spill] sm:$0xff] }
 0x54e   :  { %v3334_v31 = vmul.f32 %v5608_v4, %v3309_v19  ;;  %v3314_v56 = vmul.f32 %v5606_v50, %v3313_v11  ;;  %v9038_v11 = vld [vmem:[#allocation158_spill] sm:$0xff]  ;;  %v9039_v4 = vld [vmem:[#allocation151_spill] sm:$0xff]  ;;  %v9040_v19 = vld [vmem:[#allocation153_spill] sm:$0xff] }
 0x550   :  { %v7478_v21 = vpack.c.bf16 %v3334_v31, %v3334_v31  ;;  %v3315_v18 = vadd.f32 %v5606_v50, %v3314_v56  ;;  %v9042_v31 = vld [vmem:[#allocation164_spill] sm:$0xff]  ;;  %v9043_v56 = vld [vmem:[#allocation157_spill] sm:$0xff] }
 0x552   :  { %v3319_v0 = vsel %vm3318_vm6, %v5606_v50, %v3315_v18  ;;  %3354 = vmatmul.bf16.vlgmr.msra.gmra.mxu0 %v7478_v21  ;;  %3380 = vmatmul.bf16.vlgmr.msra.gmra.mxu2 %v7478_v21  ;;  %v9033_v50 = vld [vmem:[#allocation150_spill] sm:$0xff] }
 0x553   :  { %v3324_v41 = vsel %vm3321_vm7, %v3323_v48, %v3319_v0  ;;  %3450 = vmatpush.bf16.msra.mxu0 %v8584_v55  ;;  %3476 = vmatpush.bf16.msra.mxu2 %v8585_v3  ;;  %v9045_v18 = vld [vmem:[#allocation166_spill] sm:$0xff]  ;;  %v9047_v0 = vld [vmem:[#allocation163_spill] sm:$0xff] }
 0x554   :  { %v3335_v25 = vmul.f32 %v5610_v60, %v3324_v41  ;;  %v9046_v48 = vld [vmem:[#allocation170_spill] sm:$0xff]  ;;  %v9048_v60 = vld [vmem:[#allocation165_spill] sm:$0xff] }
 0x555   :  { %v9049_v41 = vld [vmem:[#allocation174_spill] sm:$0xff] }
 0x556   :  { %v7484_v20 = vpack.c.bf16 %v3335_v25, %v3335_v25  ;;  %v9050_v25 = vld [vmem:[#allocation176_spill] sm:$0xff] }
 0x557   :  { %3451 = vmatpush.bf16.msra.mxu0 %v8586_v38  ;;  %3477 = vmatpush.bf16.msra.mxu2 %v8587_v29 }
 0x558   :  { %3367 = vmatmul.bf16.vlgmr.msra.gmra.mxu1 %v7484_v20  ;;  %3393 = vmatmul.bf16.vlgmr.msra.gmra.mxu3 %v7484_v20 }
 0x559   :  { %3463 = vmatpush.bf16.msra.mxu1 %v8588_v52  ;;  %3489 = vmatpush.bf16.msra.mxu3 %v8589_v57 }
 0x55b   :  { %3452 = vmatpush.bf16.msra.mxu0 %v8590_v34  ;;  %3478 = vmatpush.bf16.msra.mxu2 %v8591_v14 }
 0x55d   :  { %3464 = vmatpush.bf16.msra.mxu1 %v8592_v5  ;;  %3490 = vmatpush.bf16.msra.mxu3 %v8593_v61 }
 0x55f   :  { %3453 = vmatpush.bf16.msra.mxu0 %v8594_v54  ;;  %3479 = vmatpush.bf16.msra.mxu2 %v8595_v44 }
 0x561   :  { %3465 = vmatpush.bf16.msra.mxu1 %v8596_v53  ;;  %3491 = vmatpush.bf16.msra.mxu3 %v8597_v12 }
 0x562   :  { %3406 = vmatmul.bf16.vlgmr.msrb.gmra.mxu0 %v7478_v21  ;;  %3432 = vmatmul.bf16.vlgmr.msrb.gmra.mxu2 %v7478_v21 }
 0x563   :  { %3454 = vmatpush.bf16.msra.mxu0 %v8598_v36  ;;  %3480 = vmatpush.bf16.msra.mxu2 %v8599_v45 }
 0x565   :  { %3466 = vmatpush.bf16.msra.mxu1 %v8600_v2  ;;  %3492 = vmatpush.bf16.msra.mxu3 %v8601_v6 }
 0x567   :  { %3455 = vmatpush.bf16.msra.mxu0 %v8602_v33  ;;  %3481 = vmatpush.bf16.msra.mxu2 %v8603_v23 }
 0x568   :  { %3419 = vmatmul.bf16.vlgmr.msrb.gmra.mxu1 %v7484_v20  ;;  %3445 = vmatmul.bf16.vlgmr.msrb.gmra.mxu3 %v7484_v20 }
 0x569   :  { %3467 = vmatpush.bf16.msra.mxu1 %v8701_v26  ;;  %3493 = vmatpush.bf16.msra.mxu3 %v8702_v40 }
 0x56b   :  { %3456 = vmatpush.bf16.msra.mxu0 %v8703_v1  ;;  %3482 = vmatpush.bf16.msra.mxu2 %v8704_v37 }
 0x56d   :  { %3468 = vmatpush.bf16.msra.mxu1 %v8705_v7  ;;  %3494 = vmatpush.bf16.msra.mxu3 %v8706_v63 }
 0x56f   :  { %3457 = vmatpush.bf16.msra.mxu0 %v8707_v46  ;;  %3483 = vmatpush.bf16.msra.mxu2 %v8708_v51 }
 0x571   :  { %3469 = vmatpush.bf16.msra.mxu1 %v8711_v22  ;;  %3495 = vmatpush.bf16.msra.mxu3 %v8712_v17 }
 0x572   :  { %3458 = vmatmul.bf16.vlgmr.msra.gmra.mxu0 %v7478_v21  ;;  %3484 = vmatmul.bf16.vlgmr.msra.gmra.mxu2 %v7478_v21 }
 0x573   :  { %3502 = vmatpush.bf16.msrb.mxu0 %v8709_v43  ;;  %3528 = vmatpush.bf16.msrb.mxu2 %v8710_v59 }
 0x575   :  { %3470 = vmatpush.bf16.msra.mxu1 %v8715_v28  ;;  %3496 = vmatpush.bf16.msra.mxu3 %v8716_v30 }
 0x577   :  { %3503 = vmatpush.bf16.msrb.mxu0 %v8713_v10  ;;  %3529 = vmatpush.bf16.msrb.mxu2 %v8714_v35 }
 0x578   :  { %3471 = vmatmul.bf16.vlgmr.msra.gmra.mxu1 %v7484_v20  ;;  %3497 = vmatmul.bf16.vlgmr.msra.gmra.mxu3 %v7484_v20 }
 0x579   :  { %3515 = vmatpush.bf16.msrb.mxu1 %v8922_v9  ;;  %3541 = vmatpush.bf16.msrb.mxu3 %v9028_v13 }
 0x57b   :  { %3504 = vmatpush.bf16.msrb.mxu0 %v9029_v42  ;;  %3530 = vmatpush.bf16.msrb.mxu2 %v9030_v39 }
 0x57d   :  { %3516 = vmatpush.bf16.msrb.mxu1 %v9031_v24  ;;  %3542 = vmatpush.bf16.msrb.mxu3 %v9032_v58 }
 0x57f   :  { %3505 = vmatpush.bf16.msrb.mxu0 %v9033_v50  ;;  %3531 = vmatpush.bf16.msrb.mxu2 %v9034_v8 }
 0x581   :  { %3517 = vmatpush.bf16.msrb.mxu1 %v9035_v27  ;;  %3543 = vmatpush.bf16.msrb.mxu3 %v9036_v62  ;;  %v9122_v62 = vld [vmem:[#allocation148_spill] sm:$0xff] }
 0x583   :  { %3506 = vmatpush.bf16.msrb.mxu0 %v9037_v49  ;;  %3532 = vmatpush.bf16.msrb.mxu2 %v9038_v11 }
 0x585   :  { %3518 = vmatpush.bf16.msrb.mxu1 %v9039_v4  ;;  %3544 = vmatpush.bf16.msrb.mxu3 %v9040_v19  ;;  %v9051_v19 = vld [vmem:[#allocation16_spill] sm:$0xff] }
 0x587   :  { %3507 = vmatpush.bf16.msrb.mxu0 %v9041_v16  ;;  %3533 = vmatpush.bf16.msrb.mxu2 %v9042_v31  ;;  %v9052_v16 = vld [vmem:[#allocation18_spill] sm:$0xff]  ;;  %v9053_v31 = vld [vmem:[#allocation169_spill] sm:$0xff] }
 0x589   :  { %3519 = vmatpush.bf16.msrb.mxu1 %v9043_v56  ;;  %3545 = vmatpush.bf16.msrb.mxu3 %v9044_v15  ;;  %v9054_v56 = vld [vmem:[#allocation173_spill] sm:$0xff]  ;;  %v9120_v15 = vld [vmem:[#allocation144_spill] sm:$0xff] }
 0x58b   :  { %3508 = vmatpush.bf16.msrb.mxu0 %v9045_v18  ;;  %3534 = vmatpush.bf16.msrb.mxu2 %v9046_v48  ;;  %v9055_v48 = vld [vmem:[#allocation20_spill] sm:$0xff] }
 0x58d   :  { %3520 = vmatpush.bf16.msrb.mxu1 %v9047_v0  ;;  %3546 = vmatpush.bf16.msrb.mxu3 %v9048_v60  ;;  %v9056_v0 = vld [vmem:[#allocation22_spill] sm:$0xff]  ;;  %v9057_v60 = vld [vmem:[#allocation175_spill] sm:$0xff] }
 0x58f   :  { %3509 = vmatpush.bf16.msrb.mxu0 %v9049_v41  ;;  %3535 = vmatpush.bf16.msrb.mxu2 %v9050_v25  ;;  %v9058_v41 = vld [vmem:[#allocation177_spill] sm:$0xff] }
 0x590   :  { %v9059_v25 = vld [vmem:[#allocation17_spill] sm:$0xff] }
 0x591   :  { %3521 = vmatpush.bf16.msrb.mxu1 %v9053_v31  ;;  %3547 = vmatpush.bf16.msrb.mxu3 %v9054_v56  ;;  %v9061_v56 = vld [vmem:[#allocation24_spill] sm:$0xff]  ;;  %v9062_v31 = vld [vmem:[#allocation26_spill] sm:$0xff] }
 0x592   :  { %3510 = vmatmul.bf16.vlgmr.msrb.gmra.mxu0 %v7478_v21  ;;  %3536 = vmatmul.bf16.vlgmr.msrb.gmra.mxu2 %v7478_v21  ;;  %v9063_v21 = vld [vmem:[#allocation21_spill] sm:$0xff] }
 0x593   :  { %3698 = vmatpush.bf16.msra.mxu0 %v9051_v19  ;;  %3724 = vmatpush.bf16.msra.mxu2 %v9052_v16  ;;  %v9060_v19 = vld [vmem:[#allocation19_spill] sm:$0xff]  ;;  %v9070_v16 = vld [vmem:[#allocation34_spill] sm:$0xff] }
 0x595   :  { %3522 = vmatpush.bf16.msrb.mxu1 %v9057_v60  ;;  %3548 = vmatpush.bf16.msrb.mxu3 %v9058_v41  ;;  %v9066_v60 = vld [vmem:[#allocation30_spill] sm:$0xff]  ;;  %v9067_v41 = vld [vmem:[#allocation25_spill] sm:$0xff] }
 0x597   :  { %3699 = vmatpush.bf16.msra.mxu0 %v9055_v48  ;;  %3725 = vmatpush.bf16.msra.mxu2 %v9056_v0  ;;  %v9064_v48 = vld [vmem:[#allocation23_spill] sm:$0xff]  ;;  %v9065_v0 = vld [vmem:[#allocation28_spill] sm:$0xff] }
 0x598   :  { %3523 = vmatmul.bf16.vlgmr.msrb.gmra.mxu1 %v7484_v20  ;;  %3549 = vmatmul.bf16.vlgmr.msrb.gmra.mxu3 %v7484_v20  ;;  %v9071_v20 = vld [vmem:[#allocation29_spill] sm:$0xff] }
 0x599   :  { %3711 = vmatpush.bf16.msra.mxu1 %v9059_v25  ;;  %3737 = vmatpush.bf16.msra.mxu3 %v9060_v19  ;;  %v9068_v25 = vld [vmem:[#allocation27_spill] sm:$0xff]  ;;  %v9069_v19 = vld [vmem:[#allocation32_spill] sm:$0xff] }
 0x59b   :  { %3700 = vmatpush.bf16.msra.mxu0 %v9061_v56  ;;  %3726 = vmatpush.bf16.msra.mxu2 %v9062_v31  ;;  %v9072_v56 = vld [vmem:[#allocation31_spill] sm:$0xff]  ;;  %v9073_v31 = vld [vmem:[#allocation36_spill] sm:$0xff] }
 0x59d   :  { %3712 = vmatpush.bf16.msra.mxu1 %v9063_v21  ;;  %3738 = vmatpush.bf16.msra.mxu3 %v9064_v48  ;;  %v9074_v21 = vld [vmem:[#allocation38_spill] sm:$0xff]  ;;  %v9075_v48 = vld [vmem:[#allocation33_spill] sm:$0xff] }
 0x59f   :  { %3701 = vmatpush.bf16.msra.mxu0 %v9065_v0  ;;  %3727 = vmatpush.bf16.msra.mxu2 %v9066_v60  ;;  %v9076_v0 = vld [vmem:[#allocation35_spill] sm:$0xff]  ;;  %v9077_v60 = vld [vmem:[#allocation40_spill] sm:$0xff] }
 0x5a1   :  { %3713 = vmatpush.bf16.msra.mxu1 %v9067_v41  ;;  %3739 = vmatpush.bf16.msra.mxu3 %v9068_v25  ;;  %v9078_v41 = vld [vmem:[#allocation42_spill] sm:$0xff]  ;;  %v9079_v25 = vld [vmem:[#allocation37_spill] sm:$0xff] }
 0x5a3   :  { %3702 = vmatpush.bf16.msra.mxu0 %v9069_v19  ;;  %3728 = vmatpush.bf16.msra.mxu2 %v9070_v16  ;;  %v9080_v19 = vld [vmem:[#allocation39_spill] sm:$0xff]  ;;  %v9081_v16 = vld [vmem:[#allocation44_spill] sm:$0xff] }
 0x5a5   :  { %3714 = vmatpush.bf16.msra.mxu1 %v9071_v20  ;;  %3740 = vmatpush.bf16.msra.mxu3 %v9072_v56  ;;  %v9082_v20 = vld [vmem:[#allocation46_spill] sm:$0xff]  ;;  %v9083_v56 = vld [vmem:[#allocation48_spill] sm:$0xff] }
 0x5a7   :  { %3703 = vmatpush.bf16.msra.mxu0 %v9073_v31  ;;  %3729 = vmatpush.bf16.msra.mxu2 %v9074_v21  ;;  %v9084_v31 = vld [vmem:[#allocation50_spill] sm:$0xff]  ;;  %v9085_v21 = vld [vmem:[#allocation41_spill] sm:$0xff] }
 0x5a9   :  { %3715 = vmatpush.bf16.msra.mxu1 %v9075_v48  ;;  %3741 = vmatpush.bf16.msra.mxu3 %v9076_v0  ;;  %v9086_v48 = vld [vmem:[#allocation43_spill] sm:$0xff]  ;;  %v9087_v0 = vld [vmem:[#allocation52_spill] sm:$0xff] }
 0x5ab   :  { %3704 = vmatpush.bf16.msra.mxu0 %v9077_v60  ;;  %3730 = vmatpush.bf16.msra.mxu2 %v9078_v41  ;;  %v9088_v60 = vld [vmem:[#allocation54_spill] sm:$0xff]  ;;  %v9089_v41 = vld [vmem:[#allocation45_spill] sm:$0xff] }
 0x5ad   :  { %3716 = vmatpush.bf16.msra.mxu1 %v9079_v25  ;;  %3742 = vmatpush.bf16.msra.mxu3 %v9080_v19  ;;  %v9090_v25 = vld [vmem:[#allocation47_spill] sm:$0xff]  ;;  %v9091_v19 = vld [vmem:[#allocation49_spill] sm:$0xff] }
 0x5af   :  { %3705 = vmatpush.bf16.msra.mxu0 %v9081_v16  ;;  %3731 = vmatpush.bf16.msra.mxu2 %v9082_v20  ;;  %v9092_v16 = vld [vmem:[#allocation51_spill] sm:$0xff]  ;;  %v9093_v20 = vld [vmem:[#allocation56_spill] sm:$0xff] }
 0x5b1   :  { %3717 = vmatpush.bf16.msra.mxu1 %v9085_v21  ;;  %3743 = vmatpush.bf16.msra.mxu3 %v9086_v48  ;;  %v9096_v21 = vld [vmem:[#allocation55_spill] sm:$0xff]  ;;  %v9097_v48 = vld [vmem:[#allocation60_spill] sm:$0xff] }
 0x5b3   :  { %3750 = vmatpush.bf16.msrb.mxu0 %v9083_v56  ;;  %3776 = vmatpush.bf16.msrb.mxu2 %v9084_v31  ;;  %v9094_v56 = vld [vmem:[#allocation58_spill] sm:$0xff]  ;;  %v9095_v31 = vld [vmem:[#allocation53_spill] sm:$0xff] }
 0x5b5   :  { %3718 = vmatpush.bf16.msra.mxu1 %v9089_v41  ;;  %3744 = vmatpush.bf16.msra.mxu3 %v9090_v25  ;;  %v9100_v41 = vld [vmem:[#allocation59_spill] sm:$0xff]  ;;  %v9101_v25 = vld [vmem:[#allocation64_spill] sm:$0xff] }
 0x5b7   :  { %3751 = vmatpush.bf16.msrb.mxu0 %v9087_v0  ;;  %3777 = vmatpush.bf16.msrb.mxu2 %v9088_v60  ;;  %v9098_v0 = vld [vmem:[#allocation62_spill] sm:$0xff]  ;;  %v9099_v60 = vld [vmem:[#allocation57_spill] sm:$0xff] }
 0x5b9   :  { %3763 = vmatpush.bf16.msrb.mxu1 %v9091_v19  ;;  %3789 = vmatpush.bf16.msrb.mxu3 %v9092_v16  ;;  %v9102_v19 = vld [vmem:[#allocation66_spill] sm:$0xff]  ;;  %v9103_v16 = vld [vmem:[#allocation61_spill] sm:$0xff] }
 0x5bb   :  { %3752 = vmatpush.bf16.msrb.mxu0 %v9093_v20  ;;  %3778 = vmatpush.bf16.msrb.mxu2 %v9094_v56  ;;  %v9104_v20 = vld [vmem:[#allocation63_spill] sm:$0xff]  ;;  %v9105_v56 = vld [vmem:[#allocation68_spill] sm:$0xff] }
 0x5bd   :  { %3764 = vmatpush.bf16.msrb.mxu1 %v9095_v31  ;;  %3790 = vmatpush.bf16.msrb.mxu3 %v9096_v21  ;;  %v9106_v31 = vld [vmem:[#allocation70_spill] sm:$0xff]  ;;  %v9107_v21 = vld [vmem:[#allocation65_spill] sm:$0xff] }
 0x5bf   :  { %3753 = vmatpush.bf16.msrb.mxu0 %v9097_v48  ;;  %3779 = vmatpush.bf16.msrb.mxu2 %v9098_v0  ;;  %v9108_v48 = vld [vmem:[#allocation67_spill] sm:$0xff]  ;;  %v9109_v0 = vld [vmem:[#allocation72_spill] sm:$0xff] }
 0x5c1   :  { %3765 = vmatpush.bf16.msrb.mxu1 %v9099_v60  ;;  %3791 = vmatpush.bf16.msrb.mxu3 %v9100_v41  ;;  %v9110_v60 = vld [vmem:[#allocation74_spill] sm:$0xff]  ;;  %v9111_v41 = vld [vmem:[#allocation69_spill] sm:$0xff] }
 0x5c3   :  { %3754 = vmatpush.bf16.msrb.mxu0 %v9101_v25  ;;  %3780 = vmatpush.bf16.msrb.mxu2 %v9102_v19  ;;  %v9112_v25 = vld [vmem:[#allocation71_spill] sm:$0xff]  ;;  %v9113_v19 = vld [vmem:[#allocation76_spill] sm:$0xff] }
 0x5c5   :  { %3766 = vmatpush.bf16.msrb.mxu1 %v9103_v16  ;;  %3792 = vmatpush.bf16.msrb.mxu3 %v9104_v20  ;;  %v9114_v16 = vld [vmem:[#allocation78_spill] sm:$0xff]  ;;  %v9115_v20 = vld [vmem:[#allocation73_spill] sm:$0xff] }
 0x5c7   :  { %3755 = vmatpush.bf16.msrb.mxu0 %v9105_v56  ;;  %3781 = vmatpush.bf16.msrb.mxu2 %v9106_v31  ;;  %v9116_v56 = vld [vmem:[#allocation75_spill] sm:$0xff]  ;;  %v9117_v31 = vld [vmem:[#allocation77_spill] sm:$0xff] }
 0x5c9   :  { %3767 = vmatpush.bf16.msrb.mxu1 %v9107_v21  ;;  %3793 = vmatpush.bf16.msrb.mxu3 %v9108_v48  ;;  %v9118_v21 = vld [vmem:[#allocation79_spill] sm:$0xff] }
 0x5cb   :  { %3756 = vmatpush.bf16.msrb.mxu0 %v9109_v0  ;;  %3782 = vmatpush.bf16.msrb.mxu2 %v9110_v60  ;;  %v9119_v60 = vld [vmem:[#allocation98_spill] sm:$0xff] }
 0x5cd   :  { %3768 = vmatpush.bf16.msrb.mxu1 %v9111_v41  ;;  %3794 = vmatpush.bf16.msrb.mxu3 %v9112_v25  ;;  %v536_v41 = vadd.f32 %v9120_v15, %v9119_v60 }
 0x5cf   :  { %3757 = vmatpush.bf16.msrb.mxu0 %v9113_v19  ;;  %3783 = vmatpush.bf16.msrb.mxu2 %v9114_v16  ;;  %v3355_v48 = vpop.f32.mrf.mxu0  ;;  %v9121_v16 = vld [vmem:[#allocation104_spill] sm:$0xff] }
 0x5d1   :  { %3769 = vmatpush.bf16.msrb.mxu1 %v9115_v20  ;;  %3795 = vmatpush.bf16.msrb.mxu3 %v9116_v56  ;;  %v565_v20 = vadd.f32 %v9122_v62, %v9121_v16 }
 0x5d5   :  { %3770 = vmatpush.bf16.msrb.mxu1 %v9117_v31  ;;  %3796 = vmatpush.bf16.msrb.mxu3 %v9118_v21  ;;  %v3368_v0 = vpop.f32.mrf.mxu1  ;;  %v3381_v18 = vpop.f32.mrf.mxu2 }
 0x5d6   :  { %v3369_v4 = vadd.f32 %v3368_v0, %v3355_v48  ;;  %v9123_v0 = vld [vmem:[#allocation112_spill] sm:$0xff] }
 0x5d7   :  { %v3357_v25 = vpop.f32.mrf.mxu0 }
 0x5d8   :  { %v3554_v11 = vadd.f32 %v3369_v4, %v536_v41  ;;  %v9124_v4 = vld [vmem:[#allocation154_spill] sm:$0xff] }
 0x5da   :  { %v5227_v19 = vmul.f32 -1.442695, %v3554_v11  ;;  %v594_v11 = vadd.f32 %v9124_v4, %v9123_v0 }
 0x5db   :  { %v3394_v49 = vpop.f32.mrf.mxu3 }
 0x5dc   :  { %5611 = vpow2.f32 %v5227_v19  ;;  %v3395_v56 = vadd.f32 %v3394_v49, %v3381_v18 }
 0x5dd   :  { %v3370_v27 = vpop.f32.mrf.mxu1  ;;  %v3383_v31 = vpop.f32.mrf.mxu2 }
 0x5de   :  { %v3555_v8 = vadd.f32 %v3395_v56, %v565_v20 }
 0x5df   :  { %v3407_v21 = vpop.f32.mrf.mxu0 }
 0x5e0   :  { %v5228_v50 = vmul.f32 -1.442695, %v3555_v8 }
 0x5e2   :  { %v5612_v58 = vpop.eup %5611  ;;  %5613 = vpow2.f32 %v5228_v50 }
 0x5e3   :  { %v3568_v24 = vadd.f32 1.0, %v5612_v58  ;;  %v3396_v39 = vpop.f32.mrf.mxu3  ;;  %v9125_v58 = vld [vmem:[#allocation113_spill] sm:$0xff] }
 0x5e4   :  { %v9126_v39 = vld [vmem:[#allocation156_spill] sm:$0xff] }
 0x5e5   :  { %v3420_v15 = vpop.f32.mrf.mxu1  ;;  %v3433_v48 = vpop.f32.mrf.mxu2  ;;  %5615 = vrcp.f32 %v3568_v24  ;;  %v623_v50 = vadd.f32 %v9126_v39, %v9125_v58  ;;  %v9128_v39 = vld [vmem:[#allocation199_spill] sm:$0xff]  ;;  %vm3575_vm9 = vweird.f32 %v3568_v24 }
 0x5e6   :  { %v3421_v41 = vadd.f32 %v3420_v15, %v3407_v21 }
 0x5e7   :  { %v3409_v25 = vpop.f32.mrf.mxu0 }
 0x5e8   :  { %v5614_v62 = vpop.eup %5613  ;;  %v3556_v19 = vadd.f32 %v3421_v41, %v594_v11 }
 0x5e9   :  { %v7632_v49 = vadd.f32 1.0, %v5614_v62 }
 0x5ea   :  { %v5229_v27 = vmul.f32 -1.442695, %v3556_v19 }
 0x5eb   :  { %5617 = vrcp.f32 %v7632_v49  ;;  %v3446_v8 = vpop.f32.mrf.mxu3  ;;  %v7635_v31 = vpop.eup %5615  ;;  %vm3590_vm14 = vweird.f32 %v7632_v49 }
 0x5ec   :  { %5619 = vpow2.f32 %v5229_v27  ;;  %v3447_v56 = vadd.f32 %v3446_v8, %v3433_v48  ;;  %v3571_v21 = vmul.f32 %v7635_v31, %v3568_v24  ;;  %v9127_v8 = vld [vmem:[#allocation182_spill] sm:$0xff]  ;;  %vm3576_vm8 = vweird.f32 %v7635_v31 }
 0x5ed   :  { %v3422_v18 = vpop.f32.mrf.mxu1  ;;  %v3435_v20 = vpop.f32.mrf.mxu2  ;;  %vm7655_vm10 = vmor %vm3575_vm9, %vm3576_vm8 }
 0x5ee   :  { %v3557_v4 = vadd.f32 %v3447_v56, %v623_v50  ;;  %v3572_v62 = vsub.f32 1.0, %v3571_v21  ;;  %v652_v50 = vadd.f32 %v9128_v39, %v9127_v8  ;;  %v9130_v39 = vld [vmem:[#allocation201_spill] sm:$0xff] }
 0x5ef   :  { %v3459_v15 = vpop.f32.mrf.mxu0 }
 0x5f0   :  { %v5230_v11 = vmul.f32 -1.442695, %v3557_v4  ;;  %v3573_v18 = vmul.f32 %v7635_v31, %v3572_v62 }
 0x5f1   :  { %v7640_v41 = vpop.eup %5617 }
 0x5f2   :  { %v5620_v25 = vpop.eup %5619  ;;  %5621 = vpow2.f32 %v5230_v11  ;;  %v3586_v16 = vmul.f32 %v7640_v41, %v7632_v49  ;;  %v3579_v11 = vand.u32 2147483647, %v3568_v24  ;;  %v3574_v42 = vadd.f32 %v7635_v31, %v3573_v18 }
 0x5f3   :  { %v3606_v19 = vadd.f32 1.0, %v5620_v25  ;;  %v3448_v0 = vpop.f32.mrf.mxu3  ;;  %vm3591_vm12 = vweird.f32 %v7640_v41 }
 0x5f4   :  { %v3587_v58 = vsub.f32 1.0, %v3586_v16  ;;  %v3581_v0 = vand.u32 2147483648, %v3568_v24  ;;  %vm7659_vm11 = vcmp.eq.f32.partialorder %v3579_v11, 8.507059e+37  ;;  %v3594_v11 = vand.u32 2147483647, %v7632_v49  ;;  %vm7676_vm0 = vmor %vm3590_vm14, %vm3591_vm12 }
 0x5f5   :  { %5623 = vrcp.f32 %v3606_v19  ;;  %v3485_v27 = vpop.f32.mrf.mxu2  ;;  %v3472_v48 = vpop.f32.mrf.mxu1  ;;  %v3619_v9 = vand.u32 2147483648, %v3606_v19  ;;  %vm3613_vm15 = vweird.f32 %v3606_v19 }
 0x5f6   :  { %v3473_v56 = vadd.f32 %v3472_v48, %v3459_v15  ;;  %v3588_v62 = vmul.f32 %v7640_v41, %v3587_v58  ;;  %v9129_v48 = vld [vmem:[#allocation184_spill] sm:$0xff]  ;;  %v3582_v8 = vor.u32 1.1754944e-38, %v3581_v0  ;;  %v3578_v58 = vsel %vm7655_vm10, %v7635_v31, %v3574_v42 }
 0x5f7   :  { %v3461_v20 = vpop.f32.mrf.mxu0  ;;  %v681_v16 = vadd.f32 %v9130_v39, %v9129_v48  ;;  %v3596_v0 = vand.u32 2147483648, %v7632_v49  ;;  %vm3595_vm3 = vcmp.eq.f32.partialorder %v3594_v11, 8.507059e+37  ;;  %v9164_v48 = vld [vmem:[#allocation176_spill] sm:$0xff] }
 0x5f8   :  { %v5622_v4 = vpop.eup %5621  ;;  %v3558_v21 = vadd.f32 %v3473_v56, %v652_v50  ;;  %v3583_v31 = vsel %vm7659_vm11, %v3582_v8, %v3578_v58 }
 0x5f9   :  { %v7647_v60 = vadd.f32 1.0, %v5622_v4  ;;  %v3597_v58 = vor.u32 1.1754944e-38, %v3596_v0 }
 0x5fb   :  { %v5624_v25 = vpop.eup %5623  ;;  %5625 = vrcp.f32 %v7647_v60  ;;  %v3498_v15 = vpop.f32.mrf.mxu3  ;;  %v3634_v8 = vand.u32 2147483648, %v7647_v60  ;;  %vm3628_vm5 = vweird.f32 %v7647_v60 }
 0x5fc   :  { %v3609_v13 = vmul.f32 %v5624_v25, %v3606_v19  ;;  %5627 = vtanh.f32 %v3558_v21  ;;  %v3499_v20 = vadd.f32 %v3498_v15, %v3485_v27  ;;  %vm3614_vm13 = vweird.f32 %v5624_v25 }
 0x5fd   :  { %v3487_v50 = vpop.f32.mrf.mxu2  ;;  %v3474_v21 = vpop.f32.mrf.mxu1  ;;  %v3589_v27 = vadd.f32 %v7640_v41, %v3588_v62  ;;  %vm3615_vm1 = vmor %vm3613_vm15, %vm3614_vm13 }
 0x5fe   :  { %v3610_v56 = vsub.f32 1.0, %v3609_v13  ;;  %v3559_v39 = vadd.f32 %v3499_v20, %v681_v16  ;;  %v3617_v13 = vand.u32 2147483647, %v3606_v19  ;;  %v3620_v20 = vor.u32 1.1754944e-38, %v3619_v9 }
 0x5ff   :  { %v3593_v19 = vsel %vm7676_vm0, %v7640_v41, %v3589_v27  ;;  %v3632_v9 = vand.u32 2147483647, %v7647_v60  ;;  %v3635_v27 = vor.u32 1.1754944e-38, %v3634_v8  ;;  %v9140_v8 = vld [vmem:[#allocation203_spill] sm:$0xff] }
 0x600   :  { %v3611_v24 = vmul.f32 %v5624_v25, %v3610_v56  ;;  %5629 = vtanh.f32 %v3559_v39  ;;  %vm3618_vm2 = vcmp.eq.f32.partialorder %v3617_v13, 8.507059e+37 }
 0x601   :  { %v5626_v15 = vpop.eup %5625  ;;  %vm3633_vm7 = vcmp.eq.f32.partialorder %v3632_v9, 8.507059e+37 }
 0x602   :  { %v5628_v50 = vpop.eup %5627  ;;  %v3624_v42 = vmul.f32 %v5626_v15, %v7647_v60  ;;  %v3612_v16 = vadd.f32 %v5624_v25, %v3611_v24  ;;  %vm3629_vm4 = vweird.f32 %v5626_v15 }
 0x603   :  { %v3680_v56 = vmul.f32 %v5628_v50, %v3583_v31  ;;  %v3500_v21 = vpop.f32.mrf.mxu3  ;;  %vm3630_vm6 = vmor %vm3628_vm5, %vm3629_vm4 }
 0x604   :  { %v3625_v4 = vsub.f32 1.0, %v3624_v42  ;;  %v3616_v49 = vsel %vm3615_vm1, %v5624_v25, %v3612_v16  ;;  %v3598_v42 = vsel %vm3595_vm3, %v3597_v58, %v3593_v19 }
 0x605   :  { %v3621_v18 = vsel %vm3618_vm2, %v3620_v20, %v3616_v49  ;;  %v9138_v49 = vld [vmem:[#allocation202_spill] sm:$0xff] }
 0x606   :  { %v3626_v39 = vmul.f32 %v5626_v15, %v3625_v4  ;;  %v3678_v24 = vmul.f32 %v3621_v18, %v7469_v32  ;;  %v5630_v50 = vpop.eup %5629  ;;  %v9137_v4 = vld [vmem:[#allocation188_spill] sm:$0xff] }
 0x607   :  { %v3681_v41 = vmul.f32 %v5630_v50, %v3598_v42  ;;  %v710_v19 = vadd.f32 %v9138_v49, %v9137_v4  ;;  %v9163_v4 = vld [vmem:[#allocation174_spill] sm:$0xff] }
 0x608   :  { %v7687_v25 = vadd.f32 %v3680_v56, %v3678_v24  ;;  %v3627_v13 = vadd.f32 %v5626_v15, %v3626_v39  ;;  %v9139_v39 = vld [vmem:[#allocation189_spill] sm:$0xff] }
 0x60a   :  { %v3631_v31 = vsel %vm3630_vm6, %v5626_v15, %v3627_v13  ;;  %v739_v15 = vadd.f32 %v9140_v8, %v9139_v39  ;;  %v9162_v39 = vld [vmem:[#allocation165_spill] sm:$0xff] }
 0x60b   :  { %v3636_v11 = vsel %vm3633_vm7, %v3635_v27, %v3631_v31 }
 0x60c   :  { %v3679_v0 = vmul.f32 %v3636_v11, %v7472_v47 }
 0x60e   :  { %v7690_v62 = vadd.f32 %v3681_v41, %v3679_v0 }
 0x60f   :  { %v3511_v16 = vpop.f32.mrf.mxu0 }
 0x615   :  { %v3524_v32 = vpop.f32.mrf.mxu1  ;;  %v3537_v20 = vpop.f32.mrf.mxu2 }
 0x616   :  { %v3525_v60 = vadd.f32 %v3524_v32, %v3511_v16 }
 0x617   :  { %v3513_v56 = vpop.f32.mrf.mxu0 }
 0x618   :  { %v3560_v21 = vadd.f32 %v3525_v60, %v710_v19 }
 0x61a   :  { %v5231_v18 = vmul.f32 -1.442695, %v3560_v21 }
 0x61b   :  { %v3550_v58 = vpop.f32.mrf.mxu3 }
 0x61c   :  { %5631 = vpow2.f32 %v5231_v18  ;;  %v3551_v24 = vadd.f32 %v3550_v58, %v3537_v20 }
 0x61d   :  { %v3526_v9 = vpop.f32.mrf.mxu1  ;;  %v3539_v47 = vpop.f32.mrf.mxu2 }
 0x61e   :  { %v3561_v50 = vadd.f32 %v3551_v24, %v739_v15 }
 0x620   :  { %v5232_v42 = vmul.f32 -1.442695, %v3561_v50 }
 0x622   :  { %v5632_v13 = vpop.eup %5631  ;;  %5633 = vpow2.f32 %v5232_v42 }
 0x623   :  { %v3646_v41 = vadd.f32 1.0, %v5632_v13  ;;  %v3552_v27 = vpop.f32.mrf.mxu3 }
 0x625   :  { %5635 = vrcp.f32 %v3646_v41  ;;  %v3659_v49 = vand.u32 2147483648, %v3646_v41  ;;  %v3657_v20 = vand.u32 2147483647, %v3646_v41  ;;  %vm3653_vm9 = vweird.f32 %v3646_v41 }
 0x627   :  { %v3660_v18 = vor.u32 1.1754944e-38, %v3659_v49  ;;  %vm3658_vm11 = vcmp.eq.f32.partialorder %v3657_v20, 8.507059e+37  ;;  %v9143_v20 = vld [vmem:[#allocation142_spill] sm:$0xff] }
 0x628   :  { %v5634_v31 = vpop.eup %5633 }
 0x629   :  { %v3647_v11 = vadd.f32 1.0, %v5634_v31 }
 0x62b   :  { %v5636_v0 = vpop.eup %5635  ;;  %5637 = vrcp.f32 %v3647_v11  ;;  %v3674_v9 = vand.u32 2147483648, %v3647_v11  ;;  %v3672_v42 = vand.u32 2147483647, %v3647_v11  ;;  %vm3668_vm13 = vweird.f32 %v3647_v11 }
 0x62c   :  { %v3649_v16 = vmul.f32 %v5636_v0, %v3646_v41  ;;  %5639 = vtanh.f32 %v7687_v25  ;;  %vm3654_vm8 = vweird.f32 %v5636_v0 }
 0x62d   :  { %vm3655_vm10 = vmor %vm3653_vm9, %vm3654_vm8  ;;  %5641 = vtanh.f32 %v7690_v62  ;;  %v3675_v41 = vor.u32 1.1754944e-38, %v3674_v9  ;;  %vm3673_vm15 = vcmp.eq.f32.partialorder %v3672_v42, 8.507059e+37  ;;  %v9152_v9 = vld [vmem:[#allocation158_spill] sm:$0xff] }
 0x62e   :  { %v3650_v32 = vsub.f32 1.0, %v3649_v16  ;;  %v9155_v42 = vld [vmem:[#allocation162_spill] sm:$0xff] }
 0x630   :  { %v3651_v19 = vmul.f32 %v5636_v0, %v3650_v32 }
 0x631   :  { %v5638_v60 = vpop.eup %5637 }
 0x632   :  { %v3652_v56 = vadd.f32 %v5636_v0, %v3651_v19  ;;  %v3664_v21 = vmul.f32 %v5638_v60, %v3647_v11  ;;  %v5640_v15 = vpop.eup %5639  ;;  %vm3669_vm12 = vweird.f32 %v5638_v60  ;;  %v9141_v11 = vld [vmem:[#allocation133_spill] sm:$0xff]  ;;  %v9142_v19 = vld [vmem:[#allocation136_spill] sm:$0xff] }
 0x633   :  { %vm3670_vm14 = vmor %vm3668_vm13, %vm3669_vm12 }
 0x634   :  { %v3656_v58 = vsel %vm3655_vm10, %v5636_v0, %v3652_v56  ;;  %v3665_v8 = vsub.f32 1.0, %v3664_v21  ;;  %v5642_v0 = vpop.eup %5641  ;;  %v9145_v56 = vld [vmem:[#allocation139_spill] sm:$0xff]  ;;  %v9146_v21 = vld [vmem:[#allocation141_spill] sm:$0xff] }
 0x635   :  { %v3661_v24 = vsel %vm3658_vm11, %v3660_v18, %v3656_v58  ;;  %v9147_v18 = vld [vmem:[#allocation150_spill] sm:$0xff]  ;;  %v9148_v58 = vld [vmem:[#allocation152_spill] sm:$0xff] }
 0x636   :  { %v3686_v47 = vmul.f32 %v5640_v15, %v3661_v24  ;;  %v3666_v50 = vmul.f32 %v5638_v60, %v3665_v8  ;;  %v9149_v8 = vld [vmem:[#allocation145_spill] sm:$0xff]  ;;  %v9151_v24 = vld [vmem:[#allocation155_spill] sm:$0xff] }
 0x637   :  { %v9150_v15 = vld [vmem:[#allocation149_spill] sm:$0xff] }
 0x638   :  { %v7698_v13 = vpack.c.bf16 %v3686_v47, %v3686_v47  ;;  %v3667_v27 = vadd.f32 %v5638_v60, %v3666_v50  ;;  %v9153_v47 = vld [vmem:[#allocation151_spill] sm:$0xff]  ;;  %v9154_v50 = vld [vmem:[#allocation153_spill] sm:$0xff] }
 0x63a   :  { %v3671_v31 = vsel %vm3670_vm14, %v5638_v60, %v3667_v27  ;;  %3706 = vmatmul.bf16.vlgmr.msra.gmra.mxu0 %v7698_v13  ;;  %3732 = vmatmul.bf16.vlgmr.msra.gmra.mxu2 %v7698_v13  ;;  %v9144_v60 = vld [vmem:[#allocation146_spill] sm:$0xff]  ;;  %v9156_v27 = vld [vmem:[#allocation164_spill] sm:$0xff] }
 0x63b   :  { %v3676_v16 = vsel %vm3673_vm15, %v3675_v41, %v3671_v31  ;;  %3802 = vmatpush.bf16.msra.mxu0 %v8584_v55  ;;  %3828 = vmatpush.bf16.msra.mxu2 %v8585_v3  ;;  %v9157_v41 = vld [vmem:[#allocation157_spill] sm:$0xff]  ;;  %v9158_v31 = vld [vmem:[#allocation160_spill] sm:$0xff] }
 0x63c   :  { %v3687_v32 = vmul.f32 %v5642_v0, %v3676_v16  ;;  %v9159_v0 = vld [vmem:[#allocation166_spill] sm:$0xff] }
 0x63d   :  { %v9160_v16 = vld [vmem:[#allocation170_spill] sm:$0xff] }
 0x63e   :  { %v7704_v49 = vpack.c.bf16 %v3687_v32, %v3687_v32  ;;  %v9161_v32 = vld [vmem:[#allocation163_spill] sm:$0xff] }
 0x63f   :  { %3803 = vmatpush.bf16.msra.mxu0 %v8586_v38  ;;  %3829 = vmatpush.bf16.msra.mxu2 %v8587_v29 }
 0x640   :  { %3719 = vmatmul.bf16.vlgmr.msra.gmra.mxu1 %v7704_v49  ;;  %3745 = vmatmul.bf16.vlgmr.msra.gmra.mxu3 %v7704_v49 }
 0x641   :  { %3815 = vmatpush.bf16.msra.mxu1 %v8588_v52  ;;  %3841 = vmatpush.bf16.msra.mxu3 %v8589_v57 }
 0x643   :  { %3804 = vmatpush.bf16.msra.mxu0 %v8590_v34  ;;  %3830 = vmatpush.bf16.msra.mxu2 %v8591_v14 }
 0x645   :  { %3816 = vmatpush.bf16.msra.mxu1 %v8592_v5  ;;  %3842 = vmatpush.bf16.msra.mxu3 %v8593_v61 }
 0x647   :  { %3805 = vmatpush.bf16.msra.mxu0 %v8594_v54  ;;  %3831 = vmatpush.bf16.msra.mxu2 %v8595_v44 }
 0x649   :  { %3817 = vmatpush.bf16.msra.mxu1 %v8596_v53  ;;  %3843 = vmatpush.bf16.msra.mxu3 %v8597_v12 }
 0x64a   :  { %3758 = vmatmul.bf16.vlgmr.msrb.gmra.mxu0 %v7698_v13  ;;  %3784 = vmatmul.bf16.vlgmr.msrb.gmra.mxu2 %v7698_v13 }
 0x64b   :  { %3806 = vmatpush.bf16.msra.mxu0 %v8598_v36  ;;  %3832 = vmatpush.bf16.msra.mxu2 %v8599_v45 }
 0x64d   :  { %3818 = vmatpush.bf16.msra.mxu1 %v8600_v2  ;;  %3844 = vmatpush.bf16.msra.mxu3 %v8601_v6 }
 0x64f   :  { %3807 = vmatpush.bf16.msra.mxu0 %v8602_v33  ;;  %3833 = vmatpush.bf16.msra.mxu2 %v8603_v23 }
 0x650   :  { %3771 = vmatmul.bf16.vlgmr.msrb.gmra.mxu1 %v7704_v49  ;;  %3797 = vmatmul.bf16.vlgmr.msrb.gmra.mxu3 %v7704_v49 }
 0x651   :  { %3819 = vmatpush.bf16.msra.mxu1 %v8701_v26  ;;  %3845 = vmatpush.bf16.msra.mxu3 %v8702_v40 }
 0x653   :  { %3808 = vmatpush.bf16.msra.mxu0 %v8703_v1  ;;  %3834 = vmatpush.bf16.msra.mxu2 %v8704_v37 }
 0x655   :  { %3820 = vmatpush.bf16.msra.mxu1 %v8705_v7  ;;  %3846 = vmatpush.bf16.msra.mxu3 %v8706_v63 }
 0x657   :  { %3809 = vmatpush.bf16.msra.mxu0 %v8707_v46  ;;  %3835 = vmatpush.bf16.msra.mxu2 %v8708_v51 }
 0x659   :  { %3821 = vmatpush.bf16.msra.mxu1 %v8711_v22  ;;  %3847 = vmatpush.bf16.msra.mxu3 %v8712_v17 }
 0x65a   :  { %3810 = vmatmul.bf16.vlgmr.msra.gmra.mxu0 %v7698_v13  ;;  %3836 = vmatmul.bf16.vlgmr.msra.gmra.mxu2 %v7698_v13 }
 0x65b   :  { %3854 = vmatpush.bf16.msrb.mxu0 %v8709_v43  ;;  %3880 = vmatpush.bf16.msrb.mxu2 %v8710_v59 }
 0x65d   :  { %3822 = vmatpush.bf16.msra.mxu1 %v8715_v28  ;;  %3848 = vmatpush.bf16.msra.mxu3 %v8716_v30 }
 0x65f   :  { %3855 = vmatpush.bf16.msrb.mxu0 %v8713_v10  ;;  %3881 = vmatpush.bf16.msrb.mxu2 %v8714_v35 }
 0x660   :  { %3823 = vmatmul.bf16.vlgmr.msra.gmra.mxu1 %v7704_v49  ;;  %3849 = vmatmul.bf16.vlgmr.msra.gmra.mxu3 %v7704_v49 }
 0x661   :  { %3867 = vmatpush.bf16.msrb.mxu1 %v9141_v11  ;;  %3893 = vmatpush.bf16.msrb.mxu3 %v9142_v19  ;;  %v9242_v19 = vld [vmem:[#allocation205_spill] sm:$0xff] }
 0x663   :  { %3856 = vmatpush.bf16.msrb.mxu0 %v9143_v20  ;;  %3882 = vmatpush.bf16.msrb.mxu2 %v9144_v60 }
 0x665   :  { %3868 = vmatpush.bf16.msrb.mxu1 %v9145_v56  ;;  %3894 = vmatpush.bf16.msrb.mxu3 %v9146_v21 }
 0x667   :  { %3857 = vmatpush.bf16.msrb.mxu0 %v9147_v18  ;;  %3883 = vmatpush.bf16.msrb.mxu2 %v9148_v58 }
 0x669   :  { %3869 = vmatpush.bf16.msrb.mxu1 %v9149_v8  ;;  %3895 = vmatpush.bf16.msrb.mxu3 %v9150_v15 }
 0x66b   :  { %3858 = vmatpush.bf16.msrb.mxu0 %v9151_v24  ;;  %3884 = vmatpush.bf16.msrb.mxu2 %v9152_v9 }
 0x66d   :  { %3870 = vmatpush.bf16.msrb.mxu1 %v9153_v47  ;;  %3896 = vmatpush.bf16.msrb.mxu3 %v9154_v50  ;;  %v9165_v50 = vld [vmem:[#allocation16_spill] sm:$0xff] }
 0x66f   :  { %3859 = vmatpush.bf16.msrb.mxu0 %v9155_v42  ;;  %3885 = vmatpush.bf16.msrb.mxu2 %v9156_v27  ;;  %v9166_v42 = vld [vmem:[#allocation18_spill] sm:$0xff]  ;;  %v9167_v27 = vld [vmem:[#allocation169_spill] sm:$0xff] }
 0x671   :  { %3871 = vmatpush.bf16.msrb.mxu1 %v9157_v41  ;;  %3897 = vmatpush.bf16.msrb.mxu3 %v9158_v31  ;;  %v9168_v41 = vld [vmem:[#allocation173_spill] sm:$0xff] }
 0x673   :  { %3860 = vmatpush.bf16.msrb.mxu0 %v9159_v0  ;;  %3886 = vmatpush.bf16.msrb.mxu2 %v9160_v16  ;;  %v9169_v16 = vld [vmem:[#allocation20_spill] sm:$0xff] }
 0x675   :  { %3872 = vmatpush.bf16.msrb.mxu1 %v9161_v32  ;;  %3898 = vmatpush.bf16.msrb.mxu3 %v9162_v39  ;;  %v9170_v32 = vld [vmem:[#allocation22_spill] sm:$0xff]  ;;  %v9171_v39 = vld [vmem:[#allocation175_spill] sm:$0xff] }
 0x677   :  { %3861 = vmatpush.bf16.msrb.mxu0 %v9163_v4  ;;  %3887 = vmatpush.bf16.msrb.mxu2 %v9164_v48  ;;  %v9172_v4 = vld [vmem:[#allocation177_spill] sm:$0xff] }
 0x678   :  { %v9173_v48 = vld [vmem:[#allocation17_spill] sm:$0xff] }
 0x679   :  { %3873 = vmatpush.bf16.msrb.mxu1 %v9167_v27  ;;  %3899 = vmatpush.bf16.msrb.mxu3 %v9168_v41  ;;  %v9176_v41 = vld [vmem:[#allocation26_spill] sm:$0xff] }
 0x67a   :  { %3862 = vmatmul.bf16.vlgmr.msrb.gmra.mxu0 %v7698_v13  ;;  %3888 = vmatmul.bf16.vlgmr.msrb.gmra.mxu2 %v7698_v13  ;;  %v9177_v13 = vld [vmem:[#allocation21_spill] sm:$0xff]  ;;  %v9184_v27 = vld [vmem:[#allocation34_spill] sm:$0xff] }
 0x67b   :  { %4050 = vmatpush.bf16.msra.mxu0 %v9165_v50  ;;  %4076 = vmatpush.bf16.msra.mxu2 %v9166_v42  ;;  %v9174_v50 = vld [vmem:[#allocation19_spill] sm:$0xff]  ;;  %v9175_v42 = vld [vmem:[#allocation24_spill] sm:$0xff] }
 0x67d   :  { %3874 = vmatpush.bf16.msrb.mxu1 %v9171_v39  ;;  %3900 = vmatpush.bf16.msrb.mxu3 %v9172_v4  ;;  %v9180_v39 = vld [vmem:[#allocation30_spill] sm:$0xff]  ;;  %v9181_v4 = vld [vmem:[#allocation25_spill] sm:$0xff] }
 0x67f   :  { %4051 = vmatpush.bf16.msra.mxu0 %v9169_v16  ;;  %4077 = vmatpush.bf16.msra.mxu2 %v9170_v32  ;;  %v9178_v16 = vld [vmem:[#allocation23_spill] sm:$0xff]  ;;  %v9179_v32 = vld [vmem:[#allocation28_spill] sm:$0xff] }
 0x680   :  { %3875 = vmatmul.bf16.vlgmr.msrb.gmra.mxu1 %v7704_v49  ;;  %3901 = vmatmul.bf16.vlgmr.msrb.gmra.mxu3 %v7704_v49  ;;  %v9185_v49 = vld [vmem:[#allocation29_spill] sm:$0xff] }
 0x681   :  { %4063 = vmatpush.bf16.msra.mxu1 %v9173_v48  ;;  %4089 = vmatpush.bf16.msra.mxu3 %v9174_v50  ;;  %v9182_v48 = vld [vmem:[#allocation27_spill] sm:$0xff]  ;;  %v9183_v50 = vld [vmem:[#allocation32_spill] sm:$0xff] }
 0x683   :  { %4052 = vmatpush.bf16.msra.mxu0 %v9175_v42  ;;  %4078 = vmatpush.bf16.msra.mxu2 %v9176_v41  ;;  %v9186_v42 = vld [vmem:[#allocation31_spill] sm:$0xff]  ;;  %v9187_v41 = vld [vmem:[#allocation36_spill] sm:$0xff] }
 0x685   :  { %4064 = vmatpush.bf16.msra.mxu1 %v9177_v13  ;;  %4090 = vmatpush.bf16.msra.mxu3 %v9178_v16  ;;  %v9188_v13 = vld [vmem:[#allocation38_spill] sm:$0xff]  ;;  %v9189_v16 = vld [vmem:[#allocation33_spill] sm:$0xff] }
 0x687   :  { %4053 = vmatpush.bf16.msra.mxu0 %v9179_v32  ;;  %4079 = vmatpush.bf16.msra.mxu2 %v9180_v39  ;;  %v9190_v32 = vld [vmem:[#allocation35_spill] sm:$0xff]  ;;  %v9191_v39 = vld [vmem:[#allocation40_spill] sm:$0xff] }
 0x689   :  { %4065 = vmatpush.bf16.msra.mxu1 %v9181_v4  ;;  %4091 = vmatpush.bf16.msra.mxu3 %v9182_v48  ;;  %v9192_v4 = vld [vmem:[#allocation42_spill] sm:$0xff]  ;;  %v9193_v48 = vld [vmem:[#allocation37_spill] sm:$0xff] }
 0x68b   :  { %4054 = vmatpush.bf16.msra.mxu0 %v9183_v50  ;;  %4080 = vmatpush.bf16.msra.mxu2 %v9184_v27  ;;  %v9194_v50 = vld [vmem:[#allocation39_spill] sm:$0xff]  ;;  %v9195_v27 = vld [vmem:[#allocation44_spill] sm:$0xff] }
 0x68d   :  { %4066 = vmatpush.bf16.msra.mxu1 %v9185_v49  ;;  %4092 = vmatpush.bf16.msra.mxu3 %v9186_v42  ;;  %v9196_v49 = vld [vmem:[#allocation46_spill] sm:$0xff]  ;;  %v9197_v42 = vld [vmem:[#allocation48_spill] sm:$0xff] }
 0x68f   :  { %4055 = vmatpush.bf16.msra.mxu0 %v9187_v41  ;;  %4081 = vmatpush.bf16.msra.mxu2 %v9188_v13  ;;  %v9198_v41 = vld [vmem:[#allocation50_spill] sm:$0xff]  ;;  %v9199_v13 = vld [vmem:[#allocation41_spill] sm:$0xff] }
 0x691   :  { %4067 = vmatpush.bf16.msra.mxu1 %v9189_v16  ;;  %4093 = vmatpush.bf16.msra.mxu3 %v9190_v32  ;;  %v9200_v16 = vld [vmem:[#allocation43_spill] sm:$0xff]  ;;  %v9201_v32 = vld [vmem:[#allocation52_spill] sm:$0xff] }
 0x693   :  { %4056 = vmatpush.bf16.msra.mxu0 %v9191_v39  ;;  %4082 = vmatpush.bf16.msra.mxu2 %v9192_v4  ;;  %v9202_v39 = vld [vmem:[#allocation54_spill] sm:$0xff]  ;;  %v9203_v4 = vld [vmem:[#allocation45_spill] sm:$0xff] }
 0x695   :  { %4068 = vmatpush.bf16.msra.mxu1 %v9193_v48  ;;  %4094 = vmatpush.bf16.msra.mxu3 %v9194_v50  ;;  %v9204_v48 = vld [vmem:[#allocation47_spill] sm:$0xff]  ;;  %v9205_v50 = vld [vmem:[#allocation49_spill] sm:$0xff] }
 0x697   :  { %4057 = vmatpush.bf16.msra.mxu0 %v9195_v27  ;;  %4083 = vmatpush.bf16.msra.mxu2 %v9196_v49  ;;  %v9206_v27 = vld [vmem:[#allocation51_spill] sm:$0xff]  ;;  %v9207_v49 = vld [vmem:[#allocation56_spill] sm:$0xff] }
 0x699   :  { %4069 = vmatpush.bf16.msra.mxu1 %v9199_v13  ;;  %4095 = vmatpush.bf16.msra.mxu3 %v9200_v16  ;;  %v9210_v13 = vld [vmem:[#allocation55_spill] sm:$0xff]  ;;  %v9211_v16 = vld [vmem:[#allocation60_spill] sm:$0xff] }
 0x69b   :  { %4102 = vmatpush.bf16.msrb.mxu0 %v9197_v42  ;;  %4128 = vmatpush.bf16.msrb.mxu2 %v9198_v41  ;;  %v9208_v42 = vld [vmem:[#allocation58_spill] sm:$0xff]  ;;  %v9209_v41 = vld [vmem:[#allocation53_spill] sm:$0xff] }
 0x69d   :  { %4070 = vmatpush.bf16.msra.mxu1 %v9203_v4  ;;  %4096 = vmatpush.bf16.msra.mxu3 %v9204_v48  ;;  %v9214_v4 = vld [vmem:[#allocation59_spill] sm:$0xff]  ;;  %v9215_v48 = vld [vmem:[#allocation64_spill] sm:$0xff] }
 0x69f   :  { %4103 = vmatpush.bf16.msrb.mxu0 %v9201_v32  ;;  %4129 = vmatpush.bf16.msrb.mxu2 %v9202_v39  ;;  %v9212_v32 = vld [vmem:[#allocation62_spill] sm:$0xff]  ;;  %v9213_v39 = vld [vmem:[#allocation57_spill] sm:$0xff] }
 0x6a1   :  { %4115 = vmatpush.bf16.msrb.mxu1 %v9205_v50  ;;  %4141 = vmatpush.bf16.msrb.mxu3 %v9206_v27  ;;  %v9216_v50 = vld [vmem:[#allocation66_spill] sm:$0xff]  ;;  %v9217_v27 = vld [vmem:[#allocation61_spill] sm:$0xff] }
 0x6a3   :  { %4104 = vmatpush.bf16.msrb.mxu0 %v9207_v49  ;;  %4130 = vmatpush.bf16.msrb.mxu2 %v9208_v42  ;;  %v9218_v49 = vld [vmem:[#allocation63_spill] sm:$0xff]  ;;  %v9219_v42 = vld [vmem:[#allocation68_spill] sm:$0xff] }
 0x6a5   :  { %4116 = vmatpush.bf16.msrb.mxu1 %v9209_v41  ;;  %4142 = vmatpush.bf16.msrb.mxu3 %v9210_v13  ;;  %v9220_v41 = vld [vmem:[#allocation70_spill] sm:$0xff]  ;;  %v9221_v13 = vld [vmem:[#allocation65_spill] sm:$0xff] }
 0x6a7   :  { %4105 = vmatpush.bf16.msrb.mxu0 %v9211_v16  ;;  %4131 = vmatpush.bf16.msrb.mxu2 %v9212_v32  ;;  %v9222_v16 = vld [vmem:[#allocation67_spill] sm:$0xff]  ;;  %v9223_v32 = vld [vmem:[#allocation72_spill] sm:$0xff] }
 0x6a9   :  { %4117 = vmatpush.bf16.msrb.mxu1 %v9213_v39  ;;  %4143 = vmatpush.bf16.msrb.mxu3 %v9214_v4  ;;  %v9224_v39 = vld [vmem:[#allocation74_spill] sm:$0xff]  ;;  %v9225_v4 = vld [vmem:[#allocation69_spill] sm:$0xff] }
 0x6ab   :  { %4106 = vmatpush.bf16.msrb.mxu0 %v9215_v48  ;;  %4132 = vmatpush.bf16.msrb.mxu2 %v9216_v50  ;;  %v9226_v48 = vld [vmem:[#allocation71_spill] sm:$0xff]  ;;  %v9227_v50 = vld [vmem:[#allocation76_spill] sm:$0xff] }
 0x6ad   :  { %4118 = vmatpush.bf16.msrb.mxu1 %v9217_v27  ;;  %4144 = vmatpush.bf16.msrb.mxu3 %v9218_v49  ;;  %v9228_v27 = vld [vmem:[#allocation78_spill] sm:$0xff]  ;;  %v9229_v49 = vld [vmem:[#allocation73_spill] sm:$0xff] }
 0x6af   :  { %4107 = vmatpush.bf16.msrb.mxu0 %v9219_v42  ;;  %4133 = vmatpush.bf16.msrb.mxu2 %v9220_v41  ;;  %v9230_v42 = vld [vmem:[#allocation75_spill] sm:$0xff]  ;;  %v9231_v41 = vld [vmem:[#allocation77_spill] sm:$0xff] }
 0x6b1   :  { %4119 = vmatpush.bf16.msrb.mxu1 %v9221_v13  ;;  %4145 = vmatpush.bf16.msrb.mxu3 %v9222_v16  ;;  %v9232_v13 = vld [vmem:[#allocation79_spill] sm:$0xff] }
 0x6b3   :  { %4108 = vmatpush.bf16.msrb.mxu0 %v9223_v32  ;;  %4134 = vmatpush.bf16.msrb.mxu2 %v9224_v39 }
 0x6b5   :  { %4120 = vmatpush.bf16.msrb.mxu1 %v9225_v4  ;;  %4146 = vmatpush.bf16.msrb.mxu3 %v9226_v48  ;;  %v9233_v4 = vld [vmem:[#allocation159_spill] sm:$0xff] }
 0x6b7   :  { %4109 = vmatpush.bf16.msrb.mxu0 %v9227_v50  ;;  %4135 = vmatpush.bf16.msrb.mxu2 %v9228_v27  ;;  %v3707_v16 = vpop.f32.mrf.mxu0 }
 0x6b9   :  { %4121 = vmatpush.bf16.msrb.mxu1 %v9229_v49  ;;  %4147 = vmatpush.bf16.msrb.mxu3 %v9230_v42  ;;  %v9234_v49 = vld [vmem:[#allocation161_spill] sm:$0xff] }
 0x6bd   :  { %4122 = vmatpush.bf16.msrb.mxu1 %v9231_v41  ;;  %4148 = vmatpush.bf16.msrb.mxu3 %v9232_v13  ;;  %v3720_v32 = vpop.f32.mrf.mxu1  ;;  %v3733_v0 = vpop.f32.mrf.mxu2 }
 0x6be   :  { %v3721_v39 = vadd.f32 %v3720_v32, %v3707_v16 }
 0x6bf   :  { %v3709_v31 = vpop.f32.mrf.mxu0 }
 0x6c0   :  { %v3906_v47 = vadd.f32 %v3721_v39, %v9233_v4 }
 0x6c2   :  { %v5233_v48 = vmul.f32 -1.442695, %v3906_v47  ;;  %v9235_v47 = vld [vmem:[#allocation167_spill] sm:$0xff] }
 0x6c3   :  { %v3746_v9 = vpop.f32.mrf.mxu3 }
 0x6c4   :  { %5643 = vpow2.f32 %v5233_v48  ;;  %v3747_v50 = vadd.f32 %v3746_v9, %v3733_v0 }
 0x6c5   :  { %v3722_v27 = vpop.f32.mrf.mxu1  ;;  %v3735_v24 = vpop.f32.mrf.mxu2 }
 0x6c6   :  { %v3907_v15 = vadd.f32 %v3747_v50, %v9234_v49 }
 0x6c7   :  { %v3759_v42 = vpop.f32.mrf.mxu0 }
 0x6c8   :  { %v5234_v8 = vmul.f32 -1.442695, %v3907_v15 }
 0x6ca   :  { %v5644_v41 = vpop.eup %5643  ;;  %5645 = vpow2.f32 %v5234_v8 }
 0x6cb   :  { %v3920_v13 = vadd.f32 1.0, %v5644_v41  ;;  %v3748_v58 = vpop.f32.mrf.mxu3 }
 0x6cc   :  { %v9236_v58 = vld [vmem:[#allocation171_spill] sm:$0xff] }
 0x6cd   :  { %v3772_v18 = vpop.f32.mrf.mxu1  ;;  %v3785_v21 = vpop.f32.mrf.mxu2  ;;  %5647 = vrcp.f32 %v3920_v13  ;;  %v3931_v60 = vand.u32 2147483647, %v3920_v13  ;;  %vm3927_vm1 = vweird.f32 %v3920_v13 }
 0x6ce   :  { %v3773_v31 = vadd.f32 %v3772_v18, %v3759_v42 }
 0x6cf   :  { %v3761_v16 = vpop.f32.mrf.mxu0  ;;  %vm7866_vm3 = vcmp.eq.f32.partialorder %v3931_v60, 8.507059e+37 }
 0x6d0   :  { %v5646_v32 = vpop.eup %5645  ;;  %v3908_v39 = vadd.f32 %v3773_v31, %v9235_v47 }
 0x6d1   :  { %v7849_v4 = vadd.f32 1.0, %v5646_v32 }
 0x6d2   :  { %v5235_v9 = vmul.f32 -1.442695, %v3908_v39 }
 0x6d3   :  { %5649 = vrcp.f32 %v7849_v4  ;;  %v3798_v24 = vpop.f32.mrf.mxu3  ;;  %v5648_v0 = vpop.eup %5647  ;;  %vm3942_vm6 = vweird.f32 %v7849_v4  ;;  %v3946_v60 = vand.u32 2147483647, %v7849_v4 }
 0x6d4   :  { %5651 = vpow2.f32 %v5235_v9  ;;  %v3799_v15 = vadd.f32 %v3798_v24, %v3785_v21  ;;  %v3923_v27 = vmul.f32 %v5648_v0, %v3920_v13  ;;  %vm3928_vm0 = vweird.f32 %v5648_v0 }
 0x6d5   :  { %v3774_v8 = vpop.f32.mrf.mxu1  ;;  %v3787_v48 = vpop.f32.mrf.mxu2  ;;  %vm7862_vm2 = vmor %vm3927_vm1, %vm3928_vm0  ;;  %vm3947_vm11 = vcmp.eq.f32.partialorder %v3946_v60, 8.507059e+37 }
 0x6d6   :  { %v3909_v50 = vadd.f32 %v3799_v15, %v9236_v58  ;;  %v3924_v31 = vsub.f32 1.0, %v3923_v27 }
 0x6d7   :  { %v3811_v49 = vpop.f32.mrf.mxu0 }
 0x6d8   :  { %v5236_v18 = vmul.f32 -1.442695, %v3909_v50  ;;  %v3925_v24 = vmul.f32 %v5648_v0, %v3924_v31  ;;  %v9237_v50 = vld [vmem:[#allocation204_spill] sm:$0xff] }
 0x6d9   :  { %v7853_v42 = vpop.eup %5649 }
 0x6da   :  { %v5652_v41 = vpop.eup %5651  ;;  %5653 = vpow2.f32 %v5236_v18  ;;  %v3938_v47 = vmul.f32 %v7853_v42, %v7849_v4  ;;  %v3933_v18 = vand.u32 2147483648, %v3920_v13  ;;  %vm3943_vm4 = vweird.f32 %v7853_v42 }
 0x6db   :  { %v3958_v16 = vadd.f32 1.0, %v5652_v41  ;;  %v3800_v32 = vpop.f32.mrf.mxu3  ;;  %v3926_v41 = vadd.f32 %v5648_v0, %v3925_v24  ;;  %vm7883_vm8 = vmor %vm3942_vm6, %vm3943_vm4 }
 0x6dc   :  { %v3939_v48 = vsub.f32 1.0, %v3938_v47 }
 0x6dd   :  { %5655 = vrcp.f32 %v3958_v16  ;;  %v3837_v39 = vpop.f32.mrf.mxu2  ;;  %v3824_v21 = vpop.f32.mrf.mxu1  ;;  %v3969_v13 = vand.u32 2147483647, %v3958_v16  ;;  %vm3965_vm7 = vweird.f32 %v3958_v16 }
 0x6de   :  { %v3825_v9 = vadd.f32 %v3824_v21, %v3811_v49  ;;  %v3940_v49 = vmul.f32 %v7853_v42, %v3939_v48 }
 0x6df   :  { %v3813_v8 = vpop.f32.mrf.mxu0  ;;  %vm3970_vm10 = vcmp.eq.f32.partialorder %v3969_v13, 8.507059e+37 }
 0x6e0   :  { %v5654_v15 = vpop.eup %5653  ;;  %v3910_v56 = vadd.f32 %v3825_v9, %v9237_v50  ;;  %v3971_v50 = vand.u32 2147483648, %v3958_v16 }
 0x6e1   :  { %v7857_v58 = vadd.f32 1.0, %v5654_v15  ;;  %v3934_v15 = vor.u32 1.1754944e-38, %v3933_v18  ;;  %v3948_v18 = vand.u32 2147483648, %v7849_v4 }
 0x6e3   :  { %v5656_v27 = vpop.eup %5655  ;;  %5657 = vrcp.f32 %v7857_v58  ;;  %v3850_v20 = vpop.f32.mrf.mxu3  ;;  %v3986_v9 = vand.u32 2147483648, %v7857_v58  ;;  %vm3980_vm13 = vweird.f32 %v7857_v58 }
 0x6e4   :  { %v3961_v32 = vmul.f32 %v5656_v27, %v3958_v16  ;;  %5659 = vtanh.f32 %v3910_v56  ;;  %v3851_v31 = vadd.f32 %v3850_v20, %v3837_v39  ;;  %v3930_v56 = vsel %vm7862_vm2, %v5648_v0, %v3926_v41 }
 0x6e5   :  { %v3839_v21 = vpop.f32.mrf.mxu2  ;;  %v3826_v24 = vpop.f32.mrf.mxu1  ;;  %vm3966_vm5 = vweird.f32 %v5656_v27  ;;  %v3941_v39 = vadd.f32 %v7853_v42, %v3940_v49 }
 0x6e6   :  { %v3962_v47 = vsub.f32 1.0, %v3961_v32  ;;  %v3911_v48 = vadd.f32 %v3851_v31, %v9242_v19  ;;  %v3935_v19 = vsel %vm7866_vm3, %v3934_v15, %v3930_v56  ;;  %vm3967_vm9 = vmor %vm3965_vm7, %vm3966_vm5  ;;  %v3972_v31 = vor.u32 1.1754944e-38, %v3971_v50 }
 0x6e7   :  { %v3945_v16 = vsel %vm7883_vm8, %v7853_v42, %v3941_v39  ;;  %v3949_v56 = vor.u32 1.1754944e-38, %v3948_v18  ;;  %v3984_v50 = vand.u32 2147483647, %v7857_v58  ;;  %v3987_v39 = vor.u32 1.1754944e-38, %v3986_v9 }
 0x6e8   :  { %v3963_v20 = vmul.f32 %v5656_v27, %v3962_v47  ;;  %5661 = vtanh.f32 %v3911_v48 }
 0x6e9   :  { %v5658_v32 = vpop.eup %5657  ;;  %vm3985_vm15 = vcmp.eq.f32.partialorder %v3984_v50, 8.507059e+37 }
 0x6ea   :  { %v5660_v21 = vpop.eup %5659  ;;  %v3976_v0 = vmul.f32 %v5658_v32, %v7857_v58  ;;  %v3964_v41 = vadd.f32 %v5656_v27, %v3963_v20  ;;  %vm3981_vm12 = vweird.f32 %v5658_v32 }
 0x6eb   :  { %v4032_v47 = vmul.f32 %v5660_v21, %v3935_v19  ;;  %v3852_v24 = vpop.f32.mrf.mxu3  ;;  %vm3982_vm14 = vmor %vm3980_vm13, %vm3981_vm12 }
 0x6ec   :  { %v3977_v8 = vsub.f32 1.0, %v3976_v0  ;;  %v3968_v4 = vsel %vm3967_vm9, %v5656_v27, %v3964_v41  ;;  %v3950_v0 = vsel %vm3947_vm11, %v3949_v56, %v3945_v16  ;;  %v9245_v16 = vld [vmem:[#allocation206_spill] sm:$0xff] }
 0x6ed   :  { %v3973_v15 = vsel %vm3970_vm10, %v3972_v31, %v3968_v4 }
 0x6ee   :  { %v3978_v48 = vmul.f32 %v5658_v32, %v3977_v8  ;;  %v4030_v20 = vmul.f32 %v3973_v15, %v7687_v25  ;;  %v5662_v21 = vpop.eup %5661 }
 0x6ef   :  { %v4033_v42 = vmul.f32 %v5662_v21, %v3950_v0 }
 0x6f0   :  { %v7894_v27 = vadd.f32 %v4032_v47, %v4030_v20  ;;  %v3979_v13 = vadd.f32 %v5658_v32, %v3978_v48 }
 0x6f2   :  { %v3983_v19 = vsel %vm3982_vm14, %v5658_v32, %v3979_v13  ;;  %v9246_v32 = vld [vmem:[#allocation208_spill] sm:$0xff] }
 0x6f3   :  { %v3988_v60 = vsel %vm3985_vm15, %v3987_v39, %v3983_v19 }
 0x6f4   :  { %v4031_v18 = vmul.f32 %v3988_v60, %v7690_v62 }
 0x6f6   :  { %v7897_v49 = vadd.f32 %v4033_v42, %v4031_v18 }
 0x6f7   :  { %v3863_v41 = vpop.f32.mrf.mxu0 }
 0x6fd   :  { %v3876_v25 = vpop.f32.mrf.mxu1  ;;  %v3889_v31 = vpop.f32.mrf.mxu2 }
 0x6fe   :  { %v3877_v8 = vadd.f32 %v3876_v25, %v3863_v41 }
 0x6ff   :  { %v3865_v4 = vpop.f32.mrf.mxu0 }
 0x700   :  { %v3912_v58 = vadd.f32 %v3877_v8, %v9245_v16 }
 0x702   :  { %v5237_v47 = vmul.f32 -1.442695, %v3912_v58 }
 0x703   :  { %v3902_v24 = vpop.f32.mrf.mxu3 }
 0x704   :  { %5663 = vpow2.f32 %v5237_v47  ;;  %v3903_v15 = vadd.f32 %v3902_v24, %v3889_v31 }
 0x705   :  { %v3878_v56 = vpop.f32.mrf.mxu1  ;;  %v3891_v9 = vpop.f32.mrf.mxu2 }
 0x706   :  { %v3913_v48 = vadd.f32 %v3903_v15, %v9246_v32 }
 0x708   :  { %v5238_v20 = vmul.f32 -1.442695, %v3913_v48 }
 0x70a   :  { %v5664_v50 = vpop.eup %5663  ;;  %5665 = vpow2.f32 %v5238_v20 }
 0x70b   :  { %v3998_v62 = vadd.f32 1.0, %v5664_v50  ;;  %v3904_v21 = vpop.f32.mrf.mxu3 }
 0x70d   :  { %5667 = vrcp.f32 %v3998_v62  ;;  %v4011_v60 = vand.u32 2147483648, %v3998_v62  ;;  %v4009_v41 = vand.u32 2147483647, %v3998_v62  ;;  %vm4005_vm1 = vweird.f32 %v3998_v62 }
 0x70f   :  { %v4012_v4 = vor.u32 1.1754944e-38, %v4011_v60  ;;  %vm4010_vm3 = vcmp.eq.f32.partialorder %v4009_v41, 8.507059e+37  ;;  %v9277_v60 = vld [vmem:[#allocation172_spill] sm:$0xff] }
 0x710   :  { %v5666_v0 = vpop.eup %5665 }
 0x711   :  { %v3999_v13 = vadd.f32 1.0, %v5666_v0 }
 0x713   :  { %v5668_v42 = vpop.eup %5667  ;;  %5669 = vrcp.f32 %v3999_v13  ;;  %v4026_v15 = vand.u32 2147483648, %v3999_v13  ;;  %v4024_v32 = vand.u32 2147483647, %v3999_v13  ;;  %vm4020_vm5 = vweird.f32 %v3999_v13 }
 0x714   :  { %v4001_v39 = vmul.f32 %v5668_v42, %v3998_v62  ;;  %5671 = vtanh.f32 %v7894_v27  ;;  %vm4006_vm0 = vweird.f32 %v5668_v42 }
 0x715   :  { %vm4007_vm2 = vmor %vm4005_vm1, %vm4006_vm0  ;;  %5673 = vtanh.f32 %v7897_v49  ;;  %v4027_v50 = vor.u32 1.1754944e-38, %v4026_v15  ;;  %vm4025_vm7 = vcmp.eq.f32.partialorder %v4024_v32, 8.507059e+37  ;;  %v9279_v32 = vld [vmem:[#allocation178_spill] sm:$0xff] }
 0x716   :  { %v4002_v19 = vsub.f32 1.0, %v4001_v39 }
 0x718   :  { %v4003_v18 = vmul.f32 %v5668_v42, %v4002_v19  ;;  %v9276_v19 = vld [vmem:[#allocation104_spill] sm:$0xff] }
 0x719   :  { %v5670_v25 = vpop.eup %5669 }
 0x71a   :  { %v4004_v31 = vadd.f32 %v5668_v42, %v4003_v18  ;;  %v4016_v8 = vmul.f32 %v5670_v25, %v3999_v13  ;;  %v5672_v47 = vpop.eup %5671  ;;  %vm4021_vm4 = vweird.f32 %v5670_v25  ;;  %v570_v18 = vadd.f32 %v9277_v60, %v9276_v19 }
 0x71b   :  { %vm4022_vm6 = vmor %vm4020_vm5, %vm4021_vm4  ;;  %v5674_v21 = vpop.eup %5673 }
 0x71c   :  { %v4008_v16 = vsel %vm4007_vm2, %v5668_v42, %v4004_v31  ;;  %v4017_v58 = vsub.f32 1.0, %v4016_v8 }
 0x71d   :  { %v4013_v24 = vsel %vm4010_vm3, %v4012_v4, %v4008_v16 }
 0x71e   :  { %v4038_v56 = vmul.f32 %v5672_v47, %v4013_v24  ;;  %v4018_v9 = vmul.f32 %v5670_v25, %v4017_v58 }
 0x720   :  { %v7903_v48 = vpack.c.bf16 %v4038_v56, %v4038_v56  ;;  %v4019_v20 = vadd.f32 %v5670_v25, %v4018_v9  ;;  %v9278_v9 = vld [vmem:[#allocation112_spill] sm:$0xff] }
 0x722   :  { %v4023_v62 = vsel %vm4022_vm6, %v5670_v25, %v4019_v20  ;;  %4058 = vmatmul.bf16.vlgmr.msra.gmra.mxu0 %v7903_v48  ;;  %4084 = vmatmul.bf16.vlgmr.msra.gmra.mxu2 %v7903_v48 }
 0x723   :  { %v4028_v0 = vsel %vm4025_vm7, %v4027_v50, %v4023_v62  ;;  %4154 = vmatpush.bf16.msra.mxu0 %v8584_v55  ;;  %4180 = vmatpush.bf16.msra.mxu2 %v8585_v3  ;;  %v9247_v55 = vld [vmem:[#allocation136_spill] sm:$0xff]  ;;  %v9248_v3 = vld [vmem:[#allocation142_spill] sm:$0xff] }
 0x724   :  { %v4039_v42 = vmul.f32 %v5674_v21, %v4028_v0 }
 0x726   :  { %v7909_v39 = vpack.c.bf16 %v4039_v42, %v4039_v42 }
 0x727   :  { %4155 = vmatpush.bf16.msra.mxu0 %v8586_v38  ;;  %4181 = vmatpush.bf16.msra.mxu2 %v8587_v29  ;;  %v9249_v38 = vld [vmem:[#allocation146_spill] sm:$0xff]  ;;  %v9250_v29 = vld [vmem:[#allocation139_spill] sm:$0xff] }
 0x728   :  { %4071 = vmatmul.bf16.vlgmr.msra.gmra.mxu1 %v7909_v39  ;;  %4097 = vmatmul.bf16.vlgmr.msra.gmra.mxu3 %v7909_v39 }
 0x729   :  { %4167 = vmatpush.bf16.msra.mxu1 %v8588_v52  ;;  %4193 = vmatpush.bf16.msra.mxu3 %v8589_v57  ;;  %v9251_v52 = vld [vmem:[#allocation141_spill] sm:$0xff]  ;;  %v9252_v57 = vld [vmem:[#allocation150_spill] sm:$0xff] }
 0x72b   :  { %4156 = vmatpush.bf16.msra.mxu0 %v8590_v34  ;;  %4182 = vmatpush.bf16.msra.mxu2 %v8591_v14  ;;  %v9253_v34 = vld [vmem:[#allocation152_spill] sm:$0xff]  ;;  %v9254_v14 = vld [vmem:[#allocation145_spill] sm:$0xff] }
 0x72d   :  { %4168 = vmatpush.bf16.msra.mxu1 %v8592_v5  ;;  %4194 = vmatpush.bf16.msra.mxu3 %v8593_v61  ;;  %v9255_v5 = vld [vmem:[#allocation149_spill] sm:$0xff]  ;;  %v9256_v61 = vld [vmem:[#allocation155_spill] sm:$0xff] }
 0x72f   :  { %4157 = vmatpush.bf16.msra.mxu0 %v8594_v54  ;;  %4183 = vmatpush.bf16.msra.mxu2 %v8595_v44  ;;  %v9257_v54 = vld [vmem:[#allocation158_spill] sm:$0xff]  ;;  %v9258_v44 = vld [vmem:[#allocation151_spill] sm:$0xff] }
 0x731   :  { %4169 = vmatpush.bf16.msra.mxu1 %v8596_v53  ;;  %4195 = vmatpush.bf16.msra.mxu3 %v8597_v12  ;;  %v9259_v53 = vld [vmem:[#allocation153_spill] sm:$0xff]  ;;  %v9260_v12 = vld [vmem:[#allocation162_spill] sm:$0xff] }
 0x732   :  { %4110 = vmatmul.bf16.vlgmr.msrb.gmra.mxu0 %v7903_v48  ;;  %4136 = vmatmul.bf16.vlgmr.msrb.gmra.mxu2 %v7903_v48 }
 0x733   :  { %4158 = vmatpush.bf16.msra.mxu0 %v8598_v36  ;;  %4184 = vmatpush.bf16.msra.mxu2 %v8599_v45  ;;  %v9261_v36 = vld [vmem:[#allocation164_spill] sm:$0xff]  ;;  %v9262_v45 = vld [vmem:[#allocation157_spill] sm:$0xff] }
 0x735   :  { %4170 = vmatpush.bf16.msra.mxu1 %v8600_v2  ;;  %4196 = vmatpush.bf16.msra.mxu3 %v8601_v6  ;;  %v9263_v2 = vld [vmem:[#allocation160_spill] sm:$0xff]  ;;  %v9264_v6 = vld [vmem:[#allocation166_spill] sm:$0xff] }
 0x737   :  { %4159 = vmatpush.bf16.msra.mxu0 %v8602_v33  ;;  %4185 = vmatpush.bf16.msra.mxu2 %v8603_v23  ;;  %v9265_v33 = vld [vmem:[#allocation170_spill] sm:$0xff]  ;;  %v9266_v23 = vld [vmem:[#allocation163_spill] sm:$0xff] }
 0x738   :  { %4123 = vmatmul.bf16.vlgmr.msrb.gmra.mxu1 %v7909_v39  ;;  %4149 = vmatmul.bf16.vlgmr.msrb.gmra.mxu3 %v7909_v39 }
 0x739   :  { %4171 = vmatpush.bf16.msra.mxu1 %v8701_v26  ;;  %4197 = vmatpush.bf16.msra.mxu3 %v8702_v40  ;;  %v9267_v26 = vld [vmem:[#allocation165_spill] sm:$0xff]  ;;  %v9268_v40 = vld [vmem:[#allocation174_spill] sm:$0xff] }
 0x73b   :  { %4160 = vmatpush.bf16.msra.mxu0 %v8703_v1  ;;  %4186 = vmatpush.bf16.msra.mxu2 %v8704_v37  ;;  %v9269_v1 = vld [vmem:[#allocation176_spill] sm:$0xff]  ;;  %v9270_v37 = vld [vmem:[#allocation169_spill] sm:$0xff] }
 0x73d   :  { %4172 = vmatpush.bf16.msra.mxu1 %v8705_v7  ;;  %4198 = vmatpush.bf16.msra.mxu3 %v8706_v63  ;;  %v9271_v7 = vld [vmem:[#allocation173_spill] sm:$0xff]  ;;  %v9272_v63 = vld [vmem:[#allocation175_spill] sm:$0xff] }
 0x73f   :  { %4161 = vmatpush.bf16.msra.mxu0 %v8707_v46  ;;  %4187 = vmatpush.bf16.msra.mxu2 %v8708_v51  ;;  %v9273_v46 = vld [vmem:[#allocation177_spill] sm:$0xff] }
 0x741   :  { %4173 = vmatpush.bf16.msra.mxu1 %v8711_v22  ;;  %4199 = vmatpush.bf16.msra.mxu3 %v8712_v17  ;;  %v9274_v22 = vld [vmem:[#allocation98_spill] sm:$0xff]  ;;  %v9275_v17 = vld [vmem:[#allocation168_spill] sm:$0xff] }
 0x742   :  { %4162 = vmatmul.bf16.vlgmr.msra.gmra.mxu0 %v7903_v48  ;;  %4188 = vmatmul.bf16.vlgmr.msra.gmra.mxu2 %v7903_v48 }
 0x743   :  { %4206 = vmatpush.bf16.msrb.mxu0 %v8709_v43  ;;  %4232 = vmatpush.bf16.msrb.mxu2 %v8710_v59 }
 0x745   :  { %4174 = vmatpush.bf16.msra.mxu1 %v8715_v28  ;;  %4200 = vmatpush.bf16.msra.mxu3 %v8716_v30 }
 0x747   :  { %4207 = vmatpush.bf16.msrb.mxu0 %v8713_v10  ;;  %4233 = vmatpush.bf16.msrb.mxu2 %v8714_v35  ;;  %v541_v10 = vadd.f32 %v9275_v17, %v9274_v22 }
 0x748   :  { %4175 = vmatmul.bf16.vlgmr.msra.gmra.mxu1 %v7909_v39  ;;  %4201 = vmatmul.bf16.vlgmr.msra.gmra.mxu3 %v7909_v39 }
 0x749   :  { %4219 = vmatpush.bf16.msrb.mxu1 %v9141_v11  ;;  %4245 = vmatpush.bf16.msrb.mxu3 %v9247_v55 }
 0x74b   :  { %4208 = vmatpush.bf16.msrb.mxu0 %v9248_v3  ;;  %4234 = vmatpush.bf16.msrb.mxu2 %v9249_v38  ;;  %v9280_v3 = vld [vmem:[#allocation113_spill] sm:$0xff]  ;;  %v9281_v38 = vld [vmem:[#allocation179_spill] sm:$0xff] }
 0x74d   :  { %4220 = vmatpush.bf16.msrb.mxu1 %v9250_v29  ;;  %4246 = vmatpush.bf16.msrb.mxu3 %v9251_v52  ;;  %v628_v29 = vadd.f32 %v9281_v38, %v9280_v3 }
 0x74f   :  { %4209 = vmatpush.bf16.msrb.mxu0 %v9252_v57  ;;  %4235 = vmatpush.bf16.msrb.mxu2 %v9253_v34 }
 0x751   :  { %4221 = vmatpush.bf16.msrb.mxu1 %v9254_v14  ;;  %4247 = vmatpush.bf16.msrb.mxu3 %v9255_v5 }
 0x753   :  { %4210 = vmatpush.bf16.msrb.mxu0 %v9256_v61  ;;  %4236 = vmatpush.bf16.msrb.mxu2 %v9257_v54 }
 0x755   :  { %4222 = vmatpush.bf16.msrb.mxu1 %v9258_v44  ;;  %4248 = vmatpush.bf16.msrb.mxu3 %v9259_v53 }
 0x757   :  { %4211 = vmatpush.bf16.msrb.mxu0 %v9260_v12  ;;  %4237 = vmatpush.bf16.msrb.mxu2 %v9261_v36 }
 0x759   :  { %4223 = vmatpush.bf16.msrb.mxu1 %v9262_v45  ;;  %4249 = vmatpush.bf16.msrb.mxu3 %v9263_v2 }
 0x75b   :  { %4212 = vmatpush.bf16.msrb.mxu0 %v9264_v6  ;;  %4238 = vmatpush.bf16.msrb.mxu2 %v9265_v33 }
 0x75d   :  { %4224 = vmatpush.bf16.msrb.mxu1 %v9266_v23  ;;  %4250 = vmatpush.bf16.msrb.mxu3 %v9267_v26  ;;  %v9282_v23 = vld [vmem:[#allocation182_spill] sm:$0xff]  ;;  %v9283_v26 = vld [vmem:[#allocation207_spill] sm:$0xff] }
 0x75f   :  { %4213 = vmatpush.bf16.msrb.mxu0 %v9268_v40  ;;  %4239 = vmatpush.bf16.msrb.mxu2 %v9269_v1  ;;  %v657_v40 = vadd.f32 %v9283_v26, %v9282_v23 }
 0x761   :  { %4225 = vmatpush.bf16.msrb.mxu1 %v9270_v37  ;;  %4251 = vmatpush.bf16.msrb.mxu3 %v9271_v7 }
 0x762   :  { %4214 = vmatmul.bf16.vlgmr.msrb.gmra.mxu0 %v7903_v48  ;;  %4240 = vmatmul.bf16.vlgmr.msrb.gmra.mxu2 %v7903_v48  ;;  %v599_v48 = vadd.f32 %v9279_v32, %v9278_v9 }
 0x765   :  { %4226 = vmatpush.bf16.msrb.mxu1 %v9272_v63  ;;  %4252 = vmatpush.bf16.msrb.mxu3 %v9273_v46 }
 0x768   :  { %4227 = vmatmul.bf16.vlgmr.msrb.gmra.mxu1 %v7909_v39  ;;  %4253 = vmatmul.bf16.vlgmr.msrb.gmra.mxu3 %v7909_v39 }
 0x79f   :  { %v4059_v51 = vpop.f32.mrf.mxu0 }
 0x7a5   :  { %v4072_v43 = vpop.f32.mrf.mxu1  ;;  %v4085_v59 = vpop.f32.mrf.mxu2 }
 0x7a6   :  { %v4073_v35 = vadd.f32 %v4072_v43, %v4059_v51 }
 0x7a7   :  { %v4061_v28 = vpop.f32.mrf.mxu0 }
 0x7a8   :  { %v4258_v30 = vadd.f32 %v4073_v35, %v541_v10 }
 0x7aa   :  { %v5239_v11 = vmul.f32 -1.442695, %v4258_v30 }
 0x7ab   :  { %v4098_v13 = vpop.f32.mrf.mxu3 }
 0x7ac   :  { %5675 = vpow2.f32 %v5239_v11  ;;  %v4099_v41 = vadd.f32 %v4098_v13, %v4085_v59  ;;  %v9284_v11 = vld [vmem:[#allocation184_spill] sm:$0xff]  ;;  %v9285_v13 = vld [vmem:[#allocation209_spill] sm:$0xff] }
 0x7ad   :  { %v4074_v25 = vpop.f32.mrf.mxu1  ;;  %v4087_v31 = vpop.f32.mrf.mxu2  ;;  %v686_v19 = vadd.f32 %v9285_v13, %v9284_v11 }
 0x7ae   :  { %v4259_v8 = vadd.f32 %v4099_v41, %v570_v18 }
 0x7af   :  { %v4111_v4 = vpop.f32.mrf.mxu0 }
 0x7b0   :  { %v5240_v16 = vmul.f32 -1.442695, %v4259_v8 }
 0x7b2   :  { %v5676_v58 = vpop.eup %5675  ;;  %5677 = vpow2.f32 %v5240_v16 }
 0x7b3   :  { %v4272_v47 = vadd.f32 1.0, %v5676_v58  ;;  %v4100_v24 = vpop.f32.mrf.mxu3 }
 0x7b5   :  { %v4124_v15 = vpop.f32.mrf.mxu1  ;;  %v4137_v56 = vpop.f32.mrf.mxu2  ;;  %5679 = vrcp.f32 %v4272_v47  ;;  %v4283_v59 = vand.u32 2147483647, %v4272_v47  ;;  %v4285_v22 = vand.u32 2147483648, %v4272_v47  ;;  %vm4279_vm9 = vweird.f32 %v4272_v47 }
 0x7b6   :  { %v4125_v20 = vadd.f32 %v4124_v15, %v4111_v4 }
 0x7b7   :  { %v4113_v50 = vpop.f32.mrf.mxu0  ;;  %vm8020_vm11 = vcmp.eq.f32.partialorder %v4283_v59, 8.507059e+37  ;;  %v4286_v8 = vor.u32 1.1754944e-38, %v4285_v22  ;;  %v9294_v22 = vld [vmem:[#allocation189_spill] sm:$0xff] }
 0x7b8   :  { %v5678_v62 = vpop.eup %5677  ;;  %v4260_v21 = vadd.f32 %v4125_v20, %v599_v48 }
 0x7b9   :  { %v7993_v0 = vadd.f32 1.0, %v5678_v62 }
 0x7ba   :  { %v5241_v42 = vmul.f32 -1.442695, %v4260_v21 }
 0x7bb   :  { %5681 = vrcp.f32 %v7993_v0  ;;  %v4150_v39 = vpop.f32.mrf.mxu3  ;;  %v7996_v55 = vpop.eup %5679  ;;  %vm4294_vm14 = vweird.f32 %v7993_v0  ;;  %v4298_v32 = vand.u32 2147483647, %v7993_v0  ;;  %v4300_v48 = vand.u32 2147483648, %v7993_v0 }
 0x7bc   :  { %5683 = vpow2.f32 %v5241_v42  ;;  %v4151_v52 = vadd.f32 %v4150_v39, %v4137_v56  ;;  %v4275_v5 = vmul.f32 %v7996_v55, %v4272_v47  ;;  %vm4280_vm8 = vweird.f32 %v7996_v55 }
 0x7bd   :  { %v4126_v57 = vpop.f32.mrf.mxu1  ;;  %v4139_v34 = vpop.f32.mrf.mxu2  ;;  %vm8016_vm10 = vmor %vm4279_vm9, %vm4280_vm8  ;;  %vm4299_vm3 = vcmp.eq.f32.partialorder %v4298_v32, 8.507059e+37 }
 0x7be   :  { %v4261_v14 = vadd.f32 %v4151_v52, %v628_v29  ;;  %v4276_v12 = vsub.f32 1.0, %v4275_v5  ;;  %v4301_v34 = vor.u32 1.1754944e-38, %v4300_v48 }
 0x7bf   :  { %v4163_v61 = vpop.f32.mrf.mxu0 }
 0x7c0   :  { %v5242_v54 = vmul.f32 -1.442695, %v4261_v14  ;;  %v4277_v37 = vmul.f32 %v7996_v55, %v4276_v12 }
 0x7c1   :  { %v8001_v44 = vpop.eup %5681 }
 0x7c2   :  { %v5684_v53 = vpop.eup %5683  ;;  %5685 = vpow2.f32 %v5242_v54  ;;  %v4290_v2 = vmul.f32 %v8001_v44, %v7993_v0  ;;  %v4278_v10 = vadd.f32 %v7996_v55, %v4277_v37  ;;  %vm4295_vm12 = vweird.f32 %v8001_v44  ;;  %v9293_v37 = vld [vmem:[#allocation210_spill] sm:$0xff] }
 0x7c3   :  { %v4310_v36 = vadd.f32 1.0, %v5684_v53  ;;  %v4152_v45 = vpop.f32.mrf.mxu3  ;;  %vm8037_vm0 = vmor %vm4294_vm14, %vm4295_vm12 }
 0x7c4   :  { %v4291_v46 = vsub.f32 1.0, %v4290_v2  ;;  %v4282_v58 = vsel %vm8016_vm10, %v7996_v55, %v4278_v10 }
 0x7c5   :  { %5687 = vrcp.f32 %v4310_v36  ;;  %v4189_v6 = vpop.f32.mrf.mxu2  ;;  %v4176_v33 = vpop.f32.mrf.mxu1  ;;  %v4323_v16 = vand.u32 2147483648, %v4310_v36  ;;  %v4321_v15 = vand.u32 2147483647, %v4310_v36  ;;  %vm4317_vm15 = vweird.f32 %v4310_v36 }
 0x7c6   :  { %v4177_v1 = vadd.f32 %v4176_v33, %v4163_v61  ;;  %v4292_v30 = vmul.f32 %v8001_v44, %v4291_v46  ;;  %v4287_v62 = vsel %vm8020_vm11, %v4286_v8, %v4282_v58 }
 0x7c7   :  { %v4165_v7 = vpop.f32.mrf.mxu0  ;;  %v4324_v39 = vor.u32 1.1754944e-38, %v4323_v16  ;;  %vm4322_vm2 = vcmp.eq.f32.partialorder %v4321_v15, 8.507059e+37 }
 0x7c8   :  { %v5686_v63 = vpop.eup %5685  ;;  %v4262_v43 = vadd.f32 %v4177_v1, %v657_v40  ;;  %v4293_v56 = vadd.f32 %v8001_v44, %v4292_v30  ;;  %v9292_v1 = vld [vmem:[#allocation188_spill] sm:$0xff] }
 0x7c9   :  { %v8008_v51 = vadd.f32 1.0, %v5686_v63  ;;  %v715_v7 = vadd.f32 %v9293_v37, %v9292_v1 }
 0x7ca   :  { %v4297_v38 = vsel %vm8037_vm0, %v8001_v44, %v4293_v56 }
 0x7cb   :  { %v5688_v17 = vpop.eup %5687  ;;  %5689 = vrcp.f32 %v8008_v51  ;;  %v4202_v28 = vpop.f32.mrf.mxu3  ;;  %v4338_v52 = vand.u32 2147483648, %v8008_v51  ;;  %v4336_v61 = vand.u32 2147483647, %v8008_v51  ;;  %v4302_v53 = vsel %vm4299_vm3, %v4301_v34, %v4297_v38 }
 0x7cc   :  { %v4313_v35 = vmul.f32 %v5688_v17, %v4310_v36  ;;  %5691 = vtanh.f32 %v4262_v43  ;;  %v4203_v60 = vadd.f32 %v4202_v28, %v4189_v6  ;;  %vm4318_vm13 = vweird.f32 %v5688_v17 }
 0x7cd   :  { %v4191_v18 = vpop.f32.mrf.mxu2  ;;  %v4178_v4 = vpop.f32.mrf.mxu1  ;;  %vm4319_vm1 = vmor %vm4317_vm15, %vm4318_vm13  ;;  %vm4332_vm5 = vweird.f32 %v8008_v51  ;;  %v4339_v44 = vor.u32 1.1754944e-38, %v4338_v52  ;;  %vm4337_vm7 = vcmp.eq.f32.partialorder %v4336_v61, 8.507059e+37 }
 0x7ce   :  { %v4314_v41 = vsub.f32 1.0, %v4313_v35  ;;  %v4263_v24 = vadd.f32 %v4203_v60, %v686_v19 }
 0x7d0   :  { %v4315_v47 = vmul.f32 %v5688_v17, %v4314_v41  ;;  %5693 = vtanh.f32 %v4263_v24 }
 0x7d1   :  { %v5690_v9 = vpop.eup %5689 }
 0x7d2   :  { %v5692_v20 = vpop.eup %5691  ;;  %v4328_v50 = vmul.f32 %v5690_v9, %v8008_v51  ;;  %v4316_v21 = vadd.f32 %v5688_v17, %v4315_v47  ;;  %vm4333_vm4 = vweird.f32 %v5690_v9 }
 0x7d3   :  { %v4384_v55 = vmul.f32 %v5692_v20, %v4287_v62  ;;  %v4204_v29 = vpop.f32.mrf.mxu3  ;;  %vm4334_vm6 = vmor %vm4332_vm5, %vm4333_vm4 }
 0x7d4   :  { %v4329_v3 = vsub.f32 1.0, %v4328_v50  ;;  %v4320_v0 = vsel %vm4319_vm1, %v5688_v17, %v4316_v21  ;;  %v9295_v17 = vld [vmem:[#allocation211_spill] sm:$0xff] }
 0x7d5   :  { %v4325_v57 = vsel %vm4322_vm2, %v4324_v39, %v4320_v0  ;;  %v744_v10 = vadd.f32 %v9295_v17, %v9294_v22 }
 0x7d6   :  { %v4330_v14 = vmul.f32 %v5690_v9, %v4329_v3  ;;  %v4382_v5 = vmul.f32 %v4325_v57, %v7894_v27  ;;  %v5694_v54 = vpop.eup %5693 }
 0x7d7   :  { %v4385_v45 = vmul.f32 %v5694_v54, %v4302_v53 }
 0x7d8   :  { %v4386_v12 = vadd.f32 %v4384_v55, %v4382_v5  ;;  %v4331_v36 = vadd.f32 %v5690_v9, %v4330_v14 }
 0x7da   :  { %v4335_v2 = vsel %vm4334_vm6, %v5690_v9, %v4331_v36 }
 0x7db   :  { %v4340_v6 = vsel %vm4337_vm7, %v4339_v44, %v4335_v2 }
 0x7dc   :  { %v4383_v33 = vmul.f32 %v4340_v6, %v7897_v49 }
 0x7de   :  { %v4387_v26 = vadd.f32 %v4385_v45, %v4383_v33 }
 0x7df   :  { %v4215_v23 = vpop.f32.mrf.mxu0 }
 0x7e5   :  { %v4228_v40 = vpop.f32.mrf.mxu1  ;;  %v4241_v27 = vpop.f32.mrf.mxu2 }
 0x7e6   :  { %v4229_v63 = vadd.f32 %v4228_v40, %v4215_v23 }
 0x7e7   :  { %v4217_v46 = vpop.f32.mrf.mxu0 }
 0x7e8   :  { %v4264_v51 = vadd.f32 %v4229_v63, %v715_v7 }
 0x7ea   :  { %v5243_v43 = vmul.f32 -1.442695, %v4264_v51 }
 0x7eb   :  { %v4254_v59 = vpop.f32.mrf.mxu3 }
 0x7ec   :  { %5695 = vpow2.f32 %v5243_v43  ;;  %v4255_v35 = vadd.f32 %v4254_v59, %v4241_v27 }
 0x7ed   :  { %v4230_v28 = vpop.f32.mrf.mxu1  ;;  %v4243_v30 = vpop.f32.mrf.mxu2 }
 0x7ee   :  { %v4265_v49 = vadd.f32 %v4255_v35, %v744_v10 }
 0x7f0   :  { %v5244_v11 = vmul.f32 -1.442695, %v4265_v49 }
 0x7f2   :  { %v5696_v13 = vpop.eup %5695  ;;  %5697 = vpow2.f32 %v5244_v11 }
 0x7f3   :  { %v4350_v19 = vadd.f32 1.0, %v5696_v13  ;;  %v4256_v60 = vpop.f32.mrf.mxu3 }
 0x7f5   :  { %5699 = vrcp.f32 %v4350_v19  ;;  %v4363_v4 = vand.u32 2147483648, %v4350_v19  ;;  %v4361_v58 = vand.u32 2147483647, %v4350_v19  ;;  %vm4357_vm9 = vweird.f32 %v4350_v19 }
 0x7f7   :  { %v4364_v56 = vor.u32 1.1754944e-38, %v4363_v4  ;;  %vm4362_vm11 = vcmp.eq.f32.partialorder %v4361_v58, 8.507059e+37 }
 0x7f8   :  { %v5698_v18 = vpop.eup %5697 }
 0x7f9   :  { %v4351_v41 = vadd.f32 1.0, %v5698_v18 }
 0x7fb   :  { %v5700_v25 = vpop.eup %5699  ;;  %5701 = vrcp.f32 %v4351_v41  ;;  %v4378_v50 = vand.u32 2147483648, %v4351_v41  ;;  %v4376_v21 = vand.u32 2147483647, %v4351_v41  ;;  %vm4372_vm13 = vweird.f32 %v4351_v41 }
 0x7fc   :  { %v4353_v31 = vmul.f32 %v5700_v25, %v4350_v19  ;;  %5703 = vtanh.f32 %v4386_v12  ;;  %vm4358_vm8 = vweird.f32 %v5700_v25 }
 0x7fd   :  { %vm4359_vm10 = vmor %vm4357_vm9, %vm4358_vm8  ;;  %5705 = vtanh.f32 %v4387_v26  ;;  %v4379_v55 = vor.u32 1.1754944e-38, %v4378_v50  ;;  %vm4377_vm15 = vcmp.eq.f32.partialorder %v4376_v21, 8.507059e+37 }
 0x7fe   :  { %v4354_v8 = vsub.f32 1.0, %v4353_v31 }
 0x800   :  { %v4355_v16 = vmul.f32 %v5700_v25, %v4354_v8 }
 0x801   :  { %v5702_v24 = vpop.eup %5701 }
 0x802   :  { %v4368_v47 = vmul.f32 %v5702_v24, %v4351_v41  ;;  %v4356_v15 = vadd.f32 %v5700_v25, %v4355_v16  ;;  %v5704_v48 = vpop.eup %5703  ;;  %vm4373_vm12 = vweird.f32 %v5702_v24 }
 0x803   :  { %vm4374_vm14 = vmor %vm4372_vm13, %vm4373_vm12  ;;  %v5706_v0 = vpop.eup %5705 }
 0x804   :  { %v4369_v9 = vsub.f32 1.0, %v4368_v47  ;;  %v4360_v32 = vsel %vm4359_vm10, %v5700_v25, %v4356_v15 }
 0x805   :  { %v4365_v20 = vsel %vm4362_vm11, %v4364_v56, %v4360_v32 }
 0x806   :  { %v4370_v62 = vmul.f32 %v5702_v24, %v4369_v9  ;;  %v4390_v42 = vmul.f32 %v5704_v48, %v4365_v20 }
 0x808   :  { %v4371_v39 = vadd.f32 %v5702_v24, %v4370_v62  ;;  %4392 = vst [vmem:[#allocation11] sm:$0xff] %v4390_v42 }
 0x80a   :  { %v4375_v3 = vsel %vm4374_vm14, %v5702_v24, %v4371_v39 }
 0x80b   :  { %v4380_v38 = vsel %vm4377_vm15, %v4379_v55, %v4375_v3 }
 0x80c   :  { %v4391_v29 = vmul.f32 %v5706_v0, %v4380_v38 }
 0x80e   :  { %4393 = vst [vmem:[#allocation11 + $0x8] sm:$0xff] %v4391_v29 }
 0x80f   :  { %4404 = dma.vmem_to_hbm [thread:$0]  %s4400_s3, 256, %s4402_s13, [#allocation5]  }
 0x810   :  { %5833 = dma.done.wait [#allocation5], 256  }
 0x811   :  { %5834 = vsyncadd [#allocation5], 4294967040 }
 0x812   :  { %4409 = vsyncpa [#allocation4], 1 }
 0x813   :  { %4410 = vsyncpa [#allocation7], 1 }
 0x814   :  { %4411 = vsyncpa [#allocation10], 1 }
 0x815   :  { %4412 = vsyncpa [#allocation5], 1 }

</bundles_post_ra>
